<compile_context>
chip_gen: v7x
topology: tpu7x:2x2x1
jax: 0.10.0
libtpu: 0.0.40
codegen_flags: <defaults>
</compile_context>

<pallas_src>
import jax
import jax.numpy as jnp
from jax.experimental import pallas as pl
from jax.experimental.pallas import tpu as pltpu

FEAT_DIM = 256        # self.layers[-1].out_channels
HEAD_HIDDEN = 256
CLASSES_NUM = 40      # cfg.classes_num (ModelNet40-style)
CLASSES_PAD = 128     # lane-dense logits block; sliced back to CLASSES_NUM

TB_MAX = 16           # batch rows per grid step (head-matmul M, sublane aligned)
TN_MAX = 256          # points per grid step (lane axis, multiple of 128)


def _leaky_relu(x, slope=0.2):
    return jnp.where(x >= 0, x, slope * x)


def _round_up(x, m):
    return (x + m - 1) // m * m


def _pick_tb(batch):
    tb = min(TB_MAX, _round_up(batch, 8))
    # Prefer >=2 batch tiles so the "parallel" axis can shard across v7x's two
    # TensorCores (no-op for tiny batches).
    if batch > 8 and _round_up(batch, tb) // tb < 2:
        tb = _round_up((batch + 1) // 2, 8)
    return tb


def _make_kernel(n_points, tn, mask_ragged):
    def kernel(x_ref, w0t_ref, b0_ref, w1_ref, b1_ref, w2_ref, b2_ref,
               out_ref, acc_ref):
        # x_ref:   (TB, 3, TN)   lane-dense xyz tile (points on lanes)
        # w0t_ref: (FEAT, 3)     layer-0 weight, channel-on-sublane
        # acc_ref: (TB, FEAT)    running max over points (pre-bias/activation)
        n = pl.program_id(1)

        @pl.when(n == 0)
        def _init():
            acc_ref[...] = jnp.full(acc_ref.shape, -jnp.inf, acc_ref.dtype)

        x = x_ref[...]                                   # (TB, 3, TN)
        w0t = w0t_ref[...]                               # (FEAT, 3)
        # Channel-on-sublane weight columns, broadcast once per grid step
        # (loop-invariant; no per-point lane extracts).
        w0x = w0t[:, 0:1].reshape(1, FEAT_DIM, 1)
        w0y = w0t[:, 1:2].reshape(1, FEAT_DIM, 1)
        w0z = w0t[:, 2:3].reshape(1, FEAT_DIM, 1)

        # Point-wise Linear(3 -> 256) as 3 VPU broadcast-FMAs, fully vectorized
        # over the batch tile.  bias + LeakyReLU hoisted past the max (exact:
        # monotone activation, point-invariant bias).
        h = (x[:, 0:1, :] * w0x
             + x[:, 1:2, :] * w0y
             + x[:, 2:3, :] * w0z)                       # (TB, FEAT, TN)

        if mask_ragged:
            # Ragged last point tile: out-of-bounds lanes hold unspecified
            # data; force them to -inf so they can never win the max.
            lane = jax.lax.broadcasted_iota(jnp.int32, (1, 1, tn), 2)
            valid = (n * tn + lane) < n_points
            h = jnp.where(valid, h, -jnp.inf)

        pooled = jnp.max(h, axis=-1)                     # (TB, FEAT) lane reduce
        acc_ref[...] = jnp.maximum(acc_ref[...], pooled)  # one full-tile update

        @pl.when(n == pl.num_programs(1) - 1)
        def _finalize():
            f = _leaky_relu(acc_ref[...] + b0_ref[...])              # (TB, FEAT)
            h1 = jnp.dot(f, w1_ref[...],
                         preferred_element_type=jnp.float32) + b1_ref[...]
            h1 = _leaky_relu(h1)                                     # (TB, 256)
            logits = jnp.dot(h1, w2_ref[...],
                             preferred_element_type=jnp.float32) + b2_ref[...]
            out_ref[...] = logits.astype(out_ref.dtype)              # (TB, 128)

    return kernel


@jax.jit
def model_forward(xyz, params):
    """xyz: [B, N, 3] float32 -> {'pred': [B], 'logits': [B, classes]}."""
    B, N, _ = xyz.shape
    w0, b0, w1, b1, w2, b2 = params

    tb = _pick_tb(B)
    b_pad = _round_up(B, tb)
    tn = min(TN_MAX, _round_up(N, 128))
    grid = (b_pad // tb, pl.cdiv(N, tn))
    mask_ragged = (N % tn) != 0

    # Lane-dense layout: points on the last (lane) axis.
    x = jnp.transpose(xyz, (0, 2, 1))                      # (B, 3, N)
    if b_pad != B:
        x = jnp.pad(x, ((0, b_pad - B), (0, 0), (0, 0)))   # zero rows, sliced off

    # Tiny weight-layout prep (fused by XLA):
    w0t = jnp.transpose(w0, (1, 0))                        # (FEAT, 3)
    w2p = jnp.pad(w2, ((0, 0), (0, CLASSES_PAD - CLASSES_NUM)))
    b2p = jnp.pad(b2, ((0, 0), (0, CLASSES_PAD - CLASSES_NUM)))

    def rep(*shape):
        return pl.BlockSpec(shape, lambda i, n: (0,) * len(shape))

    logits = pl.pallas_call(
        _make_kernel(N, tn, mask_ragged),
        out_shape=jax.ShapeDtypeStruct((b_pad, CLASSES_PAD), jnp.float32),
        grid_spec=pltpu.PrefetchScalarGridSpec(
            num_scalar_prefetch=0,
            grid=grid,
            in_specs=[
                pl.BlockSpec((tb, 3, tn), lambda i, n: (i, 0, n)),
                rep(FEAT_DIM, 3),
                rep(1, FEAT_DIM),
                rep(FEAT_DIM, HEAD_HIDDEN),
                rep(1, HEAD_HIDDEN),
                rep(HEAD_HIDDEN, CLASSES_PAD),
                rep(1, CLASSES_PAD),
            ],
            out_specs=pl.BlockSpec((tb, CLASSES_PAD), lambda i, n: (i, 0)),
            scratch_shapes=[pltpu.VMEM((tb, FEAT_DIM), jnp.float32)],
        ),
        compiler_params=pltpu.CompilerParams(
            dimension_semantics=("parallel", "arbitrary"),
            vmem_limit_bytes=32 * 1024 * 1024),
    )(x, w0t, b0, w1, b1, w2p, b2p)

    logits = logits[:B, :CLASSES_NUM]
    pred = jnp.argmax(logits, axis=1)     # inference path of Model.forward
    return {"pred": pred, "logits": logits}


def init_params(key):
    ks = jax.random.split(key, 6)
    scale = 0.05
    w0 = scale * jax.random.normal(ks[0], (3, FEAT_DIM), jnp.float32)
    b0 = scale * jax.random.normal(ks[1], (1, FEAT_DIM), jnp.float32)
    w1 = scale * jax.random.normal(ks[2], (FEAT_DIM, HEAD_HIDDEN), jnp.float32)
    b1 = scale * jax.random.normal(ks[3], (1, HEAD_HIDDEN), jnp.float32)
    w2 = scale * jax.random.normal(ks[4], (HEAD_HIDDEN, CLASSES_NUM), jnp.float32)
    b2 = scale * jax.random.normal(ks[5], (1, CLASSES_NUM), jnp.float32)
    return (w0, b0, w1, b1, w2, b2)


def reference_forward(xyz, params):
    """Pure-JAX reference of the same math (bias/activation BEFORE max)."""
    w0, b0, w1, b1, w2, b2 = params
    h = _leaky_relu(xyz @ w0 + b0)
    f = jnp.max(h, axis=1)
    h1 = _leaky_relu(f @ w1 + b1)
    return h1 @ w2 + b2


if __name__ == "__main__":
    key = jax.random.PRNGKey(0)
    k_x, k_p = jax.random.split(key)

    # Small shapes: B=2 point clouds of N=300 points.  Exercises batch padding
    # (2 -> 8), two point tiles with a running max, and the ragged-tile mask.
    B, N = 2, 300
    xyz = jax.random.normal(k_x, (B, N, 3), jnp.float32)
    params = init_params(k_p)

    out = model_forward(xyz, params)
    jax.block_until_ready(out["logits"])

    ref = reference_forward(xyz, params)
    assert out["logits"].shape == (B, CLASSES_NUM)
    assert jnp.allclose(out["logits"], ref, atol=1e-3, rtol=1e-3), "mismatch vs reference"
    assert out["pred"].shape == (B,)
    assert jnp.array_equal(out["pred"], jnp.argmax(ref, axis=1))

    print("KERNEL_OK")
</pallas_src>

<mosaic_0001>
module attributes {stable_mosaic.version = 11 : i64} {
  func.func @kernel(%arg0: i32, %arg1: i32, %arg2: memref<8x3x256xf32, #tpu.memory_space<vmem>>, %arg3: memref<256x3xf32, #tpu.memory_space<vmem>>, %arg4: memref<1x256xf32, #tpu.memory_space<vmem>>, %arg5: memref<256x256xf32, #tpu.memory_space<vmem>>, %arg6: memref<1x256xf32, #tpu.memory_space<vmem>>, %arg7: memref<256x128xf32, #tpu.memory_space<vmem>>, %arg8: memref<1x128xf32, #tpu.memory_space<vmem>>, %arg9: memref<8x128xf32, #tpu.memory_space<vmem>>, %arg10: memref<8x256xf32, #tpu.memory_space<vmem>>) attributes {dimension_semantics = [#tpu.dimension_semantics<parallel>, #tpu.dimension_semantics<arbitrary>], iteration_bounds = array<i64: 1, 2>, scalar_prefetch = 0 : i64, scratch_operands = 1 : i64, tpu.core_type = #tpu.core_type<tc>, window_params = [{transform_indices = @transform_0, window_bounds = array<i64: 8, 3, 256>}, {pipeline_mode = #tpu.pipeline_mode<synchronous>, transform_indices = @transform_1, window_bounds = array<i64: 256, 3>}, {pipeline_mode = #tpu.pipeline_mode<synchronous>, transform_indices = @transform_2, window_bounds = array<i64: 1, 256>}, {pipeline_mode = #tpu.pipeline_mode<synchronous>, transform_indices = @transform_3, window_bounds = array<i64: 256, 256>}, {pipeline_mode = #tpu.pipeline_mode<synchronous>, transform_indices = @transform_4, window_bounds = array<i64: 1, 256>}, {pipeline_mode = #tpu.pipeline_mode<synchronous>, transform_indices = @transform_5, window_bounds = array<i64: 256, 128>}, {pipeline_mode = #tpu.pipeline_mode<synchronous>, transform_indices = @transform_6, window_bounds = array<i64: 1, 128>}, {transform_indices = @transform_7, window_bounds = array<i64: 8, 128>}]} {
    %c0_i32 = arith.constant 0 : i32
    %0 = arith.cmpi eq, %arg1, %c0_i32 : i32
    %1 = arith.extui %0 : i1 to i32
    %c0_i32_0 = arith.constant 0 : i32
    %2 = arith.cmpi ne, %1, %c0_i32_0 : i32
    scf.if %2 {
      %cst_11 = arith.constant 0xFF800000 : f32
      %42 = vector.broadcast %cst_11 : f32 to vector<8x256xf32>
      %c0_12 = arith.constant 0 : index
      %c0_13 = arith.constant 0 : index
      %43 = vector.load %arg10[%c0_12, %c0_13] : memref<8x256xf32, #tpu.memory_space<vmem>>, vector<8x256xf32>
      tpu.vector_store %arg10[%c0_12, %c0_13], %42 {strides = array<i32>} : memref<8x256xf32, #tpu.memory_space<vmem>>, vector<8x256xf32>,
    } else {
    }
    %c0 = arith.constant 0 : index
    %c0_1 = arith.constant 0 : index
    %c0_2 = arith.constant 0 : index
    %3 = vector.load %arg2[%c0, %c0_1, %c0_2] : memref<8x3x256xf32, #tpu.memory_space<vmem>>, vector<8x3x256xf32>
    %c0_3 = arith.constant 0 : index
    %c0_4 = arith.constant 0 : index
    %4 = vector.load %arg3[%c0_3, %c0_4] : memref<256x3xf32, #tpu.memory_space<vmem>>, vector<256x3xf32>
    %5 = vector.extract_strided_slice %4 {offsets = [0, 0], sizes = [256, 1], strides = [1, 1]} : vector<256x3xf32> to vector<256x1xf32>
    %6 = vector.shape_cast %5 : vector<256x1xf32> to vector<1x256x1xf32>
    %7 = vector.extract_strided_slice %4 {offsets = [0, 1], sizes = [256, 1], strides = [1, 1]} : vector<256x3xf32> to vector<256x1xf32>
    %8 = vector.shape_cast %7 : vector<256x1xf32> to vector<1x256x1xf32>
    %9 = vector.extract_strided_slice %4 {offsets = [0, 2], sizes = [256, 1], strides = [1, 1]} : vector<256x3xf32> to vector<256x1xf32>
    %10 = vector.shape_cast %9 : vector<256x1xf32> to vector<1x256x1xf32>
    %11 = vector.extract_strided_slice %3 {offsets = [0, 0, 0], sizes = [8, 1, 256], strides = [1, 1, 1]} : vector<8x3x256xf32> to vector<8x1x256xf32>
    %12 = vector.broadcast %11 : vector<8x1x256xf32> to vector<8x256x256xf32>
    %13 = vector.broadcast %6 : vector<1x256x1xf32> to vector<8x256x256xf32>
    %14 = arith.mulf %12, %13 : vector<8x256x256xf32>
    %15 = vector.extract_strided_slice %3 {offsets = [0, 1, 0], sizes = [8, 1, 256], strides = [1, 1, 1]} : vector<8x3x256xf32> to vector<8x1x256xf32>
    %16 = vector.broadcast %15 : vector<8x1x256xf32> to vector<8x256x256xf32>
    %17 = vector.broadcast %8 : vector<1x256x1xf32> to vector<8x256x256xf32>
    %18 = arith.mulf %16, %17 : vector<8x256x256xf32>
    %19 = arith.addf %14, %18 : vector<8x256x256xf32>
    %20 = vector.extract_strided_slice %3 {offsets = [0, 2, 0], sizes = [8, 1, 256], strides = [1, 1, 1]} : vector<8x3x256xf32> to vector<8x1x256xf32>
    %21 = vector.broadcast %20 : vector<8x1x256xf32> to vector<8x256x256xf32>
    %22 = vector.broadcast %10 : vector<1x256x1xf32> to vector<8x256x256xf32>
    %23 = arith.mulf %21, %22 : vector<8x256x256xf32>
    %24 = arith.addf %19, %23 : vector<8x256x256xf32>
    %25 = tpu.iota {dimensions = array<i32: 2>} : vector<1x1x256xi32>
    %c256_i32 = arith.constant 256 : i32
    %26 = arith.muli %arg1, %c256_i32 : i32
    %27 = vector.broadcast %26 : i32 to vector<1x1x256xi32>
    %28 = arith.addi %27, %25 : vector<1x1x256xi32>
    %c300_i32 = arith.constant 300 : i32
    %29 = vector.broadcast %c300_i32 : i32 to vector<1x1x256xi32>
    %30 = arith.cmpi slt, %28, %29 : vector<1x1x256xi32>
    %cst = arith.constant 0xFF800000 : f32
    %31 = vector.shape_cast %30 : vector<1x1x256xi1> to vector<1x1x256xi1>
    %32 = vector.broadcast %31 : vector<1x1x256xi1> to vector<8x256x256xi1>
    %33 = vector.broadcast %cst : f32 to vector<8x256x256xf32>
    %34 = arith.select %32, %24, %33 : vector<8x256x256xi1>, vector<8x256x256xf32>
    %cst_5 = arith.constant dense<0xFF800000> : vector<8x256xf32>
    %35 = vector.multi_reduction <maximumf>, %34, %cst_5 [2] : vector<8x256x256xf32> to vector<8x256xf32>
    %c0_6 = arith.constant 0 : index
    %c0_7 = arith.constant 0 : index
    %36 = vector.load %arg10[%c0_6, %c0_7] : memref<8x256xf32, #tpu.memory_space<vmem>>, vector<8x256xf32>
    %37 = arith.maximumf %36, %35 : vector<8x256xf32>
    %c0_8 = arith.constant 0 : index
    %c0_9 = arith.constant 0 : index
    %38 = vector.load %arg10[%c0_8, %c0_9] : memref<8x256xf32, #tpu.memory_space<vmem>>, vector<8x256xf32>
    tpu.vector_store %arg10[%c0_8, %c0_9], %37 {strides = array<i32>} : memref<8x256xf32, #tpu.memory_space<vmem>>, vector<8x256xf32>,
    %c1_i32 = arith.constant 1 : i32
    %39 = arith.cmpi eq, %arg1, %c1_i32 : i32
    %40 = arith.extui %39 : i1 to i32
    %c0_i32_10 = arith.constant 0 : i32
    %41 = arith.cmpi ne, %40, %c0_i32_10 : i32
    scf.if %41 {
      %c0_11 = arith.constant 0 : index
      %c0_12 = arith.constant 0 : index
      %42 = vector.load %arg10[%c0_11, %c0_12] : memref<8x256xf32, #tpu.memory_space<vmem>>, vector<8x256xf32>
      %c0_13 = arith.constant 0 : index
      %c0_14 = arith.constant 0 : index
      %43 = vector.load %arg4[%c0_13, %c0_14] : memref<1x256xf32, #tpu.memory_space<vmem>>, vector<1x256xf32>
      %44 = vector.broadcast %43 : vector<1x256xf32> to vector<8x256xf32>
      %45 = arith.addf %42, %44 : vector<8x256xf32>
      %cst_15 = arith.constant 0.000000e+00 : f32
      %46 = vector.broadcast %cst_15 : f32 to vector<8x256xf32>
      %47 = arith.cmpf oge, %45, %46 : vector<8x256xf32>
      %cst_16 = arith.constant 2.000000e-01 : f32
      %48 = vector.broadcast %cst_16 : f32 to vector<8x256xf32>
      %49 = arith.mulf %48, %45 : vector<8x256xf32>
      %50 = arith.select %47, %45, %49 : vector<8x256xi1>, vector<8x256xf32>
      %c0_17 = arith.constant 0 : index
      %c0_18 = arith.constant 0 : index
      %51 = vector.load %arg5[%c0_17, %c0_18] : memref<256x256xf32, #tpu.memory_space<vmem>>, vector<256x256xf32>
      %cst_19 = arith.constant dense<0.000000e+00> : vector<8x256xf32>
      %52 = tpu.matmul %50, %51, %cst_19 {dimension_numbers = #tpu.dot_dimension_numbers<[1], [0], [0], [1], [0, 0, 1, 1], [], []>} : vector<8x256xf32>, vector<256x256xf32>, vector<8x256xf32> -> vector<8x256xf32>
      %c0_20 = arith.constant 0 : index
      %c0_21 = arith.constant 0 : index
      %53 = vector.load %arg6[%c0_20, %c0_21] : memref<1x256xf32, #tpu.memory_space<vmem>>, vector<1x256xf32>
      %54 = vector.broadcast %53 : vector<1x256xf32> to vector<8x256xf32>
      %55 = arith.addf %52, %54 : vector<8x256xf32>
      %cst_22 = arith.constant 0.000000e+00 : f32
      %56 = vector.broadcast %cst_22 : f32 to vector<8x256xf32>
      %57 = arith.cmpf oge, %55, %56 : vector<8x256xf32>
      %cst_23 = arith.constant 2.000000e-01 : f32
      %58 = vector.broadcast %cst_23 : f32 to vector<8x256xf32>
      %59 = arith.mulf %58, %55 : vector<8x256xf32>
      %60 = arith.select %57, %55, %59 : vector<8x256xi1>, vector<8x256xf32>
      %c0_24 = arith.constant 0 : index
      %c0_25 = arith.constant 0 : index
      %61 = vector.load %arg7[%c0_24, %c0_25] : memref<256x128xf32, #tpu.memory_space<vmem>>, vector<256x128xf32>
      %cst_26 = arith.constant dense<0.000000e+00> : vector<8x128xf32>
      %62 = tpu.matmul %60, %61, %cst_26 {dimension_numbers = #tpu.dot_dimension_numbers<[1], [0], [0], [1], [0, 0, 1, 1], [], []>} : vector<8x256xf32>, vector<256x128xf32>, vector<8x128xf32> -> vector<8x128xf32>
      %c0_27 = arith.constant 0 : index
      %c0_28 = arith.constant 0 : index
      %63 = vector.load %arg8[%c0_27, %c0_28] : memref<1x128xf32, #tpu.memory_space<vmem>>, vector<1x128xf32>
      %64 = vector.broadcast %63 : vector<1x128xf32> to vector<8x128xf32>
      %65 = arith.addf %62, %64 : vector<8x128xf32>
      %c0_29 = arith.constant 0 : index
      %c0_30 = arith.constant 0 : index
      %66 = vector.load %arg9[%c0_29, %c0_30] : memref<8x128xf32, #tpu.memory_space<vmem>>, vector<8x128xf32>
      tpu.vector_store %arg9[%c0_29, %c0_30], %65 {strides = array<i32>} : memref<8x128xf32, #tpu.memory_space<vmem>>, vector<8x128xf32>,
    } else {
    }
    return
  }
  func.func @transform_0(%arg0: i32, %arg1: i32) -> (i32, i32, i32) {
    %c0_i32 = arith.constant 0 : i32
    %c0_i32_0 = arith.constant 0 : i32
    return %arg0, %c0_i32, %arg1 : i32, i32, i32
  }
  func.func @transform_1(%arg0: i32, %arg1: i32) -> (i32, i32) {
    %c0_i32 = arith.constant 0 : i32
    %c0_i32_0 = arith.constant 0 : i32
    %c0_i32_1 = arith.constant 0 : i32
    return %c0_i32, %c0_i32_0 : i32, i32
  }
  func.func @transform_2(%arg0: i32, %arg1: i32) -> (i32, i32) {
    %c0_i32 = arith.constant 0 : i32
    %c0_i32_0 = arith.constant 0 : i32
    %c0_i32_1 = arith.constant 0 : i32
    return %c0_i32, %c0_i32_0 : i32, i32
  }
  func.func @transform_3(%arg0: i32, %arg1: i32) -> (i32, i32) {
    %c0_i32 = arith.constant 0 : i32
    %c0_i32_0 = arith.constant 0 : i32
    %c0_i32_1 = arith.constant 0 : i32
    return %c0_i32, %c0_i32_0 : i32, i32
  }
  func.func @transform_4(%arg0: i32, %arg1: i32) -> (i32, i32) {
    %c0_i32 = arith.constant 0 : i32
    %c0_i32_0 = arith.constant 0 : i32
    %c0_i32_1 = arith.constant 0 : i32
    return %c0_i32, %c0_i32_0 : i32, i32
  }
  func.func @transform_5(%arg0: i32, %arg1: i32) -> (i32, i32) {
    %c0_i32 = arith.constant 0 : i32
    %c0_i32_0 = arith.constant 0 : i32
    %c0_i32_1 = arith.constant 0 : i32
    return %c0_i32, %c0_i32_0 : i32, i32
  }
  func.func @transform_6(%arg0: i32, %arg1: i32) -> (i32, i32) {
    %c0_i32 = arith.constant 0 : i32
    %c0_i32_0 = arith.constant 0 : i32
    %c0_i32_1 = arith.constant 0 : i32
    return %c0_i32, %c0_i32_0 : i32, i32
  }
  func.func @transform_7(%arg0: i32, %arg1: i32) -> (i32, i32) {
    %c0_i32 = arith.constant 0 : i32
    %c0_i32_0 = arith.constant 0 : i32
    return %arg0, %c0_i32 : i32, i32
  }
}

</mosaic_0001>

<bundles_post_ra>
// kernel: model_forward.1
= control target key start
LH: loop header
LB: loop body
LE: loop exit
PB: predicated region body
PF: predicated region fallthrough
CT: control target
= control target key end

     0   :  { %s15671_s0 = inlined_call_operand.vmem [shape: f32[8,3,300], index: 0, kind: input, shape index: {}]   ;;  %s15672_s1 = inlined_call_operand.vmem [shape: f32[256,3], index: 1, kind: input, shape index: {}]   ;;  %s15673_s2 = inlined_call_operand.vmem [shape: f32[1,256], index: 2, kind: input, shape index: {}]   ;;  %s15674_s3 = inlined_call_operand.vmem [shape: f32[256,256], index: 3, kind: input, shape index: {}]   ;;  %s15675_s4 = inlined_call_operand.vmem [shape: f32[1,256], index: 4, kind: input, shape index: {}]   ;;  %s15676_s5 = inlined_call_operand.vmem [shape: f32[256,128], index: 5, kind: input, shape index: {}]   ;;  %s15677_s6 = inlined_call_operand.vmem [shape: f32[1,128], index: 6, kind: input, shape index: {}]   ;;  %s15678_s7 = inlined_call_operand.vmem [shape: f32[8,128], index: 7, kind: output, shape index: {}]  }
   0x1   :  { %16203 = sst [smem:[#allocation238_spill]] %s15671_s0 }
   0x2   :  { %s8075_s24 = smov 0   ;;  %s8077_s25 = smov 0  }
   0x3   :  { %s8079_s26 = smov 0   ;;  %s8081_s27 = smov 0  }
   0x4   :  { %s8083_s28 = smov 0  }
   0x5 LB: > { %s26_s29 = sadd.s32 1, %s7991_s27  ;;  %p45_p1 = scmp.ne.s32.totalorder %s7983_s25, %s7979_s24  ;;  %s7995_s28 = sphi %s8083_s28, %s17_s28   ;;  %s7991_s27 = sphi %s8081_s27, %s17543_s27   ;;  %s7987_s26 = sphi %s8079_s26, %s17542_s26   ;;  %s7983_s25 = sphi %s8077_s25, %s17541_s25   ;;  %s7979_s24 = sphi %s8075_s24, %s17540_s24  }
   0x6   : > { %p27_p0 = scmp.ge.s32.totalorder %s26_s29, 2  ;;  %p46_p2 = scmp.eq.s32.totalorder %s7995_s28, 0 }
   0x7   : > { %s38_s8 = sadd.s32 1, %s7983_s25  ;;  %p7540_p5 = scmp.ge.s32.totalorder %s7995_s28, 2 }
   0x8   : > { %s17545_s29 = smov (%p27_p0, %s26_s29), 0  ;;  %p47_p3 = por %p46_p2, %p45_p1 }
   0x9   : > { %s34_s30 = ssub.s32 %s7991_s27, %s17545_s29  ;;  %241 = sbr.rel (%p7540_p5) target bundleno = 110 (0x6e), region = 40 }
   0xa   : > { %p36_p4 = scmp.eq.s32.totalorder %s34_s30, 0 }
   0xc   : > { %s8110_s9 = scalar_select %p36_p4, %s7983_s25, %s38_s8  }
  0x10   : > { %244 = sbr.rel (!%p47_p3) target bundleno = 110 (0x6e), region = 44  ;;  %s246_s10 = sand.u32 (%p47_p3), 1, %s7983_s25  }
  0x11   : > { %s7542_s11 = sshll.u32 (%p47_p3), %s7991_s27, 1  ;;  %s7541_s12 = sshll.u32 (%p47_p3), %s246_s10, 6 }
  0x12   : > { %s251_s13 = ssub.s32 (%p47_p3), 3, %s7542_s11  ;;  %s7577_s14 = sshll.u32 (%p47_p3), %s7991_s27, 3 }
  0x13   : > { %p252_p6 = scmp.lt.s32.totalorder (%p47_p3), %s251_s13, 2  ;;  %s16204_s0 = sld [smem:[#allocation238_spill]] (%p47_p3) }
  0x14   : > { %s8123_s20 = scalar_lea.vmem (%p47_p3), [#allocation3], %s7541_s12  }
  0x17   : > { %s17547_s13 = smov (!%p252_p6, %s251_s13), 2 }
  0x18   : > { %s7543_s18 = sshll.u32 %s17547_s13, 9  ;;  %s8121_s19 = sshll.u32 %s17547_s13, 2 }
  0x19   : > { %s8119_s17 = scalar_lea.vmem %s16204_s0, %s7577_s14   ;;  %p7547_p7 = scmp.eq.s32.totalorder %s7543_s18, 0 }
  0x1a   : > { %p264_p8 = scmp.lt.u32.totalorder (!%p7547_p7), %s8121_s19, 8 }
  0x1b   : > { %263 = sbr.rel (%p7547_p7) target bundleno = 110 (0x6e), region = 48 }
  0x22   : > { %267 = sbr.rel (%p264_p8) target bundleno = 99 (0x63), region = 52  ;;  %s8127_s21 = sand.u32 (!%p264_p8), 7, %s8121_s19  }
  0x23   : > { %p297_p9 = scmp.eq.s32.totalorder (!%p264_p8), %s8127_s21, 0  ;;  %p7548_p10 = scmp.ne.s32.totalorder (!%p264_p8), %s8127_s21, 0 }
  0x29   : > { %300 = sbr.rel (%p7548_p10) target bundleno = 65 (0x41), region = 67  ;;  %s301_s22 = sshrl.u32 (!%p7548_p10), %s8121_s19, 3 }
  0x2a   : > { %s302_s23 = sshrl.u32 (!%p7548_p10), %s301_s22, 3  ;;  %s8132_s30 = sand.u32 (!%p7548_p10), 7, %s301_s22  }
  0x2b   : > { %s7578_s8 = sshll.u32 (!%p7548_p10), %s302_s23, 10  ;;  %p7555_p11 = scmp.le.s32.totalorder (!%p7548_p10), %s8132_s30, 0 }
  0x2c   : > { %s453_s10 = sshra.s32 (!%p7548_p10), %s7578_s8, 4 }
  0x2d   : > { %s8135_s11 = scalar_lea.vmem (!%p7548_p10), %s8119_s17, %s453_s10   ;;  %s8138_s12 = scalar_lea.vmem (!%p7548_p10), %s8123_s20, %s453_s10 [#allocation3]  }
  0x30   : > { %7475 = sbr.rel (%p7555_p11) target bundleno = 65 (0x41), region = 180  ;;  %s16205_s13 = smov (!%p7555_p11), %s8138_s12 }
  0x31   : > { %s16206_s14 = smov (!%p7555_p11), %s8135_s11  ;;  %s8147_s15 = smov (!%p7555_p11), 0  }
  0x32   : > { %s8149_s16 = smov (!%p7555_p11), 0  }
  0x37 LB: >> { %v469_v0 = vld [vmem:[%s8003_s14] sm:$0xff]  ;;  %v471_v1 = vld [vmem:[%s8003_s14 + $0xc] sm:$0xff]  ;;  %v473_v2 = vld [vmem:[%s8003_s14 + $0x18] sm:$0xff]  ;;  %s485_s18 = sadd.s32 1, %s8007_s15  ;;  %s463_s16 = sadd.s32 1, %s8011_s16   ;;  %s8011_s16 = sphi %s8149_s16, %s463_s16   ;;  %s8007_s15 = sphi %s8147_s15, %s16207_s15   ;;  %s8003_s14 = sphi %s16206_s14, %s490_s14   ;;  %s7999_s13 = sphi %s16205_s13, %s491_s13  }
  0x38   : >> { %470 = vst [vmem:[%s7999_s13] sm:$0xff] %v469_v0  ;;  %472 = vst [vmem:[%s7999_s13 + $0x8] sm:$0xff] %v471_v1  ;;  %v475_v3 = vld [vmem:[%s8003_s14 + $0x24] sm:$0xff]  ;;  %v477_v4 = vld [vmem:[%s8003_s14 + $0x30] sm:$0xff]  ;;  %p486_p12 = scmp.ge.s32.totalorder %s485_s18, %s8132_s30  ;;  %p462_p13 = scmp.ge.s32.totalorder %s463_s16, %s8132_s30 }
  0x39   : >> { %474 = vst [vmem:[%s7999_s13 + $0x10] sm:$0xff] %v473_v2  ;;  %v479_v5 = vld [vmem:[%s8003_s14 + $0x3c] sm:$0xff]  ;;  %476 = vst [vmem:[%s7999_s13 + $0x18] sm:$0xff] %v475_v3  ;;  %v481_v6 = vld [vmem:[%s8003_s14 + $0x48] sm:$0xff] }
  0x3a   : >> { %478 = vst [vmem:[%s7999_s13 + $0x20] sm:$0xff] %v477_v4  ;;  %480 = vst [vmem:[%s7999_s13 + $0x28] sm:$0xff] %v479_v5  ;;  %v483_v7 = vld [vmem:[%s8003_s14 + $0x54] sm:$0xff]  ;;  %s17549_s18 = smov (%p486_p12, %s485_s18), 0  ;;  %465 = sbr.rel (!%p462_p13) target bundleno = 55 (0x37), region = 186 }
  0x3b   : >> { %482 = vst [vmem:[%s7999_s13 + $0x30] sm:$0xff] %v481_v6  ;;  %484 = vst [vmem:[%s7999_s13 + $0x38] sm:$0xff] %v483_v7  ;;  %s7556_s22 = sshll.u32 %s17549_s18, 3  ;;  %s16207_s15 = smov %s17549_s18 }
  0x3c   : >> { %s490_s14 = scalar_lea.vmem %s8135_s11, %s7556_s22   ;;  %s491_s13 = scalar_lea.vmem %s8138_s12, %s7556_s22 [#allocation3]  }
  0x41 PF: > { %494 = sbr.rel (%p297_p9) target bundleno = 99 (0x63), region = 85  ;;  %s496_s23 = ssub.s32 (!%p297_p9), %s8121_s19, %s8127_s21 }
  0x42   : > { %s500_s8 = sshrl.u32 (!%p297_p9), %s8121_s19, 3  ;;  %s8173_s10 = scalar_lea.vmem (!%p297_p9), %s8119_s17, %s496_s23 }
  0x43   : > { %s8176_s18 = scalar_lea.vmem (!%p297_p9), %s8123_s20, %s496_s23 [#allocation3]  ;;  %s501_s16 = sshrl.u32 (!%p297_p9), %s500_s8, 3 }
  0x44   : > { %s8178_s22 = sand.u32 (!%p297_p9), 7, %s500_s8   ;;  %s7580_s30 = sshll.u32 (!%p297_p9), %s501_s16, 10 }
  0x45   : > { %s652_s11 = sshra.s32 (!%p297_p9), %s7580_s30, 4  ;;  %p7564_p0 = scmp.le.s32.totalorder (!%p297_p9), %s8178_s22, 0 }
  0x46   : > { %s8181_s12 = scalar_lea.vmem (!%p297_p9), %s8119_s17, %s652_s11   ;;  %s8184_s13 = scalar_lea.vmem (!%p297_p9), %s8123_s20, %s652_s11 [#allocation3]  }
  0x48   : > { %7503 = sbr.rel (%p7564_p0) target bundleno = 89 (0x59), region = 202  ;;  %s16208_s14 = smov (!%p7564_p0), %s8184_s13 }
  0x49   : > { %s16209_s15 = smov (!%p7564_p0), %s8181_s12  ;;  %s8193_s23 = smov (!%p7564_p0), 0  }
  0x4a   : > { %s8195_s0 = smov (!%p7564_p0), 0  }
  0x4f LB: >> { %v668_v8 = vld [vmem:[%s8019_s15] sm:$0xff]  ;;  %v670_v9 = vld [vmem:[%s8019_s15 + $0xc] sm:$0xff]  ;;  %v672_v10 = vld [vmem:[%s8019_s15 + $0x18] sm:$0xff]  ;;  %s684_s8 = sadd.s32 1, %s8023_s23  ;;  %s662_s0 = sadd.s32 1, %s8027_s0   ;;  %s8027_s0 = sphi %s8195_s0, %s662_s0   ;;  %s8023_s23 = sphi %s8193_s23, %s16210_s23   ;;  %s8019_s15 = sphi %s16209_s15, %s689_s15   ;;  %s8015_s14 = sphi %s16208_s14, %s690_s14  }
  0x50   : >> { %669 = vst [vmem:[%s8015_s14] sm:$0xff] %v668_v8  ;;  %671 = vst [vmem:[%s8015_s14 + $0x8] sm:$0xff] %v670_v9  ;;  %v674_v11 = vld [vmem:[%s8019_s15 + $0x24] sm:$0xff]  ;;  %v676_v12 = vld [vmem:[%s8019_s15 + $0x30] sm:$0xff]  ;;  %p685_p1 = scmp.ge.s32.totalorder %s684_s8, %s8178_s22  ;;  %p661_p2 = scmp.ge.s32.totalorder %s662_s0, %s8178_s22 }
  0x51   : >> { %673 = vst [vmem:[%s8015_s14 + $0x10] sm:$0xff] %v672_v10  ;;  %v678_v13 = vld [vmem:[%s8019_s15 + $0x3c] sm:$0xff]  ;;  %675 = vst [vmem:[%s8015_s14 + $0x18] sm:$0xff] %v674_v11  ;;  %v680_v14 = vld [vmem:[%s8019_s15 + $0x48] sm:$0xff] }
  0x52   : >> { %677 = vst [vmem:[%s8015_s14 + $0x20] sm:$0xff] %v676_v12  ;;  %679 = vst [vmem:[%s8015_s14 + $0x28] sm:$0xff] %v678_v13  ;;  %v682_v15 = vld [vmem:[%s8019_s15 + $0x54] sm:$0xff]  ;;  %s17551_s8 = smov (%p685_p1, %s684_s8), 0  ;;  %664 = sbr.rel (!%p661_p2) target bundleno = 79 (0x4f), region = 208 }
  0x53   : >> { %681 = vst [vmem:[%s8015_s14 + $0x30] sm:$0xff] %v680_v14  ;;  %683 = vst [vmem:[%s8015_s14 + $0x38] sm:$0xff] %v682_v15  ;;  %s7565_s16 = sshll.u32 %s17551_s8, 3  ;;  %s16210_s23 = smov %s17551_s8 }
  0x54   : >> { %s689_s15 = scalar_lea.vmem %s8181_s12, %s7565_s16   ;;  %s690_s14 = scalar_lea.vmem %s8184_s13, %s7565_s16 [#allocation3]  }
  0x59 PF: > { %s8029_s30 = smov 0  }
  0x5a   : > { %s691_s0 = sshllo.u32 %s8029_s30, %s8127_s21 }
  0x5b   : > { %v700_v16 = vld [vmem:[%s8173_s10] sm:%s691_s0]  ;;  %v702_v17 = vld [vmem:[%s8173_s10 + $0xc] sm:%s691_s0] }
  0x5c   : > { %701 = vst [vmem:[%s8176_s18] sm:%s691_s0] %v700_v16  ;;  %703 = vst [vmem:[%s8176_s18 + $0x8] sm:%s691_s0] %v702_v17 }
  0x5d   : > { %v704_v18 = vld [vmem:[%s8173_s10 + $0x18] sm:%s691_s0]  ;;  %v706_v19 = vld [vmem:[%s8173_s10 + $0x24] sm:%s691_s0] }
  0x5e   : > { %705 = vst [vmem:[%s8176_s18 + $0x10] sm:%s691_s0] %v704_v18  ;;  %707 = vst [vmem:[%s8176_s18 + $0x18] sm:%s691_s0] %v706_v19 }
  0x5f   : > { %v708_v20 = vld [vmem:[%s8173_s10 + $0x30] sm:%s691_s0]  ;;  %v710_v21 = vld [vmem:[%s8173_s10 + $0x3c] sm:%s691_s0] }
  0x60   : > { %709 = vst [vmem:[%s8176_s18 + $0x20] sm:%s691_s0] %v708_v20  ;;  %711 = vst [vmem:[%s8176_s18 + $0x28] sm:%s691_s0] %v710_v21 }
  0x61   : > { %v712_v22 = vld [vmem:[%s8173_s10 + $0x48] sm:%s691_s0]  ;;  %v714_v23 = vld [vmem:[%s8173_s10 + $0x54] sm:%s691_s0] }
  0x62   : > { %713 = vst [vmem:[%s8176_s18 + $0x30] sm:%s691_s0] %v712_v22  ;;  %715 = vst [vmem:[%s8176_s18 + $0x38] sm:%s691_s0] %v714_v23 }
  0x63 PF: > { %p7567_p3 = scmp.ge.u32.totalorder %s8121_s19, 8 }
  0x64   : > { %s8030_s21 = smov (!%p7567_p3), 0  }
  0x65   : > { %270 = sbr.rel (%p7567_p3) target bundleno = 110 (0x6e), region = 56  ;;  %s271_s10 = sshllo.u32 (!%p7567_p3), %s8030_s21, %s8121_s19 }
  0x66   : > { %v280_v24 = vld [vmem:[%s8119_s17] sm:%s271_s10] (!%p7567_p3)  ;;  %v282_v25 = vld [vmem:[%s8119_s17 + $0xc] sm:%s271_s10] (!%p7567_p3) }
  0x67   : > { %281 = vst [vmem:[%s8123_s20] sm:%s271_s10] (!%p7567_p3), %v280_v24  ;;  %283 = vst [vmem:[%s8123_s20 + $0x8] sm:%s271_s10] (!%p7567_p3), %v282_v25 }
  0x68   : > { %v284_v26 = vld [vmem:[%s8119_s17 + $0x18] sm:%s271_s10] (!%p7567_p3)  ;;  %v286_v27 = vld [vmem:[%s8119_s17 + $0x24] sm:%s271_s10] (!%p7567_p3) }
  0x69   : > { %285 = vst [vmem:[%s8123_s20 + $0x10] sm:%s271_s10] (!%p7567_p3), %v284_v26  ;;  %287 = vst [vmem:[%s8123_s20 + $0x18] sm:%s271_s10] (!%p7567_p3), %v286_v27 }
  0x6a   : > { %v288_v28 = vld [vmem:[%s8119_s17 + $0x30] sm:%s271_s10] (!%p7567_p3)  ;;  %v290_v29 = vld [vmem:[%s8119_s17 + $0x3c] sm:%s271_s10] (!%p7567_p3) }
  0x6b   : > { %289 = vst [vmem:[%s8123_s20 + $0x20] sm:%s271_s10] (!%p7567_p3), %v288_v28  ;;  %291 = vst [vmem:[%s8123_s20 + $0x28] sm:%s271_s10] (!%p7567_p3), %v290_v29 }
  0x6c   : > { %v292_v30 = vld [vmem:[%s8119_s17 + $0x48] sm:%s271_s10]  ;;  %v294_v31 = vld [vmem:[%s8119_s17 + $0x54] sm:%s271_s10] }
  0x6d   : > { %293 = vst [vmem:[%s8123_s20 + $0x30] sm:%s271_s10] %v292_v30  ;;  %295 = vst [vmem:[%s8123_s20 + $0x38] sm:%s271_s10] %v294_v31 }
  0x6e PF: > { %p7568_p4 = scmp.ge.s32.totalorder %s7995_s28, 1  ;;  %p718_p5 = scmp.lt.s32.totalorder %s7995_s28, 3 }
  0x70   : > { %p719_p6 = pnand %p7568_p4, %p718_p5 }
  0x72   : > { %722 = sbr.rel (%p719_p6) target bundleno = 1836 (0x72c), region = 110 }
  0x79   : > { %s725_s19 = sand.u32 1, %s7979_s24   ;;  %p7570_p7 = scmp.ne.s32.totalorder %s7987_s26, 0 }
  0x7a   : > { %s7569_s18 = sshll.u32 %s725_s19, 6  ;;  %v8031_v32 = vmov (!%p7570_p7), -inf  }
  0x7b   : > { %s8251_s22 = scalar_lea.vmem [#allocation3], %s7569_s18  ;;  %768 = sbr.rel (%p7570_p7) target bundleno = 130 (0x82), region = 118  ;;  %769 = vst [vmem:[#allocation2] sm:$0xff] (!%p7570_p7), %v8031_v32  ;;  %770 = vst [vmem:[#allocation2 + $0x8] sm:$0xff] (!%p7570_p7), %v8031_v32 }
  0x82 PF: > { %v8257_v33 = vld [vmem:[%s15672_s1 + $0x10] sm:$0xff]  ;;  %v8262_v34 = vld [vmem:[%s15672_s1] sm:$0xff]  ;;  %v8032_v35 = vmov 0   ;;  %v8269_v36 = vld [vmem:[%s15672_s1 + $0x18] sm:$0xff]  ;;  %v8033_v2 = vmov 1   ;;  %v8034_v5 = vmov 2   ;;  %v819_v10 = vlaneseq }
  0x83   : > { %7888 = vset.pattern.permute.xlu1 %v8032_v35  ;;  %7887 = vset.pattern.permute.xlu0 %v8032_v35  ;;  %v8274_v37 = vld [vmem:[%s15672_s1 + $0x8] sm:$0xff]  ;;  %v8286_v39 = vld [vmem:[%s15672_s1 + $0x20] sm:$0xff]  ;;  %v8293_v40 = vld [vmem:[%s15672_s1 + $0x38] sm:$0xff]  ;;  %s7571_s21 = sshll.u32 %s7987_s26, 8  ;;  %vm5787_vm2 = vcmask 130112   ;;  %vm5794_vm3 = vcmask 195712  }
  0x84   : > { %975 = vperm.xlu1 %7888, %v8257_v33   ;;  %965 = vperm.xlu0 %7887, %v8262_v34   ;;  %v8281_v38 = vld [vmem:[%s15672_s1 + $0x28] sm:$0xff]  ;;  %v8298_v41 = vld [vmem:[%s15672_s1 + $0x30] sm:$0xff]  ;;  %v8310_v43 = vld [vmem:[%s15672_s1 + $0x40] sm:$0xff]  ;;  %v8500_v13 = vshrl.u32 %v819_v10, 7  ;;  %vm5801_vm4 = vcmask 261312   ;;  %vm5808_vm5 = vcmask 326912  }
  0x85   : > { %v8305_v42 = vld [vmem:[%s15672_s1 + $0x48] sm:$0xff]  ;;  %v8317_v44 = vld [vmem:[%s15672_s1 + $0x58] sm:$0xff]  ;;  %v8322_v45 = vld [vmem:[%s15672_s1 + $0x50] sm:$0xff]  ;;  %vm5815_vm6 = vcmask 392512   ;;  %vm5822_vm7 = vcmask 458112   ;;  %vm5829_vm8 = vcmask 523712  }
  0x86   : > { %v8329_v46 = vld [vmem:[%s15672_s1 + $0x68] sm:$0xff]  ;;  %v8334_v47 = vld [vmem:[%s15672_s1 + $0x60] sm:$0xff]  ;;  %v8341_v48 = vld [vmem:[%s15672_s1 + $0x78] sm:$0xff]  ;;  %16219 = vst [vmem:[#allocation12_spill] sm:$0xff] %v8500_v13  ;;  %v8509_v16 = vsub.s32 0, %v8500_v13  ;;  %v8513_v18 = vsub.s32 4, %v8500_v13 }
  0x87   : > { %v8346_v49 = vld [vmem:[%s15672_s1 + $0x70] sm:$0xff]  ;;  %v8353_v50 = vld [vmem:[%s15672_s1 + $0x88] sm:$0xff]  ;;  %v8358_v51 = vld [vmem:[%s15672_s1 + $0x80] sm:$0xff]  ;;  %v8518_v19 = vsub.s32 1, %v8500_v13  ;;  %v8528_v23 = vsub.s32 5, %v8500_v13  ;;  %v8535_v26 = vsub.s32 2, %v8500_v13 }
  0x88   : > { %980 = vperm.xlu1 %7888, %v8269_v36   ;;  %970 = vperm.xlu0 %7887, %v8274_v37   ;;  %v8365_v52 = vld [vmem:[%s15672_s1 + $0x98] sm:$0xff]  ;;  %v8370_v53 = vld [vmem:[%s15672_s1 + $0x90] sm:$0xff]  ;;  %v8377_v54 = vld [vmem:[%s15672_s1 + $0xa8] sm:$0xff]  ;;  %16222 = vst [vmem:[#allocation15_spill] sm:$0xff] %v8509_v16  ;;  %v8539_v28 = vsub.s32 6, %v8500_v13  ;;  %vm5836_vm9 = vcmask 589312  }
  0x89   : > { %v8382_v55 = vld [vmem:[%s15672_s1 + $0xa0] sm:$0xff]  ;;  %v8389_v56 = vld [vmem:[%s15672_s1 + $0xb8] sm:$0xff]  ;;  %v8394_v57 = vld [vmem:[%s15672_s1 + $0xb0] sm:$0xff]  ;;  %16223 = vst [vmem:[#allocation16_spill] sm:$0xff] %v8513_v18  ;;  %vm5843_vm10 = vcmask 654912   ;;  %vm5850_vm11 = vcmask 720512  }
  0x8a   : > { %v8401_v58 = vld [vmem:[%s15672_s1 + $0xc8] sm:$0xff]  ;;  %v8406_v59 = vld [vmem:[%s15672_s1 + $0xc0] sm:$0xff]  ;;  %v8413_v60 = vld [vmem:[%s15672_s1 + $0xd8] sm:$0xff]  ;;  %16224 = vst [vmem:[#allocation17_spill] sm:$0xff] %v8518_v19  ;;  %vm5857_vm12 = vcmask 786112   ;;  %vm5864_vm13 = vcmask 851712  }
  0x8b   : > { %v8418_v61 = vld [vmem:[%s15672_s1 + $0xd0] sm:$0xff]  ;;  %v8425_v62 = vld [vmem:[%s15672_s1 + $0xe8] sm:$0xff]  ;;  %v8430_v63 = vld [vmem:[%s15672_s1 + $0xe0] sm:$0xff]  ;;  %16227 = vst [vmem:[#allocation20_spill] sm:$0xff] %v8528_v23  ;;  %vm5871_vm14 = vcmask 917312   ;;  %vm5878_vm15 = vcmask 982912  }
  0x8c   : > { %990 = vperm.xlu1 %7888, %v8281_v38   ;;  %985 = vperm.xlu0 %7887, %v8286_v39   ;;  %v8437_v0 = vld [vmem:[%s15672_s1 + $0xf8] sm:$0xff]  ;;  %v8442_v1 = vld [vmem:[%s15672_s1 + $0xf0] sm:$0xff]  ;;  %v8531_v24 = vld [vmem:[%s8251_s22 + $0x10] sm:$0x77]  ;;  %16228 = vst [vmem:[#allocation21_spill] sm:$0xff] %v8535_v26  ;;  %p7572_p8 = scmp.ne.s32.totalorder %s7987_s26, 1 }
  0x8d   : > { %v771_v17 = vld [vmem:[%s8251_s22] sm:$0x77]  ;;  %v8521_v20 = vld [vmem:[%s8251_s22 + $0x8] sm:$0x77]  ;;  %16229 = vst [vmem:[#allocation22_spill] sm:$0xff] %v8539_v28  ;;  %v838_v32 = vrot.slane %v8531_v24, %v8509_v16 }
  0x8e   : > { %v822_v25 = vrot.slane %v771_v17, %v8509_v16  ;;  %v826_v27 = vrot.slane %v771_v17, %v8513_v18  ;;  %v830_v29 = vrot.slane %v8521_v20, %v8509_v16  ;;  %v834_v30 = vrot.slane %v8521_v20, %v8513_v18 }
  0x8f   : > { %v1638_v31 = vrot.slane %v771_v17, %v8518_v19 }
  0x90   : > { %1000 = vperm.xlu1 %7888, %v8293_v40   ;;  %995 = vperm.xlu0 %7887, %v8298_v41  }
  0x94   : > { %1010 = vperm.xlu1 %7888, %v8305_v42   ;;  %1005 = vperm.xlu0 %7887, %v8310_v43  }
  0x98   : > { %1020 = vperm.xlu1 %7888, %v8317_v44   ;;  %1015 = vperm.xlu0 %7887, %v8322_v45  }
  0x9c   : > { %1030 = vperm.xlu1 %7888, %v8329_v46   ;;  %1025 = vperm.xlu0 %7887, %v8334_v47  }
  0xa0   : > { %1040 = vperm.xlu1 %7888, %v8341_v48   ;;  %1035 = vperm.xlu0 %7887, %v8346_v49  }
  0xa4   : > { %1050 = vperm.xlu1 %7888, %v8353_v50   ;;  %1045 = vperm.xlu0 %7887, %v8358_v51  }
  0xa8   : > { %1060 = vperm.xlu1 %7888, %v8365_v52   ;;  %1055 = vperm.xlu0 %7887, %v8370_v53  }
  0xac   : > { %1070 = vperm.xlu1 %7888, %v8377_v54   ;;  %1065 = vperm.xlu0 %7887, %v8382_v55  }
  0xb0   : > { %1080 = vperm.xlu1 %7888, %v8389_v56   ;;  %1075 = vperm.xlu0 %7887, %v8394_v57  }
  0xb4   : > { %1090 = vperm.xlu1 %7888, %v8401_v58   ;;  %1085 = vperm.xlu0 %7887, %v8406_v59  }
  0xb8   : > { %1100 = vperm.xlu1 %7888, %v8413_v60   ;;  %1095 = vperm.xlu0 %7887, %v8418_v61  }
  0xbc   : > { %1110 = vperm.xlu1 %7888, %v8425_v62   ;;  %1105 = vperm.xlu0 %7887, %v8430_v63  }
  0xc0   : > { %1120 = vperm.xlu1 %7888, %v8437_v0   ;;  %1115 = vperm.xlu0 %7887, %v8442_v1  }
  0xc4   : > { %7890 = vset.pattern.permute.xlu1 %v8033_v2  ;;  %7889 = vset.pattern.permute.xlu0 %v8033_v2  ;;  %v8577_v2 = vrot.slane %v830_v29, %v8509_v16 }
  0xc5   : > { %1784 = vperm.xlu1 %7890, %v8274_v37   ;;  %1780 = vperm.xlu0 %7889, %v8262_v34  }
  0xc6   : > { %16233 = vst [vmem:[#allocation26_spill] sm:$0xff] %v8577_v2 }
  0xc9   : > { %1788 = vperm.xlu1 %7890, %v8257_v33   ;;  %1792 = vperm.xlu0 %7889, %v8269_v36  }
  0xcd   : > { %1796 = vperm.xlu1 %7890, %v8286_v39   ;;  %1800 = vperm.xlu0 %7889, %v8281_v38  }
  0xd1   : > { %1804 = vperm.xlu1 %7890, %v8298_v41   ;;  %1808 = vperm.xlu0 %7889, %v8293_v40  }
  0xd5   : > { %1812 = vperm.xlu1 %7890, %v8310_v43   ;;  %1816 = vperm.xlu0 %7889, %v8305_v42  }
  0xd9   : > { %1820 = vperm.xlu1 %7890, %v8322_v45   ;;  %1824 = vperm.xlu0 %7889, %v8317_v44  }
  0xdd   : > { %1828 = vperm.xlu1 %7890, %v8334_v47   ;;  %1832 = vperm.xlu0 %7889, %v8329_v46  }
  0xe1   : > { %1836 = vperm.xlu1 %7890, %v8346_v49   ;;  %1840 = vperm.xlu0 %7889, %v8341_v48  }
  0xe5   : > { %1844 = vperm.xlu1 %7890, %v8358_v51   ;;  %1848 = vperm.xlu0 %7889, %v8353_v50  }
  0xe9   : > { %1852 = vperm.xlu1 %7890, %v8370_v53   ;;  %1856 = vperm.xlu0 %7889, %v8365_v52  }
  0xed   : > { %1860 = vperm.xlu1 %7890, %v8382_v55   ;;  %1864 = vperm.xlu0 %7889, %v8377_v54  }
  0xf1   : > { %1868 = vperm.xlu1 %7890, %v8394_v57   ;;  %1872 = vperm.xlu0 %7889, %v8389_v56  }
  0xf5   : > { %1876 = vperm.xlu1 %7890, %v8406_v59   ;;  %1880 = vperm.xlu0 %7889, %v8401_v58  }
  0xf9   : > { %1884 = vperm.xlu1 %7890, %v8418_v61   ;;  %1888 = vperm.xlu0 %7889, %v8413_v60  }
  0xfd   : > { %1892 = vperm.xlu1 %7890, %v8430_v63   ;;  %1896 = vperm.xlu0 %7889, %v8425_v62  }
 0x101   : > { %1900 = vperm.xlu1 %7890, %v8442_v1   ;;  %1904 = vperm.xlu0 %7889, %v8437_v0  }
 0x103   : > { %v8478_v3 = vpop.permute.xlu1 %975  ;;  %v8480_v4 = vpop.permute.xlu0 %965 }
 0x104   : > { %16211 = vst [vmem:[#allocation4_spill] sm:$0xff] %v8478_v3  ;;  %16212 = vst [vmem:[#allocation5_spill] sm:$0xff] %v8480_v4 }
 0x105   : > { %7891 = vset.pattern.permute.xlu1 %v8034_v5  ;;  %7892 = vset.pattern.permute.xlu0 %v8034_v5  ;;  %v8580_v5 = vrot.slane %v834_v30, %v8509_v16 }
 0x106   : > { %3076 = vperm.xlu1 %7891, %v8262_v34   ;;  %3080 = vperm.xlu0 %7892, %v8274_v37   ;;  %v8557_v37 = vand.u32 127, %v819_v10  ;;  %v8585_v10 = vrot.slane %v1638_v31, %v8518_v19 }
 0x107   : > { %v8484_v6 = vpop.permute.xlu1 %980  ;;  %v8486_v7 = vpop.permute.xlu0 %970  ;;  %16234 = vst [vmem:[#allocation27_spill] sm:$0xff] %v8580_v5 }
 0x108   : > { %16213 = vst [vmem:[#allocation6_spill] sm:$0xff] %v8484_v6  ;;  %16214 = vst [vmem:[#allocation7_spill] sm:$0xff] %v8486_v7 }
 0x109   : > { %16232 = vst [vmem:[#allocation25_spill] sm:$0xff] %v8557_v37 }
 0x10a   : > { %3084 = vperm.xlu1 %7891, %v8257_v33   ;;  %3092 = vperm.xlu0 %7892, %v8286_v39   ;;  %v842_v33 = vrot.slane %v8531_v24, %v8513_v18  ;;  %v1650_v39 = vrot.slane %v8521_v20, %v8528_v23 }
 0x10b   : > { %v8490_v8 = vpop.permute.xlu1 %990  ;;  %v8492_v9 = vpop.permute.xlu0 %985 }
 0x10c   : > { %16215 = vst [vmem:[#allocation8_spill] sm:$0xff] %v8490_v8  ;;  %16216 = vst [vmem:[#allocation9_spill] sm:$0xff] %v8492_v9  ;;  %v8605_v31 = vrot.slane %v1650_v39, %v8518_v19  ;;  %v2942_v39 = vrot.slane %v8521_v20, %v8535_v26 }
 0x10e   : > { %3088 = vperm.xlu1 %7891, %v8269_v36   ;;  %3100 = vperm.xlu0 %7892, %v8298_v41   ;;  %v1642_v36 = vrot.slane %v771_v17, %v8528_v23  ;;  %v2934_v41 = vrot.slane %v771_v17, %v8535_v26  ;;  %16240 = vst [vmem:[#allocation33_spill] sm:$0xff] %v8605_v31 }
 0x10f   : > { %v8496_v11 = vpop.permute.xlu1 %1000  ;;  %v8498_v12 = vpop.permute.xlu0 %995 }
 0x110   : > { %16217 = vst [vmem:[#allocation10_spill] sm:$0xff] %v8496_v11  ;;  %16218 = vst [vmem:[#allocation11_spill] sm:$0xff] %v8498_v12  ;;  %v8598_v30 = vrot.slane %v1642_v36, %v8518_v19 }
 0x112   : > { %3096 = vperm.xlu1 %7891, %v8281_v38   ;;  %3108 = vperm.xlu0 %7892, %v8310_v43   ;;  %v1646_v38 = vrot.slane %v8521_v20, %v8518_v19  ;;  %v1658_v43 = vrot.slane %v8531_v24, %v8528_v23 }
 0x113   : > { %v8504_v14 = vpop.permute.xlu1 %1010  ;;  %v8506_v15 = vpop.permute.xlu0 %1005 }
 0x114   : > { %16220 = vst [vmem:[#allocation13_spill] sm:$0xff] %v8504_v14  ;;  %16221 = vst [vmem:[#allocation14_spill] sm:$0xff] %v8506_v15  ;;  %v8614_v23 = vrot.slane %v1658_v43, %v8518_v19 }
 0x116   : > { %3104 = vperm.xlu1 %7891, %v8293_v40   ;;  %3116 = vperm.xlu0 %7892, %v8322_v45   ;;  %v8564_v40 = vrot.slane %v822_v25, %v8509_v16  ;;  %v8572_v45 = vrot.slane %v826_v27, %v8509_v16  ;;  %v8588_v25 = vrot.slane %v838_v32, %v8509_v16 }
 0x117   : > { %v8523_v21 = vpop.permute.xlu1 %1020  ;;  %v8525_v22 = vpop.permute.xlu0 %1015  ;;  %v8591_v27 = vrot.slane %v842_v33, %v8509_v16  ;;  %v8608_v32 = vrot.slane %v2934_v41, %v8535_v26  ;;  %v4231_v33 = vstv %s7571_s21  ;;  %16243 = vst [vmem:[#allocation36_spill] sm:$0xff] %v8614_v23  ;;  %v2946_v41 = vrot.slane %v8521_v20, %v8539_v28 }
 0x118   : > { %16225 = vst [vmem:[#allocation18_spill] sm:$0xff] %v8523_v21  ;;  %16226 = vst [vmem:[#allocation19_spill] sm:$0xff] %v8525_v22  ;;  %v8635_v43 = vmul.f32 %v8478_v3, %v8564_v40  ;;  %v8652_v20 = vmul.f32 %v8480_v4, %v8577_v2  ;;  %v8656_v16 = vmul.f32 %v8480_v4, %v8580_v5 }
 0x119   : > { %16235 = vst [vmem:[#allocation28_spill] sm:$0xff] %v8588_v25  ;;  %16236 = vst [vmem:[#allocation29_spill] sm:$0xff] %v8591_v27  ;;  %v8680_v23 = vmul.f32 %v8484_v6, %v8572_v45 }
 0x11a   : > { %3112 = vperm.xlu1 %7891, %v8305_v42   ;;  %3124 = vperm.xlu0 %7892, %v8334_v47   ;;  %v1654_v42 = vrot.slane %v8531_v24, %v8518_v19  ;;  %v2938_v47 = vrot.slane %v771_v17, %v8539_v28  ;;  %16241 = vst [vmem:[#allocation34_spill] sm:$0xff] %v8608_v32 }
 0x11b   : > { %v8552_v34 = vpop.permute.xlu1 %1030  ;;  %v8554_v35 = vpop.permute.xlu0 %1025  ;;  %v8664_v32 = vmul.f32 %v8486_v7, %v8572_v45 }
 0x11c   : > { %16230 = vst [vmem:[#allocation23_spill] sm:$0xff] %v8552_v34  ;;  %16231 = vst [vmem:[#allocation24_spill] sm:$0xff] %v8554_v35  ;;  %v8611_v13 = vrot.slane %v1654_v42, %v8518_v19  ;;  %v8617_v36 = vrot.slane %v2938_v47, %v8535_v26  ;;  %v8631_v42 = vmul.f32 %v8480_v4, %v8572_v45 }
 0x11d   : > { %v8639_v47 = vmul.f32 %v8478_v3, %v8572_v45 }
 0x11e   : > { %3120 = vperm.xlu1 %7891, %v8317_v44   ;;  %3132 = vperm.xlu0 %7892, %v8346_v49   ;;  %v4229_v44 = vadd.s32 128, %v8557_v37  ;;  %v8602_v49 = vrot.slane %v1646_v38, %v8518_v19  ;;  %16242 = vst [vmem:[#allocation35_spill] sm:$0xff] %v8611_v13  ;;  %16244 = vst [vmem:[#allocation37_spill] sm:$0xff] %v8617_v36  ;;  %v8621_v38 = vmul.f32 %v8480_v4, %v8564_v40 }
 0x11f   : > { %v8593_v17 = vpop.permute.xlu1 %1040  ;;  %v8595_v29 = vpop.permute.xlu0 %1035  ;;  %v8660_v36 = vmul.f32 %v8486_v7, %v8564_v40  ;;  %v8683_v13 = vrot.slane %v2942_v39, %v8535_v26 }
 0x120   : > { %16237 = vst [vmem:[#allocation30_spill] sm:$0xff] %v8593_v17  ;;  %16238 = vst [vmem:[#allocation31_spill] sm:$0xff] %v8595_v29 }
 0x121   : > { %16239 = vst [vmem:[#allocation32_spill] sm:$0xff] %v8602_v49  ;;  %16251 = vst [vmem:[#allocation44_spill] sm:$0xff] %v8683_v13  ;;  %v8720_v13 = vmul.f32 %v8478_v3, %v8588_v25 }
 0x122   : > { %3128 = vperm.xlu1 %7891, %v8329_v46   ;;  %3140 = vperm.xlu0 %7892, %v8358_v51   ;;  %v8646_v46 = vadd.s32 %v4231_v33, %v8557_v37  ;;  %v8648_v51 = vadd.s32 %v4231_v33, %v4229_v44  ;;  %v8668_v44 = vmul.f32 %v8478_v3, %v8577_v2 }
 0x123   : > { %v8641_v19 = vpop.permute.xlu1 %1050  ;;  %v8643_v18 = vpop.permute.xlu0 %1045  ;;  %v8672_v33 = vmul.f32 %v8478_v3, %v8580_v5  ;;  %v8676_v37 = vmul.f32 %v8484_v6, %v8564_v40  ;;  %16259 = vst [vmem:[#allocation52_spill] sm:$0xff] %v8720_v13  ;;  %v8744_v13 = vmul.f32 %v8492_v9, %v8580_v5 }
 0x124   : > { %16245 = vst [vmem:[#allocation38_spill] sm:$0xff] %v8641_v19  ;;  %16246 = vst [vmem:[#allocation39_spill] sm:$0xff] %v8643_v18 }
 0x125   : > { %16247 = vst [vmem:[#allocation40_spill] sm:$0xff] %v8646_v46  ;;  %16248 = vst [vmem:[#allocation41_spill] sm:$0xff] %v8648_v51  ;;  %v8686_v51 = vrot.slane %v2946_v41, %v8535_v26  ;;  %v8692_v46 = vmul.f32 %v8486_v7, %v8577_v2 }
 0x126   : > { %16249 = vst [vmem:[#allocation42_spill] sm:$0xff] %v8668_v44  ;;  %16250 = vst [vmem:[#allocation43_spill] sm:$0xff] %v8672_v33  ;;  %3136 = vperm.xlu1 %7891, %v8341_v48   ;;  %3148 = vperm.xlu0 %7892, %v8370_v53   ;;  %v8696_v33 = vmul.f32 %v8486_v7, %v8580_v5  ;;  %v8700_v44 = vmul.f32 %v8484_v6, %v8577_v2 }
 0x127   : > { %16252 = vst [vmem:[#allocation45_spill] sm:$0xff] %v8686_v51  ;;  %v8702_v39 = vpop.permute.xlu1 %1060  ;;  %v8704_v41 = vpop.permute.xlu0 %1055  ;;  %v8708_v48 = vmul.f32 %v8484_v6, %v8580_v5  ;;  %v8712_v53 = vmul.f32 %v8480_v4, %v8588_v25  ;;  %v8716_v51 = vmul.f32 %v8480_v4, %v8591_v27  ;;  %v8728_v6 = vmul.f32 %v8492_v9, %v8572_v45 }
 0x128   : > { %16253 = vst [vmem:[#allocation46_spill] sm:$0xff] %v8700_v44  ;;  %16254 = vst [vmem:[#allocation47_spill] sm:$0xff] %v8702_v39  ;;  %v8724_v44 = vmul.f32 %v8492_v9, %v8564_v40  ;;  %v8736_v4 = vmul.f32 %v8490_v8, %v8572_v45 }
 0x129   : > { %16255 = vst [vmem:[#allocation48_spill] sm:$0xff] %v8704_v41  ;;  %16256 = vst [vmem:[#allocation49_spill] sm:$0xff] %v8708_v48  ;;  %v8732_v48 = vmul.f32 %v8490_v8, %v8564_v40 }
 0x12a   : > { %16257 = vst [vmem:[#allocation50_spill] sm:$0xff] %v8712_v53  ;;  %16258 = vst [vmem:[#allocation51_spill] sm:$0xff] %v8716_v51  ;;  %v8740_v51 = vmul.f32 %v8492_v9, %v8577_v2  ;;  %v8748_v53 = vmul.f32 %v8490_v8, %v8577_v2  ;;  %3144 = vperm.xlu1 %7891, %v8353_v50   ;;  %3156 = vperm.xlu0 %7892, %v8382_v55  }
 0x12b   : > { %16260 = vst [vmem:[#allocation53_spill] sm:$0xff] %v8728_v6  ;;  %16261 = vst [vmem:[#allocation54_spill] sm:$0xff] %v8736_v4  ;;  %v8752_v6 = vmul.f32 %v8490_v8, %v8580_v5  ;;  %v8758_v4 = vmul.f32 %v8498_v12, %v8564_v40  ;;  %v8770_v8 = vpop.permute.xlu0 %1065  ;;  %v8774_v50 = vmul.f32 %v8496_v11, %v8564_v40 }
 0x12c   : > { %16262 = vst [vmem:[#allocation55_spill] sm:$0xff] %v8740_v51  ;;  %16263 = vst [vmem:[#allocation56_spill] sm:$0xff] %v8744_v13  ;;  %v8762_v51 = vmul.f32 %v8498_v12, %v8572_v45  ;;  %v8766_v13 = vmul.f32 %v8478_v3, %v8591_v27  ;;  %v8778_v55 = vmul.f32 %v8496_v11, %v8572_v45 }
 0x12d   : > { %16264 = vst [vmem:[#allocation57_spill] sm:$0xff] %v8748_v53  ;;  %16265 = vst [vmem:[#allocation58_spill] sm:$0xff] %v8752_v6  ;;  %v8768_v53 = vpop.permute.xlu1 %1070  ;;  %v8782_v6 = vmul.f32 %v8498_v12, %v8577_v2  ;;  %v8786_v3 = vmul.f32 %v8498_v12, %v8580_v5  ;;  %v8806_v12 = vmul.f32 %v8504_v14, %v8564_v40 }
 0x12e   : > { %16266 = vst [vmem:[#allocation59_spill] sm:$0xff] %v8762_v51  ;;  %16267 = vst [vmem:[#allocation60_spill] sm:$0xff] %v8766_v13  ;;  %v8790_v13 = vmul.f32 %v8506_v15, %v8564_v40  ;;  %v8794_v51 = vmul.f32 %v8506_v15, %v8572_v45  ;;  %3152 = vperm.xlu1 %7891, %v8365_v52   ;;  %3164 = vperm.xlu0 %7892, %v8394_v57  }
 0x12f   : > { %16268 = vst [vmem:[#allocation61_spill] sm:$0xff] %v8768_v53  ;;  %16269 = vst [vmem:[#allocation62_spill] sm:$0xff] %v8770_v8  ;;  %v8840_v52 = vmul.f32 %v8525_v22, %v8572_v45  ;;  %v8844_v57 = vmul.f32 %v8523_v21, %v8564_v40 }
 0x130   : > { %16270 = vst [vmem:[#allocation63_spill] sm:$0xff] %v8774_v50  ;;  %16271 = vst [vmem:[#allocation64_spill] sm:$0xff] %v8778_v55  ;;  %v8798_v50 = vmul.f32 %v8496_v11, %v8577_v2  ;;  %v8802_v55 = vmul.f32 %v8496_v11, %v8580_v5  ;;  %v8824_v11 = vmul.f32 %v8525_v22, %v8564_v40 }
 0x131   : > { %16272 = vst [vmem:[#allocation65_spill] sm:$0xff] %v8786_v3  ;;  %16273 = vst [vmem:[#allocation66_spill] sm:$0xff] %v8790_v13  ;;  %v8810_v3 = vmul.f32 %v8504_v14, %v8572_v45  ;;  %v8814_v13 = vmul.f32 %v8506_v15, %v8577_v2 }
 0x132   : > { %16274 = vst [vmem:[#allocation67_spill] sm:$0xff] %v8794_v51  ;;  %16275 = vst [vmem:[#allocation68_spill] sm:$0xff] %v8806_v12  ;;  %v8818_v51 = vmul.f32 %v8506_v15, %v8580_v5  ;;  %v8828_v12 = vmul.f32 %v8504_v14, %v8577_v2  ;;  %v8836_v15 = vpop.permute.xlu0 %1075  ;;  %3160 = vperm.xlu1 %7891, %v8377_v54   ;;  %3172 = vperm.xlu0 %7892, %v8406_v59  }
 0x133   : > { %16276 = vst [vmem:[#allocation69_spill] sm:$0xff] %v8810_v3  ;;  %16277 = vst [vmem:[#allocation70_spill] sm:$0xff] %v8814_v13  ;;  %v8832_v3 = vmul.f32 %v8504_v14, %v8580_v5  ;;  %v8834_v13 = vpop.permute.xlu1 %1080  ;;  %v8852_v14 = vmul.f32 %v8525_v22, %v8577_v2  ;;  %v8906_v54 = vmul.f32 %v8595_v29, %v8564_v40 }
 0x134   : > { %16278 = vst [vmem:[#allocation71_spill] sm:$0xff] %v8824_v11  ;;  %16279 = vst [vmem:[#allocation72_spill] sm:$0xff] %v8828_v12  ;;  %v8848_v11 = vmul.f32 %v8523_v21, %v8572_v45  ;;  %v8860_v12 = vmul.f32 %v8525_v22, %v8580_v5  ;;  %v8880_v22 = vmul.f32 %v8552_v34, %v8572_v45 }
 0x135   : > { %16280 = vst [vmem:[#allocation73_spill] sm:$0xff] %v8832_v3  ;;  %16281 = vst [vmem:[#allocation74_spill] sm:$0xff] %v8834_v13  ;;  %v8856_v3 = vmul.f32 %v8554_v35, %v8564_v40  ;;  %v8910_v59 = vmul.f32 %v8595_v29, %v8572_v45 }
 0x136   : > { %16282 = vst [vmem:[#allocation75_spill] sm:$0xff] %v8836_v15  ;;  %16283 = vst [vmem:[#allocation76_spill] sm:$0xff] %v8840_v52  ;;  %v8864_v52 = vmul.f32 %v8523_v21, %v8577_v2  ;;  %3168 = vperm.xlu1 %7891, %v8389_v56   ;;  %3180 = vperm.xlu0 %7892, %v8418_v61   ;;  %v8972_v56 = vmul.f32 %v8704_v41, %v8564_v40 }
 0x137   : > { %16284 = vst [vmem:[#allocation77_spill] sm:$0xff] %v8844_v57  ;;  %16285 = vst [vmem:[#allocation78_spill] sm:$0xff] %v8848_v11  ;;  %v8868_v57 = vmul.f32 %v8523_v21, %v8580_v5  ;;  %v8872_v11 = vmul.f32 %v8554_v35, %v8572_v45  ;;  %v8890_v21 = vmul.f32 %v8554_v35, %v8580_v5 }
 0x138   : > { %16286 = vst [vmem:[#allocation79_spill] sm:$0xff] %v8852_v14  ;;  %16287 = vst [vmem:[#allocation80_spill] sm:$0xff] %v8856_v3  ;;  %v8876_v14 = vmul.f32 %v8552_v34, %v8564_v40  ;;  %v8884_v3 = vmul.f32 %v8554_v35, %v8577_v2  ;;  %v8914_v35 = vmul.f32 %v8593_v17, %v8564_v40 }
 0x139   : > { %16288 = vst [vmem:[#allocation81_spill] sm:$0xff] %v8868_v57  ;;  %16289 = vst [vmem:[#allocation82_spill] sm:$0xff] %v8872_v11  ;;  %v8894_v11 = vmul.f32 %v8552_v34, %v8577_v2  ;;  %v8902_v57 = vpop.permute.xlu0 %1085  ;;  %v8976_v61 = vmul.f32 %v8704_v41, %v8572_v45 }
 0x13a   : > { %16290 = vst [vmem:[#allocation83_spill] sm:$0xff] %v8876_v14  ;;  %16291 = vst [vmem:[#allocation84_spill] sm:$0xff] %v8880_v22  ;;  %v8898_v14 = vmul.f32 %v8552_v34, %v8580_v5  ;;  %v8900_v22 = vpop.permute.xlu1 %1090  ;;  %v8918_v34 = vmul.f32 %v8593_v17, %v8572_v45  ;;  %3176 = vperm.xlu1 %7891, %v8401_v58   ;;  %3188 = vperm.xlu0 %7892, %v8430_v63  }
 0x13b   : > { %16292 = vst [vmem:[#allocation85_spill] sm:$0xff] %v8894_v11  ;;  %16294 = vst [vmem:[#allocation87_spill] sm:$0xff] %v8900_v22  ;;  %v8926_v11 = vmul.f32 %v8595_v29, %v8580_v5  ;;  %v9038_v58 = vmul.f32 %v8836_v15, %v8564_v40  ;;  %v9042_v63 = vmul.f32 %v8836_v15, %v8572_v45 }
 0x13c   : > { %16293 = vst [vmem:[#allocation86_spill] sm:$0xff] %v8898_v14  ;;  %16295 = vst [vmem:[#allocation88_spill] sm:$0xff] %v8902_v57  ;;  %v8922_v14 = vmul.f32 %v8595_v29, %v8577_v2  ;;  %v8946_v29 = vmul.f32 %v8641_v19, %v8564_v40 }
 0x13d   : > { %16296 = vst [vmem:[#allocation89_spill] sm:$0xff] %v8906_v54  ;;  %16297 = vst [vmem:[#allocation90_spill] sm:$0xff] %v8910_v59  ;;  %v8930_v54 = vmul.f32 %v8593_v17, %v8577_v2  ;;  %v8934_v59 = vmul.f32 %v8593_v17, %v8580_v5  ;;  %v8956_v17 = vmul.f32 %v8643_v18, %v8577_v2 }
 0x13e   : > { %16298 = vst [vmem:[#allocation91_spill] sm:$0xff] %v8914_v35  ;;  %16299 = vst [vmem:[#allocation92_spill] sm:$0xff] %v8918_v34  ;;  %v8938_v35 = vmul.f32 %v8643_v18, %v8564_v40  ;;  %v8942_v34 = vmul.f32 %v8643_v18, %v8572_v45  ;;  %3184 = vperm.xlu1 %7891, %v8413_v60   ;;  %3196 = vperm.xlu0 %7892, %v8442_v1  }
 0x13f   : > { %16300 = vst [vmem:[#allocation93_spill] sm:$0xff] %v8926_v11  ;;  %16301 = vst [vmem:[#allocation94_spill] sm:$0xff] %v8934_v59  ;;  %v8950_v11 = vmul.f32 %v8641_v19, %v8572_v45  ;;  %v8968_v59 = vpop.permute.xlu0 %1095  ;;  %v9104_v60 = vmul.f32 %v8902_v57, %v8580_v5  ;;  %v9108_v1 = vmul.f32 %v8900_v22, %v8577_v2 }
 0x140   : > { %16302 = vst [vmem:[#allocation95_spill] sm:$0xff] %v8938_v35  ;;  %16303 = vst [vmem:[#allocation96_spill] sm:$0xff] %v8942_v34  ;;  %v8960_v35 = vmul.f32 %v8643_v18, %v8580_v5  ;;  %v8964_v34 = vmul.f32 %v8641_v19, %v8577_v2  ;;  %v8980_v18 = vmul.f32 %v8702_v39, %v8564_v40 }
 0x141   : > { %16304 = vst [vmem:[#allocation97_spill] sm:$0xff] %v8946_v29  ;;  %16305 = vst [vmem:[#allocation98_spill] sm:$0xff] %v8956_v17  ;;  %v8966_v29 = vpop.permute.xlu1 %1100  ;;  %v8992_v17 = vmul.f32 %v8704_v41, %v8577_v2 }
 0x142   : > { %16306 = vst [vmem:[#allocation99_spill] sm:$0xff] %v8960_v35  ;;  %16307 = vst [vmem:[#allocation100_spill] sm:$0xff] %v8964_v34  ;;  %v8984_v35 = vmul.f32 %v8641_v19, %v8580_v5  ;;  %v8988_v34 = vmul.f32 %v8702_v39, %v8572_v45  ;;  %v9004_v19 = vmul.f32 %v8770_v8, %v8564_v40  ;;  %3192 = vperm.xlu1 %7891, %v8425_v62  }
 0x143   : > { %16308 = vst [vmem:[#allocation101_spill] sm:$0xff] %v8966_v29  ;;  %16309 = vst [vmem:[#allocation102_spill] sm:$0xff] %v8968_v59 }
 0x144   : > { %16310 = vst [vmem:[#allocation103_spill] sm:$0xff] %v8972_v56  ;;  %16311 = vst [vmem:[#allocation104_spill] sm:$0xff] %v8976_v61  ;;  %v8996_v56 = vmul.f32 %v8704_v41, %v8580_v5  ;;  %v9000_v61 = vmul.f32 %v8702_v39, %v8577_v2  ;;  %v9016_v41 = vmul.f32 %v8702_v39, %v8580_v5  ;;  %v9034_v39 = vpop.permute.xlu0 %1105 }
 0x145   : > { %16312 = vst [vmem:[#allocation105_spill] sm:$0xff] %v8984_v35  ;;  %16313 = vst [vmem:[#allocation106_spill] sm:$0xff] %v8988_v34  ;;  %v9008_v35 = vmul.f32 %v8770_v8, %v8572_v45  ;;  %v9012_v34 = vmul.f32 %v8768_v53, %v8564_v40  ;;  %v9169_v62 = vmul.f32 %v9034_v39, %v8572_v45 }
 0x146   : > { %16314 = vst [vmem:[#allocation107_spill] sm:$0xff] %v9000_v61  ;;  %16315 = vst [vmem:[#allocation108_spill] sm:$0xff] %v9004_v19  ;;  %v9022_v61 = vmul.f32 %v8768_v53, %v8572_v45  ;;  %v9026_v19 = vmul.f32 %v8770_v8, %v8577_v2  ;;  %3200 = vperm.xlu1 %7891, %v8437_v0  }
 0x147   : > { %16316 = vst [vmem:[#allocation109_spill] sm:$0xff] %v9008_v35  ;;  %16317 = vst [vmem:[#allocation110_spill] sm:$0xff] %v9012_v34  ;;  %v9030_v35 = vmul.f32 %v8770_v8, %v8580_v5  ;;  %v9032_v34 = vpop.permute.xlu1 %1110  ;;  %v9050_v8 = vmul.f32 %v8768_v53, %v8580_v5 }
 0x148   : > { %16318 = vst [vmem:[#allocation111_spill] sm:$0xff] %v9022_v61  ;;  %16319 = vst [vmem:[#allocation112_spill] sm:$0xff] %v9026_v19  ;;  %v9046_v61 = vmul.f32 %v8768_v53, %v8577_v2  ;;  %v9058_v19 = vmul.f32 %v8834_v13, %v8572_v45  ;;  %v9070_v53 = vmul.f32 %v8902_v57, %v8564_v40 }
 0x149   : > { %16320 = vst [vmem:[#allocation113_spill] sm:$0xff] %v9030_v35  ;;  %16321 = vst [vmem:[#allocation114_spill] sm:$0xff] %v9032_v34  ;;  %v9054_v35 = vmul.f32 %v8834_v13, %v8564_v40 }
 0x14a   : > { %16322 = vst [vmem:[#allocation115_spill] sm:$0xff] %v9034_v39  ;;  %16323 = vst [vmem:[#allocation116_spill] sm:$0xff] %v9038_v58  ;;  %v9062_v58 = vmul.f32 %v8836_v15, %v8577_v2 }
 0x14b   : > { %16324 = vst [vmem:[#allocation117_spill] sm:$0xff] %v9042_v63  ;;  %16325 = vst [vmem:[#allocation118_spill] sm:$0xff] %v9050_v8  ;;  %v9066_v63 = vmul.f32 %v8836_v15, %v8580_v5  ;;  %v9074_v8 = vmul.f32 %v8902_v57, %v8572_v45  ;;  %v9088_v15 = vmul.f32 %v8900_v22, %v8564_v40 }
 0x14c   : > { %16326 = vst [vmem:[#allocation119_spill] sm:$0xff] %v9054_v35  ;;  %16327 = vst [vmem:[#allocation120_spill] sm:$0xff] %v9058_v19  ;;  %v9078_v35 = vmul.f32 %v8834_v13, %v8577_v2  ;;  %v9082_v19 = vmul.f32 %v8834_v13, %v8580_v5  ;;  %v9100_v13 = vpop.permute.xlu0 %1115 }
 0x14d   : > { %16328 = vst [vmem:[#allocation121_spill] sm:$0xff] %v9070_v53  ;;  %16329 = vst [vmem:[#allocation122_spill] sm:$0xff] %v9074_v8  ;;  %v9092_v53 = vmul.f32 %v8900_v22, %v8572_v45  ;;  %v9096_v8 = vmul.f32 %v8902_v57, %v8577_v2  ;;  %v9126_v57 = vmul.f32 %v8486_v7, %v8588_v25 }
 0x14e   : > { %16330 = vst [vmem:[#allocation123_spill] sm:$0xff] %v9078_v35  ;;  %16331 = vst [vmem:[#allocation124_spill] sm:$0xff] %v9082_v19  ;;  %v9098_v35 = vpop.permute.xlu1 %1120  ;;  %v9122_v19 = vmul.f32 %v8492_v9, %v8591_v27 }
 0x14f   : > { %16332 = vst [vmem:[#allocation125_spill] sm:$0xff] %v9088_v15  ;;  %16333 = vst [vmem:[#allocation126_spill] sm:$0xff] %v9092_v53  ;;  %v9112_v15 = vmul.f32 %v8900_v22, %v8580_v5  ;;  %v9116_v53 = vmul.f32 %v8492_v9, %v8588_v25  ;;  %v9134_v22 = vmul.f32 %v8968_v59, %v8564_v40 }
 0x150   : > { %16334 = vst [vmem:[#allocation127_spill] sm:$0xff] %v9096_v8  ;;  %16335 = vst [vmem:[#allocation128_spill] sm:$0xff] %v9098_v35  ;;  %v2950_v8 = vrot.slane %v8531_v24, %v8535_v26  ;;  %v9142_v9 = vmul.f32 %v8966_v29, %v8564_v40  ;;  %v2954_v25 = vrot.slane %v8531_v24, %v8539_v28 }
 0x151   : > { %16336 = vst [vmem:[#allocation129_spill] sm:$0xff] %v9100_v13  ;;  %16337 = vst [vmem:[#allocation130_spill] sm:$0xff] %v9108_v1  ;;  %v9130_v1 = vmul.f32 %v8486_v7, %v8591_v27  ;;  %v9149_v7 = vmul.f32 %v8966_v29, %v8572_v45  ;;  %v9153_v27 = vmul.f32 %v8968_v59, %v8577_v2 }
 0x152   : > { %16338 = vst [vmem:[#allocation131_spill] sm:$0xff] %v9116_v53  ;;  %16339 = vst [vmem:[#allocation132_spill] sm:$0xff] %v9122_v19  ;;  %v9138_v53 = vmul.f32 %v8968_v59, %v8572_v45  ;;  %v9165_v24 = vmul.f32 %v9034_v39, %v8564_v40  ;;  %v9173_v28 = vmul.f32 %v9032_v34, %v8564_v40  ;;  %v9179_v19 = vpop.permute.xlu1 %1784 }
 0x153   : > { %16340 = vst [vmem:[#allocation133_spill] sm:$0xff] %v9126_v57  ;;  %16341 = vst [vmem:[#allocation134_spill] sm:$0xff] %v9130_v1  ;;  %v9157_v1 = vmul.f32 %v8968_v59, %v8580_v5  ;;  %v9161_v57 = vmul.f32 %v8966_v29, %v8577_v2  ;;  %v9177_v59 = vmul.f32 %v8966_v29, %v8580_v5 }
 0x154   : > { %16344 = vst [vmem:[#allocation137_spill] sm:$0xff] %v9165_v24  ;;  %16345 = vst [vmem:[#allocation138_spill] sm:$0xff] %v9169_v62  ;;  %v9189_v24 = vmul.f32 %v9034_v39, %v8577_v2  ;;  %v9193_v62 = vmul.f32 %v9034_v39, %v8580_v5  ;;  %v9200_v29 = vmul.f32 %v9100_v13, %v8564_v40 }
 0x155   : > { %16342 = vst [vmem:[#allocation135_spill] sm:$0xff] %v9157_v1  ;;  %16343 = vst [vmem:[#allocation136_spill] sm:$0xff] %v9161_v57  ;;  %v9181_v1 = vpop.permute.xlu0 %1780  ;;  %v9185_v57 = vmul.f32 %v9032_v34, %v8572_v45  ;;  %v1910_v39 = vmul.f32 %v9179_v19, %v8598_v30  ;;  %v9230_v0 = vmul.f32 %v9098_v35, %v8572_v45 }
 0x156   : > { %16346 = vst [vmem:[#allocation139_spill] sm:$0xff] %v9173_v28  ;;  %16347 = vst [vmem:[#allocation140_spill] sm:$0xff] %v9177_v59  ;;  %v9196_v28 = vrot.slane %v2950_v8, %v8535_v26  ;;  %v9203_v59 = vrot.slane %v2954_v25, %v8535_v26  ;;  %v1909_v8 = vmul.f32 %v9179_v19, %v8585_v10 }
 0x157   : > { %16348 = vst [vmem:[#allocation141_spill] sm:$0xff] %v9179_v19  ;;  %16349 = vst [vmem:[#allocation142_spill] sm:$0xff] %v9181_v1  ;;  %v9220_v25 = vmul.f32 %v9100_v13, %v8572_v45  ;;  %v9224_v26 = vmul.f32 %v9098_v35, %v8564_v40  ;;  %v1908_v40 = vmul.f32 %v9181_v1, %v8598_v30 }
 0x158   : > { %16350 = vst [vmem:[#allocation143_spill] sm:$0xff] %v9185_v57  ;;  %16351 = vst [vmem:[#allocation144_spill] sm:$0xff] %v9189_v24  ;;  %v9207_v57 = vmul.f32 %v9032_v34, %v8577_v2  ;;  %v9211_v24 = vmul.f32 %v9032_v34, %v8580_v5  ;;  %v1907_v34 = vmul.f32 %v9181_v1, %v8585_v10 }
 0x159   : > { %16352 = vst [vmem:[#allocation145_spill] sm:$0xff] %v9193_v62  ;;  %16353 = vst [vmem:[#allocation146_spill] sm:$0xff] %v9196_v28  ;;  %v9238_v28 = vmul.f32 %v9100_v13, %v8580_v5  ;;  %v1972_v45 = vmul.f32 %v9181_v1, %v8605_v31  ;;  %v1973_v35 = vmul.f32 %v9179_v19, %v8602_v49 }
 0x15a   : > { %16354 = vst [vmem:[#allocation147_spill] sm:$0xff] %v9200_v29  ;;  %16355 = vst [vmem:[#allocation148_spill] sm:$0xff] %v9203_v59  ;;  %v9234_v59 = vmul.f32 %v9100_v13, %v8577_v2  ;;  %v9264_v29 = vadd.f32 %v1910_v39, %v8664_v32 }
 0x15b   : > { %16356 = vst [vmem:[#allocation149_spill] sm:$0xff] %v9207_v57  ;;  %16357 = vst [vmem:[#allocation150_spill] sm:$0xff] %v9211_v24  ;;  %v9240_v24 = vpop.permute.xlu1 %1788  ;;  %v9242_v57 = vpop.permute.xlu0 %1792 }
 0x15c   : > { %16358 = vst [vmem:[#allocation151_spill] sm:$0xff] %v9220_v25  ;;  %16359 = vst [vmem:[#allocation152_spill] sm:$0xff] %v9224_v26  ;;  %v1971_v25 = vmul.f32 %v9181_v1, %v8602_v49  ;;  %v1911_v13 = vmul.f32 %v9240_v24, %v8585_v10  ;;  %v1912_v5 = vmul.f32 %v9240_v24, %v8598_v30 }
 0x15d   : > { %16360 = vst [vmem:[#allocation153_spill] sm:$0xff] %v9230_v0  ;;  %16361 = vst [vmem:[#allocation154_spill] sm:$0xff] %v9234_v59  ;;  %v1913_v2 = vmul.f32 %v9242_v57, %v8585_v10  ;;  %v9261_v59 = vadd.f32 %v1909_v8, %v8660_v36  ;;  %v1914_v62 = vmul.f32 %v9242_v57, %v8598_v30 }
 0x15e   : > { %16362 = vst [vmem:[#allocation155_spill] sm:$0xff] %v9238_v28  ;;  %16363 = vst [vmem:[#allocation156_spill] sm:$0xff] %v9240_v24  ;;  %v1974_v28 = vmul.f32 %v9179_v19, %v8605_v31  ;;  %v1975_v0 = vmul.f32 %v9240_v24, %v8602_v49  ;;  %v9271_v26 = vadd.f32 %v1907_v34, %v8621_v38 }
 0x15f   : > { %16364 = vst [vmem:[#allocation157_spill] sm:$0xff] %v9242_v57  ;;  %16365 = vst [vmem:[#allocation158_spill] sm:$0xff] %v9264_v29  ;;  %v1976_v1 = vmul.f32 %v9240_v24, %v8605_v31  ;;  %v1977_v19 = vmul.f32 %v9242_v57, %v8602_v49  ;;  %v1978_v36 = vmul.f32 %v9242_v57, %v8605_v31  ;;  %v9279_v32 = vpop.permute.xlu1 %1796  ;;  %v9281_v39 = vpop.permute.xlu0 %1800 }
 0x160   : > { %16366 = vst [vmem:[#allocation159_spill] sm:$0xff] %v9271_v26  ;;  %16367 = vst [vmem:[#allocation160_spill] sm:$0xff] %v9279_v32  ;;  %v9284_v8 = vadd.f32 %v1908_v40, %v8631_v42  ;;  %v9287_v29 = vadd.f32 %v1971_v25, %v8652_v20  ;;  %v9290_v34 = vadd.f32 %v1972_v45, %v8656_v16 }
 0x161   : > { %16368 = vst [vmem:[#allocation161_spill] sm:$0xff] %v9281_v39  ;;  %v9293_v38 = vadd.f32 %v1973_v35, %v8692_v46  ;;  %v9296_v24 = vadd.f32 %v1911_v13, %v8635_v43  ;;  %v9299_v57 = vadd.f32 %v1912_v5, %v8639_v47  ;;  %v9302_v26 = vadd.f32 %v1913_v2, %v8676_v37  ;;  %v16375_v13 = vld [vmem:[#allocation42_spill] sm:$0xff]  ;;  %v16377_v37 = vld [vmem:[#allocation43_spill] sm:$0xff]  ;;  %v16381_v46 = vld [vmem:[#allocation49_spill] sm:$0xff] }
 0x162   : > { %16369 = vst [vmem:[#allocation162_spill] sm:$0xff] %v9287_v29  ;;  %16370 = vst [vmem:[#allocation163_spill] sm:$0xff] %v9290_v34  ;;  %v9305_v42 = vadd.f32 %v1974_v28, %v8696_v33  ;;  %v1915_v20 = vmul.f32 %v9279_v32, %v8585_v10  ;;  %v1916_v16 = vmul.f32 %v9279_v32, %v8598_v30  ;;  %v16379_v28 = vld [vmem:[#allocation46_spill] sm:$0xff] }
 0x163   : > { %16371 = vst [vmem:[#allocation164_spill] sm:$0xff] %v9293_v38  ;;  %16372 = vst [vmem:[#allocation165_spill] sm:$0xff] %v9302_v26  ;;  %v9312_v35 = vadd.f32 %v1914_v62, %v8680_v23  ;;  %v9315_v43 = vadd.f32 %v1975_v0, %v16375_v13  ;;  %v1917_v5 = vmul.f32 %v9281_v39, %v8585_v10  ;;  %v9328_v25 = vpop.permute.xlu1 %1804  ;;  %v9330_v40 = vpop.permute.xlu0 %1808 }
 0x164   : > { %16373 = vst [vmem:[#allocation166_spill] sm:$0xff] %v9305_v42  ;;  %v9320_v2 = vadd.f32 %v1976_v1, %v16377_v37  ;;  %v9323_v47 = vadd.f32 %v1977_v19, %v16379_v28  ;;  %v9326_v33 = vadd.f32 %v1978_v36, %v16381_v46  ;;  %16383 = vst [vmem:[#allocation168_spill] sm:$0xff] %v9328_v25  ;;  %v16385_v28 = vld [vmem:[#allocation53_spill] sm:$0xff]  ;;  %v16391_v42 = vld [vmem:[#allocation55_spill] sm:$0xff] }
 0x165   : > { %16374 = vst [vmem:[#allocation167_spill] sm:$0xff] %v9312_v35  ;;  %16376 = vst [vmem:[#allocation42_spill] sm:$0xff] %v9315_v43  ;;  %v1918_v23 = vmul.f32 %v9281_v39, %v8598_v30  ;;  %v1979_v62 = vmul.f32 %v9279_v32, %v8602_v49  ;;  %v1980_v1 = vmul.f32 %v9279_v32, %v8605_v31  ;;  %v16398_v35 = vld [vmem:[#allocation63_spill] sm:$0xff] }
 0x166   : > { %16378 = vst [vmem:[#allocation43_spill] sm:$0xff] %v9320_v2  ;;  %16380 = vst [vmem:[#allocation46_spill] sm:$0xff] %v9323_v47  ;;  %v1981_v19 = vmul.f32 %v9281_v39, %v8602_v49  ;;  %v1919_v0 = vmul.f32 %v9328_v25, %v8585_v10  ;;  %v1920_v45 = vmul.f32 %v9328_v25, %v8598_v30 }
 0x167   : > { %16382 = vst [vmem:[#allocation49_spill] sm:$0xff] %v9326_v33  ;;  %16384 = vst [vmem:[#allocation169_spill] sm:$0xff] %v9330_v40  ;;  %v1921_v36 = vmul.f32 %v9330_v40, %v8585_v10  ;;  %v1982_v13 = vmul.f32 %v9281_v39, %v8605_v31  ;;  %v9349_v37 = vadd.f32 %v1915_v20, %v8724_v44  ;;  %v9367_v20 = vpop.permute.xlu1 %1812 }
 0x168   : > { %v9352_v46 = vadd.f32 %v1916_v16, %v16385_v28  ;;  %v1922_v32 = vmul.f32 %v9330_v40, %v8598_v30  ;;  %v1983_v33 = vmul.f32 %v9328_v25, %v8602_v49  ;;  %v9359_v47 = vadd.f32 %v1917_v5, %v8732_v48  ;;  %16387 = vst [vmem:[#allocation170_spill] sm:$0xff] %v9367_v20  ;;  %v9369_v16 = vpop.permute.xlu0 %1816  ;;  %v16389_v28 = vld [vmem:[#allocation54_spill] sm:$0xff]  ;;  %v16393_v48 = vld [vmem:[#allocation56_spill] sm:$0xff] }
 0x169   : > { %v1984_v2 = vmul.f32 %v9328_v25, %v8605_v31  ;;  %v1985_v39 = vmul.f32 %v9330_v40, %v8602_v49  ;;  %v1986_v44 = vmul.f32 %v9330_v40, %v8605_v31  ;;  %16388 = vst [vmem:[#allocation171_spill] sm:$0xff] %v9369_v16  ;;  %v9372_v43 = vadd.f32 %v1918_v23, %v16389_v28  ;;  %v16395_v25 = vld [vmem:[#allocation57_spill] sm:$0xff]  ;;  %v16397_v40 = vld [vmem:[#allocation59_spill] sm:$0xff]  ;;  %v16400_v23 = vld [vmem:[#allocation58_spill] sm:$0xff] }
 0x16a   : > { %16386 = vst [vmem:[#allocation53_spill] sm:$0xff] %v9359_v47  ;;  %v9375_v38 = vadd.f32 %v1979_v62, %v16391_v42  ;;  %v9378_v5 = vadd.f32 %v1980_v1, %v16393_v48  ;;  %v9381_v34 = vadd.f32 %v1981_v19, %v16395_v25  ;;  %v9384_v29 = vadd.f32 %v1919_v0, %v8758_v4  ;;  %v16402_v25 = vld [vmem:[#allocation64_spill] sm:$0xff]  ;;  %v16411_v48 = vld [vmem:[#allocation66_spill] sm:$0xff] }
 0x16b   : > { %16390 = vst [vmem:[#allocation54_spill] sm:$0xff] %v9372_v43  ;;  %v9387_v47 = vadd.f32 %v1920_v45, %v16397_v40  ;;  %v9390_v26 = vadd.f32 %v1921_v36, %v16398_v35  ;;  %v9393_v28 = vadd.f32 %v1982_v13, %v16400_v23  ;;  %v1923_v42 = vmul.f32 %v9367_v20, %v8585_v10  ;;  %v16405_v35 = vld [vmem:[#allocation65_spill] sm:$0xff]  ;;  %v9416_v36 = vpop.permute.xlu1 %1820 }
 0x16c   : > { %16392 = vst [vmem:[#allocation55_spill] sm:$0xff] %v9375_v38  ;;  %16394 = vst [vmem:[#allocation56_spill] sm:$0xff] %v9378_v5  ;;  %v1924_v62 = vmul.f32 %v9367_v20, %v8598_v30  ;;  %v9400_v1 = vadd.f32 %v1922_v32, %v16402_v25  ;;  %v9403_v4 = vadd.f32 %v1983_v33, %v8782_v6  ;;  %v9418_v13 = vpop.permute.xlu0 %1824  ;;  %v16412_v25 = vld [vmem:[#allocation67_spill] sm:$0xff] }
 0x16d   : > { %16396 = vst [vmem:[#allocation57_spill] sm:$0xff] %v9381_v34  ;;  %16399 = vst [vmem:[#allocation59_spill] sm:$0xff] %v9390_v26  ;;  %v1925_v40 = vmul.f32 %v9369_v16, %v8585_v10  ;;  %v9408_v19 = vadd.f32 %v1984_v2, %v16405_v35  ;;  %v9411_v0 = vadd.f32 %v1985_v39, %v8798_v50  ;;  %v16424_v38 = vld [vmem:[#allocation71_spill] sm:$0xff]  ;;  %v16426_v26 = vld [vmem:[#allocation77_spill] sm:$0xff] }
 0x16e   : > { %16401 = vst [vmem:[#allocation63_spill] sm:$0xff] %v9393_v28  ;;  %16403 = vst [vmem:[#allocation58_spill] sm:$0xff] %v9400_v1  ;;  %v9414_v45 = vadd.f32 %v1986_v44, %v8802_v55  ;;  %v1926_v6 = vmul.f32 %v9369_v16, %v8598_v30  ;;  %v1987_v32 = vmul.f32 %v9367_v20, %v8602_v49 }
 0x16f   : > { %16404 = vst [vmem:[#allocation64_spill] sm:$0xff] %v9403_v4  ;;  %16406 = vst [vmem:[#allocation65_spill] sm:$0xff] %v9408_v19  ;;  %v1988_v2 = vmul.f32 %v9367_v20, %v8605_v31  ;;  %v1989_v50 = vmul.f32 %v9369_v16, %v8602_v49  ;;  %v1927_v55 = vmul.f32 %v9416_v36, %v8585_v10  ;;  %v16419_v4 = vld [vmem:[#allocation70_spill] sm:$0xff] }
 0x170   : > { %16407 = vst [vmem:[#allocation172_spill] sm:$0xff] %v9411_v0  ;;  %16408 = vst [vmem:[#allocation173_spill] sm:$0xff] %v9414_v45  ;;  %v1928_v39 = vmul.f32 %v9416_v36, %v8598_v30  ;;  %v1929_v33 = vmul.f32 %v9418_v13, %v8585_v10  ;;  %v1990_v44 = vmul.f32 %v9369_v16, %v8605_v31  ;;  %v16413_v0 = vld [vmem:[#allocation68_spill] sm:$0xff] }
 0x171   : > { %16409 = vst [vmem:[#allocation174_spill] sm:$0xff] %v9416_v36  ;;  %16410 = vst [vmem:[#allocation175_spill] sm:$0xff] %v9418_v13  ;;  %v9437_v23 = vadd.f32 %v1923_v42, %v16411_v48  ;;  %v9440_v35 = vadd.f32 %v1924_v62, %v16412_v25  ;;  %v1930_v20 = vmul.f32 %v9418_v13, %v8598_v30  ;;  %v9455_v62 = vpop.permute.xlu1 %1828  ;;  %v9457_v48 = vpop.permute.xlu0 %1832  ;;  %v16417_v25 = vld [vmem:[#allocation69_spill] sm:$0xff] }
 0x172   : > { %v1991_v45 = vmul.f32 %v9416_v36, %v8602_v49  ;;  %v9447_v28 = vadd.f32 %v1925_v40, %v16413_v0  ;;  %v1992_v34 = vmul.f32 %v9416_v36, %v8605_v31  ;;  %v1993_v16 = vmul.f32 %v9418_v13, %v8602_v49  ;;  %16415 = vst [vmem:[#allocation67_spill] sm:$0xff] %v9455_v62  ;;  %v16422_v0 = vld [vmem:[#allocation72_spill] sm:$0xff] }
 0x173   : > { %v1994_v42 = vmul.f32 %v9418_v13, %v8605_v31  ;;  %16416 = vst [vmem:[#allocation68_spill] sm:$0xff] %v9457_v48  ;;  %v9460_v19 = vadd.f32 %v1926_v6, %v16417_v25  ;;  %v9463_v5 = vadd.f32 %v1987_v32, %v16419_v4  ;;  %v9466_v40 = vadd.f32 %v1988_v2, %v8818_v51  ;;  %v16425_v13 = vld [vmem:[#allocation76_spill] sm:$0xff]  ;;  %v16428_v6 = vld [vmem:[#allocation73_spill] sm:$0xff]  ;;  %v16430_v32 = vld [vmem:[#allocation78_spill] sm:$0xff] }
 0x174   : > { %16414 = vst [vmem:[#allocation66_spill] sm:$0xff] %v9447_v28  ;;  %v9469_v36 = vadd.f32 %v1989_v50, %v16422_v0  ;;  %v9472_v28 = vadd.f32 %v1927_v55, %v16424_v38  ;;  %v9475_v1 = vadd.f32 %v1928_v39, %v16425_v13  ;;  %v9478_v43 = vadd.f32 %v1929_v33, %v16426_v26  ;;  %v16432_v38 = vld [vmem:[#allocation79_spill] sm:$0xff]  ;;  %v16436_v39 = vld [vmem:[#allocation81_spill] sm:$0xff] }
 0x175   : > { %16418 = vst [vmem:[#allocation69_spill] sm:$0xff] %v9460_v19  ;;  %16420 = vst [vmem:[#allocation70_spill] sm:$0xff] %v9463_v5  ;;  %v9481_v25 = vadd.f32 %v1990_v44, %v16428_v6  ;;  %v1931_v4 = vmul.f32 %v9455_v62, %v8585_v10  ;;  %v1932_v51 = vmul.f32 %v9455_v62, %v8598_v30  ;;  %v9504_v44 = vpop.permute.xlu1 %1836  ;;  %v9506_v0 = vpop.permute.xlu0 %1840  ;;  %v16452_v5 = vld [vmem:[#allocation89_spill] sm:$0xff] }
 0x176   : > { %16421 = vst [vmem:[#allocation176_spill] sm:$0xff] %v9466_v40  ;;  %16423 = vst [vmem:[#allocation72_spill] sm:$0xff] %v9469_v36  ;;  %v9488_v2 = vadd.f32 %v1930_v20, %v16430_v32  ;;  %v9491_v50 = vadd.f32 %v1991_v45, %v16432_v38  ;;  %v1933_v13 = vmul.f32 %v9457_v48, %v8585_v10  ;;  %v16440_v32 = vld [vmem:[#allocation80_spill] sm:$0xff] }
 0x177   : > { %16427 = vst [vmem:[#allocation71_spill] sm:$0xff] %v9478_v43  ;;  %16429 = vst [vmem:[#allocation76_spill] sm:$0xff] %v9481_v25  ;;  %v9496_v26 = vadd.f32 %v1992_v34, %v8860_v12  ;;  %v9499_v55 = vadd.f32 %v1993_v16, %v8864_v52  ;;  %v9502_v33 = vadd.f32 %v1994_v42, %v16436_v39  ;;  %v16441_v39 = vld [vmem:[#allocation82_spill] sm:$0xff]  ;;  %v16442_v25 = vld [vmem:[#allocation83_spill] sm:$0xff] }
 0x178   : > { %16431 = vst [vmem:[#allocation77_spill] sm:$0xff] %v9488_v2  ;;  %16433 = vst [vmem:[#allocation73_spill] sm:$0xff] %v9491_v50  ;;  %v1934_v20 = vmul.f32 %v9457_v48, %v8598_v30  ;;  %v1995_v45 = vmul.f32 %v9455_v62, %v8602_v49  ;;  %v1996_v12 = vmul.f32 %v9455_v62, %v8605_v31  ;;  %v16454_v43 = vld [vmem:[#allocation91_spill] sm:$0xff] }
 0x179   : > { %16434 = vst [vmem:[#allocation78_spill] sm:$0xff] %v9496_v26  ;;  %16435 = vst [vmem:[#allocation79_spill] sm:$0xff] %v9499_v55  ;;  %v1997_v52 = vmul.f32 %v9457_v48, %v8602_v49  ;;  %v1935_v34 = vmul.f32 %v9504_v44, %v8585_v10  ;;  %v1936_v16 = vmul.f32 %v9504_v44, %v8598_v30 }
 0x17a   : > { %16437 = vst [vmem:[#allocation81_spill] sm:$0xff] %v9502_v33  ;;  %16438 = vst [vmem:[#allocation177_spill] sm:$0xff] %v9504_v44  ;;  %v1937_v42 = vmul.f32 %v9506_v0, %v8585_v10  ;;  %v1998_v6 = vmul.f32 %v9457_v48, %v8605_v31  ;;  %v9525_v38 = vadd.f32 %v1931_v4, %v16440_v32  ;;  %v9545_v32 = vpop.permute.xlu0 %1848 }
 0x17b   : > { %16439 = vst [vmem:[#allocation178_spill] sm:$0xff] %v9506_v0  ;;  %v9528_v62 = vadd.f32 %v1932_v51, %v16441_v39  ;;  %v1938_v33 = vmul.f32 %v9506_v0, %v8598_v30  ;;  %v1999_v55 = vmul.f32 %v9504_v44, %v8602_v49  ;;  %v9535_v36 = vadd.f32 %v1933_v13, %v16442_v25  ;;  %v9543_v51 = vpop.permute.xlu1 %1844  ;;  %v16446_v39 = vld [vmem:[#allocation84_spill] sm:$0xff]  ;;  %v16450_v13 = vld [vmem:[#allocation85_spill] sm:$0xff] }
 0x17c   : > { %v2000_v26 = vmul.f32 %v9504_v44, %v8605_v31  ;;  %v2001_v48 = vmul.f32 %v9506_v0, %v8602_v49  ;;  %v2002_v4 = vmul.f32 %v9506_v0, %v8605_v31  ;;  %16444 = vst [vmem:[#allocation82_spill] sm:$0xff] %v9543_v51  ;;  %16445 = vst [vmem:[#allocation83_spill] sm:$0xff] %v9545_v32  ;;  %v16453_v0 = vld [vmem:[#allocation90_spill] sm:$0xff] }
 0x17d   : > { %16443 = vst [vmem:[#allocation80_spill] sm:$0xff] %v9535_v36  ;;  %v9548_v50 = vadd.f32 %v1934_v20, %v16446_v39  ;;  %v9551_v40 = vadd.f32 %v1995_v45, %v8884_v3  ;;  %v9554_v25 = vadd.f32 %v1996_v12, %v8890_v21  ;;  %v9557_v44 = vadd.f32 %v1997_v52, %v16450_v13  ;;  %v16456_v20 = vld [vmem:[#allocation86_spill] sm:$0xff]  ;;  %v16458_v45 = vld [vmem:[#allocation92_spill] sm:$0xff] }
 0x17e   : > { %v9560_v36 = vadd.f32 %v1935_v34, %v16452_v5  ;;  %v9563_v2 = vadd.f32 %v1936_v16, %v16453_v0  ;;  %v9566_v19 = vadd.f32 %v1937_v42, %v16454_v43  ;;  %v9569_v39 = vadd.f32 %v1998_v6, %v16456_v20  ;;  %v16461_v43 = vld [vmem:[#allocation93_spill] sm:$0xff]  ;;  %v16464_v16 = vld [vmem:[#allocation94_spill] sm:$0xff]  ;;  %v9594_v13 = vpop.permute.xlu0 %1856 }
 0x17f   : > { %16447 = vst [vmem:[#allocation84_spill] sm:$0xff] %v9548_v50  ;;  %16448 = vst [vmem:[#allocation179_spill] sm:$0xff] %v9551_v40  ;;  %v1939_v3 = vmul.f32 %v9543_v51, %v8585_v10  ;;  %v1940_v21 = vmul.f32 %v9543_v51, %v8598_v30  ;;  %v9576_v12 = vadd.f32 %v1938_v33, %v16458_v45  ;;  %v9592_v6 = vpop.permute.xlu1 %1852  ;;  %v16468_v45 = vld [vmem:[#allocation95_spill] sm:$0xff] }
 0x180   : > { %16449 = vst [vmem:[#allocation180_spill] sm:$0xff] %v9554_v25  ;;  %16451 = vst [vmem:[#allocation85_spill] sm:$0xff] %v9557_v44  ;;  %v9579_v5 = vadd.f32 %v1999_v55, %v8922_v14  ;;  %v1941_v0 = vmul.f32 %v9545_v32, %v8585_v10  ;;  %v9584_v52 = vadd.f32 %v2000_v26, %v16461_v43 }
 0x181   : > { %16455 = vst [vmem:[#allocation89_spill] sm:$0xff] %v9566_v19  ;;  %16457 = vst [vmem:[#allocation90_spill] sm:$0xff] %v9569_v39  ;;  %v9587_v34 = vadd.f32 %v2001_v48, %v8930_v54  ;;  %v9590_v42 = vadd.f32 %v2002_v4, %v16464_v16  ;;  %v1942_v14 = vmul.f32 %v9545_v32, %v8598_v30  ;;  %v16469_v16 = vld [vmem:[#allocation96_spill] sm:$0xff]  ;;  %v16470_v39 = vld [vmem:[#allocation97_spill] sm:$0xff] }
 0x182   : > { %16459 = vst [vmem:[#allocation91_spill] sm:$0xff] %v9576_v12  ;;  %16460 = vst [vmem:[#allocation86_spill] sm:$0xff] %v9579_v5  ;;  %v2003_v55 = vmul.f32 %v9543_v51, %v8602_v49  ;;  %v2004_v26 = vmul.f32 %v9543_v51, %v8605_v31  ;;  %v2005_v54 = vmul.f32 %v9545_v32, %v8602_v49  ;;  %v16475_v5 = vld [vmem:[#allocation98_spill] sm:$0xff] }
 0x183   : > { %16462 = vst [vmem:[#allocation92_spill] sm:$0xff] %v9584_v52  ;;  %16463 = vst [vmem:[#allocation93_spill] sm:$0xff] %v9587_v34  ;;  %v1943_v48 = vmul.f32 %v9592_v6, %v8585_v10  ;;  %v1944_v33 = vmul.f32 %v9592_v6, %v8598_v30  ;;  %v1945_v4 = vmul.f32 %v9594_v13, %v8585_v10 }
 0x184   : > { %16465 = vst [vmem:[#allocation94_spill] sm:$0xff] %v9590_v42  ;;  %16466 = vst [vmem:[#allocation181_spill] sm:$0xff] %v9592_v6  ;;  %v2006_v20 = vmul.f32 %v9545_v32, %v8605_v31  ;;  %v9613_v43 = vadd.f32 %v1939_v3, %v16468_v45  ;;  %v9616_v51 = vadd.f32 %v1940_v21, %v16469_v16  ;;  %v9631_v21 = vpop.permute.xlu1 %1860  ;;  %v9633_v45 = vpop.permute.xlu0 %1864 }
 0x185   : > { %16467 = vst [vmem:[#allocation182_spill] sm:$0xff] %v9594_v13  ;;  %v1946_v42 = vmul.f32 %v9594_v13, %v8598_v30  ;;  %v2007_v34 = vmul.f32 %v9592_v6, %v8602_v49  ;;  %v9623_v44 = vadd.f32 %v1941_v0, %v16470_v39  ;;  %v2008_v52 = vmul.f32 %v9592_v6, %v8605_v31  ;;  %v16477_v39 = vld [vmem:[#allocation99_spill] sm:$0xff]  ;;  %v16479_v6 = vld [vmem:[#allocation100_spill] sm:$0xff] }
 0x186   : > { %v2009_v32 = vmul.f32 %v9594_v13, %v8602_v49  ;;  %v2010_v3 = vmul.f32 %v9594_v13, %v8605_v31  ;;  %16472 = vst [vmem:[#allocation96_spill] sm:$0xff] %v9631_v21  ;;  %16473 = vst [vmem:[#allocation97_spill] sm:$0xff] %v9633_v45  ;;  %v9636_v16 = vadd.f32 %v1942_v14, %v8950_v11  ;;  %v16482_v13 = vld [vmem:[#allocation104_spill] sm:$0xff]  ;;  %v16484_v11 = vld [vmem:[#allocation105_spill] sm:$0xff] }
 0x187   : > { %16471 = vst [vmem:[#allocation95_spill] sm:$0xff] %v9623_v44  ;;  %v9639_v25 = vadd.f32 %v2003_v55, %v16475_v5  ;;  %v9642_v0 = vadd.f32 %v2004_v26, %v16477_v39  ;;  %v9645_v40 = vadd.f32 %v2005_v54, %v16479_v6  ;;  %v16481_v44 = vld [vmem:[#allocation103_spill] sm:$0xff]  ;;  %v9651_v19 = vadd.f32 %v1944_v33, %v16482_v13  ;;  %v16486_v6 = vld [vmem:[#allocation106_spill] sm:$0xff]  ;;  %v16495_v39 = vld [vmem:[#allocation108_spill] sm:$0xff] }
 0x188   : > { %16474 = vst [vmem:[#allocation183_spill] sm:$0xff] %v9636_v16  ;;  %v9648_v12 = vadd.f32 %v1943_v48, %v16481_v44  ;;  %v9654_v50 = vadd.f32 %v1945_v4, %v8980_v18  ;;  %v9657_v14 = vadd.f32 %v2006_v20, %v16484_v11  ;;  %v1947_v5 = vmul.f32 %v9631_v21, %v8585_v10  ;;  %v16490_v54 = vld [vmem:[#allocation107_spill] sm:$0xff]  ;;  %v9680_v4 = vpop.permute.xlu1 %1868  ;;  %v9682_v20 = vpop.permute.xlu0 %1872 }
 0x189   : > { %16476 = vst [vmem:[#allocation98_spill] sm:$0xff] %v9639_v25  ;;  %16478 = vst [vmem:[#allocation99_spill] sm:$0xff] %v9642_v0  ;;  %v1948_v55 = vmul.f32 %v9631_v21, %v8598_v30  ;;  %v9664_v26 = vadd.f32 %v1946_v42, %v16486_v6  ;;  %v9667_v44 = vadd.f32 %v2007_v34, %v8992_v17  ;;  %v16496_v6 = vld [vmem:[#allocation109_spill] sm:$0xff]  ;;  %v16507_v25 = vld [vmem:[#allocation116_spill] sm:$0xff] }
 0x18a   : > { %16480 = vst [vmem:[#allocation100_spill] sm:$0xff] %v9645_v40  ;;  %16483 = vst [vmem:[#allocation103_spill] sm:$0xff] %v9654_v50  ;;  %v1949_v13 = vmul.f32 %v9633_v45, %v8585_v10  ;;  %v9672_v18 = vadd.f32 %v2008_v52, %v8996_v56  ;;  %v9675_v48 = vadd.f32 %v2009_v32, %v16490_v54  ;;  %v16509_v50 = vld [vmem:[#allocation119_spill] sm:$0xff] }
 0x18b   : > { %16485 = vst [vmem:[#allocation104_spill] sm:$0xff] %v9657_v14  ;;  %16487 = vst [vmem:[#allocation105_spill] sm:$0xff] %v9664_v26  ;;  %v9678_v33 = vadd.f32 %v2010_v3, %v9016_v41  ;;  %v1950_v17 = vmul.f32 %v9633_v45, %v8598_v30  ;;  %v2011_v34 = vmul.f32 %v9631_v21, %v8602_v49 }
 0x18c   : > { %16488 = vst [vmem:[#allocation106_spill] sm:$0xff] %v9667_v44  ;;  %16489 = vst [vmem:[#allocation184_spill] sm:$0xff] %v9672_v18  ;;  %v2012_v56 = vmul.f32 %v9631_v21, %v8605_v31  ;;  %v2013_v32 = vmul.f32 %v9633_v45, %v8602_v49  ;;  %v1951_v41 = vmul.f32 %v9680_v4, %v8585_v10  ;;  %v16502_v44 = vld [vmem:[#allocation112_spill] sm:$0xff] }
 0x18d   : > { %16491 = vst [vmem:[#allocation107_spill] sm:$0xff] %v9675_v48  ;;  %16492 = vst [vmem:[#allocation185_spill] sm:$0xff] %v9678_v33  ;;  %v1952_v52 = vmul.f32 %v9680_v4, %v8598_v30  ;;  %v1953_v42 = vmul.f32 %v9682_v20, %v8585_v10  ;;  %v2014_v3 = vmul.f32 %v9633_v45, %v8605_v31  ;;  %v16497_v48 = vld [vmem:[#allocation110_spill] sm:$0xff] }
 0x18e   : > { %16493 = vst [vmem:[#allocation186_spill] sm:$0xff] %v9680_v4  ;;  %16494 = vst [vmem:[#allocation187_spill] sm:$0xff] %v9682_v20  ;;  %v9701_v11 = vadd.f32 %v1947_v5, %v16495_v39  ;;  %v9704_v54 = vadd.f32 %v1948_v55, %v16496_v6  ;;  %v1954_v21 = vmul.f32 %v9682_v20, %v8598_v30  ;;  %v9719_v55 = vpop.permute.xlu1 %1876  ;;  %v9721_v39 = vpop.permute.xlu0 %1880  ;;  %v16501_v6 = vld [vmem:[#allocation111_spill] sm:$0xff] }
 0x18f   : > { %v2015_v33 = vmul.f32 %v9680_v4, %v8602_v49  ;;  %v9711_v14 = vadd.f32 %v1949_v13, %v16497_v48  ;;  %v2016_v40 = vmul.f32 %v9680_v4, %v8605_v31  ;;  %v2017_v45 = vmul.f32 %v9682_v20, %v8602_v49  ;;  %16499 = vst [vmem:[#allocation109_spill] sm:$0xff] %v9719_v55  ;;  %v16504_v13 = vld [vmem:[#allocation113_spill] sm:$0xff] }
 0x190   : > { %v2018_v5 = vmul.f32 %v9682_v20, %v8605_v31  ;;  %16500 = vst [vmem:[#allocation110_spill] sm:$0xff] %v9721_v39  ;;  %v9724_v18 = vadd.f32 %v1950_v17, %v16501_v6  ;;  %v9727_v0 = vadd.f32 %v2011_v34, %v16502_v44  ;;  %v9730_v48 = vadd.f32 %v2012_v56, %v16504_v13  ;;  %v16508_v20 = vld [vmem:[#allocation117_spill] sm:$0xff]  ;;  %v16510_v17 = vld [vmem:[#allocation118_spill] sm:$0xff] }
 0x191   : > { %16498 = vst [vmem:[#allocation108_spill] sm:$0xff] %v9711_v14  ;;  %v9733_v4 = vadd.f32 %v2013_v32, %v9046_v61  ;;  %v9736_v14 = vadd.f32 %v1951_v41, %v16507_v25  ;;  %v9739_v26 = vadd.f32 %v1952_v52, %v16508_v20  ;;  %v9742_v16 = vadd.f32 %v1953_v42, %v16509_v50  ;;  %v16512_v61 = vld [vmem:[#allocation120_spill] sm:$0xff]  ;;  %v16516_v32 = vld [vmem:[#allocation123_spill] sm:$0xff] }
 0x192   : > { %16503 = vst [vmem:[#allocation111_spill] sm:$0xff] %v9727_v0  ;;  %16505 = vst [vmem:[#allocation112_spill] sm:$0xff] %v9730_v48  ;;  %v9745_v6 = vadd.f32 %v2014_v3, %v16510_v17  ;;  %v1955_v44 = vmul.f32 %v9719_v55, %v8585_v10  ;;  %v1956_v34 = vmul.f32 %v9719_v55, %v8598_v30  ;;  %v16518_v52 = vld [vmem:[#allocation124_spill] sm:$0xff]  ;;  %v9768_v3 = vpop.permute.xlu1 %1884  ;;  %v9770_v13 = vpop.permute.xlu0 %1888  ;;  %v16530_v48 = vld [vmem:[#allocation127_spill] sm:$0xff] }
 0x193   : > { %16506 = vst [vmem:[#allocation113_spill] sm:$0xff] %v9733_v4  ;;  %v9752_v56 = vadd.f32 %v1954_v21, %v16512_v61  ;;  %v9755_v25 = vadd.f32 %v2015_v33, %v9062_v58  ;;  %v1957_v20 = vmul.f32 %v9721_v39, %v8585_v10  ;;  %v9760_v50 = vadd.f32 %v2016_v40, %v9066_v63  ;;  %v16522_v61 = vld [vmem:[#allocation121_spill] sm:$0xff] }
 0x194   : > { %16511 = vst [vmem:[#allocation116_spill] sm:$0xff] %v9745_v6  ;;  %v9763_v41 = vadd.f32 %v2017_v45, %v16516_v32  ;;  %v9766_v42 = vadd.f32 %v2018_v5, %v16518_v52  ;;  %16520 = vst [vmem:[#allocation124_spill] sm:$0xff] %v9768_v3  ;;  %v1958_v58 = vmul.f32 %v9721_v39, %v8598_v30  ;;  %v16523_v52 = vld [vmem:[#allocation122_spill] sm:$0xff]  ;;  %v16524_v6 = vld [vmem:[#allocation125_spill] sm:$0xff] }
 0x195   : > { %16513 = vst [vmem:[#allocation117_spill] sm:$0xff] %v9752_v56  ;;  %16514 = vst [vmem:[#allocation119_spill] sm:$0xff] %v9755_v25  ;;  %v2019_v21 = vmul.f32 %v9719_v55, %v8602_v49  ;;  %v2020_v63 = vmul.f32 %v9719_v55, %v8605_v31  ;;  %v2021_v40 = vmul.f32 %v9721_v39, %v8602_v49 }
 0x196   : > { %16515 = vst [vmem:[#allocation118_spill] sm:$0xff] %v9760_v50  ;;  %16517 = vst [vmem:[#allocation120_spill] sm:$0xff] %v9763_v41  ;;  %v1959_v45 = vmul.f32 %v9768_v3, %v8585_v10  ;;  %v1960_v33 = vmul.f32 %v9768_v3, %v8598_v30  ;;  %v1961_v5 = vmul.f32 %v9770_v13, %v8585_v10 }
 0x197   : > { %16519 = vst [vmem:[#allocation123_spill] sm:$0xff] %v9766_v42  ;;  %16521 = vst [vmem:[#allocation188_spill] sm:$0xff] %v9770_v13  ;;  %v2022_v17 = vmul.f32 %v9721_v39, %v8605_v31  ;;  %v9789_v32 = vadd.f32 %v1955_v44, %v16522_v61  ;;  %v9792_v55 = vadd.f32 %v1956_v34, %v16523_v52  ;;  %v9807_v34 = vpop.permute.xlu1 %1892  ;;  %v9809_v61 = vpop.permute.xlu0 %1896  ;;  %v16528_v52 = vld [vmem:[#allocation126_spill] sm:$0xff] }
 0x198   : > { %v1962_v42 = vmul.f32 %v9770_v13, %v8598_v30  ;;  %v2023_v41 = vmul.f32 %v9768_v3, %v8602_v49  ;;  %v9799_v4 = vadd.f32 %v1957_v20, %v16524_v6  ;;  %v2024_v50 = vmul.f32 %v9768_v3, %v8605_v31  ;;  %16526 = vst [vmem:[#allocation122_spill] sm:$0xff] %v9807_v34  ;;  %v16533_v20 = vld [vmem:[#allocation130_spill] sm:$0xff] }
 0x199   : > { %v2025_v39 = vmul.f32 %v9770_v13, %v8602_v49  ;;  %v2026_v44 = vmul.f32 %v9770_v13, %v8605_v31  ;;  %16527 = vst [vmem:[#allocation125_spill] sm:$0xff] %v9809_v61  ;;  %v9812_v25 = vadd.f32 %v1958_v58, %v16528_v52  ;;  %v9815_v0 = vadd.f32 %v2019_v21, %v16530_v48  ;;  %v16549_v52 = vld [vmem:[#allocation35_spill] sm:$0xff] }
 0x19a   : > { %16525 = vst [vmem:[#allocation121_spill] sm:$0xff] %v9799_v4  ;;  %v9818_v6 = vadd.f32 %v2020_v63, %v9104_v60  ;;  %v9821_v3 = vadd.f32 %v2021_v40, %v16533_v20  ;;  %v9824_v4 = vadd.f32 %v1959_v45, %v9134_v22  ;;  %v9827_v13 = vadd.f32 %v1960_v33, %v9138_v53  ;;  %v16539_v53 = vld [vmem:[#allocation40_spill] sm:$0xff]  ;;  %v16540_v63 = vld [vmem:[#allocation41_spill] sm:$0xff]  ;;  %v16550_v20 = vld [vmem:[#allocation142_spill] sm:$0xff] }
 0x19b   : > { %16529 = vst [vmem:[#allocation126_spill] sm:$0xff] %v9812_v25  ;;  %16531 = vst [vmem:[#allocation127_spill] sm:$0xff] %v9815_v0  ;;  %v9830_v56 = vadd.f32 %v1961_v5, %v9142_v9  ;;  %v9833_v58 = vadd.f32 %v2022_v17, %v9112_v15  ;;  %v1963_v48 = vmul.f32 %v9807_v34, %v8585_v10  ;;  %vm4234_vm0 = vcmp.lt.s32.totalorder %v16539_v53, 300  ;;  %v16541_v15 = vld [vmem:[#allocation135_spill] sm:$0xff]  ;;  %v16543_v45 = vld [vmem:[#allocation136_spill] sm:$0xff] }
 0x19c   : > { %16532 = vst [vmem:[#allocation189_spill] sm:$0xff] %v9818_v6  ;;  %16534 = vst [vmem:[#allocation130_spill] sm:$0xff] %v9821_v3  ;;  %v1964_v60 = vmul.f32 %v9807_v34, %v8598_v30  ;;  %v9840_v21 = vadd.f32 %v1962_v42, %v9149_v7  ;;  %v9843_v22 = vadd.f32 %v2023_v41, %v9153_v27  ;;  %vm4235_vm1 = vcmp.lt.s32.totalorder %v16540_v63, 300  ;;  %v16545_v5 = vld [vmem:[#allocation140_spill] sm:$0xff]  ;;  %v9858_v7 = vpop.permute.xlu1 %1900  ;;  %v9860_v27 = vpop.permute.xlu0 %1904  ;;  %v16553_v3 = vld [vmem:[#allocation138_spill] sm:$0xff] }
 0x19d   : > { %16535 = vst [vmem:[#allocation190_spill] sm:$0xff] %v9830_v56  ;;  %16536 = vst [vmem:[#allocation191_spill] sm:$0xff] %v9833_v58  ;;  %v1965_v9 = vmul.f32 %v9809_v61, %v8585_v10  ;;  %v9850_v40 = vadd.f32 %v2024_v50, %v16541_v15  ;;  %v9853_v33 = vadd.f32 %v2025_v39, %v16543_v45  ;;  %v16554_v6 = vld [vmem:[#allocation152_spill] sm:$0xff]  ;;  %v16556_v0 = vld [vmem:[#allocation153_spill] sm:$0xff] }
 0x19e   : > { %16537 = vst [vmem:[#allocation192_spill] sm:$0xff] %v9840_v21  ;;  %16538 = vst [vmem:[#allocation193_spill] sm:$0xff] %v9843_v22  ;;  %v9856_v17 = vadd.f32 %v2026_v44, %v16545_v5  ;;  %v1966_v41 = vmul.f32 %v9809_v61, %v8598_v30  ;;  %v2027_v42 = vmul.f32 %v9807_v34, %v8602_v49  ;;  %v16551_v5 = vld [vmem:[#allocation36_spill] sm:$0xff] }
 0x19f   : > { %16542 = vst [vmem:[#allocation40_spill] sm:$0xff] %v9850_v40  ;;  %16544 = vst [vmem:[#allocation41_spill] sm:$0xff] %v9853_v33  ;;  %v2028_v50 = vmul.f32 %v9807_v34, %v8605_v31  ;;  %v2035_v39 = vmul.f32 %v16550_v20, %v16549_v52  ;;  %v1967_v44 = vmul.f32 %v9858_v7, %v8585_v10  ;;  %v16552_v33 = vld [vmem:[#allocation137_spill] sm:$0xff]  ;;  %v16562_v21 = vld [vmem:[#allocation144_spill] sm:$0xff] }
 0x1a0   : > { %16546 = vst [vmem:[#allocation135_spill] sm:$0xff] %v9856_v17  ;;  %16547 = vst [vmem:[#allocation136_spill] sm:$0xff] %v9858_v7  ;;  %v1969_v15 = vmul.f32 %v9860_v27, %v8585_v10  ;;  %v1970_v45 = vmul.f32 %v9860_v27, %v8598_v30  ;;  %v2036_v17 = vmul.f32 %v16550_v20, %v16551_v5 }
 0x1a1   : > { %16548 = vst [vmem:[#allocation140_spill] sm:$0xff] %v9860_v27  ;;  %v9879_v58 = vadd.f32 %v1963_v48, %v16552_v33  ;;  %v9882_v34 = vadd.f32 %v1964_v60, %v16553_v3  ;;  %v1968_v40 = vmul.f32 %v9858_v7, %v8598_v30  ;;  %v2031_v22 = vmul.f32 %v9858_v7, %v8602_v49  ;;  %v16558_v3 = vld [vmem:[#allocation139_spill] sm:$0xff] }
 0x1a2   : > { %v9889_v10 = vadd.f32 %v1969_v15, %v16554_v6  ;;  %v9892_v27 = vadd.f32 %v1970_v45, %v16556_v0  ;;  %v2032_v20 = vmul.f32 %v9858_v7, %v8605_v31  ;;  %v2029_v48 = vmul.f32 %v9809_v61, %v8602_v49  ;;  %v16560_v33 = vld [vmem:[#allocation143_spill] sm:$0xff]  ;;  %v16564_v6 = vld [vmem:[#allocation145_spill] sm:$0xff]  ;;  %v9910_v0 = vpop.permute.xlu1 %3076  ;;  %v9912_v45 = vpop.permute.xlu0 %3080  ;;  %v16570_v49 = vld [vmem:[#allocation50_spill] sm:$0xff] }
 0x1a3   : > { %v9899_v60 = vadd.f32 %v1965_v9, %v16558_v3  ;;  %v9902_v30 = vadd.f32 %v1966_v41, %v16560_v33  ;;  %v9905_v56 = vadd.f32 %v2027_v42, %v16562_v21  ;;  %v9908_v15 = vadd.f32 %v2028_v50, %v16564_v6  ;;  %16566 = vst [vmem:[#allocation144_spill] sm:$0xff] %v9910_v0  ;;  %v16568_v7 = vld [vmem:[#allocation147_spill] sm:$0xff]  ;;  %v16574_v41 = vld [vmem:[#allocation34_spill] sm:$0xff]  ;;  %v16575_v50 = vld [vmem:[#allocation37_spill] sm:$0xff] }
 0x1a4   : > { %16555 = vst [vmem:[#allocation137_spill] sm:$0xff] %v9889_v10  ;;  %16557 = vst [vmem:[#allocation138_spill] sm:$0xff] %v9892_v27  ;;  %v9915_v27 = vadd.f32 %v1967_v44, %v16568_v7  ;;  %v9918_v10 = vadd.f32 %v2035_v39, %v16570_v49  ;;  %v16572_v9 = vld [vmem:[#allocation51_spill] sm:$0xff]  ;;  %v2030_v21 = vmul.f32 %v9809_v61, %v8605_v31  ;;  %v16580_v31 = vld [vmem:[#allocation149_spill] sm:$0xff] }
 0x1a5   : > { %16559 = vst [vmem:[#allocation152_spill] sm:$0xff] %v9899_v60  ;;  %16561 = vst [vmem:[#allocation153_spill] sm:$0xff] %v9902_v30  ;;  %v9921_v3 = vadd.f32 %v2036_v17, %v16572_v9  ;;  %v3205_v42 = vmul.f32 %v9912_v45, %v16574_v41  ;;  %v3206_v33 = vmul.f32 %v9912_v45, %v16575_v50  ;;  %v16576_v49 = vld [vmem:[#allocation151_spill] sm:$0xff]  ;;  %v16577_v17 = vld [vmem:[#allocation154_spill] sm:$0xff] }
 0x1a6   : > { %16563 = vst [vmem:[#allocation139_spill] sm:$0xff] %v9905_v56  ;;  %16565 = vst [vmem:[#allocation143_spill] sm:$0xff] %v9908_v15  ;;  %v3203_v6 = vmul.f32 %v9910_v0, %v16574_v41  ;;  %v3204_v7 = vmul.f32 %v9910_v0, %v16575_v50  ;;  %v9934_v39 = vadd.f32 %v1968_v40, %v16576_v49  ;;  %v16578_v9 = vld [vmem:[#allocation155_spill] sm:$0xff]  ;;  %v16582_v15 = vld [vmem:[#allocation158_spill] sm:$0xff]  ;;  %v9949_v25 = vpop.permute.xlu1 %3084  ;;  %v9951_v40 = vpop.permute.xlu0 %3092 }
 0x1a7   : > { %16567 = vst [vmem:[#allocation145_spill] sm:$0xff] %v9912_v45  ;;  %16569 = vst [vmem:[#allocation147_spill] sm:$0xff] %v9915_v27  ;;  %v9937_v44 = vadd.f32 %v2031_v22, %v16577_v17  ;;  %v9940_v61 = vadd.f32 %v2032_v20, %v16578_v9  ;;  %v3718_v56 = vadd.f32 %v3206_v33, %v16582_v15  ;;  %v16583_v30 = vld [vmem:[#allocation159_spill] sm:$0xff]  ;;  %v16586_v22 = vld [vmem:[#allocation150_spill] sm:$0xff] }
 0x1a8   : > { %16571 = vst [vmem:[#allocation50_spill] sm:$0xff] %v9918_v10  ;;  %16573 = vst [vmem:[#allocation51_spill] sm:$0xff] %v9921_v3  ;;  %v9943_v3 = vadd.f32 %v2029_v48, %v16580_v31  ;;  %v3717_v10 = vadd.f32 %v3205_v42, %v9261_v59  ;;  %v3715_v60 = vadd.f32 %v3203_v6, %v16583_v30  ;;  %v16588_v20 = vld [vmem:[#allocation156_spill] sm:$0xff]  ;;  %v16591_v59 = vld [vmem:[#allocation26_spill] sm:$0xff] }
 0x1a9   : > { %16579 = vst [vmem:[#allocation34_spill] sm:$0xff] %v9940_v61  ;;  %v3716_v27 = vadd.f32 %v3204_v7, %v9284_v8  ;;  %16584 = vst [vmem:[#allocation151_spill] sm:$0xff] %v9949_v25  ;;  %v9954_v49 = vadd.f32 %v2030_v21, %v16586_v22  ;;  %v9958_v17 = vmul.f32 %v16588_v20, %v16549_v52  ;;  %v16592_v48 = vld [vmem:[#allocation128_spill] sm:$0xff]  ;;  %v4243_v15 = vsel %vm4235_vm1, %v3718_v56, -inf }
 0x1aa   : > { %16581 = vst [vmem:[#allocation37_spill] sm:$0xff] %v9943_v3  ;;  %16585 = vst [vmem:[#allocation154_spill] sm:$0xff] %v9951_v40  ;;  %v9962_v31 = vmul.f32 %v16588_v20, %v16551_v5  ;;  %v9966_v30 = vmul.f32 %v16592_v48, %v16591_v59  ;;  %v4242_v8 = vsel %vm4234_vm0, %v3717_v10, -inf  ;;  %v4240_v21 = vsel %vm4234_vm0, %v3715_v60, -inf  ;;  %v16594_v22 = vld [vmem:[#allocation44_spill] sm:$0xff]  ;;  %v16595_v59 = vld [vmem:[#allocation27_spill] sm:$0xff] }
 0x1ab   : > { %16587 = vst [vmem:[#allocation155_spill] sm:$0xff] %v9954_v49  ;;  %16589 = vst [vmem:[#allocation149_spill] sm:$0xff] %v9958_v17  ;;  %v4241_v42 = vsel %vm4235_vm1, %v3716_v27, -inf  ;;  %v4755_v33 = vmax.f32 %v4242_v8, %v4243_v15  ;;  %v3211_v7 = vmul.f32 %v9951_v40, %v16574_v41  ;;  %v3212_v9 = vmul.f32 %v9951_v40, %v16575_v50  ;;  %v9992_v8 = vpop.permute.xlu1 %3088  ;;  %v9994_v15 = vpop.permute.xlu0 %3100  ;;  %v16599_v20 = vld [vmem:[#allocation45_spill] sm:$0xff]  ;;  %v16601_v17 = vld [vmem:[#allocation167_spill] sm:$0xff] }
 0x1ac   : > { %16590 = vst [vmem:[#allocation158_spill] sm:$0xff] %v9962_v31  ;;  %16593 = vst [vmem:[#allocation159_spill] sm:$0xff] %v9966_v30  ;;  %v4752_v6 = vmax.f32 %v4240_v21, %v4241_v42  ;;  %v3207_v10 = vmul.f32 %v9949_v25, %v16574_v41  ;;  %v3208_v56 = vmul.f32 %v9949_v25, %v16575_v50 }
 0x1ad   : > { %v9986_v60 = vmul.f32 %v9910_v0, %v16594_v22  ;;  %v9990_v27 = vmul.f32 %v16592_v48, %v16595_v59  ;;  %16597 = vst [vmem:[#allocation26_spill] sm:$0xff] %v9992_v8  ;;  %16598 = vst [vmem:[#allocation44_spill] sm:$0xff] %v9994_v15  ;;  %4756 = vmax.xlane.f32.xlu1 %v4755_v33  ;;  %v3723_v21 = vadd.f32 %v3211_v7, %v9349_v37 }
 0x1ae   : > { %4753 = vmax.xlane.f32.xlu0 %v4752_v6  ;;  %v3724_v42 = vadd.f32 %v3212_v9, %v9352_v46  ;;  %v3268_v30 = vmul.f32 %v9910_v0, %v16599_v20  ;;  %v3719_v5 = vadd.f32 %v3207_v10, %v9296_v24  ;;  %v3720_v52 = vadd.f32 %v3208_v56, %v9299_v57  ;;  %v16635_v0 = vld [vmem:[#allocation43_spill] sm:$0xff] }
 0x1af   : > { %16596 = vst [vmem:[#allocation150_spill] sm:$0xff] %v9990_v27  ;;  %v3215_v59 = vmul.f32 %v9994_v15, %v16574_v41  ;;  %v3216_v48 = vmul.f32 %v9994_v15, %v16575_v50  ;;  %v4248_v33 = vsel %vm4234_vm0, %v3723_v21, -inf  ;;  %v3209_v46 = vmul.f32 %v9992_v8, %v16574_v41  ;;  %v10019_v10 = vpop.permute.xlu1 %3096  ;;  %v10021_v56 = vpop.permute.xlu0 %3108  ;;  %v16600_v27 = vld [vmem:[#allocation165_spill] sm:$0xff] }
 0x1b0   : > { %v4249_v37 = vsel %vm4235_vm1, %v3724_v42, -inf  ;;  %v3210_v24 = vmul.f32 %v9992_v8, %v16575_v50  ;;  %v4244_v57 = vsel %vm4234_vm0, %v3719_v5, -inf  ;;  %v4245_v7 = vsel %vm4235_vm1, %v3720_v52, -inf }
 0x1b1   : > { %v4764_v6 = vmax.f32 %v4248_v33, %v4249_v37  ;;  %v3727_v9 = vadd.f32 %v3215_v59, %v9384_v29  ;;  %v4758_v21 = vmax.f32 %v4244_v57, %v4245_v7  ;;  %v3728_v42 = vadd.f32 %v3216_v48, %v9387_v47  ;;  %v16604_v7 = vld [vmem:[#allocation53_spill] sm:$0xff] }
 0x1b2   : > { %v3721_v31 = vadd.f32 %v3209_v46, %v16600_v27  ;;  %v3722_v49 = vadd.f32 %v3210_v24, %v16601_v17  ;;  %v3219_v52 = vmul.f32 %v10021_v56, %v16574_v41  ;;  %v3220_v29 = vmul.f32 %v10021_v56, %v16575_v50 }
 0x1b3   : > { %4765 = vmax.xlane.f32.xlu1 %v4764_v6  ;;  %v4252_v5 = vsel %vm4234_vm0, %v3727_v9, -inf  ;;  %v3213_v59 = vmul.f32 %v10019_v10, %v16574_v41  ;;  %4759 = vmax.xlane.f32.xlu0 %v4758_v21  ;;  %v4253_v47 = vsel %vm4235_vm1, %v3728_v42, -inf  ;;  %v3214_v27 = vmul.f32 %v10019_v10, %v16575_v50  ;;  %v10044_v6 = vpop.permute.xlu1 %3104  ;;  %v10046_v57 = vpop.permute.xlu0 %3116  ;;  %v16605_v21 = vld [vmem:[#allocation54_spill] sm:$0xff] }
 0x1b4   : > { %v4246_v17 = vsel %vm4234_vm0, %v3721_v31, -inf  ;;  %v4247_v48 = vsel %vm4235_vm1, %v3722_v49, -inf  ;;  %v4770_v33 = vmax.f32 %v4252_v5, %v4253_v47  ;;  %v3731_v46 = vadd.f32 %v3219_v52, %v9437_v23  ;;  %16602 = vst [vmem:[#allocation27_spill] sm:$0xff] %v10044_v6  ;;  %16603 = vst [vmem:[#allocation45_spill] sm:$0xff] %v10046_v57 }
 0x1b5   : > { %v4761_v37 = vmax.f32 %v4246_v17, %v4247_v48  ;;  %v3732_v24 = vadd.f32 %v3220_v29, %v9440_v35  ;;  %v3725_v9 = vadd.f32 %v3213_v59, %v16604_v7  ;;  %v3726_v31 = vadd.f32 %v3214_v27, %v16605_v21  ;;  %v16608_v7 = vld [vmem:[#allocation59_spill] sm:$0xff]  ;;  %v16609_v21 = vld [vmem:[#allocation162_spill] sm:$0xff] }
 0x1b6   : > { %v3269_v49 = vmul.f32 %v9912_v45, %v16594_v22  ;;  %v3270_v42 = vmul.f32 %v9912_v45, %v16599_v20  ;;  %v4256_v23 = vsel %vm4234_vm0, %v3731_v46, -inf  ;;  %v3223_v5 = vmul.f32 %v10046_v57, %v16574_v41  ;;  %v16611_v45 = vld [vmem:[#allocation164_spill] sm:$0xff] }
 0x1b7   : > { %4771 = vmax.xlane.f32.xlu1 %v4770_v33  ;;  %v4257_v35 = vsel %vm4235_vm1, %v3732_v24, -inf  ;;  %v3224_v52 = vmul.f32 %v10046_v57, %v16575_v50  ;;  %4762 = vmax.xlane.f32.xlu0 %v4761_v37  ;;  %v4250_v59 = vsel %vm4234_vm0, %v3725_v9, -inf  ;;  %v4251_v47 = vsel %vm4235_vm1, %v3726_v31, -inf  ;;  %v10072_v24 = vpop.permute.xlu1 %3112  ;;  %v10074_v37 = vpop.permute.xlu0 %3124 }
 0x1b8   : > { %v4776_v29 = vmax.f32 %v4256_v23, %v4257_v35  ;;  %v3217_v17 = vmul.f32 %v10044_v6, %v16574_v41  ;;  %v4767_v48 = vmax.f32 %v4250_v59, %v4251_v47  ;;  %v3735_v27 = vadd.f32 %v3223_v5, %v9472_v28  ;;  %16606 = vst [vmem:[#allocation165_spill] sm:$0xff] %v10072_v24  ;;  %v16610_v23 = vld [vmem:[#allocation163_spill] sm:$0xff]  ;;  %v16612_v5 = vld [vmem:[#allocation58_spill] sm:$0xff] }
 0x1b9   : > { %v3736_v33 = vadd.f32 %v3224_v52, %v9475_v1  ;;  %v3218_v46 = vmul.f32 %v10044_v6, %v16575_v50  ;;  %16607 = vst [vmem:[#allocation167_spill] sm:$0xff] %v10074_v37  ;;  %v3779_v31 = vadd.f32 %v9986_v60, %v16609_v21  ;;  %v3780_v35 = vadd.f32 %v3268_v30, %v16610_v23  ;;  %v16616_v23 = vld [vmem:[#allocation66_spill] sm:$0xff] }
 0x1ba   : > { %v3729_v9 = vadd.f32 %v3217_v17, %v16608_v7  ;;  %v3781_v59 = vadd.f32 %v3269_v49, %v16611_v45  ;;  %v4260_v28 = vsel %vm4234_vm0, %v3735_v27, -inf  ;;  %v3227_v47 = vmul.f32 %v10074_v37, %v16574_v41 }
 0x1bb   : > { %4777 = vmax.xlane.f32.xlu1 %v4776_v29  ;;  %v4261_v1 = vsel %vm4235_vm1, %v3736_v33, -inf  ;;  %v3730_v52 = vadd.f32 %v3218_v46, %v16612_v5  ;;  %4768 = vmax.xlane.f32.xlu0 %v4767_v48  ;;  %v3228_v45 = vmul.f32 %v10074_v37, %v16575_v50  ;;  %v3221_v30 = vmul.f32 %v10072_v24, %v16574_v41  ;;  %v16613_v33 = vld [vmem:[#allocation166_spill] sm:$0xff]  ;;  %v10102_v46 = vpop.permute.xlu1 %3120  ;;  %v10104_v7 = vpop.permute.xlu0 %3132  ;;  %v16617_v5 = vld [vmem:[#allocation69_spill] sm:$0xff] }
 0x1bc   : > { %v4782_v17 = vmax.f32 %v4260_v28, %v4261_v1  ;;  %v4254_v60 = vsel %vm4234_vm0, %v3729_v9, -inf  ;;  %v3739_v29 = vadd.f32 %v3227_v47, %v9525_v38  ;;  %v3222_v27 = vmul.f32 %v10072_v24, %v16575_v50  ;;  %16614 = vst [vmem:[#allocation53_spill] sm:$0xff] %v10102_v46  ;;  %16615 = vst [vmem:[#allocation54_spill] sm:$0xff] %v10104_v7 }
 0x1bd   : > { %v4255_v49 = vsel %vm4235_vm1, %v3730_v52, -inf  ;;  %v10100_v48 = vadd.f32 %v3270_v42, %v16613_v33  ;;  %v3740_v21 = vadd.f32 %v3228_v45, %v9528_v62  ;;  %v3733_v28 = vadd.f32 %v3221_v30, %v16616_v23 }
 0x1be   : > { %v4773_v9 = vmax.f32 %v4254_v60, %v4255_v49  ;;  %v10110_v1 = vsel %vm4234_vm0, %v3779_v31, -inf  ;;  %v4264_v38 = vsel %vm4234_vm0, %v3739_v29, -inf  ;;  %v3734_v42 = vadd.f32 %v3222_v27, %v16617_v5 }
 0x1bf   : > { %4783 = vmax.xlane.f32.xlu1 %v4782_v17  ;;  %v3231_v52 = vmul.f32 %v10104_v7, %v16574_v41  ;;  %v3232_v47 = vmul.f32 %v10104_v7, %v16575_v50  ;;  %v4265_v62 = vsel %vm4235_vm1, %v3740_v21, -inf  ;;  %v4258_v31 = vsel %vm4234_vm0, %v3733_v28, -inf  ;;  %v10131_v27 = vpop.permute.xlu1 %3128  ;;  %v10133_v33 = vpop.permute.xlu0 %3140  ;;  %v16620_v21 = vld [vmem:[#allocation71_spill] sm:$0xff]  ;;  %v16621_v28 = vld [vmem:[#allocation77_spill] sm:$0xff] }
 0x1c0   : > { %4774 = vmax.xlane.f32.xlu0 %v4773_v9  ;;  %v3225_v17 = vmul.f32 %v10102_v46, %v16574_v41  ;;  %v3226_v60 = vmul.f32 %v10102_v46, %v16575_v50  ;;  %v4788_v45 = vmax.f32 %v4264_v38, %v4265_v62  ;;  %v4259_v30 = vsel %vm4235_vm1, %v3734_v42, -inf  ;;  %16618 = vst [vmem:[#allocation59_spill] sm:$0xff] %v10131_v27 }
 0x1c1   : > { %v3743_v49 = vadd.f32 %v3231_v52, %v9560_v36  ;;  %v3744_v29 = vadd.f32 %v3232_v47, %v9563_v2  ;;  %16619 = vst [vmem:[#allocation162_spill] sm:$0xff] %v10133_v33  ;;  %v4779_v9 = vmax.f32 %v4258_v31, %v4259_v30  ;;  %v10139_v3 = vsel %vm4235_vm1, %v3780_v35, -inf }
 0x1c2   : > { %v3737_v23 = vadd.f32 %v3225_v17, %v16620_v21  ;;  %v3738_v5 = vadd.f32 %v3226_v60, %v16621_v28  ;;  %v3235_v2 = vmul.f32 %v10133_v33, %v16574_v41  ;;  %v3236_v42 = vmul.f32 %v10133_v33, %v16575_v50 }
 0x1c3   : > { %4789 = vmax.xlane.f32.xlu1 %v4788_v45  ;;  %v4268_v38 = vsel %vm4234_vm0, %v3743_v49, -inf  ;;  %v4269_v36 = vsel %vm4235_vm1, %v3744_v29, -inf  ;;  %v3229_v62 = vmul.f32 %v10131_v27, %v16574_v41  ;;  %v3230_v45 = vmul.f32 %v10131_v27, %v16575_v50  ;;  %v10159_v30 = vpop.permute.xlu1 %3136  ;;  %v10161_v49 = vpop.permute.xlu0 %3148  ;;  %v16624_v29 = vld [vmem:[#allocation80_spill] sm:$0xff] }
 0x1c4   : > { %4780 = vmax.xlane.f32.xlu0 %v4779_v9  ;;  %v4794_v52 = vmax.f32 %v4268_v38, %v4269_v36  ;;  %v4262_v47 = vsel %vm4234_vm0, %v3737_v23, -inf  ;;  %v4263_v35 = vsel %vm4235_vm1, %v3738_v5, -inf  ;;  %v3747_v17 = vadd.f32 %v3235_v2, %v9613_v43  ;;  %16622 = vst [vmem:[#allocation163_spill] sm:$0xff] %v10159_v30  ;;  %16623 = vst [vmem:[#allocation164_spill] sm:$0xff] %v10161_v49  ;;  %v16625_v5 = vld [vmem:[#allocation84_spill] sm:$0xff] }
 0x1c5   : > { %v4785_v31 = vmax.f32 %v4262_v47, %v4263_v35  ;;  %v3748_v60 = vadd.f32 %v3236_v42, %v9616_v51  ;;  %v3741_v9 = vadd.f32 %v3229_v62, %v16624_v29  ;;  %v3271_v23 = vmul.f32 %v9949_v25, %v16594_v22 }
 0x1c6   : > { %v10170_v43 = vsel %vm4234_vm0, %v3781_v59, -inf  ;;  %v4272_v51 = vsel %vm4234_vm0, %v3747_v17, -inf  ;;  %v3742_v38 = vadd.f32 %v3230_v45, %v16625_v5  ;;  %v3239_v36 = vmul.f32 %v10161_v49, %v16574_v41 }
 0x1c7   : > { %4795 = vmax.xlane.f32.xlu1 %v4794_v52  ;;  %v4273_v28 = vsel %vm4235_vm1, %v3748_v60, -inf  ;;  %v4266_v42 = vsel %vm4234_vm0, %v3741_v9, -inf  ;;  %v3240_v59 = vmul.f32 %v10161_v49, %v16575_v50  ;;  %v3233_v52 = vmul.f32 %v10159_v30, %v16574_v41  ;;  %v10192_v17 = vpop.permute.xlu1 %3144  ;;  %v10194_v60 = vpop.permute.xlu0 %3156  ;;  %v16628_v9 = vld [vmem:[#allocation89_spill] sm:$0xff] }
 0x1c8   : > { %4786 = vmax.xlane.f32.xlu0 %v4785_v31  ;;  %v4800_v2 = vmax.f32 %v4272_v51, %v4273_v28  ;;  %v4267_v47 = vsel %vm4235_vm1, %v3742_v38, -inf  ;;  %v3751_v35 = vadd.f32 %v3239_v36, %v9648_v12  ;;  %v3234_v62 = vmul.f32 %v10159_v30, %v16575_v50  ;;  %16626 = vst [vmem:[#allocation58_spill] sm:$0xff] %v10192_v17  ;;  %v16629_v28 = vld [vmem:[#allocation42_spill] sm:$0xff]  ;;  %v16630_v38 = vld [vmem:[#allocation91_spill] sm:$0xff] }
 0x1c9   : > { %v3272_v31 = vmul.f32 %v9949_v25, %v16599_v20  ;;  %16627 = vst [vmem:[#allocation166_spill] sm:$0xff] %v10194_v60  ;;  %v4791_v45 = vmax.f32 %v4266_v42, %v4267_v47  ;;  %v3752_v29 = vadd.f32 %v3240_v59, %v9651_v19  ;;  %v3745_v51 = vadd.f32 %v3233_v52, %v16628_v9  ;;  %v16633_v9 = vld [vmem:[#allocation95_spill] sm:$0xff] }
 0x1ca   : > { %v3783_v5 = vadd.f32 %v3271_v23, %v16629_v28  ;;  %v4276_v12 = vsel %vm4234_vm0, %v3751_v35, -inf  ;;  %v3746_v36 = vadd.f32 %v3234_v62, %v16630_v38  ;;  %v3243_v21 = vmul.f32 %v10194_v60, %v16574_v41  ;;  %v16634_v28 = vld [vmem:[#allocation183_spill] sm:$0xff] }
 0x1cb   : > { %4801 = vmax.xlane.f32.xlu1 %v4800_v2  ;;  %v3244_v25 = vmul.f32 %v10194_v60, %v16575_v50  ;;  %v4277_v19 = vsel %vm4235_vm1, %v3752_v29, -inf  ;;  %v4270_v42 = vsel %vm4234_vm0, %v3745_v51, -inf  ;;  %v3237_v23 = vmul.f32 %v10192_v17, %v16574_v41  ;;  %v10218_v62 = vpop.permute.xlu1 %3152 }
 0x1cc   : > { %4792 = vmax.xlane.f32.xlu0 %v4791_v45  ;;  %v3238_v2 = vmul.f32 %v10192_v17, %v16575_v50  ;;  %v4806_v59 = vmax.f32 %v4276_v12, %v4277_v19  ;;  %v4271_v52 = vsel %vm4235_vm1, %v3746_v36, -inf  ;;  %v3755_v47 = vadd.f32 %v3243_v21, %v9701_v11  ;;  %16631 = vst [vmem:[#allocation66_spill] sm:$0xff] %v10218_v62  ;;  %v10220_v45 = vpop.permute.xlu0 %3164 }
 0x1cd   : > { %v3756_v35 = vadd.f32 %v3244_v25, %v9704_v54  ;;  %16632 = vst [vmem:[#allocation69_spill] sm:$0xff] %v10220_v45  ;;  %v4797_v29 = vmax.f32 %v4270_v42, %v4271_v52  ;;  %v3749_v51 = vadd.f32 %v3237_v23, %v16633_v9  ;;  %v3784_v61 = vadd.f32 %v3272_v31, %v16635_v0 }
 0x1ce   : > { %v3750_v38 = vadd.f32 %v3238_v2, %v16634_v28  ;;  %v4280_v12 = vsel %vm4234_vm0, %v3755_v47, -inf  ;;  %v3247_v54 = vmul.f32 %v10220_v45, %v16574_v41  ;;  %v3248_v25 = vmul.f32 %v10220_v45, %v16575_v50  ;;  %v16638_v47 = vld [vmem:[#allocation103_spill] sm:$0xff]  ;;  %v16639_v28 = vld [vmem:[#allocation105_spill] sm:$0xff] }
 0x1cf   : > { %4807 = vmax.xlane.f32.xlu1 %v4806_v59  ;;  %v4281_v11 = vsel %vm4235_vm1, %v3756_v35, -inf  ;;  %v4274_v36 = vsel %vm4234_vm0, %v3749_v51, -inf  ;;  %v3241_v31 = vmul.f32 %v10218_v62, %v16574_v41  ;;  %v3242_v2 = vmul.f32 %v10218_v62, %v16575_v50  ;;  %v10243_v59 = vpop.permute.xlu1 %3160 }
 0x1d0   : > { %4798 = vmax.xlane.f32.xlu0 %v4797_v29  ;;  %v4812_v21 = vmax.f32 %v4280_v12, %v4281_v11  ;;  %v4275_v0 = vsel %vm4235_vm1, %v3750_v38, -inf  ;;  %v3759_v42 = vadd.f32 %v3247_v54, %v9736_v14  ;;  %v3760_v23 = vadd.f32 %v3248_v25, %v9739_v26  ;;  %16636 = vst [vmem:[#allocation71_spill] sm:$0xff] %v10243_v59  ;;  %v10245_v52 = vpop.permute.xlu0 %3172 }
 0x1d1   : > { %v4803_v19 = vmax.f32 %v4274_v36, %v4275_v0  ;;  %16637 = vst [vmem:[#allocation77_spill] sm:$0xff] %v10245_v52  ;;  %v3753_v35 = vadd.f32 %v3241_v31, %v16638_v47  ;;  %v10250_v29 = vsel %vm4234_vm0, %v3783_v5, -inf  ;;  %v10254_v9 = vsel %vm4235_vm1, %v3784_v61, -inf }
 0x1d2   : > { %v3275_v14 = vmul.f32 %v9951_v40, %v16594_v22  ;;  %v4284_v26 = vsel %vm4234_vm0, %v3759_v42, -inf  ;;  %v4285_v51 = vsel %vm4235_vm1, %v3760_v23, -inf  ;;  %v3754_v38 = vadd.f32 %v3242_v2, %v16639_v28  ;;  %v16642_v2 = vld [vmem:[#allocation108_spill] sm:$0xff] }
 0x1d3   : > { %4813 = vmax.xlane.f32.xlu1 %v4812_v21  ;;  %v3251_v5 = vmul.f32 %v10245_v52, %v16574_v41  ;;  %v4818_v12 = vmax.f32 %v4284_v26, %v4285_v51  ;;  %v4278_v61 = vsel %vm4234_vm0, %v3753_v35, -inf  ;;  %v3252_v11 = vmul.f32 %v10245_v52, %v16575_v50  ;;  %v10278_v31 = vpop.permute.xlu1 %3168  ;;  %v16643_v35 = vld [vmem:[#allocation55_spill] sm:$0xff] }
 0x1d4   : > { %4804 = vmax.xlane.f32.xlu0 %v4803_v19  ;;  %v3245_v54 = vmul.f32 %v10243_v59, %v16574_v41  ;;  %v4279_v25 = vsel %vm4235_vm1, %v3754_v38, -inf  ;;  %v3246_v36 = vmul.f32 %v10243_v59, %v16575_v50  ;;  %v3276_v0 = vmul.f32 %v9951_v40, %v16599_v20  ;;  %16640 = vst [vmem:[#allocation80_spill] sm:$0xff] %v10278_v31  ;;  %v10280_v19 = vpop.permute.xlu0 %3180 }
 0x1d5   : > { %v3763_v21 = vadd.f32 %v3251_v5, %v9789_v32  ;;  %16641 = vst [vmem:[#allocation84_spill] sm:$0xff] %v10280_v19  ;;  %v4809_v42 = vmax.f32 %v4278_v61, %v4279_v25  ;;  %v3764_v23 = vadd.f32 %v3252_v11, %v9792_v55  ;;  %v10285_v26 = vadd.f32 %v3275_v14, %v16643_v35 }
 0x1d6   : > { %v3757_v47 = vadd.f32 %v3245_v54, %v16642_v2  ;;  %v3758_v51 = vadd.f32 %v3246_v36, %v9724_v18  ;;  %v3255_v28 = vmul.f32 %v10280_v19, %v16574_v41  ;;  %v3256_v38 = vmul.f32 %v10280_v19, %v16575_v50 }
 0x1d7   : > { %4819 = vmax.xlane.f32.xlu1 %v4818_v12  ;;  %v4288_v32 = vsel %vm4234_vm0, %v3763_v21, -inf  ;;  %v4289_v55 = vsel %vm4235_vm1, %v3764_v23, -inf  ;;  %v3249_v5 = vmul.f32 %v10278_v31, %v16574_v41  ;;  %v3250_v12 = vmul.f32 %v10278_v31, %v16575_v50  ;;  %v10306_v25 = vpop.permute.xlu1 %3176  ;;  %v16646_v23 = vld [vmem:[#allocation117_spill] sm:$0xff] }
 0x1d8   : > { %4810 = vmax.xlane.f32.xlu0 %v4809_v42  ;;  %v4282_v14 = vsel %vm4234_vm0, %v3757_v47, -inf  ;;  %v4824_v18 = vmax.f32 %v4288_v32, %v4289_v55  ;;  %v4283_v61 = vsel %vm4235_vm1, %v3758_v51, -inf  ;;  %v3767_v11 = vadd.f32 %v3255_v28, %v9824_v4  ;;  %16644 = vst [vmem:[#allocation89_spill] sm:$0xff] %v10306_v25  ;;  %v10308_v21 = vpop.permute.xlu0 %3188 }
 0x1d9   : > { %v3768_v54 = vadd.f32 %v3256_v38, %v9827_v13  ;;  %16645 = vst [vmem:[#allocation42_spill] sm:$0xff] %v10308_v21  ;;  %v4815_v36 = vmax.f32 %v4282_v14, %v4283_v61  ;;  %v3761_v42 = vadd.f32 %v3249_v5, %v9742_v16  ;;  %v3762_v2 = vadd.f32 %v3250_v12, %v16646_v23 }
 0x1da   : > { %v3279_v47 = vmul.f32 %v9994_v15, %v16594_v22  ;;  %v4292_v35 = vsel %vm4234_vm0, %v3767_v11, -inf  ;;  %v3259_v13 = vmul.f32 %v10308_v21, %v16574_v41  ;;  %v3260_v32 = vmul.f32 %v10308_v21, %v16575_v50  ;;  %v16649_v11 = vld [vmem:[#allocation121_spill] sm:$0xff] }
 0x1db   : > { %4825 = vmax.xlane.f32.xlu1 %v4824_v18  ;;  %v4293_v4 = vsel %vm4235_vm1, %v3768_v54, -inf  ;;  %v4286_v51 = vsel %vm4234_vm0, %v3761_v42, -inf  ;;  %v4287_v28 = vsel %vm4235_vm1, %v3762_v2, -inf  ;;  %v3253_v38 = vmul.f32 %v10306_v25, %v16574_v41  ;;  %v10332_v18 = vpop.permute.xlu1 %3184 }
 0x1dc   : > { %4816 = vmax.xlane.f32.xlu0 %v4815_v36  ;;  %v4830_v16 = vmax.f32 %v4292_v35, %v4293_v4  ;;  %v4821_v55 = vmax.f32 %v4286_v51, %v4287_v28  ;;  %v3771_v14 = vadd.f32 %v3259_v13, %v9879_v58  ;;  %v3772_v5 = vadd.f32 %v3260_v32, %v9882_v34  ;;  %v10334_v61 = vpop.permute.xlu0 %3196  ;;  %v16650_v36 = vld [vmem:[#allocation56_spill] sm:$0xff]  ;;  %v16651_v35 = vld [vmem:[#allocation126_spill] sm:$0xff]  ;;  %v16652_v28 = vld [vmem:[#allocation147_spill] sm:$0xff] }
 0x1dd   : > { %v3254_v12 = vmul.f32 %v10306_v25, %v16575_v50  ;;  %16647 = vst [vmem:[#allocation91_spill] sm:$0xff] %v10332_v18  ;;  %16648 = vst [vmem:[#allocation95_spill] sm:$0xff] %v10334_v61  ;;  %v3765_v54 = vadd.f32 %v3253_v38, %v16649_v11  ;;  %v3788_v42 = vadd.f32 %v3276_v0, %v16650_v36  ;;  %v10341_v23 = vsel %vm4235_vm1, %v10100_v48, -inf  ;;  %v16655_v36 = vld [vmem:[#allocation190_spill] sm:$0xff] }
 0x1de   : > { %v3280_v58 = vmul.f32 %v9994_v15, %v16599_v20  ;;  %v4296_v34 = vsel %vm4234_vm0, %v3771_v14, -inf  ;;  %v4297_v2 = vsel %vm4235_vm1, %v3772_v5, -inf  ;;  %v3263_v0 = vmul.f32 %v10334_v61, %v16574_v41  ;;  %v16653_v5 = vld [vmem:[#allocation64_spill] sm:$0xff] }
 0x1df   : > { %4831 = vmax.xlane.f32.xlu1 %v4830_v16  ;;  %v3766_v4 = vadd.f32 %v3254_v12, %v16651_v35  ;;  %v4836_v13 = vmax.f32 %v4296_v34, %v4297_v2  ;;  %v4290_v48 = vsel %vm4234_vm0, %v3765_v54, -inf  ;;  %v3264_v32 = vmul.f32 %v10334_v61, %v16575_v50  ;;  %v10364_v12 = vpop.permute.xlu1 %3192  ;;  %v16656_v2 = vld [vmem:[#allocation65_spill] sm:$0xff]  ;;  %v16657_v15 = vld [vmem:[#allocation192_spill] sm:$0xff] }
 0x1e0   : > { %4822 = vmax.xlane.f32.xlu0 %v4821_v55  ;;  %v3257_v16 = vmul.f32 %v10332_v18, %v16574_v41  ;;  %v3775_v38 = vadd.f32 %v3263_v0, %v16652_v28  ;;  %v3258_v14 = vmul.f32 %v10332_v18, %v16575_v50  ;;  %v3791_v55 = vadd.f32 %v3279_v47, %v16653_v5 }
 0x1e1   : > { %v4291_v51 = vsel %vm4235_vm1, %v3766_v4, -inf  ;;  %16654 = vst [vmem:[#allocation183_spill] sm:$0xff] %v10364_v12  ;;  %v3776_v54 = vadd.f32 %v3264_v32, %v9934_v39  ;;  %v3792_v35 = vadd.f32 %v3280_v58, %v16656_v2  ;;  %v3261_v28 = vmul.f32 %v10364_v12, %v16574_v41 }
 0x1e2   : > { %v4827_v11 = vmax.f32 %v4290_v48, %v4291_v51  ;;  %v3769_v34 = vadd.f32 %v3257_v16, %v16655_v36  ;;  %v4300_v4 = vsel %vm4234_vm0, %v3775_v38, -inf  ;;  %v3770_v0 = vadd.f32 %v3258_v14, %v16657_v15  ;;  %v16658_v16 = vld [vmem:[#allocation152_spill] sm:$0xff]  ;;  %v16659_v38 = vld [vmem:[#allocation153_spill] sm:$0xff] }
 0x1e3   : > { %4837 = vmax.xlane.f32.xlu1 %v4836_v13  ;;  %v3262_v47 = vmul.f32 %v10364_v12, %v16575_v50  ;;  %v4301_v39 = vsel %vm4235_vm1, %v3776_v54, -inf  ;;  %v3273_v58 = vmul.f32 %v9992_v8, %v16594_v22  ;;  %v3274_v13 = vmul.f32 %v9992_v8, %v16599_v20  ;;  %v10388_v5 = vpop.permute.xlu1 %3200 }
 0x1e4   : > { %4828 = vmax.xlane.f32.xlu0 %v4827_v11  ;;  %v4294_v48 = vsel %vm4234_vm0, %v3769_v34, -inf  ;;  %v4842_v15 = vmax.f32 %v4300_v4, %v4301_v39  ;;  %v4295_v32 = vsel %vm4235_vm1, %v3770_v0, -inf  ;;  %v3773_v51 = vadd.f32 %v3261_v28, %v16658_v16  ;;  %16660 = vst [vmem:[#allocation43_spill] sm:$0xff] %v10388_v5  ;;  %v16662_v39 = vld [vmem:[#allocation49_spill] sm:$0xff]  ;;  %v16664_v16 = vld [vmem:[#allocation138_spill] sm:$0xff] }
 0x1e5   : > { %v3774_v14 = vadd.f32 %v3262_v47, %v16659_v38  ;;  %v4833_v11 = vmax.f32 %v4294_v48, %v4295_v32  ;;  %v4312_v54 = vsel %vm4234_vm0, %v10285_v26, -inf  ;;  %v4313_v36 = vsel %vm4235_vm1, %v3788_v42, -inf }
 0x1e6   : > { %v10397_v34 = vsel %vm4234_vm0, %v3791_v55, -inf  ;;  %v4298_v2 = vsel %vm4234_vm0, %v3773_v51, -inf  ;;  %v3265_v0 = vmul.f32 %v10388_v5, %v16574_v41  ;;  %v3266_v26 = vmul.f32 %v10388_v5, %v16575_v50  ;;  %v16661_v55 = vld [vmem:[#allocation46_spill] sm:$0xff] }
 0x1e7   : > { %4843 = vmax.xlane.f32.xlu1 %v4842_v15  ;;  %v4299_v4 = vsel %vm4235_vm1, %v3774_v14, -inf  ;;  %v10409_v42 = vsel %vm4235_vm1, %v3792_v35, -inf  ;;  %v3785_v47 = vadd.f32 %v3273_v58, %v16661_v55  ;;  %v3786_v48 = vadd.f32 %v3274_v13, %v16662_v39  ;;  %v16663_v15 = vld [vmem:[#allocation137_spill] sm:$0xff]  ;;  %v16666_v55 = vld [vmem:[#allocation70_spill] sm:$0xff] }
 0x1e8   : > { %4834 = vmax.xlane.f32.xlu0 %v4833_v11  ;;  %v4839_v28 = vmax.f32 %v4298_v2, %v4299_v4  ;;  %v3777_v32 = vadd.f32 %v3265_v0, %v16663_v15  ;;  %v3778_v51 = vadd.f32 %v3266_v26, %v16664_v16  ;;  %v3283_v41 = vmul.f32 %v10021_v56, %v16594_v22  ;;  %v16668_v15 = vld [vmem:[#allocation57_spill] sm:$0xff]  ;;  %v16669_v16 = vld [vmem:[#allocation63_spill] sm:$0xff] }
 0x1e9   : > { %v3284_v50 = vmul.f32 %v10021_v56, %v16599_v20  ;;  %v4854_v38 = vmax.f32 %v10250_v29, %v10254_v9  ;;  %v3277_v35 = vmul.f32 %v10019_v10, %v16594_v22  ;;  %v3278_v58 = vmul.f32 %v10019_v10, %v16599_v20 }
 0x1ea   : > { %v3287_v13 = vmul.f32 %v10046_v57, %v16594_v22  ;;  %v16665_v14 = vmax.f32 %v10110_v1, %v10139_v3  ;;  %v4302_v11 = vsel %vm4234_vm0, %v3777_v32, -inf  ;;  %v4303_v2 = vsel %vm4235_vm1, %v3778_v51, -inf }
 0x1eb   : > { %v4860_v29 = vmax.f32 %v4312_v54, %v4313_v36  ;;  %v3288_v9 = vmul.f32 %v10046_v57, %v16599_v20  ;;  %v4845_v4 = vmax.f32 %v4302_v11, %v4303_v2  ;;  %v4851_v0 = vmax.f32 %v10170_v43, %v10341_v23  ;;  %v16667_v54 = vld [vmem:[#allocation176_spill] sm:$0xff]  ;;  %v16670_v23 = vld [vmem:[#allocation73_spill] sm:$0xff] }
 0x1ec   : > { %4849 = vmax.xlane.f32.xlu1 %v16665_v14  ;;  %4840 = vmax.xlane.f32.xlu0 %v4839_v28  ;;  %v4866_v26 = vmax.f32 %v10397_v34, %v10409_v42  ;;  %v4310_v3 = vsel %vm4234_vm0, %v3785_v47, -inf  ;;  %v4311_v1 = vsel %vm4235_vm1, %v3786_v48, -inf  ;;  %v3795_v39 = vadd.f32 %v3283_v41, %v16666_v55  ;;  %v16671_v42 = vld [vmem:[#allocation78_spill] sm:$0xff]  ;;  %v16672_v48 = vld [vmem:[#allocation172_spill] sm:$0xff] }
 0x1ed   : > { %v3796_v36 = vadd.f32 %v3284_v50, %v16667_v54  ;;  %v3281_v28 = vmul.f32 %v10044_v6, %v16594_v22  ;;  %v3789_v32 = vadd.f32 %v3277_v35, %v16668_v15  ;;  %v3790_v43 = vadd.f32 %v3278_v58, %v16669_v16  ;;  %v16673_v35 = vld [vmem:[#allocation173_spill] sm:$0xff]  ;;  %v16675_v54 = vld [vmem:[#allocation180_spill] sm:$0xff] }
 0x1ee   : > { %v3799_v51 = vadd.f32 %v3287_v13, %v16670_v23  ;;  %v3282_v34 = vmul.f32 %v10044_v6, %v16599_v20  ;;  %v3800_v47 = vadd.f32 %v3288_v9, %v16671_v42  ;;  %v3291_v41 = vmul.f32 %v10074_v37, %v16594_v22  ;;  %v16674_v9 = vld [vmem:[#allocation179_spill] sm:$0xff]  ;;  %v16676_v23 = vld [vmem:[#allocation72_spill] sm:$0xff] }
 0x1ef   : > { %v3793_v14 = vadd.f32 %v3281_v28, %v16672_v48  ;;  %v3292_v50 = vmul.f32 %v10074_v37, %v16599_v20  ;;  %v3285_v58 = vmul.f32 %v10072_v24, %v16594_v22  ;;  %v3286_v13 = vmul.f32 %v10072_v24, %v16599_v20  ;;  %v16677_v42 = vld [vmem:[#allocation76_spill] sm:$0xff] }
 0x1f0   : > { %4855 = vmax.xlane.f32.xlu1 %v4854_v38  ;;  %4846 = vmax.xlane.f32.xlu0 %v4845_v4  ;;  %v3794_v11 = vadd.f32 %v3282_v34, %v16673_v35  ;;  %v3295_v38 = vmul.f32 %v10104_v7, %v16594_v22  ;;  %v4857_v2 = vmax.f32 %v4310_v3, %v4311_v1  ;;  %v4320_v4 = vsel %vm4234_vm0, %v3795_v39, -inf }
 0x1f1   : > { %v3803_v55 = vadd.f32 %v3291_v41, %v16674_v9  ;;  %v3804_v28 = vadd.f32 %v3292_v50, %v16675_v54  ;;  %v3296_v15 = vmul.f32 %v10104_v7, %v16599_v20  ;;  %v4321_v16 = vsel %vm4235_vm1, %v3796_v36, -inf  ;;  %v16680_v9 = vld [vmem:[#allocation79_spill] sm:$0xff]  ;;  %v16681_v54 = vld [vmem:[#allocation81_spill] sm:$0xff] }
 0x1f2   : > { %v3797_v34 = vadd.f32 %v3285_v58, %v16676_v23  ;;  %v3798_v48 = vadd.f32 %v3286_v13, %v16677_v42  ;;  %v4314_v3 = vsel %vm4234_vm0, %v3789_v32, -inf  ;;  %v4315_v1 = vsel %vm4235_vm1, %v3790_v43, -inf  ;;  %v16678_v32 = vld [vmem:[#allocation86_spill] sm:$0xff] }
 0x1f3   : > { %v4324_v41 = vsel %vm4234_vm0, %v3799_v51, -inf  ;;  %v4325_v39 = vsel %vm4235_vm1, %v3800_v47, -inf  ;;  %v4318_v36 = vsel %vm4234_vm0, %v3793_v14, -inf  ;;  %v4319_v50 = vsel %vm4235_vm1, %v3794_v11, -inf  ;;  %v16679_v51 = vld [vmem:[#allocation92_spill] sm:$0xff] }
 0x1f4   : > { %4861 = vmax.xlane.f32.xlu1 %v4860_v29  ;;  %4852 = vmax.xlane.f32.xlu0 %v4851_v0  ;;  %v10490_v29 = vsel %vm4234_vm0, %v3803_v55, -inf  ;;  %v3807_v35 = vadd.f32 %v3295_v38, %v16678_v32  ;;  %v4329_v43 = vsel %vm4235_vm1, %v3804_v28, -inf  ;;  %v3808_v58 = vadd.f32 %v3296_v15, %v16679_v51 }
 0x1f5   : > { %v3289_v0 = vmul.f32 %v10102_v46, %v16594_v22  ;;  %v3290_v47 = vmul.f32 %v10102_v46, %v16599_v20  ;;  %v10502_v14 = vsel %vm4234_vm0, %v3797_v34, -inf  ;;  %v4323_v11 = vsel %vm4235_vm1, %v3798_v48, -inf }
 0x1f6   : > { %v3299_v13 = vmul.f32 %v10133_v33, %v16594_v22  ;;  %v3300_v38 = vmul.f32 %v10133_v33, %v16599_v20  ;;  %v3293_v15 = vmul.f32 %v10131_v27, %v16594_v22  ;;  %v3294_v23 = vmul.f32 %v10131_v27, %v16599_v20 }
 0x1f7   : > { %v3801_v55 = vadd.f32 %v3289_v0, %v16680_v9  ;;  %v3802_v28 = vadd.f32 %v3290_v47, %v16681_v54  ;;  %v4872_v34 = vmax.f32 %v4320_v4, %v4321_v16  ;;  %v4863_v42 = vmax.f32 %v4314_v3, %v4315_v1  ;;  %v16682_v4 = vld [vmem:[#allocation98_spill] sm:$0xff]  ;;  %v16683_v3 = vld [vmem:[#allocation99_spill] sm:$0xff] }
 0x1f8   : > { %4867 = vmax.xlane.f32.xlu1 %v4866_v26  ;;  %4858 = vmax.xlane.f32.xlu0 %v4857_v2  ;;  %v4878_v48 = vmax.f32 %v4324_v41, %v4325_v39  ;;  %v3303_v32 = vmul.f32 %v10161_v49, %v16594_v22  ;;  %v4869_v51 = vmax.f32 %v4318_v36, %v4319_v50  ;;  %v4332_v0 = vsel %vm4234_vm0, %v3807_v35, -inf  ;;  %v16684_v36 = vld [vmem:[#allocation85_spill] sm:$0xff] }
 0x1f9   : > { %v4884_v26 = vmax.f32 %v10490_v29, %v4329_v43  ;;  %v3304_v47 = vmul.f32 %v10161_v49, %v16599_v20  ;;  %v4875_v9 = vmax.f32 %v10502_v14, %v4323_v11  ;;  %v4333_v2 = vsel %vm4235_vm1, %v3808_v58, -inf  ;;  %v16685_v29 = vld [vmem:[#allocation90_spill] sm:$0xff] }
 0x1fa   : > { %v3811_v16 = vadd.f32 %v3299_v13, %v16682_v4  ;;  %v3812_v1 = vadd.f32 %v3300_v38, %v16683_v3  ;;  %v4326_v41 = vsel %vm4234_vm0, %v3801_v55, -inf  ;;  %v4327_v39 = vsel %vm4235_vm1, %v3802_v28, -inf  ;;  %v16686_v43 = vld [vmem:[#allocation106_spill] sm:$0xff]  ;;  %v16687_v38 = vld [vmem:[#allocation184_spill] sm:$0xff]  ;;  %v16690_v3 = vld [vmem:[#allocation111_spill] sm:$0xff] }
 0x1fb   : > { %v3805_v50 = vadd.f32 %v3293_v15, %v16684_v36  ;;  %v3806_v35 = vadd.f32 %v3294_v23, %v16685_v29  ;;  %v3815_v14 = vadd.f32 %v3303_v32, %v16686_v43  ;;  %v3297_v58 = vmul.f32 %v10159_v30, %v16594_v22  ;;  %v16689_v32 = vld [vmem:[#allocation94_spill] sm:$0xff]  ;;  %v16691_v43 = vld [vmem:[#allocation112_spill] sm:$0xff] }
 0x1fc   : > { %4873 = vmax.xlane.f32.xlu1 %v4872_v34  ;;  %4864 = vmax.xlane.f32.xlu0 %v4863_v42  ;;  %v3298_v11 = vmul.f32 %v10159_v30, %v16599_v20  ;;  %v3307_v13 = vmul.f32 %v10194_v60, %v16594_v22  ;;  %v3816_v55 = vadd.f32 %v3304_v47, %v16687_v38  ;;  %v16688_v34 = vld [vmem:[#allocation93_spill] sm:$0xff]  ;;  %v16692_v38 = vld [vmem:[#allocation100_spill] sm:$0xff]  ;;  %v4336_v27 = vsel %vm4234_vm0, %v3811_v16, -inf }
 0x1fd   : > { %v3308_v54 = vmul.f32 %v10194_v60, %v16599_v20  ;;  %v3301_v28 = vmul.f32 %v10192_v17, %v16594_v22  ;;  %v3302_v15 = vmul.f32 %v10192_v17, %v16599_v20  ;;  %v4890_v23 = vmax.f32 %v4332_v0, %v4333_v2  ;;  %v16693_v60 = vld [vmem:[#allocation104_spill] sm:$0xff] }
 0x1fe   : > { %v3809_v42 = vadd.f32 %v3297_v58, %v16688_v34  ;;  %v3810_v4 = vadd.f32 %v3298_v11, %v16689_v32  ;;  %v3819_v36 = vadd.f32 %v3307_v13, %v16690_v3  ;;  %v4881_v29 = vmax.f32 %v4326_v41, %v4327_v39  ;;  %v16696_v34 = vld [vmem:[#allocation107_spill] sm:$0xff] }
 0x1ff   : > { %v3820_v47 = vadd.f32 %v3308_v54, %v16691_v43  ;;  %v3813_v30 = vadd.f32 %v3301_v28, %v16692_v38  ;;  %v3814_v49 = vadd.f32 %v3302_v15, %v16693_v60  ;;  %v4337_v0 = vsel %vm4235_vm1, %v3812_v1, -inf  ;;  %v16695_v28 = vld [vmem:[#allocation118_spill] sm:$0xff] }
 0x200   : > { %4879 = vmax.xlane.f32.xlu1 %v4878_v48  ;;  %4870 = vmax.xlane.f32.xlu0 %v4869_v51  ;;  %v3311_v2 = vmul.f32 %v10220_v45, %v16594_v22  ;;  %v3312_v48 = vmul.f32 %v10220_v45, %v16599_v20  ;;  %v4330_v41 = vsel %vm4234_vm0, %v3805_v50, -inf  ;;  %v4331_v39 = vsel %vm4235_vm1, %v3806_v35, -inf }
 0x201   : > { %v4340_v60 = vsel %vm4234_vm0, %v3815_v14, -inf  ;;  %v4341_v51 = vsel %vm4235_vm1, %v3816_v55, -inf  ;;  %v10572_v16 = vsel %vm4234_vm0, %v3809_v42, -inf  ;;  %v4335_v1 = vsel %vm4235_vm1, %v3810_v4, -inf  ;;  %v16694_v55 = vld [vmem:[#allocation119_spill] sm:$0xff]  ;;  %v16697_v42 = vld [vmem:[#allocation185_spill] sm:$0xff] }
 0x202   : > { %v10578_v58 = vsel %vm4234_vm0, %v3819_v36, -inf  ;;  %v10582_v50 = vsel %vm4235_vm1, %v3820_v47, -inf  ;;  %v10586_v35 = vsel %vm4234_vm0, %v3813_v30, -inf  ;;  %v10590_v14 = vsel %vm4235_vm1, %v3814_v49, -inf }
 0x203   : > { %v3305_v11 = vmul.f32 %v10218_v62, %v16594_v22  ;;  %v3306_v13 = vmul.f32 %v10218_v62, %v16599_v20  ;;  %v3823_v54 = vadd.f32 %v3311_v2, %v16694_v55  ;;  %v3824_v15 = vadd.f32 %v3312_v48, %v16695_v28 }
 0x204   : > { %4885 = vmax.xlane.f32.xlu1 %v4884_v26  ;;  %4876 = vmax.xlane.f32.xlu0 %v4875_v9  ;;  %v3315_v26 = vmul.f32 %v10245_v52, %v16594_v22  ;;  %v3316_v30 = vmul.f32 %v10245_v52, %v16599_v20  ;;  %v3309_v4 = vmul.f32 %v10243_v59, %v16594_v22 }
 0x205   : > { %v3817_v49 = vadd.f32 %v3305_v11, %v16696_v34  ;;  %v3818_v32 = vadd.f32 %v3306_v13, %v16697_v42  ;;  %v3310_v9 = vmul.f32 %v10243_v59, %v16599_v20  ;;  %v4896_v3 = vmax.f32 %v4336_v27, %v4337_v0  ;;  %v16698_v0 = vld [vmem:[#allocation127_spill] sm:$0xff]  ;;  %v16704_v42 = vld [vmem:[#allocation120_spill] sm:$0xff] }
 0x206   : > { %v4887_v36 = vmax.f32 %v4330_v41, %v4331_v39  ;;  %v4902_v43 = vmax.f32 %v4340_v60, %v4341_v51  ;;  %v4893_v47 = vmax.f32 %v10572_v16, %v4335_v1  ;;  %v4908_v38 = vmax.f32 %v10578_v58, %v10582_v50  ;;  %v16699_v39 = vld [vmem:[#allocation189_spill] sm:$0xff]  ;;  %v16701_v58 = vld [vmem:[#allocation116_spill] sm:$0xff] }
 0x207   : > { %v4899_v2 = vmax.f32 %v10586_v35, %v10590_v14  ;;  %v3319_v48 = vmul.f32 %v10280_v19, %v16594_v22  ;;  %v3320_v11 = vmul.f32 %v10280_v19, %v16599_v20  ;;  %v10619_v27 = vsel %vm4234_vm0, %v3823_v54, -inf  ;;  %v16702_v54 = vld [vmem:[#allocation193_spill] sm:$0xff] }
 0x208   : > { %4891 = vmax.xlane.f32.xlu1 %v4890_v23  ;;  %4882 = vmax.xlane.f32.xlu0 %v4881_v29  ;;  %v10623_v23 = vsel %vm4235_vm1, %v3824_v15, -inf  ;;  %v3827_v41 = vadd.f32 %v3315_v26, %v16698_v0  ;;  %v3828_v60 = vadd.f32 %v3316_v30, %v16699_v39  ;;  %v10629_v51 = vsel %vm4234_vm0, %v3817_v49, -inf  ;;  %v16700_v29 = vld [vmem:[#allocation113_spill] sm:$0xff]  ;;  %v16703_v15 = vld [vmem:[#allocation40_spill] sm:$0xff]  ;;  %v16706_v0 = vld [vmem:[#allocation139_spill] sm:$0xff] }
 0x209   : > { %v10633_v16 = vsel %vm4235_vm1, %v3818_v32, -inf  ;;  %v3821_v1 = vadd.f32 %v3309_v4, %v16700_v29  ;;  %v3822_v50 = vadd.f32 %v3310_v9, %v16701_v58  ;;  %v3313_v35 = vmul.f32 %v10278_v31, %v16594_v22  ;;  %v16705_v4 = vld [vmem:[#allocation123_spill] sm:$0xff] }
 0x20a   : > { %v3314_v14 = vmul.f32 %v10278_v31, %v16599_v20  ;;  %v3323_v13 = vmul.f32 %v10308_v21, %v16594_v22  ;;  %v3324_v55 = vmul.f32 %v10308_v21, %v16599_v20  ;;  %v3831_v28 = vadd.f32 %v3319_v48, %v16702_v54  ;;  %v16707_v29 = vld [vmem:[#allocation143_spill] sm:$0xff]  ;;  %v16710_v54 = vld [vmem:[#allocation34_spill] sm:$0xff] }
 0x20b   : > { %v3832_v26 = vadd.f32 %v3320_v11, %v16703_v15  ;;  %v3317_v30 = vmul.f32 %v10306_v25, %v16594_v22  ;;  %v3318_v34 = vmul.f32 %v10306_v25, %v16599_v20  ;;  %v4914_v49 = vmax.f32 %v10619_v27, %v10623_v23  ;;  %v16735_v25 = vld [vmem:[#allocation141_spill] sm:$0xff] }
 0x20c   : > { %4897 = vmax.xlane.f32.xlu1 %v4896_v3  ;;  %4888 = vmax.xlane.f32.xlu0 %v4887_v36  ;;  %v3825_v32 = vadd.f32 %v3313_v35, %v16704_v42  ;;  %v3826_v9 = vadd.f32 %v3314_v14, %v16705_v4  ;;  %v3835_v3 = vadd.f32 %v3323_v13, %v16706_v0  ;;  %v4352_v11 = vsel %vm4234_vm0, %v3827_v41, -inf  ;;  %v16709_v35 = vld [vmem:[#allocation191_spill] sm:$0xff] }
 0x20d   : > { %v4905_v48 = vmax.f32 %v10629_v51, %v10633_v16  ;;  %v4353_v39 = vsel %vm4235_vm1, %v3828_v60, -inf  ;;  %v3327_v36 = vmul.f32 %v10334_v61, %v16594_v22  ;;  %v10666_v27 = vsel %vm4234_vm0, %v3821_v1, -inf  ;;  %v16708_v16 = vld [vmem:[#allocation130_spill] sm:$0xff] }
 0x20e   : > { %v4347_v23 = vsel %vm4235_vm1, %v3822_v50, -inf  ;;  %v3836_v58 = vadd.f32 %v3324_v55, %v16707_v29  ;;  %v3328_v51 = vmul.f32 %v10334_v61, %v16599_v20  ;;  %v10675_v41 = vsel %vm4234_vm0, %v3831_v28, -inf  ;;  %v16715_v29 = vld [vmem:[#allocation135_spill] sm:$0xff] }
 0x20f   : > { %v10679_v60 = vsel %vm4235_vm1, %v3832_v26, -inf  ;;  %v3829_v1 = vadd.f32 %v3317_v30, %v16708_v16  ;;  %v3830_v14 = vadd.f32 %v3318_v34, %v16709_v35  ;;  %v10685_v50 = vsel %vm4234_vm0, %v3825_v32, -inf  ;;  %v16711_v26 = vld [vmem:[#allocation146_spill] sm:$0xff]  ;;  %v16712_v30 = vld [vmem:[#allocation144_spill] sm:$0xff] }
 0x210   : > { %4903 = vmax.xlane.f32.xlu1 %v4902_v43  ;;  %4894 = vmax.xlane.f32.xlu0 %v4893_v47  ;;  %v10689_v43 = vsel %vm4235_vm1, %v3826_v9, -inf  ;;  %v10693_v13 = vsel %vm4234_vm0, %v3835_v3, -inf  ;;  %v3839_v55 = vadd.f32 %v3327_v36, %v9937_v44  ;;  %v3840_v28 = vadd.f32 %v3328_v51, %v16710_v54  ;;  %v16713_v32 = vld [vmem:[#allocation148_spill] sm:$0xff]  ;;  %v16714_v3 = vld [vmem:[#allocation41_spill] sm:$0xff]  ;;  %v16716_v16 = vld [vmem:[#allocation50_spill] sm:$0xff] }
 0x211   : > { %v3321_v15 = vmul.f32 %v10332_v18, %v16594_v22  ;;  %v3322_v47 = vmul.f32 %v10332_v18, %v16599_v20  ;;  %v3331_v34 = vmul.f32 %v16712_v30, %v16711_v26  ;;  %v10705_v42 = vsel %vm4235_vm1, %v3836_v58, -inf  ;;  %v16734_v18 = vld [vmem:[#allocation132_spill] sm:$0xff] }
 0x212   : > { %v3332_v4 = vmul.f32 %v16712_v30, %v16713_v32  ;;  %v3325_v44 = vmul.f32 %v10364_v12, %v16594_v22  ;;  %v3326_v9 = vmul.f32 %v10364_v12, %v16599_v20  ;;  %v4920_v0 = vmax.f32 %v4352_v11, %v4353_v39 }
 0x213   : > { %v3833_v36 = vadd.f32 %v3321_v15, %v16714_v3  ;;  %v3834_v51 = vadd.f32 %v3322_v47, %v16715_v29  ;;  %v3843_v35 = vadd.f32 %v3331_v34, %v16716_v16  ;;  %v4911_v58 = vmax.f32 %v10666_v27, %v4347_v23  ;;  %v16717_v27 = vld [vmem:[#allocation51_spill] sm:$0xff]  ;;  %v16726_v3 = vld [vmem:[#allocation140_spill] sm:$0xff]  ;;  %v16727_v29 = vld [vmem:[#allocation33_spill] sm:$0xff] }
 0x214   : > { %4909 = vmax.xlane.f32.xlu1 %v4908_v38  ;;  %4900 = vmax.xlane.f32.xlu0 %v4899_v2  ;;  %v4926_v54 = vmax.f32 %v10675_v41, %v10679_v60  ;;  %v4917_v30 = vmax.f32 %v10685_v50, %v10689_v43  ;;  %v10723_v12 = vsel %vm4234_vm0, %v3829_v1, -inf  ;;  %v4932_v38 = vmax.f32 %v10693_v13, %v10705_v42  ;;  %v16718_v41 = vld [vmem:[#allocation37_spill] sm:$0xff]  ;;  %v16719_v1 = vld [vmem:[#allocation155_spill] sm:$0xff]  ;;  %v16720_v43 = vld [vmem:[#allocation52_spill] sm:$0xff] }
 0x215   : > { %v10729_v11 = vsel %vm4235_vm1, %v3830_v14, -inf  ;;  %v10733_v2 = vsel %vm4234_vm0, %v3839_v55, -inf  ;;  %v10737_v39 = vsel %vm4235_vm1, %v3840_v28, -inf  ;;  %v3844_v23 = vadd.f32 %v3332_v4, %v16717_v27  ;;  %v16721_v13 = vld [vmem:[#allocation149_spill] sm:$0xff]  ;;  %v16722_v47 = vld [vmem:[#allocation151_spill] sm:$0xff]  ;;  %v16723_v42 = vld [vmem:[#allocation60_spill] sm:$0xff] }
 0x216   : > { %v3837_v60 = vadd.f32 %v3325_v44, %v16718_v41  ;;  %v3838_v50 = vadd.f32 %v3326_v9, %v16719_v1  ;;  %v2551_v15 = vadd.f32 %v16721_v13, %v16720_v43  ;;  %v10746_v14 = vsel %vm4234_vm0, %v3833_v36, -inf  ;;  %v16724_v4 = vld [vmem:[#allocation158_spill] sm:$0xff]  ;;  %v16725_v9 = vld [vmem:[#allocation32_spill] sm:$0xff]  ;;  %v16728_v27 = vld [vmem:[#allocation35_spill] sm:$0xff] }
 0x217   : > { %v10750_v55 = vsel %vm4235_vm1, %v3834_v51, -inf  ;;  %v10754_v28 = vsel %vm4234_vm0, %v3843_v35, -inf  ;;  %v3335_v34 = vmul.f32 %v16722_v47, %v16711_v26  ;;  %v2552_v44 = vadd.f32 %v16724_v4, %v16723_v42  ;;  %v16730_v1 = vld [vmem:[#allocation36_spill] sm:$0xff] }
 0x218   : > { %4915 = vmax.xlane.f32.xlu1 %v4914_v49  ;;  %4906 = vmax.xlane.f32.xlu0 %v4905_v48  ;;  %v3336_v49 = vmul.f32 %v16722_v47, %v16713_v32  ;;  %v2033_v36 = vmul.f32 %v16726_v3, %v16725_v9  ;;  %v2034_v51 = vmul.f32 %v16726_v3, %v16727_v29  ;;  %v16729_v48 = vld [vmem:[#allocation160_spill] sm:$0xff]  ;;  %v10776_v13 = vsel %vm4235_vm1, %v3844_v23, -inf  ;;  %v16731_v29 = vld [vmem:[#allocation159_spill] sm:$0xff]  ;;  %v16732_v23 = vld [vmem:[#allocation150_spill] sm:$0xff] }
 0x219   : > { %v3329_v16 = vmul.f32 %v10388_v5, %v16594_v22  ;;  %v3330_v35 = vmul.f32 %v10388_v5, %v16599_v20  ;;  %v2043_v41 = vmul.f32 %v16729_v48, %v16728_v27  ;;  %v2044_v43 = vmul.f32 %v16729_v48, %v16730_v1 }
 0x21a   : > { %v10780_v42 = vsel %vm4234_vm0, %v3837_v60, -inf  ;;  %v3339_v22 = vmul.f32 %v9951_v40, %v16711_v26  ;;  %v3340_v20 = vmul.f32 %v9951_v40, %v16713_v32  ;;  %v10788_v4 = vsel %vm4235_vm1, %v3838_v50, -inf  ;;  %v16733_v60 = vld [vmem:[#allocation131_spill] sm:$0xff] }
 0x21b   : > { %v3847_v9 = vadd.f32 %v3335_v34, %v2551_v15  ;;  %v2545_v48 = vadd.f32 %v2033_v36, %v16731_v29  ;;  %v2546_v5 = vadd.f32 %v2034_v51, %v16732_v23  ;;  %v3848_v3 = vadd.f32 %v3336_v49, %v2552_v44  ;;  %v16736_v15 = vld [vmem:[#allocation145_spill] sm:$0xff] }
 0x21c   : > { %4921 = vmax.xlane.f32.xlu1 %v4920_v0  ;;  %4912 = vmax.xlane.f32.xlu0 %v4911_v58  ;;  %v2555_v47 = vadd.f32 %v2043_v41, %v16733_v60  ;;  %v2556_v61 = vadd.f32 %v2044_v43, %v16734_v18  ;;  %v2037_v21 = vmul.f32 %v16735_v25, %v16728_v27  ;;  %v16737_v49 = vld [vmem:[#allocation133_spill] sm:$0xff] }
 0x21d   : > { %v3841_v40 = vadd.f32 %v3329_v16, %v2545_v48  ;;  %v3842_v0 = vadd.f32 %v3330_v35, %v2546_v5  ;;  %v2038_v50 = vmul.f32 %v16735_v25, %v16730_v1  ;;  %v3333_v34 = vmul.f32 %v16736_v15, %v16711_v26 }
 0x21e   : > { %v4923_v36 = vmax.f32 %v10723_v12, %v10729_v11  ;;  %v3851_v58 = vadd.f32 %v3339_v22, %v2555_v47  ;;  %v3852_v44 = vadd.f32 %v3340_v20, %v2556_v61  ;;  %v2549_v51 = vadd.f32 %v2037_v21, %v16737_v49  ;;  %v16743_v22 = vld [vmem:[#allocation44_spill] sm:$0xff]  ;;  %v16746_v49 = vld [vmem:[#allocation14_spill] sm:$0xff] }
 0x21f   : > { %v4938_v18 = vmax.f32 %v10733_v2, %v10737_v39  ;;  %v4929_v5 = vmax.f32 %v10746_v14, %v10750_v55  ;;  %v4944_v16 = vmax.f32 %v10754_v28, %v10776_v13  ;;  %v3334_v35 = vmul.f32 %v16736_v15, %v16713_v32  ;;  %v16739_v14 = vld [vmem:[#allocation168_spill] sm:$0xff]  ;;  %v16742_v13 = vld [vmem:[#allocation29_spill] sm:$0xff] }
 0x220   : > { %4927 = vmax.xlane.f32.xlu1 %v4926_v54  ;;  %4918 = vmax.xlane.f32.xlu0 %v4917_v30  ;;  %v4935_v12 = vmax.f32 %v10780_v42, %v10788_v4  ;;  %v10815_v21 = vsel %vm4234_vm0, %v3847_v9, -inf  ;;  %v10819_v61 = vsel %vm4235_vm1, %v3848_v3, -inf  ;;  %v3845_v54 = vadd.f32 %v3333_v34, %v2549_v51  ;;  %v16738_v30 = vld [vmem:[#allocation134_spill] sm:$0xff]  ;;  %v16740_v3 = vld [vmem:[#allocation28_spill] sm:$0xff]  ;;  %v16744_v4 = vld [vmem:[#allocation157_spill] sm:$0xff] }
 0x221   : > { %v10823_v11 = vsel %vm4234_vm0, %v3841_v40, -inf  ;;  %v10827_v2 = vsel %vm4235_vm1, %v3842_v0, -inf  ;;  %v2550_v39 = vadd.f32 %v2038_v50, %v16738_v30  ;;  %v2047_v55 = vmul.f32 %v16739_v14, %v16728_v27  ;;  %v16741_v40 = vld [vmem:[#allocation11_spill] sm:$0xff] }
 0x222   : > { %v10834_v28 = vsel %vm4234_vm0, %v3851_v58, -inf  ;;  %v10838_v47 = vsel %vm4235_vm1, %v3852_v44, -inf  ;;  %v1263_v48 = vmul.f32 %v16741_v40, %v16740_v3  ;;  %v2048_v41 = vmul.f32 %v16739_v14, %v16730_v1 }
 0x223   : > { %v3846_v43 = vadd.f32 %v3334_v35, %v2550_v39  ;;  %v1264_v42 = vmul.f32 %v16741_v40, %v16742_v13  ;;  %v3343_v20 = vmul.f32 %v16743_v22, %v16711_v26  ;;  %v2041_v9 = vmul.f32 %v16744_v4, %v16728_v27  ;;  %v16747_v35 = vld [vmem:[#allocation170_spill] sm:$0xff] }
 0x224   : > { %4933 = vmax.xlane.f32.xlu1 %v4932_v38  ;;  %4924 = vmax.xlane.f32.xlu0 %v4923_v36  ;;  %v10852_v29 = vsel %vm4234_vm0, %v3845_v54, -inf  ;;  %v3344_v23 = vmul.f32 %v16743_v22, %v16713_v32  ;;  %v16745_v38 = vld [vmem:[#allocation6_spill] sm:$0xff]  ;;  %v2042_v0 = vmul.f32 %v16744_v4, %v16730_v1  ;;  %v2559_v50 = vadd.f32 %v2047_v55, %v1263_v48 }
 0x225   : > { %v1257_v60 = vmul.f32 %v16745_v38, %v16740_v3  ;;  %v1258_v34 = vmul.f32 %v16745_v38, %v16742_v13  ;;  %v3337_v36 = vmul.f32 %v9992_v8, %v16711_v26  ;;  %v3338_v58 = vmul.f32 %v9992_v8, %v16713_v32 }
 0x226   : > { %v2560_v44 = vadd.f32 %v2048_v41, %v1264_v42  ;;  %v1267_v51 = vmul.f32 %v16746_v49, %v16740_v3  ;;  %v2051_v54 = vmul.f32 %v16747_v35, %v16728_v27  ;;  %v2052_v30 = vmul.f32 %v16747_v35, %v16730_v1 }
 0x227   : > { %v2553_v39 = vadd.f32 %v2041_v9, %v1257_v60  ;;  %v2554_v55 = vadd.f32 %v2042_v0, %v1258_v34  ;;  %v1268_v48 = vmul.f32 %v16746_v49, %v16742_v13  ;;  %v3347_v4 = vmul.f32 %v10021_v56, %v16711_v26  ;;  %v16748_v0 = vld [vmem:[#allocation161_spill] sm:$0xff] }
 0x228   : > { %4939 = vmax.xlane.f32.xlu1 %v4938_v18  ;;  %4930 = vmax.xlane.f32.xlu0 %v4929_v5  ;;  %v4371_v41 = vsel %vm4235_vm1, %v3846_v43, -inf  ;;  %v3855_v42 = vadd.f32 %v3343_v20, %v2559_v50  ;;  %v3856_v8 = vadd.f32 %v3344_v23, %v2560_v44  ;;  %v2563_v38 = vadd.f32 %v2051_v54, %v1267_v51 }
 0x229   : > { %v3849_v22 = vadd.f32 %v3337_v36, %v2553_v39  ;;  %v3850_v14 = vadd.f32 %v3338_v58, %v2554_v55  ;;  %v2564_v40 = vadd.f32 %v2052_v30, %v1268_v48  ;;  %v3348_v18 = vmul.f32 %v10021_v56, %v16713_v32  ;;  %v16750_v58 = vld [vmem:[#allocation19_spill] sm:$0xff] }
 0x22a   : > { %v4950_v9 = vmax.f32 %v10815_v21, %v10819_v61  ;;  %v3859_v60 = vadd.f32 %v3347_v4, %v2563_v38  ;;  %v2045_v34 = vmul.f32 %v16748_v0, %v16728_v27  ;;  %v2046_v5 = vmul.f32 %v16748_v0, %v16730_v1  ;;  %v16749_v21 = vld [vmem:[#allocation8_spill] sm:$0xff] }
 0x22b   : > { %v4941_v43 = vmax.f32 %v10823_v11, %v10827_v2  ;;  %v4956_v20 = vmax.f32 %v10834_v28, %v10838_v47  ;;  %v4947_v23 = vmax.f32 %v10852_v29, %v4371_v41  ;;  %v3860_v50 = vadd.f32 %v3348_v18, %v2564_v40 }
 0x22c   : > { %4945 = vmax.xlane.f32.xlu1 %v4944_v16  ;;  %4936 = vmax.xlane.f32.xlu0 %v4935_v12  ;;  %v1261_v61 = vmul.f32 %v16749_v21, %v16740_v3  ;;  %v1262_v4 = vmul.f32 %v16749_v21, %v16742_v13  ;;  %v3341_v38 = vmul.f32 %v10019_v10, %v16711_v26  ;;  %v4380_v11 = vsel %vm4234_vm0, %v3855_v42, -inf  ;;  %v16752_v42 = vld [vmem:[#allocation10_spill] sm:$0xff] }
 0x22d   : > { %v3342_v16 = vmul.f32 %v10019_v10, %v16713_v32  ;;  %v4381_v2 = vsel %vm4235_vm1, %v3856_v8, -inf  ;;  %v4374_v12 = vsel %vm4234_vm0, %v3849_v22, -inf  ;;  %v4375_v28 = vsel %vm4235_vm1, %v3850_v14, -inf  ;;  %v16751_v22 = vld [vmem:[#allocation174_spill] sm:$0xff] }
 0x22e   : > { %v4384_v47 = vsel %vm4234_vm0, %v3859_v60, -inf  ;;  %v4385_v40 = vsel %vm4235_vm1, %v3860_v50, -inf  ;;  %v2557_v29 = vadd.f32 %v2045_v34, %v1261_v61  ;;  %v2558_v36 = vadd.f32 %v2046_v5, %v1262_v4  ;;  %v16753_v60 = vld [vmem:[#allocation169_spill] sm:$0xff] }
 0x22f   : > { %v1271_v44 = vmul.f32 %v16750_v58, %v16740_v3  ;;  %v1272_v8 = vmul.f32 %v16750_v58, %v16742_v13  ;;  %v2055_v51 = vmul.f32 %v16751_v22, %v16728_v27  ;;  %v2056_v14 = vmul.f32 %v16751_v22, %v16730_v1 }
 0x230   : > { %4951 = vmax.xlane.f32.xlu1 %v4950_v9  ;;  %4942 = vmax.xlane.f32.xlu0 %v4941_v43  ;;  %v3853_v54 = vadd.f32 %v3341_v38, %v2557_v29  ;;  %v3854_v30 = vadd.f32 %v3342_v16, %v2558_v36  ;;  %v3351_v39 = vmul.f32 %v10046_v57, %v16711_v26 }
 0x231   : > { %v3352_v55 = vmul.f32 %v10046_v57, %v16713_v32  ;;  %v2567_v48 = vadd.f32 %v2055_v51, %v1271_v44  ;;  %v2568_v41 = vadd.f32 %v2056_v14, %v1272_v8  ;;  %v1265_v18 = vmul.f32 %v16752_v42, %v16740_v3 }
 0x232   : > { %v1266_v9 = vmul.f32 %v16752_v42, %v16742_v13  ;;  %v2049_v34 = vmul.f32 %v16753_v60, %v16728_v27  ;;  %v2050_v5 = vmul.f32 %v16753_v60, %v16730_v1  ;;  %v3345_v43 = vmul.f32 %v10044_v6, %v16711_v26  ;;  %v16754_v42 = vld [vmem:[#allocation24_spill] sm:$0xff] }
 0x233   : > { %v3346_v50 = vmul.f32 %v10044_v6, %v16713_v32  ;;  %v4962_v61 = vmax.f32 %v4380_v11, %v4381_v2  ;;  %v3863_v4 = vadd.f32 %v3351_v39, %v2567_v48  ;;  %v3864_v38 = vadd.f32 %v3352_v55, %v2568_v41  ;;  %v16756_v48 = vld [vmem:[#allocation13_spill] sm:$0xff] }
 0x234   : > { %4957 = vmax.xlane.f32.xlu1 %v4956_v20  ;;  %4948 = vmax.xlane.f32.xlu0 %v4947_v23  ;;  %v2561_v16 = vadd.f32 %v2049_v34, %v1265_v18  ;;  %v2562_v29 = vadd.f32 %v2050_v5, %v1266_v9  ;;  %v4953_v36 = vmax.f32 %v4374_v12, %v4375_v28  ;;  %v4378_v8 = vsel %vm4234_vm0, %v3853_v54, -inf  ;;  %v16755_v23 = vld [vmem:[#allocation67_spill] sm:$0xff] }
 0x235   : > { %v4968_v44 = vmax.f32 %v4384_v47, %v4385_v40  ;;  %v4379_v51 = vsel %vm4235_vm1, %v3854_v30, -inf  ;;  %v1275_v6 = vmul.f32 %v16754_v42, %v16740_v3  ;;  %v1276_v20 = vmul.f32 %v16754_v42, %v16742_v13  ;;  %v16757_v18 = vld [vmem:[#allocation171_spill] sm:$0xff] }
 0x236   : > { %v3857_v14 = vadd.f32 %v3345_v43, %v2561_v16  ;;  %v3858_v60 = vadd.f32 %v3346_v50, %v2562_v29  ;;  %v2059_v11 = vmul.f32 %v16755_v23, %v16728_v27  ;;  %v2060_v2 = vmul.f32 %v16755_v23, %v16730_v1 }
 0x237   : > { %v3355_v12 = vmul.f32 %v10074_v37, %v16711_v26  ;;  %v3356_v28 = vmul.f32 %v10074_v37, %v16713_v32  ;;  %v4959_v47 = vmax.f32 %v4378_v8, %v4379_v51  ;;  %v4388_v40 = vsel %vm4234_vm0, %v3863_v4, -inf }
 0x238   : > { %4963 = vmax.xlane.f32.xlu1 %v4962_v61  ;;  %4954 = vmax.xlane.f32.xlu0 %v4953_v36  ;;  %v4389_v54 = vsel %vm4235_vm1, %v3864_v38, -inf  ;;  %v4382_v30 = vsel %vm4234_vm0, %v3857_v14, -inf  ;;  %v2571_v39 = vadd.f32 %v2059_v11, %v1275_v6  ;;  %v2572_v55 = vadd.f32 %v2060_v2, %v1276_v20 }
 0x239   : > { %v1269_v41 = vmul.f32 %v16756_v48, %v16740_v3  ;;  %v2053_v9 = vmul.f32 %v16757_v18, %v16728_v27  ;;  %v1270_v34 = vmul.f32 %v16756_v48, %v16742_v13  ;;  %v2054_v5 = vmul.f32 %v16757_v18, %v16730_v1 }
 0x23a   : > { %v3349_v43 = vmul.f32 %v10072_v24, %v16711_v26  ;;  %v3350_v50 = vmul.f32 %v10072_v24, %v16713_v32  ;;  %v4383_v6 = vsel %vm4235_vm1, %v3858_v60, -inf  ;;  %v3867_v61 = vadd.f32 %v3355_v12, %v2571_v39  ;;  %v16758_v60 = vld [vmem:[#allocation31_spill] sm:$0xff]  ;;  %v16759_v12 = vld [vmem:[#allocation177_spill] sm:$0xff] }
 0x23b   : > { %v3868_v4 = vadd.f32 %v3356_v28, %v2572_v55  ;;  %v2565_v38 = vadd.f32 %v2053_v9, %v1269_v41  ;;  %v2566_v16 = vadd.f32 %v2054_v5, %v1270_v34  ;;  %v4974_v29 = vmax.f32 %v4388_v40, %v4389_v54  ;;  %v16760_v34 = vld [vmem:[#allocation18_spill] sm:$0xff] }
 0x23c   : > { %4969 = vmax.xlane.f32.xlu1 %v4968_v44  ;;  %4960 = vmax.xlane.f32.xlu0 %v4959_v47  ;;  %v4965_v8 = vmax.f32 %v4382_v30, %v4383_v6  ;;  %v4392_v51 = vsel %vm4234_vm0, %v3867_v61, -inf  ;;  %v1279_v11 = vmul.f32 %v16758_v60, %v16740_v3  ;;  %v1280_v2 = vmul.f32 %v16758_v60, %v16742_v13 }
 0x23d   : > { %v3861_v36 = vadd.f32 %v3349_v43, %v2565_v38  ;;  %v4393_v14 = vsel %vm4235_vm1, %v3868_v4, -inf  ;;  %v3862_v20 = vadd.f32 %v3350_v50, %v2566_v16  ;;  %v2063_v28 = vmul.f32 %v16759_v12, %v16728_v27  ;;  %v16761_v50 = vld [vmem:[#allocation175_spill] sm:$0xff] }
 0x23e   : > { %v2064_v40 = vmul.f32 %v16759_v12, %v16730_v1  ;;  %v3359_v54 = vmul.f32 %v10104_v7, %v16711_v26  ;;  %v3360_v30 = vmul.f32 %v10104_v7, %v16713_v32  ;;  %v4980_v39 = vmax.f32 %v4392_v51, %v4393_v14 }
 0x23f   : > { %v4386_v44 = vsel %vm4234_vm0, %v3861_v36, -inf  ;;  %v4387_v47 = vsel %vm4235_vm1, %v3862_v20, -inf  ;;  %v2575_v41 = vadd.f32 %v2063_v28, %v1279_v11  ;;  %v1273_v5 = vmul.f32 %v16760_v34, %v16740_v3 }
 0x240   : > { %4975 = vmax.xlane.f32.xlu1 %v4974_v29  ;;  %4966 = vmax.xlane.f32.xlu0 %v4965_v8  ;;  %v4971_v55 = vmax.f32 %v4386_v44, %v4387_v47  ;;  %v2576_v9 = vadd.f32 %v2064_v40, %v1280_v2  ;;  %v1274_v43 = vmul.f32 %v16760_v34, %v16742_v13  ;;  %v16762_v47 = vld [vmem:[#allocation39_spill] sm:$0xff] }
 0x241   : > { %v2057_v6 = vmul.f32 %v16761_v50, %v16728_v27  ;;  %v3871_v61 = vadd.f32 %v3359_v54, %v2575_v41  ;;  %v2058_v4 = vmul.f32 %v16761_v50, %v16730_v1  ;;  %v3353_v38 = vmul.f32 %v10102_v46, %v16711_v26 }
 0x242   : > { %v3354_v16 = vmul.f32 %v10102_v46, %v16713_v32  ;;  %v3872_v29 = vadd.f32 %v3360_v30, %v2576_v9  ;;  %v1283_v40 = vmul.f32 %v16762_v47, %v16740_v3  ;;  %v1284_v54 = vmul.f32 %v16762_v47, %v16742_v13 }
 0x243   : > { %v2569_v36 = vadd.f32 %v2057_v6, %v1273_v5  ;;  %v4396_v8 = vsel %vm4234_vm0, %v3871_v61, -inf  ;;  %v2570_v51 = vadd.f32 %v2058_v4, %v1274_v43  ;;  %v3363_v9 = vmul.f32 %v10133_v33, %v16711_v26  ;;  %v16764_v43 = vld [vmem:[#allocation23_spill] sm:$0xff] }
 0x244   : > { %4981 = vmax.xlane.f32.xlu1 %v4980_v39  ;;  %4972 = vmax.xlane.f32.xlu0 %v4971_v55  ;;  %v4397_v14 = vsel %vm4235_vm1, %v3872_v29, -inf  ;;  %v16763_v39 = vld [vmem:[#allocation82_spill] sm:$0xff]  ;;  %v3364_v5 = vmul.f32 %v10133_v33, %v16713_v32  ;;  %v1277_v6 = vmul.f32 %v16764_v43, %v16740_v3  ;;  %v1278_v61 = vmul.f32 %v16764_v43, %v16742_v13 }
 0x245   : > { %v3865_v20 = vadd.f32 %v3353_v38, %v2569_v36  ;;  %v4986_v44 = vmax.f32 %v4396_v8, %v4397_v14  ;;  %v3866_v11 = vadd.f32 %v3354_v16, %v2570_v51  ;;  %v2067_v55 = vmul.f32 %v16763_v39, %v16728_v27  ;;  %v16765_v16 = vld [vmem:[#allocation68_spill] sm:$0xff]  ;;  %v16766_v8 = vld [vmem:[#allocation59_spill] sm:$0xff] }
 0x246   : > { %v2068_v41 = vmul.f32 %v16763_v39, %v16730_v1  ;;  %v2061_v29 = vmul.f32 %v16765_v16, %v16728_v27  ;;  %v2062_v36 = vmul.f32 %v16765_v16, %v16730_v1  ;;  %v3357_v51 = vmul.f32 %v16766_v8, %v16711_v26 }
 0x247   : > { %v4390_v2 = vsel %vm4234_vm0, %v3865_v20, -inf  ;;  %v4391_v28 = vsel %vm4235_vm1, %v3866_v11, -inf  ;;  %v2579_v4 = vadd.f32 %v2067_v55, %v1283_v40  ;;  %v3358_v14 = vmul.f32 %v16766_v8, %v16713_v32  ;;  %v16773_v8 = vld [vmem:[#allocation62_spill] sm:$0xff] }
 0x248   : > { %4987 = vmax.xlane.f32.xlu1 %v4986_v44  ;;  %v4977_v30 = vmax.f32 %v4390_v2, %v4391_v28  ;;  %v2580_v38 = vadd.f32 %v2068_v41, %v1284_v54  ;;  %v2573_v11 = vadd.f32 %v2061_v29, %v1277_v6  ;;  %v2574_v2 = vadd.f32 %v2062_v36, %v1278_v61  ;;  %v16769_v36 = vld [vmem:[#allocation164_spill] sm:$0xff] }
 0x249   : > { %v3875_v20 = vadd.f32 %v3363_v9, %v2579_v4  ;;  %v16767_v9 = vld [vmem:[#allocation48_spill] sm:$0xff]  ;;  %v16768_v4 = vld [vmem:[#allocation181_spill] sm:$0xff]  ;;  %v1291_v43 = vmul.f32 %v16773_v8, %v16740_v3 }
 0x24a   : > { %4978 = vmax.xlane.f32.xlu0 %v4977_v30  ;;  %v3876_v44 = vadd.f32 %v3364_v5, %v2580_v38  ;;  %v3869_v54 = vadd.f32 %v3357_v51, %v2573_v11  ;;  %v3870_v30 = vadd.f32 %v3358_v14, %v2574_v2  ;;  %v1287_v5 = vmul.f32 %v16767_v9, %v16740_v3  ;;  %v16771_v2 = vld [vmem:[#allocation178_spill] sm:$0xff] }
 0x24b   : > { %v4400_v28 = vsel %vm4234_vm0, %v3875_v20, -inf  ;;  %v1288_v61 = vmul.f32 %v16767_v9, %v16742_v13  ;;  %v2071_v38 = vmul.f32 %v16768_v4, %v16728_v27  ;;  %v2072_v29 = vmul.f32 %v16768_v4, %v16730_v1 }
 0x24c   : > { %v4401_v40 = vsel %vm4235_vm1, %v3876_v44, -inf  ;;  %v4394_v41 = vsel %vm4234_vm0, %v3869_v54, -inf  ;;  %v4395_v16 = vsel %vm4235_vm1, %v3870_v30, -inf  ;;  %v3367_v51 = vmul.f32 %v16769_v36, %v16711_v26  ;;  %v16772_v30 = vld [vmem:[#allocation163_spill] sm:$0xff] }
 0x24d   : > { %v4992_v55 = vmax.f32 %v4400_v28, %v4401_v40  ;;  %v4983_v6 = vmax.f32 %v4394_v41, %v4395_v16  ;;  %v3368_v14 = vmul.f32 %v16769_v36, %v16713_v32  ;;  %v2583_v20 = vadd.f32 %v2071_v38, %v1287_v5  ;;  %v16770_v16 = vld [vmem:[#allocation30_spill] sm:$0xff] }
 0x24e   : > { %v2584_v44 = vadd.f32 %v2072_v29, %v1288_v61  ;;  %v1281_v11 = vmul.f32 %v16770_v16, %v16740_v3  ;;  %v2065_v28 = vmul.f32 %v16771_v2, %v16728_v27  ;;  %v1282_v40 = vmul.f32 %v16770_v16, %v16742_v13 }
 0x24f   : > { %4993 = vmax.xlane.f32.xlu1 %v4992_v55  ;;  %4984 = vmax.xlane.f32.xlu0 %v4983_v6  ;;  %v2066_v54 = vmul.f32 %v16771_v2, %v16730_v1  ;;  %v3361_v55 = vmul.f32 %v16772_v30, %v16711_v26  ;;  %v3362_v41 = vmul.f32 %v16772_v30, %v16713_v32 }
 0x250   : > { %v3879_v5 = vadd.f32 %v3367_v51, %v2583_v20  ;;  %v3880_v6 = vadd.f32 %v3368_v14, %v2584_v44  ;;  %v2577_v61 = vadd.f32 %v2065_v28, %v1281_v11  ;;  %v16774_v51 = vld [vmem:[#allocation96_spill] sm:$0xff]  ;;  %v1292_v44 = vmul.f32 %v16773_v8, %v16742_v13  ;;  %v16775_v11 = vld [vmem:[#allocation166_spill] sm:$0xff] }
 0x251   : > { %v2578_v38 = vadd.f32 %v2066_v54, %v1282_v40  ;;  %v2075_v14 = vmul.f32 %v16774_v51, %v16728_v27  ;;  %v3371_v28 = vmul.f32 %v16775_v11, %v16711_v26  ;;  %v3372_v54 = vmul.f32 %v16775_v11, %v16713_v32 }
 0x252   : > { %v4404_v29 = vsel %vm4234_vm0, %v3879_v5, -inf  ;;  %v4405_v36 = vsel %vm4235_vm1, %v3880_v6, -inf  ;;  %v3873_v16 = vadd.f32 %v3361_v55, %v2577_v61  ;;  %v16777_v5 = vld [vmem:[#allocation83_spill] sm:$0xff] }
 0x253   : > { %v4998_v4 = vmax.f32 %v4404_v29, %v4405_v36  ;;  %v3874_v9 = vadd.f32 %v3362_v41, %v2578_v38  ;;  %v2076_v36 = vmul.f32 %v16774_v51, %v16730_v1  ;;  %v2587_v40 = vadd.f32 %v2075_v14, %v1291_v43  ;;  %v16824_v51 = vld [vmem:[#allocation4_spill] sm:$0xff] }
 0x254   : > { %v4398_v2 = vsel %vm4234_vm0, %v3873_v16, -inf  ;;  %v2069_v6 = vmul.f32 %v16777_v5, %v16728_v27  ;;  %v2070_v38 = vmul.f32 %v16777_v5, %v16730_v1  ;;  %v3365_v43 = vmul.f32 %v10192_v17, %v16711_v26 }
 0x255   : > { %4999 = vmax.xlane.f32.xlu1 %v4998_v4  ;;  %v4399_v20 = vsel %vm4235_vm1, %v3874_v9, -inf  ;;  %v2588_v55 = vadd.f32 %v2076_v36, %v1292_v44  ;;  %v16776_v4 = vld [vmem:[#allocation38_spill] sm:$0xff]  ;;  %v3883_v61 = vadd.f32 %v3371_v28, %v2587_v40 }
 0x256   : > { %v4989_v16 = vmax.f32 %v4398_v2, %v4399_v20  ;;  %v1285_v41 = vmul.f32 %v16776_v4, %v16740_v3  ;;  %v1286_v9 = vmul.f32 %v16776_v4, %v16742_v13  ;;  %v3366_v2 = vmul.f32 %v10192_v17, %v16713_v32  ;;  %v16778_v4 = vld [vmem:[#allocation75_spill] sm:$0xff]  ;;  %v16779_v17 = vld [vmem:[#allocation186_spill] sm:$0xff] }
 0x257   : > { %v3884_v29 = vadd.f32 %v3372_v54, %v2588_v55  ;;  %v4408_v20 = vsel %vm4234_vm0, %v3883_v61, -inf  ;;  %v1295_v11 = vmul.f32 %v16778_v4, %v16740_v3  ;;  %v2079_v54 = vmul.f32 %v16779_v17, %v16728_v27 }
 0x258   : > { %4990 = vmax.xlane.f32.xlu0 %v4989_v16  ;;  %v2581_v14 = vadd.f32 %v2069_v6, %v1285_v41  ;;  %v2582_v44 = vadd.f32 %v2070_v38, %v1286_v9  ;;  %v1296_v41 = vmul.f32 %v16778_v4, %v16742_v13  ;;  %v2080_v9 = vmul.f32 %v16779_v17, %v16730_v1 }
 0x259   : > { %v4409_v36 = vsel %vm4235_vm1, %v3884_v29, -inf  ;;  %v3375_v6 = vmul.f32 %v10220_v45, %v16711_v26  ;;  %v2591_v38 = vadd.f32 %v2079_v54, %v1295_v11  ;;  %v16780_v29 = vld [vmem:[#allocation47_spill] sm:$0xff]  ;;  %v3369_v11 = vmul.f32 %v10218_v62, %v16711_v26 }
 0x25a   : > { %v3877_v16 = vadd.f32 %v3365_v43, %v2581_v14  ;;  %v5004_v28 = vmax.f32 %v4408_v20, %v4409_v36  ;;  %v3878_v40 = vadd.f32 %v3366_v2, %v2582_v44  ;;  %v3376_v43 = vmul.f32 %v10220_v45, %v16713_v32  ;;  %v16781_v44 = vld [vmem:[#allocation182_spill] sm:$0xff] }
 0x25b   : > { %v2592_v2 = vadd.f32 %v2080_v9, %v1296_v41  ;;  %v1289_v14 = vmul.f32 %v16780_v29, %v16740_v3  ;;  %v1290_v20 = vmul.f32 %v16780_v29, %v16742_v13  ;;  %v2073_v36 = vmul.f32 %v16781_v44, %v16728_v27 }
 0x25c   : > { %v4402_v5 = vsel %vm4234_vm0, %v3877_v16, -inf  ;;  %5005 = vmax.xlane.f32.xlu1 %v5004_v28  ;;  %v4403_v55 = vsel %vm4235_vm1, %v3878_v40, -inf  ;;  %v3887_v16 = vadd.f32 %v3375_v6, %v2591_v38  ;;  %v2074_v28 = vmul.f32 %v16781_v44, %v16730_v1  ;;  %v16782_v44 = vld [vmem:[#allocation88_spill] sm:$0xff] }
 0x25d   : > { %v4995_v61 = vmax.f32 %v4402_v5, %v4403_v55  ;;  %v3370_v5 = vmul.f32 %v10218_v62, %v16713_v32  ;;  %v3888_v40 = vadd.f32 %v3376_v43, %v2592_v2  ;;  %v2585_v54 = vadd.f32 %v2073_v36, %v1289_v14  ;;  %v16783_v2 = vld [vmem:[#allocation109_spill] sm:$0xff] }
 0x25e   : > { %v4412_v55 = vsel %vm4234_vm0, %v3887_v16, -inf  ;;  %v2586_v41 = vadd.f32 %v2074_v28, %v1290_v20  ;;  %v1299_v29 = vmul.f32 %v16782_v44, %v16740_v3  ;;  %v1300_v45 = vmul.f32 %v16782_v44, %v16742_v13  ;;  %v16786_v44 = vld [vmem:[#allocation102_spill] sm:$0xff] }
 0x25f   : > { %4996 = vmax.xlane.f32.xlu0 %v4995_v61  ;;  %v4413_v9 = vsel %vm4235_vm1, %v3888_v40, -inf  ;;  %v3881_v61 = vadd.f32 %v3369_v11, %v2585_v54  ;;  %v2083_v14 = vmul.f32 %v16783_v2, %v16728_v27  ;;  %v2084_v20 = vmul.f32 %v16783_v2, %v16730_v1  ;;  %v16784_v54 = vld [vmem:[#allocation61_spill] sm:$0xff] }
 0x260   : > { %v5010_v6 = vmax.f32 %v4412_v55, %v4413_v9  ;;  %v3882_v38 = vadd.f32 %v3370_v5, %v2586_v41  ;;  %v3379_v36 = vmul.f32 %v10245_v52, %v16711_v26  ;;  %v3380_v28 = vmul.f32 %v10245_v52, %v16713_v32  ;;  %v16785_v9 = vld [vmem:[#allocation97_spill] sm:$0xff] }
 0x261   : > { %v4406_v43 = vsel %vm4234_vm0, %v3881_v61, -inf  ;;  %v2595_v5 = vadd.f32 %v2083_v14, %v1299_v29  ;;  %v2596_v40 = vadd.f32 %v2084_v20, %v1300_v45  ;;  %v1293_v55 = vmul.f32 %v16784_v54, %v16740_v3 }
 0x262   : > { %5011 = vmax.xlane.f32.xlu1 %v5010_v6  ;;  %v4407_v16 = vsel %vm4235_vm1, %v3882_v38, -inf  ;;  %v1294_v41 = vmul.f32 %v16784_v54, %v16742_v13  ;;  %v2077_v61 = vmul.f32 %v16785_v9, %v16728_v27  ;;  %v2078_v6 = vmul.f32 %v16785_v9, %v16730_v1 }
 0x263   : > { %v5001_v11 = vmax.f32 %v4406_v43, %v4407_v16  ;;  %v3373_v38 = vmul.f32 %v10243_v59, %v16711_v26  ;;  %v3891_v52 = vadd.f32 %v3379_v36, %v2595_v5  ;;  %v3892_v43 = vadd.f32 %v3380_v28, %v2596_v40  ;;  %v16787_v28 = vld [vmem:[#allocation124_spill] sm:$0xff] }
 0x264   : > { %v3374_v45 = vmul.f32 %v10243_v59, %v16713_v32  ;;  %v2589_v29 = vadd.f32 %v2077_v61, %v1293_v55  ;;  %v2590_v14 = vadd.f32 %v2078_v6, %v1294_v41  ;;  %v1303_v62 = vmul.f32 %v16786_v44, %v16740_v3  ;;  %v16811_v59 = vld [vmem:[#allocation17_spill] sm:$0xff] }
 0x265   : > { %5002 = vmax.xlane.f32.xlu0 %v5001_v11  ;;  %v4416_v20 = vsel %vm4234_vm0, %v3891_v52, -inf  ;;  %v4417_v16 = vsel %vm4235_vm1, %v3892_v43, -inf  ;;  %v1304_v36 = vmul.f32 %v16786_v44, %v16742_v13  ;;  %v2087_v11 = vmul.f32 %v16787_v28, %v16728_v27  ;;  %v16788_v43 = vld [vmem:[#allocation74_spill] sm:$0xff] }
 0x266   : > { %v5016_v54 = vmax.f32 %v4416_v20, %v4417_v16  ;;  %v3885_v2 = vadd.f32 %v3373_v38, %v2589_v29  ;;  %v3886_v9 = vadd.f32 %v3374_v45, %v2590_v14  ;;  %v2088_v5 = vmul.f32 %v16787_v28, %v16730_v1  ;;  %v11189_v14 = vpop.xlane.xlu1 %4756 }
 0x267   : > { %v3383_v55 = vmul.f32 %v10280_v19, %v16711_v26  ;;  %v2599_v61 = vadd.f32 %v2087_v11, %v1303_v62  ;;  %v3384_v38 = vmul.f32 %v10280_v19, %v16713_v32  ;;  %v1297_v45 = vmul.f32 %v16788_v43, %v16740_v3  ;;  %16790 = vst [vmem:[#allocation103_spill] sm:$0xff] %v11189_v14 }
 0x268   : > { %5017 = vmax.xlane.f32.xlu1 %v5016_v54  ;;  %v4410_v52 = vsel %vm4234_vm0, %v3885_v2, -inf  ;;  %v4411_v40 = vsel %vm4235_vm1, %v3886_v9, -inf  ;;  %v2600_v6 = vadd.f32 %v2088_v5, %v1304_v36  ;;  %v1298_v54 = vmul.f32 %v16788_v43, %v16742_v13  ;;  %v16789_v2 = vld [vmem:[#allocation187_spill] sm:$0xff]  ;;  %v11195_v36 = vpop.xlane.xlu0 %4753  ;;  %v16799_v43 = vld [vmem:[#allocation89_spill] sm:$0xff] }
 0x269   : > { %v5007_v41 = vmax.f32 %v4410_v52, %v4411_v40  ;;  %v2081_v29 = vmul.f32 %v16789_v2, %v16728_v27  ;;  %v3895_v9 = vadd.f32 %v3383_v55, %v2599_v61  ;;  %v2082_v62 = vmul.f32 %v16789_v2, %v16730_v1  ;;  %16791 = vst [vmem:[#allocation105_spill] sm:$0xff] %v11195_v36 }
 0x26a   : > { %v3896_v20 = vadd.f32 %v3384_v38, %v2600_v6  ;;  %v3377_v16 = vmul.f32 %v10278_v31, %v16711_v26  ;;  %v3378_v5 = vmul.f32 %v10278_v31, %v16713_v32  ;;  %v16792_v6 = vld [vmem:[#allocation115_spill] sm:$0xff]  ;;  %v3381_v19 = vmul.f32 %v16799_v43, %v16711_v26 }
 0x26b   : > { %5008 = vmax.xlane.f32.xlu0 %v5007_v41  ;;  %v2593_v11 = vadd.f32 %v2081_v29, %v1297_v45  ;;  %v4420_v52 = vsel %vm4234_vm0, %v3895_v9, -inf  ;;  %v2594_v55 = vadd.f32 %v2082_v62, %v1298_v54  ;;  %v1307_v38 = vmul.f32 %v16792_v6, %v16740_v3  ;;  %v16793_v45 = vld [vmem:[#allocation122_spill] sm:$0xff]  ;;  %v16795_v62 = vld [vmem:[#allocation87_spill] sm:$0xff] }
 0x26c   : > { %v4421_v40 = vsel %vm4235_vm1, %v3896_v20, -inf  ;;  %v1308_v14 = vmul.f32 %v16792_v6, %v16742_v13  ;;  %v2091_v29 = vmul.f32 %v16793_v45, %v16728_v27  ;;  %v2092_v31 = vmul.f32 %v16793_v45, %v16730_v1  ;;  %v16794_v9 = vld [vmem:[#allocation42_spill] sm:$0xff] }
 0x26d   : > { %v5022_v41 = vmax.f32 %v4420_v52, %v4421_v40  ;;  %v3889_v61 = vadd.f32 %v3377_v16, %v2593_v11  ;;  %v3890_v36 = vadd.f32 %v3378_v5, %v2594_v55  ;;  %v3387_v2 = vmul.f32 %v16794_v9, %v16711_v26  ;;  %v11221_v5 = vpop.xlane.xlu1 %4765 }
 0x26e   : > { %v3388_v20 = vmul.f32 %v16794_v9, %v16713_v32  ;;  %v1301_v16 = vmul.f32 %v16795_v62, %v16740_v3  ;;  %v1302_v11 = vmul.f32 %v16795_v62, %v16742_v13  ;;  %16796 = vst [vmem:[#allocation108_spill] sm:$0xff] %v11221_v5  ;;  %v2603_v40 = vadd.f32 %v2091_v29, %v1307_v38 }
 0x26f   : > { %5023 = vmax.xlane.f32.xlu1 %v5022_v41  ;;  %v4414_v54 = vsel %vm4234_vm0, %v3889_v61, -inf  ;;  %v4415_v52 = vsel %vm4235_vm1, %v3890_v36, -inf  ;;  %v2604_v55 = vadd.f32 %v2092_v31, %v1308_v14  ;;  %v16797_v41 = vld [vmem:[#allocation110_spill] sm:$0xff]  ;;  %v11227_v61 = vpop.xlane.xlu0 %4759  ;;  %v3382_v5 = vmul.f32 %v16799_v43, %v16713_v32 }
 0x270   : > { %v2085_v45 = vmul.f32 %v16797_v41, %v16728_v27  ;;  %16798 = vst [vmem:[#allocation55_spill] sm:$0xff] %v11227_v61  ;;  %v5013_v6 = vmax.f32 %v4414_v54, %v4415_v52  ;;  %v2086_v9 = vmul.f32 %v16797_v41, %v16730_v1  ;;  %v3899_v62 = vadd.f32 %v3387_v2, %v2603_v40  ;;  %v16800_v54 = vld [vmem:[#allocation129_spill] sm:$0xff]  ;;  %v16801_v2 = vld [vmem:[#allocation136_spill] sm:$0xff] }
 0x271   : > { %v3900_v28 = vadd.f32 %v3388_v20, %v2604_v55  ;;  %v1311_v52 = vmul.f32 %v16800_v54, %v16740_v3  ;;  %v1312_v43 = vmul.f32 %v16800_v54, %v16742_v13  ;;  %v16805_v40 = vld [vmem:[#allocation101_spill] sm:$0xff] }
 0x272   : > { %v2597_v36 = vadd.f32 %v2085_v45, %v1301_v16  ;;  %5014 = vmax.xlane.f32.xlu0 %v5013_v6  ;;  %v2598_v31 = vadd.f32 %v2086_v9, %v1302_v11  ;;  %v4424_v14 = vsel %vm4234_vm0, %v3899_v62, -inf  ;;  %v2095_v45 = vmul.f32 %v16801_v2, %v16728_v27  ;;  %v11245_v6 = vpop.xlane.xlu1 %4771 }
 0x273   : > { %v4425_v38 = vsel %vm4235_vm1, %v3900_v28, -inf  ;;  %16802 = vst [vmem:[#allocation117_spill] sm:$0xff] %v11245_v6  ;;  %v16803_v28 = vld [vmem:[#allocation95_spill] sm:$0xff]  ;;  %v11255_v16 = vpop.xlane.xlu0 %4762  ;;  %v1305_v55 = vmul.f32 %v16805_v40, %v16740_v3 }
 0x274   : > { %v3893_v29 = vadd.f32 %v3381_v19, %v2597_v36  ;;  %v5028_v61 = vmax.f32 %v4424_v14, %v4425_v38  ;;  %v3894_v41 = vadd.f32 %v3382_v5, %v2598_v31  ;;  %v2096_v19 = vmul.f32 %v16801_v2, %v16730_v1  ;;  %16804 = vst [vmem:[#allocation121_spill] sm:$0xff] %v11255_v16  ;;  %v16806_v38 = vld [vmem:[#allocation188_spill] sm:$0xff]  ;;  %v774_v16 = vld [vmem:[%s8251_s22 + $0x18] sm:$0x77] }
 0x275   : > { %v3391_v20 = vmul.f32 %v16803_v28, %v16711_v26  ;;  %v3392_v62 = vmul.f32 %v16803_v28, %v16713_v32  ;;  %v2607_v5 = vadd.f32 %v2095_v45, %v1311_v52  ;;  %v1306_v36 = vmul.f32 %v16805_v40, %v16742_v13  ;;  %v16807_v28 = vld [vmem:[#allocation91_spill] sm:$0xff] }
 0x276   : > { %v4418_v9 = vsel %vm4234_vm0, %v3893_v29, -inf  ;;  %5029 = vmax.xlane.f32.xlu1 %v5028_v61  ;;  %v4419_v11 = vsel %vm4235_vm1, %v3894_v41, -inf  ;;  %v2608_v14 = vadd.f32 %v2096_v19, %v1312_v43  ;;  %v2089_v29 = vmul.f32 %v16806_v38, %v16728_v27 }
 0x277   : > { %v5019_v31 = vmax.f32 %v4418_v9, %v4419_v11  ;;  %v2090_v6 = vmul.f32 %v16806_v38, %v16730_v1  ;;  %v3903_v61 = vadd.f32 %v3391_v20, %v2607_v5  ;;  %v3385_v41 = vmul.f32 %v16807_v28, %v16711_v26  ;;  %v16808_v9 = vld [vmem:[#allocation15_spill] sm:$0xff]  ;;  %v16809_v11 = vld [vmem:[#allocation16_spill] sm:$0xff]  ;;  %v11276_v38 = vpop.xlane.xlu1 %4777 }
 0x278   : > { %v3386_v52 = vmul.f32 %v16807_v28, %v16713_v32  ;;  %v3904_v45 = vadd.f32 %v3392_v62, %v2608_v14  ;;  %v2601_v2 = vadd.f32 %v2089_v29, %v1305_v55  ;;  %v846_v19 = vrot.slane %v774_v16, %v16808_v9  ;;  %16810 = vst [vmem:[#allocation56_spill] sm:$0xff] %v11276_v38  ;;  %v16813_v29 = vld [vmem:[#allocation20_spill] sm:$0xff] }
 0x279   : > { %5020 = vmax.xlane.f32.xlu0 %v5019_v31  ;;  %v2602_v40 = vadd.f32 %v2090_v6, %v1306_v36  ;;  %v4428_v43 = vsel %vm4234_vm0, %v3903_v61, -inf  ;;  %v850_v54 = vrot.slane %v774_v16, %v16809_v11  ;;  %v1662_v28 = vrot.slane %v774_v16, %v16811_v59  ;;  %v11281_v31 = vpop.xlane.xlu0 %4768 }
 0x27a   : > { %v4429_v20 = vsel %vm4235_vm1, %v3904_v45, -inf  ;;  %v3897_v5 = vadd.f32 %v3385_v41, %v2601_v2  ;;  %16812 = vst [vmem:[#allocation126_spill] sm:$0xff] %v11281_v31  ;;  %v11284_v6 = vrot.slane %v846_v19, %v16808_v9  ;;  %v1666_v2 = vrot.slane %v774_v16, %v16813_v29  ;;  %v16814_v41 = vld [vmem:[#allocation5_spill] sm:$0xff] }
 0x27b   : > { %v3898_v44 = vadd.f32 %v3386_v52, %v2602_v40  ;;  %v5034_v62 = vmax.f32 %v4428_v43, %v4429_v20  ;;  %v11287_v55 = vrot.slane %v850_v54, %v16808_v9  ;;  %v11295_v40 = vrot.slane %v1662_v28, %v16811_v59  ;;  %v16815_v45 = vld [vmem:[#allocation21_spill] sm:$0xff]  ;;  %v16818_v28 = vld [vmem:[#allocation114_spill] sm:$0xff]  ;;  %v11319_v29 = vpop.xlane.xlu1 %4783 }
 0x27c   : > { %v4422_v36 = vsel %vm4234_vm0, %v3897_v5, -inf  ;;  %v1315_v52 = vmul.f32 %v16814_v41, %v11284_v6  ;;  %v2958_v43 = vrot.slane %v774_v16, %v16815_v45  ;;  %v11303_v19 = vrot.slane %v1666_v2, %v16811_v59  ;;  %v16817_v5 = vld [vmem:[#allocation22_spill] sm:$0xff]  ;;  %v16819_v31 = vld [vmem:[#allocation125_spill] sm:$0xff]  ;;  %16820 = vst [vmem:[#allocation147_spill] sm:$0xff] %v11319_v29 }
 0x27d   : > { %v4423_v14 = vsel %vm4235_vm1, %v3898_v44, -inf  ;;  %5035 = vmax.xlane.f32.xlu1 %v5034_v62  ;;  %v1316_v54 = vmul.f32 %v16814_v41, %v11287_v55  ;;  %v16816_v44 = vld [vmem:[#allocation142_spill] sm:$0xff]  ;;  %v2962_v38 = vrot.slane %v774_v16, %v16817_v5  ;;  %v1309_v62 = vmul.f32 %v16818_v28, %v16740_v3  ;;  %v11328_v11 = vpop.xlane.xlu0 %4774 }
 0x27e   : > { %v5025_v61 = vmax.f32 %v4422_v36, %v4423_v14  ;;  %v2099_v20 = vmul.f32 %v16816_v44, %v11295_v40  ;;  %v11311_v36 = vrot.slane %v2958_v43, %v16815_v45  ;;  %v1310_v14 = vmul.f32 %v16818_v28, %v16742_v13  ;;  %v16821_v43 = vld [vmem:[#allocation183_spill] sm:$0xff]  ;;  %16822 = vst [vmem:[#allocation64_spill] sm:$0xff] %v11328_v11  ;;  %v16823_v28 = vld [vmem:[#allocation144_spill] sm:$0xff] }
 0x27f   : > { %v2093_v41 = vmul.f32 %v16819_v31, %v16728_v27  ;;  %v2094_v2 = vmul.f32 %v16819_v31, %v16730_v1  ;;  %v2100_v16 = vmul.f32 %v16816_v44, %v11303_v19  ;;  %v3389_v59 = vmul.f32 %v16821_v43, %v16711_v26  ;;  %v16825_v11 = vld [vmem:[#allocation156_spill] sm:$0xff] }
 0x280   : > { %5026 = vmax.xlane.f32.xlu0 %v5025_v61  ;;  %v2611_v5 = vadd.f32 %v2099_v20, %v1315_v52  ;;  %v11324_v61 = vrot.slane %v2962_v38, %v16815_v45  ;;  %v3395_v9 = vmul.f32 %v16823_v28, %v11311_v36  ;;  %v3390_v29 = vmul.f32 %v16821_v43, %v16713_v32 }
 0x281   : > { %v2605_v17 = vadd.f32 %v2093_v41, %v1309_v62  ;;  %v2606_v4 = vadd.f32 %v2094_v2, %v1310_v14  ;;  %v2612_v31 = vadd.f32 %v2100_v16, %v1316_v54  ;;  %v1319_v8 = vmul.f32 %v16824_v51, %v11284_v6  ;;  %v16828_v2 = vld [vmem:[#allocation151_spill] sm:$0xff] }
 0x282   : > { %v3396_v52 = vmul.f32 %v16823_v28, %v11324_v61  ;;  %v3907_v20 = vadd.f32 %v3395_v9, %v2611_v5  ;;  %v2103_v30 = vmul.f32 %v16825_v11, %v11295_v40  ;;  %v11354_v5 = vpop.xlane.xlu0 %4780  ;;  %v3399_v16 = vmul.f32 %v16828_v2, %v11311_v36 }
 0x283   : > { %v3901_v38 = vadd.f32 %v3389_v59, %v2605_v17  ;;  %v3902_v44 = vadd.f32 %v3390_v29, %v2606_v4  ;;  %v1320_v17 = vmul.f32 %v16824_v51, %v11287_v55  ;;  %v11348_v59 = vpop.xlane.xlu1 %4789  ;;  %16827 = vst [vmem:[#allocation65_spill] sm:$0xff] %v11354_v5 }
 0x284   : > { %v3908_v45 = vadd.f32 %v3396_v52, %v2612_v31  ;;  %v4432_v41 = vsel %vm4234_vm0, %v3907_v20, -inf  ;;  %16826 = vst [vmem:[#allocation190_spill] sm:$0xff] %v11348_v59  ;;  %v2104_v31 = vmul.f32 %v16825_v11, %v11303_v19  ;;  %v2615_v29 = vadd.f32 %v2103_v30, %v1319_v8  ;;  %v16829_v52 = vld [vmem:[#allocation128_spill] sm:$0xff] }
 0x285   : > { %v4426_v62 = vsel %vm4234_vm0, %v3901_v38, -inf  ;;  %v4427_v54 = vsel %vm4235_vm1, %v3902_v44, -inf  ;;  %v3400_v44 = vmul.f32 %v16828_v2, %v11324_v61  ;;  %v1313_v20 = vmul.f32 %v16829_v52, %v16740_v3 }
 0x286   : > { %v4433_v4 = vsel %vm4235_vm1, %v3908_v45, -inf  ;;  %v5031_v9 = vmax.f32 %v4426_v62, %v4427_v54  ;;  %v2616_v38 = vadd.f32 %v2104_v31, %v1320_v17  ;;  %v1314_v45 = vmul.f32 %v16829_v52, %v16742_v13  ;;  %v16830_v62 = vld [vmem:[#allocation140_spill] sm:$0xff]  ;;  %v16831_v54 = vld [vmem:[#allocation43_spill] sm:$0xff]  ;;  %v16832_v31 = vld [vmem:[#allocation9_spill] sm:$0xff] }
 0x287   : > { %v5040_v14 = vmax.f32 %v4432_v41, %v4433_v4  ;;  %v2097_v8 = vmul.f32 %v16830_v62, %v16728_v27  ;;  %v2098_v30 = vmul.f32 %v16830_v62, %v16730_v1  ;;  %v3911_v41 = vadd.f32 %v3399_v16, %v2615_v29  ;;  %v11376_v5 = vpop.xlane.xlu1 %4795 }
 0x288   : > { %5032 = vmax.xlane.f32.xlu0 %v5031_v9  ;;  %v3393_v4 = vmul.f32 %v16831_v54, %v16711_v26  ;;  %v3394_v59 = vmul.f32 %v16831_v54, %v16713_v32  ;;  %v3912_v3 = vadd.f32 %v3400_v44, %v2616_v38  ;;  %v1323_v27 = vmul.f32 %v16832_v31, %v11284_v6  ;;  %v16834_v26 = vld [vmem:[#allocation160_spill] sm:$0xff]  ;;  %v11382_v32 = vpop.xlane.xlu0 %4786 }
 0x289   : > { %5041 = vmax.xlane.f32.xlu1 %v5040_v14  ;;  %v2609_v9 = vadd.f32 %v2097_v8, %v1313_v20  ;;  %v2610_v17 = vadd.f32 %v2098_v30, %v1314_v45  ;;  %v4436_v13 = vsel %vm4234_vm0, %v3911_v41, -inf  ;;  %16833 = vst [vmem:[#allocation192_spill] sm:$0xff] %v11376_v5  ;;  %v2107_v16 = vmul.f32 %v16834_v26, %v11295_v40  ;;  %v16836_v45 = vld [vmem:[#allocation154_spill] sm:$0xff] }
 0x28a   : > { %v4437_v1 = vsel %vm4235_vm1, %v3912_v3, -inf  ;;  %16835 = vst [vmem:[#allocation152_spill] sm:$0xff] %v11382_v32  ;;  %v1324_v20 = vmul.f32 %v16832_v31, %v11287_v55  ;;  %v2108_v38 = vmul.f32 %v16834_v26, %v11303_v19  ;;  %v3403_v8 = vmul.f32 %v16836_v45, %v11311_v36  ;;  %v16840_v32 = vld [vmem:[#allocation11_spill] sm:$0xff] }
 0x28b   : > { %v3905_v29 = vadd.f32 %v3393_v4, %v2609_v9  ;;  %v3906_v14 = vadd.f32 %v3394_v59, %v2610_v17  ;;  %v5046_v44 = vmax.f32 %v4436_v13, %v4437_v1  ;;  %v2619_v41 = vadd.f32 %v2107_v16, %v1323_v27  ;;  %v16837_v17 = vld [vmem:[#allocation7_spill] sm:$0xff] }
 0x28c   : > { %v3404_v4 = vmul.f32 %v16836_v45, %v11324_v61  ;;  %v2620_v9 = vadd.f32 %v2108_v38, %v1324_v20  ;;  %v1317_v13 = vmul.f32 %v16837_v17, %v11284_v6  ;;  %v1318_v1 = vmul.f32 %v16837_v17, %v11287_v55  ;;  %v11408_v20 = vpop.xlane.xlu1 %4801 }
 0x28d   : > { %v4430_v30 = vsel %vm4234_vm0, %v3905_v29, -inf  ;;  %v4431_v59 = vsel %vm4235_vm1, %v3906_v14, -inf  ;;  %5047 = vmax.xlane.f32.xlu1 %v5046_v44  ;;  %v3915_v5 = vadd.f32 %v3403_v8, %v2619_v41  ;;  %v2101_v29 = vmul.f32 %v16735_v25, %v11295_v40  ;;  %16838 = vst [vmem:[#allocation153_spill] sm:$0xff] %v11408_v20 }
 0x28e   : > { %v5037_v3 = vmax.f32 %v4430_v30, %v4431_v59  ;;  %v2102_v14 = vmul.f32 %v16735_v25, %v11303_v19  ;;  %v3397_v27 = vmul.f32 %v16736_v15, %v11311_v36  ;;  %v3916_v16 = vadd.f32 %v3404_v4, %v2620_v9  ;;  %v11412_v59 = vpop.xlane.xlu0 %4792  ;;  %v16841_v4 = vld [vmem:[#allocation168_spill] sm:$0xff] }
 0x28f   : > { %v3398_v44 = vmul.f32 %v16736_v15, %v11324_v61  ;;  %v4440_v38 = vsel %vm4234_vm0, %v3915_v5, -inf  ;;  %v2613_v8 = vadd.f32 %v2101_v29, %v1317_v13  ;;  %16839 = vst [vmem:[#allocation46_spill] sm:$0xff] %v11412_v59  ;;  %v1327_v25 = vmul.f32 %v16840_v32, %v11284_v6 }
 0x290   : > { %5038 = vmax.xlane.f32.xlu0 %v5037_v3  ;;  %v2614_v30 = vadd.f32 %v2102_v14, %v1318_v1  ;;  %v4441_v41 = vsel %vm4235_vm1, %v3916_v16, -inf  ;;  %v2111_v3 = vmul.f32 %v16841_v4, %v11295_v40  ;;  %v1328_v20 = vmul.f32 %v16840_v32, %v11287_v55  ;;  %v16842_v1 = vld [vmem:[#allocation44_spill] sm:$0xff]  ;;  %v11436_v59 = vpop.xlane.xlu1 %4807 }
 0x291   : > { %v5052_v9 = vmax.f32 %v4440_v38, %v4441_v41  ;;  %v3909_v15 = vadd.f32 %v3397_v27, %v2613_v8  ;;  %v2112_v5 = vmul.f32 %v16841_v4, %v11303_v19  ;;  %v3407_v29 = vmul.f32 %v16842_v1, %v11311_v36  ;;  %16845 = vst [vmem:[#allocation49_spill] sm:$0xff] %v11436_v59 }
 0x292   : > { %v3910_v17 = vadd.f32 %v3398_v44, %v2614_v30  ;;  %v2623_v13 = vadd.f32 %v2111_v3, %v1327_v25  ;;  %v3408_v14 = vmul.f32 %v16842_v1, %v11324_v61  ;;  %v16843_v44 = vld [vmem:[#allocation6_spill] sm:$0xff]  ;;  %v16844_v25 = vld [vmem:[#allocation157_spill] sm:$0xff]  ;;  %v1332_v59 = vmul.f32 %v16746_v49, %v11287_v55 }
 0x293   : > { %5053 = vmax.xlane.f32.xlu1 %v5052_v9  ;;  %v4434_v16 = vsel %vm4234_vm0, %v3909_v15, -inf  ;;  %v1321_v38 = vmul.f32 %v16843_v44, %v11284_v6  ;;  %v2624_v30 = vadd.f32 %v2112_v5, %v1328_v20  ;;  %v2105_v3 = vmul.f32 %v16844_v25, %v11295_v40  ;;  %v16846_v1 = vld [vmem:[#allocation26_spill] sm:$0xff] }
 0x294   : > { %v4435_v27 = vsel %vm4235_vm1, %v3910_v17, -inf  ;;  %v3919_v41 = vadd.f32 %v3407_v29, %v2623_v13  ;;  %v1322_v9 = vmul.f32 %v16843_v44, %v11287_v55  ;;  %v2106_v15 = vmul.f32 %v16844_v25, %v11303_v19 }
 0x295   : > { %v5043_v8 = vmax.f32 %v4434_v16, %v4435_v27  ;;  %v3401_v17 = vmul.f32 %v16846_v1, %v11311_v36  ;;  %v3402_v4 = vmul.f32 %v16846_v1, %v11324_v61  ;;  %v11446_v16 = vpop.xlane.xlu0 %4798  ;;  %v3920_v20 = vadd.f32 %v3408_v14, %v2624_v30 }
 0x296   : > { %16847 = vst [vmem:[#allocation137_spill] sm:$0xff] %v11446_v16  ;;  %v4444_v5 = vsel %vm4234_vm0, %v3919_v41, -inf  ;;  %v2617_v13 = vadd.f32 %v2105_v3, %v1321_v38  ;;  %v2618_v29 = vadd.f32 %v2106_v15, %v1322_v9  ;;  %v1331_v27 = vmul.f32 %v16746_v49, %v11284_v6 }
 0x297   : > { %5044 = vmax.xlane.f32.xlu0 %v5043_v8  ;;  %v4445_v25 = vsel %vm4235_vm1, %v3920_v20, -inf  ;;  %v2115_v16 = vmul.f32 %v16747_v35, %v11295_v40  ;;  %v2116_v14 = vmul.f32 %v16747_v35, %v11303_v19  ;;  %v3411_v38 = vmul.f32 %v10021_v56, %v11311_v36 }
 0x298   : > { %v3913_v44 = vadd.f32 %v3401_v17, %v2617_v13  ;;  %v5058_v8 = vmax.f32 %v4444_v5, %v4445_v25  ;;  %v3914_v30 = vadd.f32 %v3402_v4, %v2618_v29  ;;  %v3412_v15 = vmul.f32 %v10021_v56, %v11324_v61  ;;  %v11466_v17 = vpop.xlane.xlu1 %4813 }
 0x299   : > { %v2627_v3 = vadd.f32 %v2115_v16, %v1331_v27  ;;  %v2628_v9 = vadd.f32 %v2116_v14, %v1332_v59  ;;  %16848 = vst [vmem:[#allocation138_spill] sm:$0xff] %v11466_v17  ;;  %v1325_v4 = vmul.f32 %v16749_v21, %v11284_v6  ;;  %v1326_v25 = vmul.f32 %v16749_v21, %v11287_v55  ;;  %v11476_v16 = vpop.xlane.xlu0 %4804 }
 0x29a   : > { %v4438_v41 = vsel %vm4234_vm0, %v3913_v44, -inf  ;;  %5059 = vmax.xlane.f32.xlu1 %v5058_v8  ;;  %v4439_v20 = vsel %vm4235_vm1, %v3914_v30, -inf  ;;  %v2109_v44 = vmul.f32 %v16748_v0, %v11295_v40  ;;  %16849 = vst [vmem:[#allocation70_spill] sm:$0xff] %v11476_v16  ;;  %v2110_v29 = vmul.f32 %v16748_v0, %v11303_v19 }
 0x29b   : > { %v5049_v59 = vmax.f32 %v4438_v41, %v4439_v20  ;;  %v3923_v5 = vadd.f32 %v3411_v38, %v2627_v3  ;;  %v3924_v13 = vadd.f32 %v3412_v15, %v2628_v9  ;;  %v3405_v14 = vmul.f32 %v10019_v10, %v11311_v36 }
 0x29c   : > { %v2621_v27 = vadd.f32 %v2109_v44, %v1325_v4  ;;  %v3406_v8 = vmul.f32 %v10019_v10, %v11324_v61  ;;  %v2622_v41 = vadd.f32 %v2110_v29, %v1326_v25  ;;  %v1335_v9 = vmul.f32 %v16750_v58, %v11284_v6 }
 0x29d   : > { %5050 = vmax.xlane.f32.xlu0 %v5049_v59  ;;  %v4448_v30 = vsel %vm4234_vm0, %v3923_v5, -inf  ;;  %v4449_v17 = vsel %vm4235_vm1, %v3924_v13, -inf  ;;  %v1336_v20 = vmul.f32 %v16750_v58, %v11287_v55  ;;  %v2119_v4 = vmul.f32 %v16751_v22, %v11295_v40  ;;  %v11496_v59 = vpop.xlane.xlu1 %4819  ;;  %v11504_v13 = vpop.xlane.xlu0 %4810 }
 0x29e   : > { %v5064_v38 = vmax.f32 %v4448_v30, %v4449_v17  ;;  %v3917_v3 = vadd.f32 %v3405_v14, %v2621_v27  ;;  %v3918_v15 = vadd.f32 %v3406_v8, %v2622_v41  ;;  %v2120_v44 = vmul.f32 %v16751_v22, %v11303_v19  ;;  %16850 = vst [vmem:[#allocation176_spill] sm:$0xff] %v11496_v59  ;;  %v16852_v8 = vld [vmem:[#allocation10_spill] sm:$0xff]  ;;  %v16854_v22 = vld [vmem:[#allocation27_spill] sm:$0xff] }
 0x29f   : > { %v3415_v25 = vmul.f32 %v10046_v57, %v11311_v36  ;;  %v3416_v5 = vmul.f32 %v10046_v57, %v11324_v61  ;;  %16851 = vst [vmem:[#allocation57_spill] sm:$0xff] %v11504_v13  ;;  %v2631_v27 = vadd.f32 %v2119_v4, %v1335_v9  ;;  %v1329_v30 = vmul.f32 %v16852_v8, %v11284_v6 }
 0x2a0   : > { %5065 = vmax.xlane.f32.xlu1 %v5064_v38  ;;  %v4442_v17 = vsel %vm4234_vm0, %v3917_v3, -inf  ;;  %v4443_v29 = vsel %vm4235_vm1, %v3918_v15, -inf  ;;  %v2632_v14 = vadd.f32 %v2120_v44, %v1336_v20  ;;  %v1330_v38 = vmul.f32 %v16852_v8, %v11287_v55  ;;  %v16853_v3 = vld [vmem:[#allocation169_spill] sm:$0xff] }
 0x2a1   : > { %v5055_v41 = vmax.f32 %v4442_v17, %v4443_v29  ;;  %v2113_v59 = vmul.f32 %v16853_v3, %v11295_v40  ;;  %v2114_v16 = vmul.f32 %v16853_v3, %v11303_v19  ;;  %v3927_v57 = vadd.f32 %v3415_v25, %v2631_v27  ;;  %v11526_v25 = vpop.xlane.xlu1 %4825 }
 0x2a2   : > { %v3928_v13 = vadd.f32 %v3416_v5, %v2632_v14  ;;  %v3409_v15 = vmul.f32 %v16854_v22, %v11311_v36  ;;  %v3410_v9 = vmul.f32 %v16854_v22, %v11324_v61  ;;  %v1339_v29 = vmul.f32 %v16754_v42, %v11284_v6  ;;  %16855 = vst [vmem:[#allocation63_spill] sm:$0xff] %v11526_v25 }
 0x2a3   : > { %5056 = vmax.xlane.f32.xlu0 %v5055_v41  ;;  %v2625_v20 = vadd.f32 %v2113_v59, %v1329_v30  ;;  %v2626_v4 = vadd.f32 %v2114_v16, %v1330_v38  ;;  %v4452_v44 = vsel %vm4234_vm0, %v3927_v57, -inf  ;;  %v1340_v22 = vmul.f32 %v16754_v42, %v11287_v55  ;;  %v11530_v41 = vpop.xlane.xlu0 %4816 }
 0x2a4   : > { %v4453_v17 = vsel %vm4235_vm1, %v3928_v13, -inf  ;;  %16856 = vst [vmem:[#allocation73_spill] sm:$0xff] %v11530_v41  ;;  %v2123_v16 = vmul.f32 %v16755_v23, %v11295_v40  ;;  %v2124_v57 = vmul.f32 %v16755_v23, %v11303_v19  ;;  %v3419_v59 = vmul.f32 %v10074_v37, %v11311_v36 }
 0x2a5   : > { %v5070_v5 = vmax.f32 %v4452_v44, %v4453_v17  ;;  %v3921_v27 = vadd.f32 %v3409_v15, %v2625_v20  ;;  %v3922_v14 = vadd.f32 %v3410_v9, %v2626_v4  ;;  %v3420_v13 = vmul.f32 %v10074_v37, %v11324_v61 }
 0x2a6   : > { %v1333_v15 = vmul.f32 %v16756_v48, %v11284_v6  ;;  %v2635_v20 = vadd.f32 %v2123_v16, %v1339_v29  ;;  %v2636_v4 = vadd.f32 %v2124_v57, %v1340_v22  ;;  %v2117_v44 = vmul.f32 %v16757_v18, %v11295_v40  ;;  %v11556_v22 = vpop.xlane.xlu1 %4831 }
 0x2a7   : > { %5071 = vmax.xlane.f32.xlu1 %v5070_v5  ;;  %v4446_v30 = vsel %vm4234_vm0, %v3921_v27, -inf  ;;  %v4447_v38 = vsel %vm4235_vm1, %v3922_v14, -inf  ;;  %v1334_v17 = vmul.f32 %v16756_v48, %v11287_v55  ;;  %v2118_v5 = vmul.f32 %v16757_v18, %v11303_v19  ;;  %16857 = vst [vmem:[#allocation78_spill] sm:$0xff] %v11556_v22  ;;  %v16863_v22 = vld [vmem:[#allocation68_spill] sm:$0xff] }
 0x2a8   : > { %v5061_v9 = vmax.f32 %v4446_v30, %v4447_v38  ;;  %v3413_v27 = vmul.f32 %v10072_v24, %v11311_v36  ;;  %v3414_v14 = vmul.f32 %v10072_v24, %v11324_v61  ;;  %v3931_v25 = vadd.f32 %v3419_v59, %v2635_v20  ;;  %v11560_v38 = vpop.xlane.xlu0 %4822 }
 0x2a9   : > { %v3932_v30 = vadd.f32 %v3420_v13, %v2636_v4  ;;  %v2629_v29 = vadd.f32 %v2117_v44, %v1333_v15  ;;  %v2630_v16 = vadd.f32 %v2118_v5, %v1334_v17  ;;  %v1343_v57 = vmul.f32 %v16758_v60, %v11284_v6  ;;  %16858 = vst [vmem:[#allocation172_spill] sm:$0xff] %v11560_v38 }
 0x2aa   : > { %5062 = vmax.xlane.f32.xlu0 %v5061_v9  ;;  %v4456_v41 = vsel %vm4234_vm0, %v3931_v25, -inf  ;;  %v2127_v59 = vmul.f32 %v16759_v12, %v11295_v40  ;;  %v1344_v9 = vmul.f32 %v16758_v60, %v11287_v55  ;;  %v2128_v20 = vmul.f32 %v16759_v12, %v11303_v19 }
 0x2ab   : > { %v4457_v18 = vsel %vm4235_vm1, %v3932_v30, -inf  ;;  %v3925_v48 = vadd.f32 %v3413_v27, %v2629_v29  ;;  %v3926_v15 = vadd.f32 %v3414_v14, %v2630_v16  ;;  %v3423_v25 = vmul.f32 %v10104_v7, %v11311_v36  ;;  %v11588_v16 = vpop.xlane.xlu1 %4837 }
 0x2ac   : > { %v5076_v13 = vmax.f32 %v4456_v41, %v4457_v18  ;;  %v2639_v44 = vadd.f32 %v2127_v59, %v1343_v57  ;;  %v3424_v17 = vmul.f32 %v10104_v7, %v11324_v61  ;;  %v2640_v41 = vadd.f32 %v2128_v20, %v1344_v9  ;;  %16859 = vst [vmem:[#allocation173_spill] sm:$0xff] %v11588_v16 }
 0x2ad   : > { %v4450_v4 = vsel %vm4234_vm0, %v3925_v48, -inf  ;;  %v4451_v18 = vsel %vm4235_vm1, %v3926_v15, -inf  ;;  %v1337_v5 = vmul.f32 %v16760_v34, %v11284_v6  ;;  %v1338_v27 = vmul.f32 %v16760_v34, %v11287_v55  ;;  %v11594_v15 = vpop.xlane.xlu0 %4828 }
 0x2ae   : > { %5077 = vmax.xlane.f32.xlu1 %v5076_v13  ;;  %v5067_v14 = vmax.f32 %v4450_v4, %v4451_v18  ;;  %v3935_v48 = vadd.f32 %v3423_v25, %v2639_v44  ;;  %v2121_v30 = vmul.f32 %v16761_v50, %v11295_v40  ;;  %v2122_v29 = vmul.f32 %v16761_v50, %v11303_v19 }
 0x2af   : > { %v3936_v57 = vadd.f32 %v3424_v17, %v2640_v41  ;;  %v3417_v59 = vmul.f32 %v10102_v46, %v11311_v36  ;;  %v3418_v13 = vmul.f32 %v10102_v46, %v11324_v61  ;;  %16860 = vst [vmem:[#allocation179_spill] sm:$0xff] %v11594_v15  ;;  %v1347_v25 = vmul.f32 %v16762_v47, %v11284_v6  ;;  %v16928_v46 = vld [vmem:[#allocation17_spill] sm:$0xff] }
 0x2b0   : > { %5068 = vmax.xlane.f32.xlu0 %v5067_v14  ;;  %v4460_v9 = vsel %vm4234_vm0, %v3935_v48, -inf  ;;  %v2633_v20 = vadd.f32 %v2121_v30, %v1337_v5  ;;  %v2634_v4 = vadd.f32 %v2122_v29, %v1338_v27  ;;  %v2131_v16 = vmul.f32 %v16763_v39, %v11295_v40 }
 0x2b1   : > { %v4461_v44 = vsel %vm4235_vm1, %v3936_v57, -inf  ;;  %v1348_v14 = vmul.f32 %v16762_v47, %v11287_v55  ;;  %v2132_v48 = vmul.f32 %v16763_v39, %v11303_v19  ;;  %v3427_v5 = vmul.f32 %v10133_v33, %v11311_v36  ;;  %v11624_v15 = vpop.xlane.xlu0 %4834 }
 0x2b2   : > { %v5082_v17 = vmax.f32 %v4460_v9, %v4461_v44  ;;  %v3929_v18 = vadd.f32 %v3417_v59, %v2633_v20  ;;  %v3930_v41 = vadd.f32 %v3418_v13, %v2634_v4  ;;  %v3428_v27 = vmul.f32 %v10133_v33, %v11324_v61  ;;  %v16861_v59 = vld [vmem:[#allocation23_spill] sm:$0xff]  ;;  %v11618_v9 = vpop.xlane.xlu1 %4843  ;;  %16864 = vst [vmem:[#allocation72_spill] sm:$0xff] %v11624_v15 }
 0x2b3   : > { %v2643_v57 = vadd.f32 %v2131_v16, %v1347_v25  ;;  %v1341_v13 = vmul.f32 %v16861_v59, %v11284_v6  ;;  %16862 = vst [vmem:[#allocation180_spill] sm:$0xff] %v11618_v9  ;;  %v2644_v4 = vadd.f32 %v2132_v48, %v1348_v14  ;;  %v1342_v44 = vmul.f32 %v16861_v59, %v11287_v55  ;;  %v16865_v16 = vld [vmem:[#allocation59_spill] sm:$0xff] }
 0x2b4   : > { %5083 = vmax.xlane.f32.xlu1 %v5082_v17  ;;  %v4454_v30 = vsel %vm4234_vm0, %v3929_v18, -inf  ;;  %v4455_v29 = vsel %vm4235_vm1, %v3930_v41, -inf  ;;  %v2125_v17 = vmul.f32 %v16863_v22, %v11295_v40  ;;  %v2126_v41 = vmul.f32 %v16863_v22, %v11303_v19  ;;  %v16867_v22 = vld [vmem:[#allocation181_spill] sm:$0xff] }
 0x2b5   : > { %v5073_v20 = vmax.f32 %v4454_v30, %v4455_v29  ;;  %v3939_v18 = vadd.f32 %v3427_v5, %v2643_v57  ;;  %v3421_v25 = vmul.f32 %v16865_v16, %v11311_v36  ;;  %v3422_v9 = vmul.f32 %v16865_v16, %v11324_v61  ;;  %v16866_v57 = vld [vmem:[#allocation48_spill] sm:$0xff] }
 0x2b6   : > { %v3940_v14 = vadd.f32 %v3428_v27, %v2644_v4  ;;  %v2637_v48 = vadd.f32 %v2125_v17, %v1341_v13  ;;  %v2638_v29 = vadd.f32 %v2126_v41, %v1342_v44  ;;  %v1351_v38 = vmul.f32 %v16866_v57, %v11284_v6  ;;  %v16869_v17 = vld [vmem:[#allocation164_spill] sm:$0xff] }
 0x2b7   : > { %5074 = vmax.xlane.f32.xlu0 %v5073_v20  ;;  %v4464_v30 = vsel %vm4234_vm0, %v3939_v18, -inf  ;;  %v2135_v59 = vmul.f32 %v16867_v22, %v11295_v40  ;;  %v1352_v27 = vmul.f32 %v16866_v57, %v11287_v55  ;;  %v2136_v13 = vmul.f32 %v16867_v22, %v11303_v19  ;;  %v11644_v20 = vpop.xlane.xlu1 %4849  ;;  %v16876_v22 = vld [vmem:[#allocation96_spill] sm:$0xff] }
 0x2b8   : > { %v4465_v15 = vsel %vm4235_vm1, %v3940_v14, -inf  ;;  %v3933_v5 = vadd.f32 %v3421_v25, %v2637_v48  ;;  %v3934_v39 = vadd.f32 %v3422_v9, %v2638_v29  ;;  %16868 = vst [vmem:[#allocation76_spill] sm:$0xff] %v11644_v20  ;;  %v3431_v18 = vmul.f32 %v16869_v17, %v11311_v36  ;;  %v16871_v14 = vld [vmem:[#allocation30_spill] sm:$0xff]  ;;  %v16901_v57 = vld [vmem:[#allocation124_spill] sm:$0xff] }
 0x2b9   : > { %v5088_v33 = vmax.f32 %v4464_v30, %v4465_v15  ;;  %v2647_v44 = vadd.f32 %v2135_v59, %v1351_v38  ;;  %v3432_v41 = vmul.f32 %v16869_v17, %v11324_v61  ;;  %v11652_v15 = vpop.xlane.xlu0 %4840  ;;  %v2648_v25 = vadd.f32 %v2136_v13, %v1352_v27  ;;  %v16872_v29 = vld [vmem:[#allocation178_spill] sm:$0xff] }
 0x2ba   : > { %v4458_v4 = vsel %vm4234_vm0, %v3933_v5, -inf  ;;  %16870 = vst [vmem:[#allocation86_spill] sm:$0xff] %v11652_v15  ;;  %v4459_v9 = vsel %vm4235_vm1, %v3934_v39, -inf  ;;  %v1345_v48 = vmul.f32 %v16871_v14, %v11284_v6  ;;  %v1346_v30 = vmul.f32 %v16871_v14, %v11287_v55 }
 0x2bb   : > { %5089 = vmax.xlane.f32.xlu1 %v5088_v33  ;;  %v5079_v38 = vmax.f32 %v4458_v4, %v4459_v9  ;;  %v3943_v59 = vadd.f32 %v3431_v18, %v2647_v44  ;;  %v2129_v5 = vmul.f32 %v16872_v29, %v11295_v40  ;;  %v2130_v20 = vmul.f32 %v16872_v29, %v11303_v19  ;;  %v16873_v33 = vld [vmem:[#allocation163_spill] sm:$0xff]  ;;  %v16874_v18 = vld [vmem:[#allocation62_spill] sm:$0xff]  ;;  %v11674_v29 = vpop.xlane.xlu1 %4855 }
 0x2bc   : > { %v3944_v15 = vadd.f32 %v3432_v41, %v2648_v25  ;;  %v3425_v17 = vmul.f32 %v16873_v33, %v11311_v36  ;;  %v3426_v39 = vmul.f32 %v16873_v33, %v11324_v61  ;;  %v1355_v9 = vmul.f32 %v16874_v18, %v11284_v6  ;;  %16875 = vst [vmem:[#allocation92_spill] sm:$0xff] %v11674_v29  ;;  %v16880_v29 = vld [vmem:[#allocation83_spill] sm:$0xff] }
 0x2bd   : > { %5080 = vmax.xlane.f32.xlu0 %v5079_v38  ;;  %v4468_v27 = vsel %vm4234_vm0, %v3943_v59, -inf  ;;  %v2641_v13 = vadd.f32 %v2129_v5, %v1345_v48  ;;  %v2642_v4 = vadd.f32 %v2130_v20, %v1346_v30  ;;  %v2139_v33 = vmul.f32 %v16876_v22, %v11295_v40  ;;  %v11678_v38 = vpop.xlane.xlu0 %4846 }
 0x2be   : > { %v4469_v44 = vsel %vm4235_vm1, %v3944_v15, -inf  ;;  %16877 = vst [vmem:[#allocation79_spill] sm:$0xff] %v11678_v38  ;;  %v1356_v48 = vmul.f32 %v16874_v18, %v11287_v55  ;;  %v2140_v20 = vmul.f32 %v16876_v22, %v11303_v19  ;;  %v16878_v15 = vld [vmem:[#allocation166_spill] sm:$0xff]  ;;  %v2133_v22 = vmul.f32 %v16880_v29, %v11295_v40 }
 0x2bf   : > { %v5094_v41 = vmax.f32 %v4468_v27, %v4469_v44  ;;  %v3937_v25 = vadd.f32 %v3425_v17, %v2641_v13  ;;  %v3938_v14 = vadd.f32 %v3426_v39, %v2642_v4  ;;  %v3435_v30 = vmul.f32 %v16878_v15, %v11311_v36  ;;  %v16879_v27 = vld [vmem:[#allocation38_spill] sm:$0xff] }
 0x2c0   : > { %v3436_v59 = vmul.f32 %v16878_v15, %v11324_v61  ;;  %v2651_v39 = vadd.f32 %v2139_v33, %v1355_v9  ;;  %v1349_v13 = vmul.f32 %v16879_v27, %v11284_v6  ;;  %v2652_v44 = vadd.f32 %v2140_v20, %v1356_v48  ;;  %v11704_v48 = vpop.xlane.xlu1 %4861 }
 0x2c1   : > { %5095 = vmax.xlane.f32.xlu1 %v5094_v41  ;;  %v4462_v17 = vsel %vm4234_vm0, %v3937_v25, -inf  ;;  %v4463_v5 = vsel %vm4235_vm1, %v3938_v14, -inf  ;;  %v1350_v38 = vmul.f32 %v16879_v27, %v11287_v55  ;;  %v2134_v41 = vmul.f32 %v16880_v29, %v11303_v19  ;;  %v16881_v25 = vld [vmem:[#allocation58_spill] sm:$0xff]  ;;  %16882 = vst [vmem:[#allocation81_spill] sm:$0xff] %v11704_v48  ;;  %v16884_v29 = vld [vmem:[#allocation75_spill] sm:$0xff] }
 0x2c2   : > { %v5085_v4 = vmax.f32 %v4462_v17, %v4463_v5  ;;  %v3947_v15 = vadd.f32 %v3435_v30, %v2651_v39  ;;  %v3429_v18 = vmul.f32 %v16881_v25, %v11311_v36  ;;  %v3430_v14 = vmul.f32 %v16881_v25, %v11324_v61  ;;  %v11708_v5 = vpop.xlane.xlu0 %4852  ;;  %v16885_v25 = vld [vmem:[#allocation186_spill] sm:$0xff] }
 0x2c3   : > { %v3948_v33 = vadd.f32 %v3436_v59, %v2652_v44  ;;  %v2645_v9 = vadd.f32 %v2133_v22, %v1349_v13  ;;  %v2646_v17 = vadd.f32 %v2134_v41, %v1350_v38  ;;  %16883 = vst [vmem:[#allocation98_spill] sm:$0xff] %v11708_v5  ;;  %v1359_v27 = vmul.f32 %v16884_v29, %v11284_v6 }
 0x2c4   : > { %5086 = vmax.xlane.f32.xlu0 %v5085_v4  ;;  %v4472_v20 = vsel %vm4234_vm0, %v3947_v15, -inf  ;;  %v2143_v4 = vmul.f32 %v16885_v25, %v11295_v40  ;;  %v1360_v13 = vmul.f32 %v16884_v29, %v11287_v55  ;;  %v2144_v38 = vmul.f32 %v16885_v25, %v11303_v19  ;;  %v16893_v29 = vld [vmem:[#allocation109_spill] sm:$0xff] }
 0x2c5   : > { %v4473_v30 = vsel %vm4235_vm1, %v3948_v33, -inf  ;;  %v3941_v39 = vadd.f32 %v3429_v18, %v2645_v9  ;;  %v3942_v22 = vadd.f32 %v3430_v14, %v2646_v17  ;;  %v16886_v18 = vld [vmem:[#allocation69_spill] sm:$0xff]  ;;  %v2151_v16 = vmul.f32 %v16901_v57, %v11295_v40 }
 0x2c6   : > { %v5100_v59 = vmax.f32 %v4472_v20, %v4473_v30  ;;  %v2655_v44 = vadd.f32 %v2143_v4, %v1359_v27  ;;  %v3439_v41 = vmul.f32 %v16886_v18, %v11311_v36  ;;  %v3440_v33 = vmul.f32 %v16886_v18, %v11324_v61  ;;  %v16887_v20 = vld [vmem:[#allocation47_spill] sm:$0xff]  ;;  %v16888_v27 = vld [vmem:[#allocation182_spill] sm:$0xff]  ;;  %v11736_v18 = vpop.xlane.xlu1 %4867  ;;  %v11742_v25 = vpop.xlane.xlu0 %4858 }
 0x2c7   : > { %v4466_v15 = vsel %vm4234_vm0, %v3941_v39, -inf  ;;  %v4467_v14 = vsel %vm4235_vm1, %v3942_v22, -inf  ;;  %v2656_v9 = vadd.f32 %v2144_v38, %v1360_v13  ;;  %v1353_v17 = vmul.f32 %v16887_v20, %v11284_v6  ;;  %16889 = vst [vmem:[#allocation99_spill] sm:$0xff] %v11736_v18  ;;  %v16890_v22 = vld [vmem:[#allocation66_spill] sm:$0xff]  ;;  %16891 = vst [vmem:[#allocation85_spill] sm:$0xff] %v11742_v25  ;;  %v16892_v18 = vld [vmem:[#allocation88_spill] sm:$0xff] }
 0x2c8   : > { %5101 = vmax.xlane.f32.xlu1 %v5100_v59  ;;  %v1354_v30 = vmul.f32 %v16887_v20, %v11287_v55  ;;  %v5091_v48 = vmax.f32 %v4466_v15, %v4467_v14  ;;  %v3951_v39 = vadd.f32 %v3439_v41, %v2655_v44  ;;  %v2137_v4 = vmul.f32 %v16888_v27, %v11295_v40 }
 0x2c9   : > { %v2138_v5 = vmul.f32 %v16888_v27, %v11303_v19  ;;  %v3952_v59 = vadd.f32 %v3440_v33, %v2656_v9  ;;  %v3433_v13 = vmul.f32 %v16890_v22, %v11311_v36  ;;  %v3434_v38 = vmul.f32 %v16890_v22, %v11324_v61 }
 0x2ca   : > { %5092 = vmax.xlane.f32.xlu0 %v5091_v48  ;;  %v4476_v15 = vsel %vm4234_vm0, %v3951_v39, -inf  ;;  %v2649_v44 = vadd.f32 %v2137_v4, %v1353_v17  ;;  %v1363_v33 = vmul.f32 %v16892_v18, %v11284_v6  ;;  %v2147_v22 = vmul.f32 %v16893_v29, %v11295_v40 }
 0x2cb   : > { %v2650_v41 = vadd.f32 %v2138_v5, %v1354_v30  ;;  %v4477_v14 = vsel %vm4235_vm1, %v3952_v59, -inf  ;;  %v1364_v48 = vmul.f32 %v16892_v18, %v11287_v55  ;;  %v2148_v39 = vmul.f32 %v16893_v29, %v11303_v19  ;;  %v16894_v5 = vld [vmem:[#allocation77_spill] sm:$0xff]  ;;  %v11772_v29 = vpop.xlane.xlu0 %4864 }
 0x2cc   : > { %v5106_v9 = vmax.f32 %v4476_v15, %v4477_v14  ;;  %v3945_v27 = vadd.f32 %v3433_v13, %v2649_v44  ;;  %v3443_v17 = vmul.f32 %v16894_v5, %v11311_v36  ;;  %v3444_v30 = vmul.f32 %v16894_v5, %v11324_v61  ;;  %v11766_v44 = vpop.xlane.xlu1 %4873  ;;  %v16897_v5 = vld [vmem:[#allocation97_spill] sm:$0xff]  ;;  %16898 = vst [vmem:[#allocation106_spill] sm:$0xff] %v11772_v29 }
 0x2cd   : > { %v3946_v20 = vadd.f32 %v3434_v38, %v2650_v41  ;;  %v2659_v13 = vadd.f32 %v2147_v22, %v1363_v33  ;;  %v16895_v38 = vld [vmem:[#allocation61_spill] sm:$0xff]  ;;  %16896 = vst [vmem:[#allocation90_spill] sm:$0xff] %v11766_v44  ;;  %v2660_v14 = vadd.f32 %v2148_v39, %v1364_v48  ;;  %v16899_v22 = vld [vmem:[#allocation71_spill] sm:$0xff] }
 0x2ce   : > { %5107 = vmax.xlane.f32.xlu1 %v5106_v9  ;;  %v4470_v4 = vsel %vm4234_vm0, %v3945_v27, -inf  ;;  %v1357_v15 = vmul.f32 %v16895_v38, %v11284_v6  ;;  %v1358_v25 = vmul.f32 %v16895_v38, %v11287_v55  ;;  %v2141_v9 = vmul.f32 %v16897_v5, %v11295_v40 }
 0x2cf   : > { %v4471_v59 = vsel %vm4235_vm1, %v3946_v20, -inf  ;;  %v3955_v27 = vadd.f32 %v3443_v17, %v2659_v13  ;;  %v2142_v20 = vmul.f32 %v16897_v5, %v11303_v19  ;;  %v3437_v33 = vmul.f32 %v16899_v22, %v11311_v36  ;;  %v16900_v5 = vld [vmem:[#allocation102_spill] sm:$0xff] }
 0x2d0   : > { %v5097_v41 = vmax.f32 %v4470_v4, %v4471_v59  ;;  %v3438_v44 = vmul.f32 %v16899_v22, %v11324_v61  ;;  %v3956_v48 = vadd.f32 %v3444_v30, %v2660_v14  ;;  %v2653_v39 = vadd.f32 %v2141_v9, %v1357_v15  ;;  %v11788_v22 = vpop.xlane.xlu1 %4879 }
 0x2d1   : > { %v4480_v4 = vsel %vm4234_vm0, %v3955_v27, -inf  ;;  %v2654_v59 = vadd.f32 %v2142_v20, %v1358_v25  ;;  %v1367_v18 = vmul.f32 %v16900_v5, %v11284_v6  ;;  %16902 = vst [vmem:[#allocation184_spill] sm:$0xff] %v11788_v22  ;;  %v1368_v25 = vmul.f32 %v16900_v5, %v11287_v55  ;;  %v16905_v20 = vld [vmem:[#allocation74_spill] sm:$0xff]  ;;  %v16927_v5 = vld [vmem:[#allocation16_spill] sm:$0xff] }
 0x2d2   : > { %5098 = vmax.xlane.f32.xlu0 %v5097_v41  ;;  %v4481_v29 = vsel %vm4235_vm1, %v3956_v48, -inf  ;;  %v3949_v17 = vadd.f32 %v3437_v33, %v2653_v39  ;;  %v2152_v15 = vmul.f32 %v16901_v57, %v11303_v19  ;;  %v11798_v41 = vpop.xlane.xlu0 %4870  ;;  %v1361_v33 = vmul.f32 %v16905_v20, %v11284_v6 }
 0x2d3   : > { %v5112_v13 = vmax.f32 %v4480_v4, %v4481_v29  ;;  %v3950_v38 = vadd.f32 %v3438_v44, %v2654_v59  ;;  %v16903_v29 = vld [vmem:[#allocation84_spill] sm:$0xff]  ;;  %16904 = vst [vmem:[#allocation93_spill] sm:$0xff] %v11798_v41  ;;  %v2663_v9 = vadd.f32 %v2151_v16, %v1367_v18  ;;  %v1362_v4 = vmul.f32 %v16905_v20, %v11287_v55  ;;  %v16906_v59 = vld [vmem:[#allocation187_spill] sm:$0xff] }
 0x2d4   : > { %v4474_v30 = vsel %vm4234_vm0, %v3949_v17, -inf  ;;  %v3447_v44 = vmul.f32 %v16903_v29, %v11311_v36  ;;  %v3448_v27 = vmul.f32 %v16903_v29, %v11324_v61  ;;  %v2664_v39 = vadd.f32 %v2152_v15, %v1368_v25  ;;  %v16907_v16 = vld [vmem:[#allocation80_spill] sm:$0xff] }
 0x2d5   : > { %5113 = vmax.xlane.f32.xlu1 %v5112_v13  ;;  %v4475_v14 = vsel %vm4235_vm1, %v3950_v38, -inf  ;;  %v2145_v17 = vmul.f32 %v16906_v59, %v11295_v40  ;;  %v2146_v13 = vmul.f32 %v16906_v59, %v11303_v19  ;;  %v3441_v18 = vmul.f32 %v16907_v16, %v11311_v36 }
 0x2d6   : > { %v5103_v48 = vmax.f32 %v4474_v30, %v4475_v14  ;;  %v3959_v22 = vadd.f32 %v3447_v44, %v2663_v9  ;;  %v3442_v38 = vmul.f32 %v16907_v16, %v11324_v61  ;;  %v3960_v41 = vadd.f32 %v3448_v27, %v2664_v39  ;;  %v16908_v14 = vld [vmem:[#allocation115_spill] sm:$0xff]  ;;  %v11820_v44 = vpop.xlane.xlu1 %4885 }
 0x2d7   : > { %v2657_v30 = vadd.f32 %v2145_v17, %v1361_v33  ;;  %v2658_v15 = vadd.f32 %v2146_v13, %v1362_v4  ;;  %v1371_v20 = vmul.f32 %v16908_v14, %v11284_v6  ;;  %16909 = vst [vmem:[#allocation94_spill] sm:$0xff] %v11820_v44  ;;  %v1372_v29 = vmul.f32 %v16908_v14, %v11287_v55  ;;  %v11828_v33 = vpop.xlane.xlu0 %4876  ;;  %v16912_v17 = vld [vmem:[#allocation42_spill] sm:$0xff]  ;;  %v16913_v44 = vld [vmem:[#allocation87_spill] sm:$0xff] }
 0x2d8   : > { %5104 = vmax.xlane.f32.xlu0 %v5103_v48  ;;  %v4484_v25 = vsel %vm4234_vm0, %v3959_v22, -inf  ;;  %v4485_v9 = vsel %vm4235_vm1, %v3960_v41, -inf  ;;  %v16910_v48 = vld [vmem:[#allocation122_spill] sm:$0xff]  ;;  %16911 = vst [vmem:[#allocation111_spill] sm:$0xff] %v11828_v33  ;;  %v3451_v13 = vmul.f32 %v16912_v17, %v11311_v36  ;;  %v1365_v14 = vmul.f32 %v16913_v44, %v11284_v6 }
 0x2d9   : > { %v3953_v59 = vadd.f32 %v3441_v18, %v2657_v30  ;;  %v2155_v27 = vmul.f32 %v16910_v48, %v11295_v40  ;;  %v5118_v39 = vmax.f32 %v4484_v25, %v4485_v9  ;;  %v3954_v22 = vadd.f32 %v3442_v38, %v2658_v15  ;;  %v16914_v9 = vld [vmem:[#allocation110_spill] sm:$0xff] }
 0x2da   : > { %v2156_v4 = vmul.f32 %v16910_v48, %v11303_v19  ;;  %v3452_v30 = vmul.f32 %v16912_v17, %v11324_v61  ;;  %v1366_v15 = vmul.f32 %v16913_v44, %v11287_v55  ;;  %v2149_v33 = vmul.f32 %v16914_v9, %v11295_v40 }
 0x2db   : > { %v4478_v41 = vsel %vm4234_vm0, %v3953_v59, -inf  ;;  %v2667_v18 = vadd.f32 %v2155_v27, %v1371_v20  ;;  %5119 = vmax.xlane.f32.xlu1 %v5118_v39  ;;  %v4479_v38 = vsel %vm4235_vm1, %v3954_v22, -inf  ;;  %v2150_v20 = vmul.f32 %v16914_v9, %v11303_v19  ;;  %v16915_v27 = vld [vmem:[#allocation89_spill] sm:$0xff] }
 0x2dc   : > { %v2668_v25 = vadd.f32 %v2156_v4, %v1372_v29  ;;  %v5109_v48 = vmax.f32 %v4478_v41, %v4479_v38  ;;  %v3445_v17 = vmul.f32 %v16915_v27, %v11311_v36  ;;  %v2661_v39 = vadd.f32 %v2149_v33, %v1365_v14  ;;  %v11852_v29 = vpop.xlane.xlu1 %4891  ;;  %v11856_v41 = vpop.xlane.xlu0 %4882  ;;  %v16918_v38 = vld [vmem:[#allocation129_spill] sm:$0xff] }
 0x2dd   : > { %v3963_v59 = vadd.f32 %v3451_v13, %v2667_v18  ;;  %v3446_v22 = vmul.f32 %v16915_v27, %v11324_v61  ;;  %16916 = vst [vmem:[#allocation112_spill] sm:$0xff] %v11852_v29  ;;  %v2662_v44 = vadd.f32 %v2150_v20, %v1366_v15  ;;  %16917 = vst [vmem:[#allocation100_spill] sm:$0xff] %v11856_v41 }
 0x2de   : > { %v3964_v16 = vadd.f32 %v3452_v30, %v2668_v25  ;;  %5110 = vmax.xlane.f32.xlu0 %v5109_v48  ;;  %v3957_v18 = vadd.f32 %v3445_v17, %v2661_v39  ;;  %v1375_v30 = vmul.f32 %v16918_v38, %v11284_v6  ;;  %v1376_v25 = vmul.f32 %v16918_v38, %v11287_v55  ;;  %v16919_v48 = vld [vmem:[#allocation136_spill] sm:$0xff] }
 0x2df   : > { %v4488_v4 = vsel %vm4234_vm0, %v3963_v59, -inf  ;;  %v3958_v33 = vadd.f32 %v3446_v22, %v2662_v44  ;;  %v2159_v29 = vmul.f32 %v16919_v48, %v11295_v40  ;;  %v2160_v59 = vmul.f32 %v16919_v48, %v11303_v19  ;;  %v16921_v22 = vld [vmem:[#allocation101_spill] sm:$0xff]  ;;  %v16922_v48 = vld [vmem:[#allocation188_spill] sm:$0xff] }
 0x2e0   : > { %v4489_v13 = vsel %vm4235_vm1, %v3964_v16, -inf  ;;  %v4482_v15 = vsel %vm4234_vm0, %v3957_v18, -inf  ;;  %v16920_v16 = vld [vmem:[#allocation95_spill] sm:$0xff]  ;;  %v2153_v38 = vmul.f32 %v16922_v48, %v11295_v40  ;;  %v2154_v27 = vmul.f32 %v16922_v48, %v11303_v19  ;;  %v11891_v57 = vpop.xlane.xlu0 %4888 }
 0x2e1   : > { %v5124_v14 = vmax.f32 %v4488_v4, %v4489_v13  ;;  %v3455_v17 = vmul.f32 %v16920_v16, %v11311_v36  ;;  %v3456_v20 = vmul.f32 %v16920_v16, %v11324_v61  ;;  %v4483_v44 = vsel %vm4235_vm1, %v3958_v33, -inf  ;;  %v775_v16 = vld [vmem:[%s8251_s22 + $0x20] sm:$0x77]  ;;  %16925 = vst [vmem:[#allocation119_spill] sm:$0xff] %v11891_v57  ;;  %v16926_v48 = vld [vmem:[#allocation15_spill] sm:$0xff] }
 0x2e2   : > { %v2671_v39 = vadd.f32 %v2159_v29, %v1375_v30  ;;  %v1369_v4 = vmul.f32 %v16921_v22, %v11284_v6  ;;  %v1370_v13 = vmul.f32 %v16921_v22, %v11287_v55  ;;  %v5115_v18 = vmax.f32 %v4482_v15, %v4483_v44  ;;  %v16924_v29 = vld [vmem:[#allocation91_spill] sm:$0xff] }
 0x2e3   : > { %5125 = vmax.xlane.f32.xlu1 %v5124_v14  ;;  %v2672_v41 = vadd.f32 %v2160_v59, %v1376_v25  ;;  %v11885_v14 = vpop.xlane.xlu1 %4897  ;;  %v3449_v30 = vmul.f32 %v16924_v29, %v11311_v36  ;;  %v3450_v33 = vmul.f32 %v16924_v29, %v11324_v61  ;;  %v854_v22 = vrot.slane %v775_v16, %v16926_v48 }
 0x2e4   : > { %16923 = vst [vmem:[#allocation104_spill] sm:$0xff] %v11885_v14  ;;  %v3967_v9 = vadd.f32 %v3455_v17, %v2671_v39  ;;  %5116 = vmax.xlane.f32.xlu0 %v5115_v18  ;;  %v2665_v15 = vadd.f32 %v2153_v38, %v1369_v4  ;;  %v2666_v59 = vadd.f32 %v2154_v27, %v1370_v13  ;;  %v16929_v38 = vld [vmem:[#allocation20_spill] sm:$0xff] }
 0x2e5   : > { %v3968_v25 = vadd.f32 %v3456_v20, %v2672_v41  ;;  %v858_v14 = vrot.slane %v775_v16, %v16927_v5  ;;  %v1670_v29 = vrot.slane %v775_v16, %v16928_v46  ;;  %v11901_v18 = vrot.slane %v854_v22, %v16926_v48  ;;  %v16931_v22 = vld [vmem:[#allocation5_spill] sm:$0xff] }
 0x2e6   : > { %v4492_v44 = vsel %vm4234_vm0, %v3967_v9, -inf  ;;  %v3961_v39 = vadd.f32 %v3449_v30, %v2665_v15  ;;  %v3962_v47 = vadd.f32 %v3450_v33, %v2666_v59  ;;  %v1674_v20 = vrot.slane %v775_v16, %v16929_v38  ;;  %v11921_v59 = vpop.xlane.xlu0 %4894 }
 0x2e7   : > { %v4493_v17 = vsel %vm4235_vm1, %v3968_v25, -inf  ;;  %v11904_v27 = vrot.slane %v858_v14, %v16926_v48  ;;  %v11912_v4 = vrot.slane %v1670_v29, %v16928_v46  ;;  %v11914_v13 = vpop.xlane.xlu1 %4903  ;;  %v1379_v33 = vmul.f32 %v16931_v22, %v11901_v18  ;;  %v16932_v25 = vld [vmem:[#allocation21_spill] sm:$0xff]  ;;  %16933 = vst [vmem:[#allocation107_spill] sm:$0xff] %v11921_v59  ;;  %v16934_v29 = vld [vmem:[#allocation142_spill] sm:$0xff] }
 0x2e8   : > { %v5130_v50 = vmax.f32 %v4492_v44, %v4493_v17  ;;  %v4486_v9 = vsel %vm4234_vm0, %v3961_v39, -inf  ;;  %v4487_v41 = vsel %vm4235_vm1, %v3962_v47, -inf  ;;  %16930 = vst [vmem:[#allocation118_spill] sm:$0xff] %v11914_v13  ;;  %v2966_v15 = vrot.slane %v775_v16, %v16932_v25  ;;  %v16935_v17 = vld [vmem:[#allocation22_spill] sm:$0xff]  ;;  %v16937_v59 = vld [vmem:[#allocation125_spill] sm:$0xff] }
 0x2e9   : > { %v5121_v30 = vmax.f32 %v4486_v9, %v4487_v41  ;;  %v1380_v14 = vmul.f32 %v16931_v22, %v11904_v27  ;;  %v11924_v47 = vrot.slane %v1674_v20, %v16928_v46  ;;  %v2163_v44 = vmul.f32 %v16934_v29, %v11912_v4 }
 0x2ea   : > { %5131 = vmax.xlane.f32.xlu1 %v5130_v50  ;;  %v2970_v39 = vrot.slane %v775_v16, %v16935_v17  ;;  %v16936_v50 = vld [vmem:[#allocation114_spill] sm:$0xff]  ;;  %v11932_v41 = vrot.slane %v2966_v15, %v16932_v25  ;;  %v2157_v13 = vmul.f32 %v16937_v59, %v11295_v40  ;;  %v2158_v20 = vmul.f32 %v16937_v59, %v11303_v19 }
 0x2eb   : > { %v1373_v9 = vmul.f32 %v16936_v50, %v11284_v6  ;;  %5122 = vmax.xlane.f32.xlu0 %v5121_v30  ;;  %v1374_v57 = vmul.f32 %v16936_v50, %v11287_v55  ;;  %v2164_v22 = vmul.f32 %v16934_v29, %v11924_v47  ;;  %v2675_v16 = vadd.f32 %v2163_v44, %v1379_v33  ;;  %v11953_v29 = vpop.xlane.xlu1 %4909 }
 0x2ec   : > { %v11943_v17 = vrot.slane %v2970_v39, %v16932_v25  ;;  %v3453_v30 = vmul.f32 %v16821_v43, %v11311_v36  ;;  %v3459_v15 = vmul.f32 %v16823_v28, %v11932_v41  ;;  %v3454_v46 = vmul.f32 %v16821_v43, %v11324_v61  ;;  %16938 = vst [vmem:[#allocation185_spill] sm:$0xff] %v11953_v29  ;;  %v11955_v25 = vpop.xlane.xlu0 %4900 }
 0x2ed   : > { %v2669_v50 = vadd.f32 %v2157_v13, %v1373_v9  ;;  %v2670_v38 = vadd.f32 %v2158_v20, %v1374_v57  ;;  %v2676_v5 = vadd.f32 %v2164_v22, %v1380_v14  ;;  %16939 = vst [vmem:[#allocation127_spill] sm:$0xff] %v11955_v25  ;;  %v1383_v34 = vmul.f32 %v16824_v51, %v11901_v18 }
 0x2ee   : > { %v3460_v59 = vmul.f32 %v16823_v28, %v11943_v17  ;;  %v3971_v33 = vadd.f32 %v3459_v15, %v2675_v16  ;;  %v2167_v57 = vmul.f32 %v16825_v11, %v11912_v4  ;;  %v3463_v20 = vmul.f32 %v16828_v2, %v11932_v41 }
 0x2ef   : > { %v3965_v44 = vadd.f32 %v3453_v30, %v2669_v50  ;;  %v3966_v39 = vadd.f32 %v3454_v46, %v2670_v38  ;;  %v1384_v46 = vmul.f32 %v16824_v51, %v11904_v27  ;;  %v3464_v16 = vmul.f32 %v16828_v2, %v11943_v17 }
 0x2f0   : > { %v3972_v48 = vadd.f32 %v3460_v59, %v2676_v5  ;;  %v4496_v13 = vsel %vm4234_vm0, %v3971_v33, -inf  ;;  %v2168_v59 = vmul.f32 %v16825_v11, %v11924_v47  ;;  %v2679_v50 = vadd.f32 %v2167_v57, %v1383_v34 }
 0x2f1   : > { %v4490_v22 = vsel %vm4234_vm0, %v3965_v44, -inf  ;;  %v4491_v14 = vsel %vm4235_vm1, %v3966_v39, -inf  ;;  %v1377_v30 = vmul.f32 %v16829_v52, %v11284_v6  ;;  %v2161_v33 = vmul.f32 %v16830_v62, %v11295_v40  ;;  %v11985_v44 = vpop.xlane.xlu1 %4915 }
 0x2f2   : > { %v4497_v5 = vsel %vm4235_vm1, %v3972_v48, -inf  ;;  %v5127_v38 = vmax.f32 %v4490_v22, %v4491_v14  ;;  %v2680_v15 = vadd.f32 %v2168_v59, %v1384_v46  ;;  %v1378_v48 = vmul.f32 %v16829_v52, %v11287_v55  ;;  %16940 = vst [vmem:[#allocation189_spill] sm:$0xff] %v11985_v44 }
 0x2f3   : > { %v5136_v9 = vmax.f32 %v4496_v13, %v4497_v5  ;;  %v2162_v34 = vmul.f32 %v16830_v62, %v11303_v19  ;;  %v3975_v39 = vadd.f32 %v3463_v20, %v2679_v50  ;;  %v3457_v57 = vmul.f32 %v16831_v54, %v11311_v36  ;;  %v11991_v13 = vpop.xlane.xlu0 %4906 }
 0x2f4   : > { %5128 = vmax.xlane.f32.xlu0 %v5127_v38  ;;  %v3458_v6 = vmul.f32 %v16831_v54, %v11324_v61  ;;  %16941 = vst [vmem:[#allocation113_spill] sm:$0xff] %v11991_v13  ;;  %v3976_v22 = vadd.f32 %v3464_v16, %v2680_v15  ;;  %v2673_v55 = vadd.f32 %v2161_v33, %v1377_v30 }
 0x2f5   : > { %5137 = vmax.xlane.f32.xlu1 %v5136_v9  ;;  %v2674_v14 = vadd.f32 %v2162_v34, %v1378_v48  ;;  %v4500_v40 = vsel %vm4234_vm0, %v3975_v39, -inf  ;;  %v1387_v19 = vmul.f32 %v16832_v31, %v11901_v18  ;;  %v2171_v36 = vmul.f32 %v16834_v26, %v11912_v4  ;;  %v12013_v48 = vpop.xlane.xlu1 %4921  ;;  %v16943_v39 = vld [vmem:[#allocation7_spill] sm:$0xff] }
 0x2f6   : > { %v4501_v46 = vsel %vm4235_vm1, %v3976_v22, -inf  ;;  %v3969_v5 = vadd.f32 %v3457_v57, %v2673_v55  ;;  %v1388_v59 = vmul.f32 %v16832_v31, %v11904_v27  ;;  %v2172_v50 = vmul.f32 %v16834_v26, %v11924_v47  ;;  %16942 = vst [vmem:[#allocation116_spill] sm:$0xff] %v12013_v48 }
 0x2f7   : > { %v3970_v38 = vadd.f32 %v3458_v6, %v2674_v14  ;;  %v5142_v61 = vmax.f32 %v4500_v40, %v4501_v46  ;;  %v3467_v9 = vmul.f32 %v16836_v45, %v11932_v41  ;;  %v2683_v30 = vadd.f32 %v2171_v36, %v1387_v19  ;;  %v12019_v22 = vpop.xlane.xlu0 %4912  ;;  %v16945_v14 = vld [vmem:[#allocation141_spill] sm:$0xff] }
 0x2f8   : > { %v4494_v20 = vsel %vm4234_vm0, %v3969_v5, -inf  ;;  %v3468_v15 = vmul.f32 %v16836_v45, %v11943_v17  ;;  %v2684_v34 = vadd.f32 %v2172_v50, %v1388_v59  ;;  %v1381_v57 = vmul.f32 %v16943_v39, %v11901_v18  ;;  %16944 = vst [vmem:[#allocation193_spill] sm:$0xff] %v12019_v22  ;;  %v16946_v46 = vld [vmem:[#allocation145_spill] sm:$0xff] }
 0x2f9   : > { %v4495_v16 = vsel %vm4235_vm1, %v3970_v38, -inf  ;;  %5143 = vmax.xlane.f32.xlu1 %v5142_v61  ;;  %v1382_v6 = vmul.f32 %v16943_v39, %v11904_v27  ;;  %v3979_v55 = vadd.f32 %v3467_v9, %v2683_v30  ;;  %v2165_v40 = vmul.f32 %v16945_v14, %v11912_v4  ;;  %v12039_v44 = vpop.xlane.xlu1 %4927 }
 0x2fa   : > { %v5133_v33 = vmax.f32 %v4494_v20, %v4495_v16  ;;  %v2166_v19 = vmul.f32 %v16945_v14, %v11924_v47  ;;  %v3461_v5 = vmul.f32 %v16946_v46, %v11932_v41  ;;  %v3980_v38 = vadd.f32 %v3468_v15, %v2684_v34  ;;  %v16947_v16 = vld [vmem:[#allocation168_spill] sm:$0xff]  ;;  %16948 = vst [vmem:[#allocation40_spill] sm:$0xff] %v12039_v44 }
 0x2fb   : > { %v3462_v36 = vmul.f32 %v16946_v46, %v11943_v17  ;;  %v4504_v61 = vsel %vm4234_vm0, %v3979_v55, -inf  ;;  %v2677_v59 = vadd.f32 %v2165_v40, %v1381_v57  ;;  %v1391_v20 = vmul.f32 %v16840_v32, %v11901_v18  ;;  %v16949_v55 = vld [vmem:[#allocation44_spill] sm:$0xff] }
 0x2fc   : > { %5134 = vmax.xlane.f32.xlu0 %v5133_v33  ;;  %v2678_v50 = vadd.f32 %v2166_v19, %v1382_v6  ;;  %v4505_v9 = vsel %vm4235_vm1, %v3980_v38, -inf  ;;  %v2175_v30 = vmul.f32 %v16947_v16, %v11912_v4  ;;  %v1392_v34 = vmul.f32 %v16840_v32, %v11904_v27  ;;  %v12047_v38 = vpop.xlane.xlu0 %4918 }
 0x2fd   : > { %v5148_v48 = vmax.f32 %v4504_v61, %v4505_v9  ;;  %v3973_v33 = vadd.f32 %v3461_v5, %v2677_v59  ;;  %v2176_v57 = vmul.f32 %v16947_v16, %v11924_v47  ;;  %v3471_v40 = vmul.f32 %v16949_v55, %v11932_v41  ;;  %16950 = vst [vmem:[#allocation120_spill] sm:$0xff] %v12047_v38  ;;  %v16951_v61 = vld [vmem:[#allocation6_spill] sm:$0xff] }
 0x2fe   : > { %v3974_v15 = vadd.f32 %v3462_v36, %v2678_v50  ;;  %v2687_v6 = vadd.f32 %v2175_v30, %v1391_v20  ;;  %v3472_v19 = vmul.f32 %v16949_v55, %v11943_v17  ;;  %v1385_v59 = vmul.f32 %v16951_v61, %v11901_v18  ;;  %v16952_v30 = vld [vmem:[#allocation157_spill] sm:$0xff] }
 0x2ff   : > { %5149 = vmax.xlane.f32.xlu1 %v5148_v48  ;;  %v4498_v5 = vsel %vm4234_vm0, %v3973_v33, -inf  ;;  %v2688_v9 = vadd.f32 %v2176_v57, %v1392_v34  ;;  %v2169_v44 = vmul.f32 %v16952_v30, %v11912_v4  ;;  %v1386_v29 = vmul.f32 %v16951_v61, %v11904_v27 }
 0x300   : > { %v4499_v36 = vsel %vm4235_vm1, %v3974_v15, -inf  ;;  %v3983_v20 = vadd.f32 %v3471_v40, %v2687_v6  ;;  %v2170_v48 = vmul.f32 %v16952_v30, %v11924_v47  ;;  %v3465_v33 = vmul.f32 %v16846_v1, %v11932_v41 }
 0x301   : > { %v5139_v50 = vmax.f32 %v4498_v5, %v4499_v36  ;;  %v3466_v15 = vmul.f32 %v16846_v1, %v11943_v17  ;;  %v3984_v38 = vadd.f32 %v3472_v19, %v2688_v9  ;;  %v2681_v57 = vadd.f32 %v2169_v44, %v1385_v59  ;;  %v12071_v36 = vpop.xlane.xlu1 %4933  ;;  %v12079_v44 = vpop.xlane.xlu0 %4924 }
 0x302   : > { %v4508_v34 = vsel %vm4234_vm0, %v3983_v20, -inf  ;;  %v2682_v6 = vadd.f32 %v2170_v48, %v1386_v29  ;;  %v1395_v40 = vmul.f32 %v16746_v49, %v11901_v18  ;;  %v1396_v5 = vmul.f32 %v16746_v49, %v11904_v27  ;;  %16953 = vst [vmem:[#allocation123_spill] sm:$0xff] %v12071_v36  ;;  %16954 = vst [vmem:[#allocation139_spill] sm:$0xff] %v12079_v44 }
 0x303   : > { %5140 = vmax.xlane.f32.xlu0 %v5139_v50  ;;  %v4509_v22 = vsel %vm4235_vm1, %v3984_v38, -inf  ;;  %v3977_v13 = vadd.f32 %v3465_v33, %v2681_v57  ;;  %v2179_v19 = vmul.f32 %v16747_v35, %v11912_v4  ;;  %v2180_v50 = vmul.f32 %v16747_v35, %v11924_v47 }
 0x304   : > { %v5154_v29 = vmax.f32 %v4508_v34, %v4509_v22  ;;  %v3978_v59 = vadd.f32 %v3466_v15, %v2682_v6  ;;  %v3475_v9 = vmul.f32 %v10021_v56, %v11932_v41  ;;  %v3476_v38 = vmul.f32 %v10021_v56, %v11943_v17 }
 0x305   : > { %v4502_v20 = vsel %vm4234_vm0, %v3977_v13, -inf  ;;  %v2691_v48 = vadd.f32 %v2179_v19, %v1395_v40  ;;  %v2692_v36 = vadd.f32 %v2180_v50, %v1396_v5  ;;  %v1389_v57 = vmul.f32 %v16749_v21, %v11901_v18 }
 0x306   : > { %5155 = vmax.xlane.f32.xlu1 %v5154_v29  ;;  %v4503_v33 = vsel %vm4235_vm1, %v3978_v59, -inf  ;;  %v1390_v22 = vmul.f32 %v16749_v21, %v11904_v27  ;;  %v2173_v15 = vmul.f32 %v16748_v0, %v11912_v4  ;;  %v2174_v40 = vmul.f32 %v16748_v0, %v11924_v47  ;;  %v12101_v29 = vpop.xlane.xlu1 %4939 }
 0x307   : > { %v5145_v34 = vmax.f32 %v4502_v20, %v4503_v33  ;;  %v3987_v13 = vadd.f32 %v3475_v9, %v2691_v48  ;;  %v3988_v6 = vadd.f32 %v3476_v38, %v2692_v36  ;;  %v3469_v19 = vmul.f32 %v10019_v10, %v11932_v41  ;;  %16955 = vst [vmem:[#allocation143_spill] sm:$0xff] %v12101_v29  ;;  %v12107_v20 = vpop.xlane.xlu0 %4930 }
 0x308   : > { %v2685_v5 = vadd.f32 %v2173_v15, %v1389_v57  ;;  %v3470_v50 = vmul.f32 %v10019_v10, %v11943_v17  ;;  %v2686_v36 = vadd.f32 %v2174_v40, %v1390_v22  ;;  %16956 = vst [vmem:[#allocation130_spill] sm:$0xff] %v12107_v20  ;;  %v1399_v33 = vmul.f32 %v16750_v58, %v11901_v18 }
 0x309   : > { %5146 = vmax.xlane.f32.xlu0 %v5145_v34  ;;  %v4512_v59 = vsel %vm4234_vm0, %v3987_v13, -inf  ;;  %v4513_v9 = vsel %vm4235_vm1, %v3988_v6, -inf  ;;  %v1400_v15 = vmul.f32 %v16750_v58, %v11904_v27  ;;  %v16957_v34 = vld [vmem:[#allocation174_spill] sm:$0xff]  ;;  %v16958_v6 = vld [vmem:[#allocation45_spill] sm:$0xff] }
 0x30a   : > { %v5160_v48 = vmax.f32 %v4512_v59, %v4513_v9  ;;  %v3981_v38 = vadd.f32 %v3469_v19, %v2685_v5  ;;  %v3982_v57 = vadd.f32 %v3470_v50, %v2686_v36  ;;  %v2183_v29 = vmul.f32 %v16957_v34, %v11912_v4  ;;  %v12131_v20 = vpop.xlane.xlu1 %4945 }
 0x30b   : > { %v2184_v13 = vmul.f32 %v16957_v34, %v11924_v47  ;;  %v3479_v40 = vmul.f32 %v16958_v6, %v11932_v41  ;;  %v3480_v5 = vmul.f32 %v16958_v6, %v11943_v17  ;;  %v1393_v36 = vmul.f32 %v16852_v8, %v11901_v18  ;;  %16959 = vst [vmem:[#allocation191_spill] sm:$0xff] %v12131_v20 }
 0x30c   : > { %5161 = vmax.xlane.f32.xlu1 %v5160_v48  ;;  %v4506_v22 = vsel %vm4234_vm0, %v3981_v38, -inf  ;;  %v4507_v19 = vsel %vm4235_vm1, %v3982_v57, -inf  ;;  %v2695_v50 = vadd.f32 %v2183_v29, %v1399_v33  ;;  %v1394_v48 = vmul.f32 %v16852_v8, %v11904_v27  ;;  %v16960_v29 = vld [vmem:[#allocation27_spill] sm:$0xff]  ;;  %v12137_v57 = vpop.xlane.xlu0 %4936 }
 0x30d   : > { %v2696_v59 = vadd.f32 %v2184_v13, %v1400_v15  ;;  %v5151_v9 = vmax.f32 %v4506_v22, %v4507_v19  ;;  %v2177_v38 = vmul.f32 %v16853_v3, %v11912_v4  ;;  %v2178_v6 = vmul.f32 %v16853_v3, %v11924_v47  ;;  %16961 = vst [vmem:[#allocation34_spill] sm:$0xff] %v12137_v57 }
 0x30e   : > { %v3991_v44 = vadd.f32 %v3479_v40, %v2695_v50  ;;  %v3473_v33 = vmul.f32 %v16960_v29, %v11932_v41  ;;  %v3474_v13 = vmul.f32 %v16960_v29, %v11943_v17  ;;  %v1404_v57 = vmul.f32 %v16754_v42, %v11904_v27 }
 0x30f   : > { %v3992_v25 = vadd.f32 %v3480_v5, %v2696_v59  ;;  %5152 = vmax.xlane.f32.xlu0 %v5151_v9  ;;  %v2689_v15 = vadd.f32 %v2177_v38, %v1393_v36  ;;  %v2690_v5 = vadd.f32 %v2178_v6, %v1394_v48  ;;  %v1403_v59 = vmul.f32 %v16754_v42, %v11901_v18  ;;  %v16962_v48 = vld [vmem:[#allocation13_spill] sm:$0xff] }
 0x310   : > { %v4516_v22 = vsel %vm4234_vm0, %v3991_v44, -inf  ;;  %v2187_v36 = vmul.f32 %v16755_v23, %v11912_v4  ;;  %v2188_v38 = vmul.f32 %v16755_v23, %v11924_v47  ;;  %v3483_v44 = vmul.f32 %v10074_v37, %v11932_v41 }
 0x311   : > { %v4517_v40 = vsel %vm4235_vm1, %v3992_v25, -inf  ;;  %v3985_v50 = vadd.f32 %v3473_v33, %v2689_v15  ;;  %v3986_v9 = vadd.f32 %v3474_v13, %v2690_v5  ;;  %v3484_v6 = vmul.f32 %v10074_v37, %v11943_v17  ;;  %v12163_v13 = vpop.xlane.xlu1 %4951 }
 0x312   : > { %v5166_v19 = vmax.f32 %v4516_v22, %v4517_v40  ;;  %v1397_v33 = vmul.f32 %v16962_v48, %v11901_v18  ;;  %v1398_v15 = vmul.f32 %v16962_v48, %v11904_v27  ;;  %16963 = vst [vmem:[#allocation146_spill] sm:$0xff] %v12163_v13  ;;  %v2699_v40 = vadd.f32 %v2187_v36, %v1403_v59 }
 0x313   : > { %v4510_v25 = vsel %vm4234_vm0, %v3985_v50, -inf  ;;  %v4511_v22 = vsel %vm4235_vm1, %v3986_v9, -inf  ;;  %v2700_v5 = vadd.f32 %v2188_v38, %v1404_v57  ;;  %v12169_v50 = vpop.xlane.xlu0 %4942  ;;  %v3477_v42 = vmul.f32 %v10072_v24, %v11932_v41 }
 0x314   : > { %5167 = vmax.xlane.f32.xlu1 %v5166_v19  ;;  %v16964_v19 = vld [vmem:[#allocation171_spill] sm:$0xff]  ;;  %16965 = vst [vmem:[#allocation148_spill] sm:$0xff] %v12169_v50  ;;  %v5157_v23 = vmax.f32 %v4510_v25, %v4511_v22  ;;  %v3478_v13 = vmul.f32 %v10072_v24, %v11943_v17  ;;  %v3995_v48 = vadd.f32 %v3483_v44, %v2699_v40 }
 0x315   : > { %v2181_v20 = vmul.f32 %v16964_v19, %v11912_v4  ;;  %v2182_v37 = vmul.f32 %v16964_v19, %v11924_v47  ;;  %v3996_v29 = vadd.f32 %v3484_v6, %v2700_v5  ;;  %v1407_v25 = vmul.f32 %v16758_v60, %v11901_v18 }
 0x316   : > { %5158 = vmax.xlane.f32.xlu0 %v5157_v23  ;;  %v4520_v59 = vsel %vm4234_vm0, %v3995_v48, -inf  ;;  %v1408_v24 = vmul.f32 %v16758_v60, %v11904_v27  ;;  %v12187_v23 = vpop.xlane.xlu1 %4957  ;;  %v3488_v44 = vmul.f32 %v10104_v7, %v11943_v17 }
 0x317   : > { %v2693_v9 = vadd.f32 %v2181_v20, %v1397_v33  ;;  %v2694_v57 = vadd.f32 %v2182_v37, %v1398_v15  ;;  %v4521_v36 = vsel %vm4235_vm1, %v3996_v29, -inf  ;;  %v2191_v20 = vmul.f32 %v16759_v12, %v11912_v4  ;;  %16966 = vst [vmem:[#allocation41_spill] sm:$0xff] %v12187_v23  ;;  %v12197_v6 = vpop.xlane.xlu0 %4948  ;;  %v16968_v15 = vld [vmem:[#allocation18_spill] sm:$0xff] }
 0x318   : > { %v5172_v22 = vmax.f32 %v4520_v59, %v4521_v36  ;;  %v2192_v29 = vmul.f32 %v16759_v12, %v11924_v47  ;;  %16967 = vst [vmem:[#allocation135_spill] sm:$0xff] %v12197_v6  ;;  %v1402_v40 = vmul.f32 %v16968_v15, %v11904_v27 }
 0x319   : > { %v3989_v38 = vadd.f32 %v3477_v42, %v2693_v9  ;;  %v3990_v50 = vadd.f32 %v3478_v13, %v2694_v57  ;;  %v3487_v42 = vmul.f32 %v10104_v7, %v11932_v41  ;;  %v2703_v33 = vadd.f32 %v2191_v20, %v1407_v25  ;;  %v16969_v57 = vld [vmem:[#allocation175_spill] sm:$0xff] }
 0x31a   : > { %5173 = vmax.xlane.f32.xlu1 %v5172_v22  ;;  %v1401_v13 = vmul.f32 %v16968_v15, %v11901_v18  ;;  %v2704_v9 = vadd.f32 %v2192_v29, %v1408_v24  ;;  %v2185_v59 = vmul.f32 %v16969_v57, %v11912_v4  ;;  %v2186_v36 = vmul.f32 %v16969_v57, %v11924_v47  ;;  %v16970_v22 = vld [vmem:[#allocation53_spill] sm:$0xff]  ;;  %v16973_v15 = vld [vmem:[#allocation82_spill] sm:$0xff] }
 0x31b   : > { %v4514_v37 = vsel %vm4234_vm0, %v3989_v38, -inf  ;;  %v4515_v48 = vsel %vm4235_vm1, %v3990_v50, -inf  ;;  %v3999_v38 = vadd.f32 %v3487_v42, %v2703_v33  ;;  %v3481_v23 = vmul.f32 %v16970_v22, %v11932_v41 }
 0x31c   : > { %v5163_v5 = vmax.f32 %v4514_v37, %v4515_v48  ;;  %v3482_v50 = vmul.f32 %v16970_v22, %v11943_v17  ;;  %v4000_v25 = vadd.f32 %v3488_v44, %v2704_v9  ;;  %v2697_v20 = vadd.f32 %v2185_v59, %v1401_v13  ;;  %v16971_v37 = vld [vmem:[#allocation39_spill] sm:$0xff]  ;;  %v12217_v48 = vpop.xlane.xlu1 %4963  ;;  %v16975_v9 = vld [vmem:[#allocation162_spill] sm:$0xff] }
 0x31d   : > { %v2698_v6 = vadd.f32 %v2186_v36, %v1402_v40  ;;  %v4524_v24 = vsel %vm4234_vm0, %v3999_v38, -inf  ;;  %v1411_v29 = vmul.f32 %v16971_v37, %v11901_v18  ;;  %16972 = vst [vmem:[#allocation50_spill] sm:$0xff] %v12217_v48  ;;  %v2195_v22 = vmul.f32 %v16973_v15, %v11912_v4 }
 0x31e   : > { %5164 = vmax.xlane.f32.xlu0 %v5163_v5  ;;  %v4525_v42 = vsel %vm4235_vm1, %v4000_v25, -inf  ;;  %v3993_v33 = vadd.f32 %v3481_v23, %v2697_v20  ;;  %v12223_v5 = vpop.xlane.xlu0 %4954  ;;  %v1412_v13 = vmul.f32 %v16971_v37, %v11904_v27  ;;  %v2196_v40 = vmul.f32 %v16973_v15, %v11924_v47  ;;  %v16976_v20 = vld [vmem:[#allocation23_spill] sm:$0xff] }
 0x31f   : > { %v3994_v57 = vadd.f32 %v3482_v50, %v2698_v6  ;;  %16974 = vst [vmem:[#allocation51_spill] sm:$0xff] %v12223_v5  ;;  %v5178_v44 = vmax.f32 %v4524_v24, %v4525_v42  ;;  %v3491_v59 = vmul.f32 %v16975_v9, %v11932_v41  ;;  %v2707_v6 = vadd.f32 %v2195_v22, %v1411_v29  ;;  %v16977_v5 = vld [vmem:[#allocation68_spill] sm:$0xff]  ;;  %v16978_v22 = vld [vmem:[#allocation59_spill] sm:$0xff] }
 0x320   : > { %v4518_v36 = vsel %vm4234_vm0, %v3993_v33, -inf  ;;  %v3492_v38 = vmul.f32 %v16975_v9, %v11943_v17  ;;  %v2708_v25 = vadd.f32 %v2196_v40, %v1412_v13  ;;  %v1405_v24 = vmul.f32 %v16976_v20, %v11901_v18  ;;  %v12249_v40 = vpop.xlane.xlu1 %4969 }
 0x321   : > { %v4519_v23 = vsel %vm4235_vm1, %v3994_v57, -inf  ;;  %5179 = vmax.xlane.f32.xlu1 %v5178_v44  ;;  %v1406_v42 = vmul.f32 %v16976_v20, %v11904_v27  ;;  %v4003_v48 = vadd.f32 %v3491_v59, %v2707_v6  ;;  %v2189_v33 = vmul.f32 %v16977_v5, %v11912_v4  ;;  %16979 = vst [vmem:[#allocation37_spill] sm:$0xff] %v12249_v40  ;;  %v16981_v20 = vld [vmem:[#allocation48_spill] sm:$0xff] }
 0x322   : > { %v5169_v50 = vmax.f32 %v4518_v36, %v4519_v23  ;;  %v2190_v57 = vmul.f32 %v16977_v5, %v11924_v47  ;;  %v3485_v29 = vmul.f32 %v16978_v22, %v11932_v41  ;;  %v4004_v44 = vadd.f32 %v3492_v38, %v2708_v25  ;;  %v12253_v6 = vpop.xlane.xlu0 %4960  ;;  %v16982_v38 = vld [vmem:[#allocation181_spill] sm:$0xff] }
 0x323   : > { %v3486_v13 = vmul.f32 %v16978_v22, %v11943_v17  ;;  %v4528_v36 = vsel %vm4234_vm0, %v4003_v48, -inf  ;;  %v2701_v59 = vadd.f32 %v2189_v33, %v1405_v24  ;;  %16980 = vst [vmem:[#allocation155_spill] sm:$0xff] %v12253_v6  ;;  %v1415_v9 = vmul.f32 %v16981_v20, %v11901_v18 }
 0x324   : > { %5170 = vmax.xlane.f32.xlu0 %v5169_v50  ;;  %v2702_v23 = vadd.f32 %v2190_v57, %v1406_v42  ;;  %v4529_v5 = vsel %vm4235_vm1, %v4004_v44, -inf  ;;  %v2199_v50 = vmul.f32 %v16982_v38, %v11912_v4  ;;  %v1416_v40 = vmul.f32 %v16981_v20, %v11904_v27  ;;  %v16983_v42 = vld [vmem:[#allocation164_spill] sm:$0xff]  ;;  %v12277_v6 = vpop.xlane.xlu1 %4975 }
 0x325   : > { %v5184_v25 = vmax.f32 %v4528_v36, %v4529_v5  ;;  %v3997_v22 = vadd.f32 %v3485_v29, %v2701_v59  ;;  %v2200_v48 = vmul.f32 %v16982_v38, %v11924_v47  ;;  %v3495_v33 = vmul.f32 %v16983_v42, %v11932_v41  ;;  %v16984_v29 = vld [vmem:[#allocation30_spill] sm:$0xff]  ;;  %16986 = vst [vmem:[#allocation52_spill] sm:$0xff] %v12277_v6 }
 0x326   : > { %v3998_v15 = vadd.f32 %v3486_v13, %v2702_v23  ;;  %v2711_v24 = vadd.f32 %v2199_v50, %v1415_v9  ;;  %v3496_v57 = vmul.f32 %v16983_v42, %v11943_v17  ;;  %v1409_v13 = vmul.f32 %v16984_v29, %v11901_v18  ;;  %v16985_v9 = vld [vmem:[#allocation178_spill] sm:$0xff]  ;;  %v16987_v42 = vld [vmem:[#allocation163_spill] sm:$0xff] }
 0x327   : > { %5185 = vmax.xlane.f32.xlu1 %v5184_v25  ;;  %v4522_v44 = vsel %vm4234_vm0, %v3997_v22, -inf  ;;  %v2712_v59 = vadd.f32 %v2200_v48, %v1416_v40  ;;  %v2193_v50 = vmul.f32 %v16985_v9, %v11912_v4  ;;  %v1410_v25 = vmul.f32 %v16984_v29, %v11904_v27  ;;  %v12287_v40 = vpop.xlane.xlu0 %4966 }
 0x328   : > { %v4523_v5 = vsel %vm4235_vm1, %v3998_v15, -inf  ;;  %v4007_v23 = vadd.f32 %v3495_v33, %v2711_v24  ;;  %v2194_v22 = vmul.f32 %v16985_v9, %v11924_v47  ;;  %v3489_v15 = vmul.f32 %v16987_v42, %v11932_v41  ;;  %16988 = vst [vmem:[#allocation149_spill] sm:$0xff] %v12287_v40 }
 0x329   : > { %v5175_v36 = vmax.f32 %v4522_v44, %v4523_v5  ;;  %v3490_v38 = vmul.f32 %v16987_v42, %v11943_v17  ;;  %v4008_v48 = vadd.f32 %v3496_v57, %v2712_v59  ;;  %v2705_v33 = vadd.f32 %v2193_v50, %v1409_v13  ;;  %v16989_v5 = vld [vmem:[#allocation62_spill] sm:$0xff] }
 0x32a   : > { %v4532_v24 = vsel %vm4234_vm0, %v4007_v23, -inf  ;;  %v2706_v44 = vadd.f32 %v2194_v22, %v1410_v25  ;;  %v1419_v6 = vmul.f32 %v16989_v5, %v11901_v18  ;;  %v1420_v9 = vmul.f32 %v16989_v5, %v11904_v27  ;;  %v16991_v13 = vld [vmem:[#allocation166_spill] sm:$0xff] }
 0x32b   : > { %5176 = vmax.xlane.f32.xlu0 %v5175_v36  ;;  %v4533_v29 = vsel %vm4235_vm1, %v4008_v48, -inf  ;;  %v4001_v20 = vadd.f32 %v3489_v15, %v2705_v33  ;;  %v16990_v36 = vld [vmem:[#allocation96_spill] sm:$0xff]  ;;  %v3499_v50 = vmul.f32 %v16991_v13, %v11932_v41  ;;  %v3500_v48 = vmul.f32 %v16991_v13, %v11943_v17  ;;  %v12309_v33 = vpop.xlane.xlu1 %4981 }
 0x32c   : > { %v2203_v42 = vmul.f32 %v16990_v36, %v11912_v4  ;;  %v2204_v57 = vmul.f32 %v16990_v36, %v11924_v47  ;;  %v5190_v59 = vmax.f32 %v4532_v24, %v4533_v29  ;;  %v4002_v23 = vadd.f32 %v3490_v38, %v2706_v44  ;;  %16992 = vst [vmem:[#allocation60_spill] sm:$0xff] %v12309_v33  ;;  %v16993_v29 = vld [vmem:[#allocation38_spill] sm:$0xff]  ;;  %v16994_v44 = vld [vmem:[#allocation83_spill] sm:$0xff] }
 0x32d   : > { %v4526_v25 = vsel %vm4234_vm0, %v4001_v20, -inf  ;;  %v1413_v38 = vmul.f32 %v16993_v29, %v11901_v18  ;;  %v1414_v24 = vmul.f32 %v16993_v29, %v11904_v27  ;;  %v2197_v20 = vmul.f32 %v16994_v44, %v11912_v4  ;;  %v16996_v33 = vld [vmem:[#allocation58_spill] sm:$0xff] }
 0x32e   : > { %v2715_v22 = vadd.f32 %v2203_v42, %v1419_v6  ;;  %v2716_v40 = vadd.f32 %v2204_v57, %v1420_v9  ;;  %5191 = vmax.xlane.f32.xlu1 %v5190_v59  ;;  %v4527_v15 = vsel %vm4235_vm1, %v4002_v23, -inf  ;;  %v12317_v42 = vpop.xlane.xlu0 %4972  ;;  %v2198_v59 = vmul.f32 %v16994_v44, %v11924_v47 }
 0x32f   : > { %v5181_v6 = vmax.f32 %v4526_v25, %v4527_v15  ;;  %16995 = vst [vmem:[#allocation158_spill] sm:$0xff] %v12317_v42  ;;  %v2709_v23 = vadd.f32 %v2197_v20, %v1413_v38  ;;  %v3493_v13 = vmul.f32 %v16996_v33, %v11932_v41  ;;  %v3494_v36 = vmul.f32 %v16996_v33, %v11943_v17  ;;  %v16998_v42 = vld [vmem:[#allocation186_spill] sm:$0xff] }
 0x330   : > { %v4011_v9 = vadd.f32 %v3499_v50, %v2715_v22  ;;  %v4012_v57 = vadd.f32 %v3500_v48, %v2716_v40  ;;  %v2710_v15 = vadd.f32 %v2198_v59, %v1414_v24  ;;  %v16997_v22 = vld [vmem:[#allocation75_spill] sm:$0xff]  ;;  %v2207_v33 = vmul.f32 %v16998_v42, %v11912_v4  ;;  %v12339_v24 = vpop.xlane.xlu1 %4987 }
 0x331   : > { %5182 = vmax.xlane.f32.xlu0 %v5181_v6  ;;  %v4005_v40 = vadd.f32 %v3493_v13, %v2709_v23  ;;  %v1423_v48 = vmul.f32 %v16997_v22, %v11901_v18  ;;  %v1424_v20 = vmul.f32 %v16997_v22, %v11904_v27  ;;  %v2208_v6 = vmul.f32 %v16998_v42, %v11924_v47  ;;  %v17000_v13 = vld [vmem:[#allocation69_spill] sm:$0xff] }
 0x332   : > { %v4536_v29 = vsel %vm4234_vm0, %v4011_v9, -inf  ;;  %v4537_v25 = vsel %vm4235_vm1, %v4012_v57, -inf  ;;  %v4006_v38 = vadd.f32 %v3494_v36, %v2710_v15  ;;  %16999 = vst [vmem:[#allocation32_spill] sm:$0xff] %v12339_v24  ;;  %v3504_v36 = vmul.f32 %v17000_v13, %v11943_v17  ;;  %v12347_v59 = vpop.xlane.xlu0 %4978  ;;  %v17002_v15 = vld [vmem:[#allocation47_spill] sm:$0xff]  ;;  %v17003_v24 = vld [vmem:[#allocation182_spill] sm:$0xff] }
 0x333   : > { %v5196_v50 = vmax.f32 %v4536_v29, %v4537_v25  ;;  %v4530_v9 = vsel %vm4234_vm0, %v4005_v40, -inf  ;;  %v3503_v29 = vmul.f32 %v17000_v13, %v11932_v41  ;;  %17001 = vst [vmem:[#allocation33_spill] sm:$0xff] %v12347_v59  ;;  %v2719_v23 = vadd.f32 %v2207_v33, %v1423_v48 }
 0x334   : > { %v4531_v57 = vsel %vm4235_vm1, %v4006_v38, -inf  ;;  %v2720_v25 = vadd.f32 %v2208_v6, %v1424_v20  ;;  %v1418_v40 = vmul.f32 %v17002_v15, %v11904_v27  ;;  %v2201_v22 = vmul.f32 %v17003_v24, %v11912_v4  ;;  %v17004_v38 = vld [vmem:[#allocation66_spill] sm:$0xff] }
 0x335   : > { %5197 = vmax.xlane.f32.xlu1 %v5196_v50  ;;  %v1417_v50 = vmul.f32 %v17002_v15, %v11901_v18  ;;  %v5187_v42 = vmax.f32 %v4530_v9, %v4531_v57  ;;  %v2202_v13 = vmul.f32 %v17003_v24, %v11924_v47  ;;  %v4015_v44 = vadd.f32 %v3503_v29, %v2719_v23  ;;  %v12365_v29 = vpop.xlane.xlu1 %4993 }
 0x336   : > { %v4016_v5 = vadd.f32 %v3504_v36, %v2720_v25  ;;  %v3497_v59 = vmul.f32 %v17004_v38, %v11932_v41  ;;  %v3498_v33 = vmul.f32 %v17004_v38, %v11943_v17  ;;  %17005 = vst [vmem:[#allocation35_spill] sm:$0xff] %v12365_v29  ;;  %v17006_v36 = vld [vmem:[#allocation88_spill] sm:$0xff]  ;;  %v12369_v25 = vpop.xlane.xlu0 %4984 }
 0x337   : > { %5188 = vmax.xlane.f32.xlu0 %v5187_v42  ;;  %v2713_v48 = vadd.f32 %v2201_v22, %v1417_v50  ;;  %v2714_v20 = vadd.f32 %v2202_v13, %v1418_v40  ;;  %v4540_v6 = vsel %vm4234_vm0, %v4015_v44, -inf  ;;  %v1427_v23 = vmul.f32 %v17006_v36, %v11901_v18  ;;  %17007 = vst [vmem:[#allocation36_spill] sm:$0xff] %v12369_v25  ;;  %v17008_v22 = vld [vmem:[#allocation109_spill] sm:$0xff] }
 0x338   : > { %v4541_v9 = vsel %vm4235_vm1, %v4016_v5, -inf  ;;  %v1428_v42 = vmul.f32 %v17006_v36, %v11904_v27  ;;  %v2211_v13 = vmul.f32 %v17008_v22, %v11912_v4  ;;  %v2212_v44 = vmul.f32 %v17008_v22, %v11924_v47  ;;  %v17009_v5 = vld [vmem:[#allocation77_spill] sm:$0xff] }
 0x339   : > { %v5202_v57 = vmax.f32 %v4540_v6, %v4541_v9  ;;  %v4009_v15 = vadd.f32 %v3497_v59, %v2713_v48  ;;  %v4010_v24 = vadd.f32 %v3498_v33, %v2714_v20  ;;  %v3507_v59 = vmul.f32 %v17009_v5, %v11932_v41  ;;  %v17010_v48 = vld [vmem:[#allocation61_spill] sm:$0xff] }
 0x33a   : > { %v3508_v33 = vmul.f32 %v17009_v5, %v11943_v17  ;;  %v1421_v20 = vmul.f32 %v17010_v48, %v11901_v18  ;;  %v2723_v9 = vadd.f32 %v2211_v13, %v1427_v23  ;;  %v2724_v25 = vadd.f32 %v2212_v44, %v1428_v42  ;;  %v12397_v13 = vpop.xlane.xlu1 %4999 }
 0x33b   : > { %5203 = vmax.xlane.f32.xlu1 %v5202_v57  ;;  %v4534_v50 = vsel %vm4234_vm0, %v4009_v15, -inf  ;;  %v4535_v40 = vsel %vm4235_vm1, %v4010_v24, -inf  ;;  %v1422_v29 = vmul.f32 %v17010_v48, %v11904_v27  ;;  %v17011_v57 = vld [vmem:[#allocation97_spill] sm:$0xff]  ;;  %v17012_v24 = vld [vmem:[#allocation71_spill] sm:$0xff]  ;;  %17013 = vst [vmem:[#allocation159_spill] sm:$0xff] %v12397_v13 }
 0x33c   : > { %v5193_v6 = vmax.f32 %v4534_v50, %v4535_v40  ;;  %v2205_v22 = vmul.f32 %v17011_v57, %v11912_v4  ;;  %v2206_v15 = vmul.f32 %v17011_v57, %v11924_v47  ;;  %v3501_v36 = vmul.f32 %v17012_v24, %v11932_v41  ;;  %v12403_v57 = vpop.xlane.xlu0 %4990 }
 0x33d   : > { %v3502_v5 = vmul.f32 %v17012_v24, %v11943_v17  ;;  %v4019_v38 = vadd.f32 %v3507_v59, %v2723_v9  ;;  %v4020_v50 = vadd.f32 %v3508_v33, %v2724_v25  ;;  %17014 = vst [vmem:[#allocation150_spill] sm:$0xff] %v12403_v57  ;;  %v17015_v24 = vld [vmem:[#allocation102_spill] sm:$0xff]  ;;  %v17017_v59 = vld [vmem:[#allocation84_spill] sm:$0xff] }
 0x33e   : > { %5194 = vmax.xlane.f32.xlu0 %v5193_v6  ;;  %v2717_v23 = vadd.f32 %v2205_v22, %v1421_v20  ;;  %v2718_v42 = vadd.f32 %v2206_v15, %v1422_v29  ;;  %v1431_v6 = vmul.f32 %v17015_v24, %v11901_v18  ;;  %v1432_v25 = vmul.f32 %v17015_v24, %v11904_v27  ;;  %v17016_v29 = vld [vmem:[#allocation124_spill] sm:$0xff]  ;;  %v17018_v9 = vld [vmem:[#allocation74_spill] sm:$0xff]  ;;  %v17041_v24 = vld [vmem:[#allocation17_spill] sm:$0xff] }
 0x33f   : > { %v4544_v44 = vsel %vm4234_vm0, %v4019_v38, -inf  ;;  %v4545_v40 = vsel %vm4235_vm1, %v4020_v50, -inf  ;;  %v2215_v22 = vmul.f32 %v17016_v29, %v11912_v4  ;;  %v2216_v38 = vmul.f32 %v17016_v29, %v11924_v47 }
 0x340   : > { %v5208_v48 = vmax.f32 %v4544_v44, %v4545_v40  ;;  %v4013_v37 = vadd.f32 %v3501_v36, %v2717_v23  ;;  %v4014_v7 = vadd.f32 %v3502_v5, %v2718_v42  ;;  %v3511_v33 = vmul.f32 %v17017_v59, %v11932_v41 }
 0x341   : > { %v3512_v20 = vmul.f32 %v17017_v59, %v11943_v17  ;;  %v1425_v15 = vmul.f32 %v17018_v9, %v11901_v18  ;;  %v2727_v23 = vadd.f32 %v2215_v22, %v1431_v6  ;;  %v2728_v42 = vadd.f32 %v2216_v38, %v1432_v25  ;;  %v12433_v59 = vpop.xlane.xlu1 %5005  ;;  %v12435_v22 = vpop.xlane.xlu0 %4996 }
 0x342   : > { %5209 = vmax.xlane.f32.xlu1 %v5208_v48  ;;  %v4538_v36 = vsel %vm4234_vm0, %v4013_v37, -inf  ;;  %v4539_v5 = vsel %vm4235_vm1, %v4014_v7, -inf  ;;  %v1426_v44 = vmul.f32 %v17018_v9, %v11904_v27  ;;  %v17019_v48 = vld [vmem:[#allocation187_spill] sm:$0xff]  ;;  %v17020_v7 = vld [vmem:[#allocation80_spill] sm:$0xff]  ;;  %17021 = vst [vmem:[#allocation131_spill] sm:$0xff] %v12433_v59  ;;  %17022 = vst [vmem:[#allocation132_spill] sm:$0xff] %v12435_v22 }
 0x343   : > { %v5199_v50 = vmax.f32 %v4538_v36, %v4539_v5  ;;  %v2209_v40 = vmul.f32 %v17019_v48, %v11912_v4  ;;  %v2210_v37 = vmul.f32 %v17019_v48, %v11924_v47  ;;  %v3505_v57 = vmul.f32 %v17020_v7, %v11932_v41  ;;  %v17023_v5 = vld [vmem:[#allocation115_spill] sm:$0xff] }
 0x344   : > { %v3506_v13 = vmul.f32 %v17020_v7, %v11943_v17  ;;  %v4023_v6 = vadd.f32 %v3511_v33, %v2727_v23  ;;  %v4024_v25 = vadd.f32 %v3512_v20, %v2728_v42  ;;  %v1435_v9 = vmul.f32 %v17023_v5, %v11901_v18 }
 0x345   : > { %5200 = vmax.xlane.f32.xlu0 %v5199_v50  ;;  %v2721_v38 = vadd.f32 %v2209_v40, %v1425_v15  ;;  %v2722_v36 = vadd.f32 %v2210_v37, %v1426_v44  ;;  %v1436_v7 = vmul.f32 %v17023_v5, %v11904_v27  ;;  %v17024_v50 = vld [vmem:[#allocation122_spill] sm:$0xff] }
 0x346   : > { %v4548_v48 = vsel %vm4234_vm0, %v4023_v6, -inf  ;;  %v4549_v29 = vsel %vm4235_vm1, %v4024_v25, -inf  ;;  %v2219_v33 = vmul.f32 %v17024_v50, %v11912_v4  ;;  %v2220_v15 = vmul.f32 %v17024_v50, %v11924_v47  ;;  %v17025_v40 = vld [vmem:[#allocation42_spill] sm:$0xff]  ;;  %v17026_v25 = vld [vmem:[#allocation87_spill] sm:$0xff]  ;;  %v17030_v50 = vld [vmem:[#allocation89_spill] sm:$0xff] }
 0x347   : > { %v5214_v20 = vmax.f32 %v4548_v48, %v4549_v29  ;;  %v4017_v23 = vadd.f32 %v3505_v57, %v2721_v38  ;;  %v4018_v42 = vadd.f32 %v3506_v13, %v2722_v36  ;;  %v3515_v37 = vmul.f32 %v17025_v40, %v11932_v41  ;;  %v17028_v36 = vld [vmem:[#allocation110_spill] sm:$0xff] }
 0x348   : > { %v2731_v44 = vadd.f32 %v2219_v33, %v1435_v9  ;;  %v3516_v6 = vmul.f32 %v17025_v40, %v11943_v17  ;;  %v1429_v59 = vmul.f32 %v17026_v25, %v11901_v18  ;;  %v2732_v13 = vadd.f32 %v2220_v15, %v1436_v7  ;;  %v12461_v9 = vpop.xlane.xlu1 %5011  ;;  %v12467_v40 = vpop.xlane.xlu0 %5002 }
 0x349   : > { %5215 = vmax.xlane.f32.xlu1 %v5214_v20  ;;  %v4542_v22 = vsel %vm4234_vm0, %v4017_v23, -inf  ;;  %v4543_v57 = vsel %vm4235_vm1, %v4018_v42, -inf  ;;  %v1430_v29 = vmul.f32 %v17026_v25, %v11904_v27  ;;  %17027 = vst [vmem:[#allocation133_spill] sm:$0xff] %v12461_v9  ;;  %v2213_v33 = vmul.f32 %v17028_v36, %v11912_v4  ;;  %17029 = vst [vmem:[#allocation134_spill] sm:$0xff] %v12467_v40 }
 0x34a   : > { %v5205_v48 = vmax.f32 %v4542_v22, %v4543_v57  ;;  %v4027_v38 = vadd.f32 %v3515_v37, %v2731_v44  ;;  %v2214_v20 = vmul.f32 %v17028_v36, %v11924_v47  ;;  %v4028_v23 = vadd.f32 %v3516_v6, %v2732_v13  ;;  %v17031_v57 = vld [vmem:[#allocation129_spill] sm:$0xff]  ;;  %v17032_v36 = vld [vmem:[#allocation136_spill] sm:$0xff] }
 0x34b   : > { %v3509_v42 = vmul.f32 %v17030_v50, %v11932_v41  ;;  %v3510_v7 = vmul.f32 %v17030_v50, %v11943_v17  ;;  %v2725_v15 = vadd.f32 %v2213_v33, %v1429_v59  ;;  %v1439_v9 = vmul.f32 %v17031_v57, %v11901_v18 }
 0x34c   : > { %5206 = vmax.xlane.f32.xlu0 %v5205_v48  ;;  %v4552_v22 = vsel %vm4234_vm0, %v4027_v38, -inf  ;;  %v2726_v44 = vadd.f32 %v2214_v20, %v1430_v29  ;;  %v4553_v37 = vsel %vm4235_vm1, %v4028_v23, -inf  ;;  %v2223_v25 = vmul.f32 %v17032_v36, %v11912_v4  ;;  %v17033_v29 = vld [vmem:[#allocation95_spill] sm:$0xff]  ;;  %v12489_v20 = vpop.xlane.xlu1 %5017 }
 0x34d   : > { %v5220_v40 = vmax.f32 %v4552_v22, %v4553_v37  ;;  %v4021_v6 = vadd.f32 %v3509_v42, %v2725_v15  ;;  %v1440_v48 = vmul.f32 %v17031_v57, %v11904_v27  ;;  %v2224_v59 = vmul.f32 %v17032_v36, %v11924_v47  ;;  %17034 = vst [vmem:[#allocation28_spill] sm:$0xff] %v12489_v20  ;;  %v17035_v22 = vld [vmem:[#allocation101_spill] sm:$0xff]  ;;  %v17037_v20 = vld [vmem:[#allocation188_spill] sm:$0xff] }
 0x34e   : > { %v4022_v13 = vadd.f32 %v3510_v7, %v2726_v44  ;;  %v3519_v38 = vmul.f32 %v17033_v29, %v11932_v41  ;;  %v3520_v33 = vmul.f32 %v17033_v29, %v11943_v17  ;;  %v2735_v7 = vadd.f32 %v2223_v25, %v1439_v9  ;;  %v12497_v44 = vpop.xlane.xlu0 %5008  ;;  %v776_v57 = vld [vmem:[%s8251_s22 + $0x28] sm:$0x77]  ;;  %v17038_v25 = vld [vmem:[#allocation91_spill] sm:$0xff] }
 0x34f   : > { %5221 = vmax.xlane.f32.xlu1 %v5220_v40  ;;  %v4546_v23 = vsel %vm4234_vm0, %v4021_v6, -inf  ;;  %v1433_v15 = vmul.f32 %v17035_v22, %v11901_v18  ;;  %17036 = vst [vmem:[#allocation29_spill] sm:$0xff] %v12497_v44  ;;  %v2736_v36 = vadd.f32 %v2224_v59, %v1440_v48  ;;  %v1434_v29 = vmul.f32 %v17035_v22, %v11904_v27  ;;  %v17039_v44 = vld [vmem:[#allocation15_spill] sm:$0xff] }
 0x350   : > { %v4547_v42 = vsel %vm4235_vm1, %v4022_v13, -inf  ;;  %v2217_v40 = vmul.f32 %v17037_v20, %v11912_v4  ;;  %v4031_v50 = vadd.f32 %v3519_v38, %v2735_v7  ;;  %v2218_v6 = vmul.f32 %v17037_v20, %v11924_v47  ;;  %v17040_v20 = vld [vmem:[#allocation16_spill] sm:$0xff]  ;;  %v12517_v60 = vpop.xlane.xlu1 %5023 }
 0x351   : > { %v5211_v37 = vmax.f32 %v4546_v23, %v4547_v42  ;;  %v3513_v9 = vmul.f32 %v17038_v25, %v11932_v41  ;;  %v3514_v13 = vmul.f32 %v17038_v25, %v11943_v17  ;;  %v4032_v23 = vadd.f32 %v3520_v33, %v2736_v36  ;;  %17042 = vst [vmem:[#allocation14_spill] sm:$0xff] %v12517_v60 }
 0x352   : > { %v2729_v48 = vadd.f32 %v2217_v40, %v1433_v15  ;;  %v4556_v59 = vsel %vm4234_vm0, %v4031_v50, -inf  ;;  %v2730_v42 = vadd.f32 %v2218_v6, %v1434_v29  ;;  %v862_v22 = vrot.slane %v776_v57, %v17039_v44  ;;  %v12522_v33 = vpop.xlane.xlu0 %5014  ;;  %v17044_v15 = vld [vmem:[#allocation20_spill] sm:$0xff] }
 0x353   : > { %5212 = vmax.xlane.f32.xlu0 %v5211_v37  ;;  %v4557_v38 = vsel %vm4235_vm1, %v4032_v23, -inf  ;;  %v866_v5 = vrot.slane %v776_v57, %v17040_v20  ;;  %v1678_v12 = vrot.slane %v776_v57, %v17041_v24  ;;  %17043 = vst [vmem:[#allocation170_spill] sm:$0xff] %v12522_v33  ;;  %v1682_v40 = vrot.slane %v776_v57, %v17044_v15  ;;  %v17046_v23 = vld [vmem:[#allocation21_spill] sm:$0xff]  ;;  %v17049_v33 = vld [vmem:[#allocation114_spill] sm:$0xff] }
 0x354   : > { %v4025_v7 = vadd.f32 %v3513_v9, %v2729_v48  ;;  %v5226_v25 = vmax.f32 %v4556_v59, %v4557_v38  ;;  %v4026_v37 = vadd.f32 %v3514_v13, %v2730_v42  ;;  %v12520_v36 = vrot.slane %v862_v22, %v17039_v44  ;;  %v17045_v22 = vld [vmem:[#allocation5_spill] sm:$0xff]  ;;  %v17047_v59 = vld [vmem:[#allocation22_spill] sm:$0xff] }
 0x355   : > { %v12527_v29 = vrot.slane %v866_v5, %v17039_v44  ;;  %v12531_v6 = vrot.slane %v1678_v12, %v17041_v24  ;;  %v2974_v48 = vrot.slane %v776_v57, %v17046_v23  ;;  %v2978_v42 = vrot.slane %v776_v57, %v17047_v59  ;;  %v17048_v12 = vld [vmem:[#allocation142_spill] sm:$0xff]  ;;  %v12562_v59 = vpop.xlane.xlu1 %5029 }
 0x356   : > { %v4550_v50 = vsel %vm4234_vm0, %v4025_v7, -inf  ;;  %5227 = vmax.xlane.f32.xlu1 %v5226_v25  ;;  %v4551_v9 = vsel %vm4235_vm1, %v4026_v37, -inf  ;;  %v1443_v13 = vmul.f32 %v17045_v22, %v12520_v36  ;;  %v12542_v7 = vrot.slane %v1682_v40, %v17041_v24  ;;  %17051 = vst [vmem:[#allocation161_spill] sm:$0xff] %v12562_v59 }
 0x357   : > { %v5217_v38 = vmax.f32 %v4550_v50, %v4551_v9  ;;  %v1444_v5 = vmul.f32 %v17045_v22, %v12527_v29  ;;  %v2227_v25 = vmul.f32 %v17048_v12, %v12531_v6  ;;  %v12547_v60 = vrot.slane %v2974_v48, %v17046_v23  ;;  %v17050_v9 = vld [vmem:[#allocation125_spill] sm:$0xff] }
 0x358   : > { %v12550_v37 = vrot.slane %v2978_v42, %v17046_v23  ;;  %v1437_v15 = vmul.f32 %v17049_v33, %v11901_v18  ;;  %v1438_v57 = vmul.f32 %v17049_v33, %v11904_v27  ;;  %v2228_v50 = vmul.f32 %v17048_v12, %v12542_v7 }
 0x359   : > { %5218 = vmax.xlane.f32.xlu0 %v5217_v38  ;;  %v2739_v40 = vadd.f32 %v2227_v25, %v1443_v13  ;;  %v2221_v22 = vmul.f32 %v17050_v9, %v11912_v4  ;;  %v2222_v48 = vmul.f32 %v17050_v9, %v11924_v47  ;;  %v3523_v42 = vmul.f32 %v16823_v28, %v12547_v60  ;;  %v12572_v25 = vpop.xlane.xlu0 %5020 }
 0x35a   : > { %v3524_v23 = vmul.f32 %v16823_v28, %v12550_v37  ;;  %v3517_v38 = vmul.f32 %v16821_v43, %v11932_v41  ;;  %v3518_v13 = vmul.f32 %v16821_v43, %v11943_v17  ;;  %17052 = vst [vmem:[#allocation8_spill] sm:$0xff] %v12572_v25  ;;  %v2740_v33 = vadd.f32 %v2228_v50, %v1444_v5  ;;  %v12592_v5 = vpop.xlane.xlu1 %5035 }
 0x35b   : > { %v2733_v12 = vadd.f32 %v2221_v22, %v1437_v15  ;;  %v2734_v24 = vadd.f32 %v2222_v48, %v1438_v57  ;;  %v4035_v9 = vadd.f32 %v3523_v42, %v2739_v40  ;;  %v1447_v19 = vmul.f32 %v16824_v51, %v12520_v36  ;;  %17053 = vst [vmem:[#allocation4_spill] sm:$0xff] %v12592_v5 }
 0x35c   : > { %v4036_v20 = vadd.f32 %v3524_v23, %v2740_v33  ;;  %v1448_v3 = vmul.f32 %v16824_v51, %v12527_v29  ;;  %v2231_v43 = vmul.f32 %v16825_v11, %v12531_v6  ;;  %v2232_v15 = vmul.f32 %v16825_v11, %v12542_v7 }
 0x35d   : > { %v4029_v59 = vadd.f32 %v3517_v38, %v2733_v12  ;;  %v4030_v44 = vadd.f32 %v3518_v13, %v2734_v24  ;;  %v4560_v28 = vsel %vm4234_vm0, %v4035_v9, -inf  ;;  %v3527_v23 = vmul.f32 %v16828_v2, %v12547_v60  ;;  %v12594_v9 = vpop.xlane.xlu0 %5026 }
 0x35e   : > { %v4561_v33 = vsel %vm4235_vm1, %v4036_v20, -inf  ;;  %v2743_v50 = vadd.f32 %v2231_v43, %v1447_v19  ;;  %v2744_v40 = vadd.f32 %v2232_v15, %v1448_v3  ;;  %17054 = vst [vmem:[#allocation156_spill] sm:$0xff] %v12594_v9  ;;  %v3528_v20 = vmul.f32 %v16828_v2, %v12550_v37 }
 0x35f   : > { %v4554_v24 = vsel %vm4234_vm0, %v4029_v59, -inf  ;;  %v4555_v22 = vsel %vm4235_vm1, %v4030_v44, -inf  ;;  %v5232_v12 = vmax.f32 %v4560_v28, %v4561_v33  ;;  %v1441_v59 = vmul.f32 %v16829_v52, %v11901_v18 }
 0x360   : > { %v5223_v57 = vmax.f32 %v4554_v24, %v4555_v22  ;;  %v1442_v44 = vmul.f32 %v16829_v52, %v11904_v27  ;;  %v2225_v48 = vmul.f32 %v16830_v62, %v11912_v4  ;;  %v4039_v28 = vadd.f32 %v3527_v23, %v2743_v50 }
 0x361   : > { %5233 = vmax.xlane.f32.xlu1 %v5232_v12  ;;  %v2226_v43 = vmul.f32 %v16830_v62, %v11924_v47  ;;  %v3521_v3 = vmul.f32 %v16831_v54, %v11932_v41  ;;  %v4040_v19 = vadd.f32 %v3528_v20, %v2744_v40  ;;  %v3522_v18 = vmul.f32 %v16831_v54, %v11943_v17  ;;  %v12616_v47 = vpop.xlane.xlu1 %5041  ;;  %v12622_v22 = vpop.xlane.xlu0 %5032 }
 0x362   : > { %5224 = vmax.xlane.f32.xlu0 %v5223_v57  ;;  %v2737_v42 = vadd.f32 %v2225_v48, %v1441_v59  ;;  %v4564_v27 = vsel %vm4234_vm0, %v4039_v28, -inf  ;;  %v1451_v15 = vmul.f32 %v16832_v31, %v12520_v36  ;;  %17055 = vst [vmem:[#allocation151_spill] sm:$0xff] %v12616_v47  ;;  %v1452_v24 = vmul.f32 %v16832_v31, %v12527_v29 }
 0x363   : > { %v2738_v38 = vadd.f32 %v2226_v43, %v1442_v44  ;;  %v4565_v4 = vsel %vm4235_vm1, %v4040_v19, -inf  ;;  %v2235_v17 = vmul.f32 %v16834_v26, %v12531_v6  ;;  %17056 = vst [vmem:[#allocation9_spill] sm:$0xff] %v12622_v22  ;;  %v2236_v12 = vmul.f32 %v16834_v26, %v12542_v7 }
 0x364   : > { %v4033_v13 = vadd.f32 %v3521_v3, %v2737_v42  ;;  %v5238_v33 = vmax.f32 %v4564_v27, %v4565_v4  ;;  %v3531_v57 = vmul.f32 %v16836_v45, %v12547_v60  ;;  %v3532_v50 = vmul.f32 %v16836_v45, %v12550_v37 }
 0x365   : > { %v4034_v41 = vadd.f32 %v3522_v18, %v2738_v38  ;;  %v2747_v20 = vadd.f32 %v2235_v17, %v1451_v15  ;;  %v1445_v59 = vmul.f32 %v16943_v39, %v12520_v36  ;;  %v1446_v44 = vmul.f32 %v16943_v39, %v12527_v29 }
 0x366   : > { %v4558_v23 = vsel %vm4234_vm0, %v4033_v13, -inf  ;;  %5239 = vmax.xlane.f32.xlu1 %v5238_v33  ;;  %v2748_v28 = vadd.f32 %v2236_v12, %v1452_v24  ;;  %v2229_v43 = vmul.f32 %v16945_v14, %v12531_v6  ;;  %v2230_v3 = vmul.f32 %v16945_v14, %v12542_v7  ;;  %v12646_v13 = vpop.xlane.xlu1 %5047 }
 0x367   : > { %v4559_v40 = vsel %vm4235_vm1, %v4034_v41, -inf  ;;  %v4043_v19 = vadd.f32 %v3531_v57, %v2747_v20  ;;  %v3525_v42 = vmul.f32 %v16946_v46, %v12547_v60  ;;  %v3526_v18 = vmul.f32 %v16946_v46, %v12550_v37  ;;  %17057 = vst [vmem:[#allocation160_spill] sm:$0xff] %v12646_v13  ;;  %v12652_v41 = vpop.xlane.xlu0 %5038 }
 0x368   : > { %v5229_v48 = vmax.f32 %v4558_v23, %v4559_v40  ;;  %v4044_v27 = vadd.f32 %v3532_v50, %v2748_v28  ;;  %v2741_v38 = vadd.f32 %v2229_v43, %v1445_v59  ;;  %v2742_v4 = vadd.f32 %v2230_v3, %v1446_v44  ;;  %17058 = vst [vmem:[#allocation154_spill] sm:$0xff] %v12652_v41 }
 0x369   : > { %v4568_v15 = vsel %vm4234_vm0, %v4043_v19, -inf  ;;  %v1455_v33 = vmul.f32 %v16840_v32, %v12520_v36  ;;  %v2239_v12 = vmul.f32 %v16947_v16, %v12531_v6  ;;  %v1456_v50 = vmul.f32 %v16840_v32, %v12527_v29 }
 0x36a   : > { %5230 = vmax.xlane.f32.xlu0 %v5229_v48  ;;  %v4569_v24 = vsel %vm4235_vm1, %v4044_v27, -inf  ;;  %v4037_v17 = vadd.f32 %v3525_v42, %v2741_v38  ;;  %v4038_v23 = vadd.f32 %v3526_v18, %v2742_v4  ;;  %v2240_v40 = vmul.f32 %v16947_v16, %v12542_v7 }
 0x36b   : > { %v5244_v57 = vmax.f32 %v4568_v15, %v4569_v24  ;;  %v3535_v20 = vmul.f32 %v16949_v55, %v12547_v60  ;;  %v2751_v48 = vadd.f32 %v2239_v12, %v1455_v33  ;;  %v3536_v28 = vmul.f32 %v16949_v55, %v12550_v37  ;;  %v12680_v15 = vpop.xlane.xlu1 %5053 }
 0x36c   : > { %v4562_v59 = vsel %vm4234_vm0, %v4037_v17, -inf  ;;  %v4563_v44 = vsel %vm4235_vm1, %v4038_v23, -inf  ;;  %v2752_v3 = vadd.f32 %v2240_v40, %v1456_v50  ;;  %v1449_v19 = vmul.f32 %v16951_v61, %v12520_v36  ;;  %17059 = vst [vmem:[#allocation11_spill] sm:$0xff] %v12680_v15  ;;  %v12684_v17 = vpop.xlane.xlu0 %5044 }
 0x36d   : > { %5245 = vmax.xlane.f32.xlu1 %v5244_v57  ;;  %v5235_v43 = vmax.f32 %v4562_v59, %v4563_v44  ;;  %v1450_v42 = vmul.f32 %v16951_v61, %v12527_v29  ;;  %v4047_v18 = vadd.f32 %v3535_v20, %v2751_v48  ;;  %v2233_v27 = vmul.f32 %v16952_v30, %v12531_v6 }
 0x36e   : > { %v2234_v38 = vmul.f32 %v16952_v30, %v12542_v7  ;;  %v3529_v4 = vmul.f32 %v16846_v1, %v12547_v60  ;;  %v4048_v33 = vadd.f32 %v3536_v28, %v2752_v3  ;;  %v3530_v24 = vmul.f32 %v16846_v1, %v12550_v37  ;;  %17060 = vst [vmem:[#allocation26_spill] sm:$0xff] %v12684_v17 }
 0x36f   : > { %5236 = vmax.xlane.f32.xlu0 %v5235_v43  ;;  %v4572_v23 = vsel %vm4234_vm0, %v4047_v18, -inf  ;;  %v2745_v12 = vadd.f32 %v2233_v27, %v1449_v19  ;;  %v1459_v40 = vmul.f32 %v16746_v49, %v12520_v36  ;;  %v2243_v20 = vmul.f32 %v16747_v35, %v12531_v6 }
 0x370   : > { %v2746_v57 = vadd.f32 %v2234_v38, %v1450_v42  ;;  %v4573_v50 = vsel %vm4235_vm1, %v4048_v33, -inf  ;;  %v1460_v28 = vmul.f32 %v16746_v49, %v12527_v29  ;;  %v2244_v43 = vmul.f32 %v16747_v35, %v12542_v7 }
 0x371   : > { %v5250_v59 = vmax.f32 %v4572_v23, %v4573_v50  ;;  %v4041_v44 = vadd.f32 %v3529_v4, %v2745_v12  ;;  %v2755_v3 = vadd.f32 %v2243_v20, %v1459_v40  ;;  %v3539_v19 = vmul.f32 %v10021_v56, %v12547_v60  ;;  %v12708_v4 = vpop.xlane.xlu1 %5059 }
 0x372   : > { %v4042_v48 = vadd.f32 %v3530_v24, %v2746_v57  ;;  %v3540_v42 = vmul.f32 %v10021_v56, %v12550_v37  ;;  %v1453_v38 = vmul.f32 %v16749_v21, %v12520_v36  ;;  %17061 = vst [vmem:[#allocation7_spill] sm:$0xff] %v12708_v4  ;;  %v2756_v24 = vadd.f32 %v2244_v43, %v1460_v28  ;;  %v12712_v57 = vpop.xlane.xlu0 %5050 }
 0x373   : > { %5251 = vmax.xlane.f32.xlu1 %v5250_v59  ;;  %v4566_v18 = vsel %vm4234_vm0, %v4041_v44, -inf  ;;  %v4051_v23 = vadd.f32 %v3539_v19, %v2755_v3  ;;  %v2237_v12 = vmul.f32 %v16748_v0, %v12531_v6  ;;  %17062 = vst [vmem:[#allocation141_spill] sm:$0xff] %v12712_v57  ;;  %v1454_v50 = vmul.f32 %v16749_v21, %v12527_v29 }
 0x374   : > { %v4567_v27 = vsel %vm4235_vm1, %v4042_v48, -inf  ;;  %v2238_v40 = vmul.f32 %v16748_v0, %v12542_v7  ;;  %v3533_v20 = vmul.f32 %v10019_v10, %v12547_v60  ;;  %v3534_v59 = vmul.f32 %v10019_v10, %v12550_v37 }
 0x375   : > { %v5241_v33 = vmax.f32 %v4566_v18, %v4567_v27  ;;  %v4052_v44 = vadd.f32 %v3540_v42, %v2756_v24  ;;  %v4576_v48 = vsel %vm4234_vm0, %v4051_v23, -inf  ;;  %v2749_v28 = vadd.f32 %v2237_v12, %v1453_v38  ;;  %v17063_v38 = vld [vmem:[#allocation45_spill] sm:$0xff]  ;;  %v12736_v12 = vpop.xlane.xlu1 %5065 }
 0x376   : > { %v2750_v43 = vadd.f32 %v2238_v40, %v1454_v50  ;;  %v1463_v3 = vmul.f32 %v16750_v58, %v12520_v36  ;;  %v1464_v19 = vmul.f32 %v16750_v58, %v12527_v29  ;;  %v2247_v5 = vmul.f32 %v16957_v34, %v12531_v6  ;;  %17064 = vst [vmem:[#allocation145_spill] sm:$0xff] %v12736_v12 }
 0x377   : > { %5242 = vmax.xlane.f32.xlu0 %v5241_v33  ;;  %v4577_v18 = vsel %vm4235_vm1, %v4052_v44, -inf  ;;  %v4045_v27 = vadd.f32 %v3533_v20, %v2749_v28  ;;  %v2248_v42 = vmul.f32 %v16957_v34, %v12542_v7  ;;  %v3543_v23 = vmul.f32 %v17063_v38, %v12547_v60  ;;  %v12740_v44 = vpop.xlane.xlu0 %5056 }
 0x378   : > { %v5256_v33 = vmax.f32 %v4576_v48, %v4577_v18  ;;  %v4046_v24 = vadd.f32 %v3534_v59, %v2750_v43  ;;  %v2759_v40 = vadd.f32 %v2247_v5, %v1463_v3  ;;  %17065 = vst [vmem:[#allocation168_spill] sm:$0xff] %v12740_v44  ;;  %v3544_v48 = vmul.f32 %v17063_v38, %v12550_v37  ;;  %v17066_v5 = vld [vmem:[#allocation169_spill] sm:$0xff] }
 0x379   : > { %v4570_v50 = vsel %vm4234_vm0, %v4045_v27, -inf  ;;  %v2760_v41 = vadd.f32 %v2248_v42, %v1464_v19  ;;  %v1457_v59 = vmul.f32 %v16852_v8, %v12520_v36  ;;  %v1458_v28 = vmul.f32 %v16852_v8, %v12527_v29  ;;  %v17067_v42 = vld [vmem:[#allocation27_spill] sm:$0xff]  ;;  %v12766_v9 = vpop.xlane.xlu1 %5071 }
 0x37a   : > { %5257 = vmax.xlane.f32.xlu1 %v5256_v33  ;;  %v4571_v20 = vsel %vm4235_vm1, %v4046_v24, -inf  ;;  %v4055_v18 = vadd.f32 %v3543_v23, %v2759_v40  ;;  %v2241_v3 = vmul.f32 %v17066_v5, %v12531_v6  ;;  %v2242_v19 = vmul.f32 %v17066_v5, %v12542_v7  ;;  %v17068_v40 = vld [vmem:[#allocation24_spill] sm:$0xff]  ;;  %17070 = vst [vmem:[#allocation44_spill] sm:$0xff] %v12766_v9 }
 0x37b   : > { %v5247_v43 = vmax.f32 %v4570_v50, %v4571_v20  ;;  %v4056_v27 = vadd.f32 %v3544_v48, %v2760_v41  ;;  %v3537_v33 = vmul.f32 %v17067_v42, %v12547_v60  ;;  %v3538_v24 = vmul.f32 %v17067_v42, %v12550_v37  ;;  %v17069_v41 = vld [vmem:[#allocation67_spill] sm:$0xff] }
 0x37c   : > { %v4580_v22 = vsel %vm4234_vm0, %v4055_v18, -inf  ;;  %v2753_v12 = vadd.f32 %v2241_v3, %v1457_v59  ;;  %v2754_v50 = vadd.f32 %v2242_v19, %v1458_v28  ;;  %v1467_v20 = vmul.f32 %v17068_v40, %v12520_v36  ;;  %v12770_v18 = vpop.xlane.xlu0 %5062  ;;  %v17072_v3 = vld [vmem:[#allocation167_spill] sm:$0xff] }
 0x37d   : > { %5248 = vmax.xlane.f32.xlu0 %v5247_v43  ;;  %v4581_v23 = vsel %vm4235_vm1, %v4056_v27, -inf  ;;  %v2251_v48 = vmul.f32 %v17069_v41, %v12531_v6  ;;  %v1468_v43 = vmul.f32 %v17068_v40, %v12527_v29  ;;  %17071 = vst [vmem:[#allocation6_spill] sm:$0xff] %v12770_v18  ;;  %v2252_v59 = vmul.f32 %v17069_v41, %v12542_v7 }
 0x37e   : > { %v5262_v4 = vmax.f32 %v4580_v22, %v4581_v23  ;;  %v4049_v25 = vadd.f32 %v3537_v33, %v2753_v12  ;;  %v4050_v15 = vadd.f32 %v3538_v24, %v2754_v50  ;;  %v3547_v19 = vmul.f32 %v17072_v3, %v12547_v60  ;;  %v17073_v33 = vld [vmem:[#allocation13_spill] sm:$0xff] }
 0x37f   : > { %v2763_v28 = vadd.f32 %v2251_v48, %v1467_v20  ;;  %v3548_v27 = vmul.f32 %v17072_v3, %v12550_v37  ;;  %v1461_v24 = vmul.f32 %v17073_v33, %v12520_v36  ;;  %v2764_v23 = vadd.f32 %v2252_v59, %v1468_v43  ;;  %v17074_v20 = vld [vmem:[#allocation171_spill] sm:$0xff] }
 0x380   : > { %5263 = vmax.xlane.f32.xlu1 %v5262_v4  ;;  %v4574_v22 = vsel %vm4234_vm0, %v4049_v25, -inf  ;;  %v4575_v12 = vsel %vm4235_vm1, %v4050_v15, -inf  ;;  %v2245_v48 = vmul.f32 %v17074_v20, %v12531_v6  ;;  %v1462_v18 = vmul.f32 %v17073_v33, %v12527_v29  ;;  %v17075_v25 = vld [vmem:[#allocation165_spill] sm:$0xff]  ;;  %v12802_v47 = vpop.xlane.xlu0 %5068 }
 0x381   : > { %v5253_v50 = vmax.f32 %v4574_v22, %v4575_v12  ;;  %v4059_v9 = vadd.f32 %v3547_v19, %v2763_v28  ;;  %v2246_v4 = vmul.f32 %v17074_v20, %v12542_v7  ;;  %v3541_v44 = vmul.f32 %v17075_v25, %v12547_v60  ;;  %v12796_v28 = vpop.xlane.xlu1 %5077  ;;  %v17077_v22 = vld [vmem:[#allocation31_spill] sm:$0xff]  ;;  %17078 = vst [vmem:[#allocation194_spill] sm:$0xff] %v12802_v47 }
 0x382   : > { %v3542_v15 = vmul.f32 %v17075_v25, %v12550_v37  ;;  %v4060_v13 = vadd.f32 %v3548_v27, %v2764_v23  ;;  %v2757_v59 = vadd.f32 %v2245_v48, %v1461_v24  ;;  %17076 = vst [vmem:[#allocation157_spill] sm:$0xff] %v12796_v28  ;;  %v1471_v12 = vmul.f32 %v17077_v22, %v12520_v36  ;;  %v17079_v27 = vld [vmem:[#allocation177_spill] sm:$0xff]  ;;  %v17080_v48 = vld [vmem:[#allocation54_spill] sm:$0xff] }
 0x383   : > { %5254 = vmax.xlane.f32.xlu0 %v5253_v50  ;;  %v4584_v43 = vsel %vm4234_vm0, %v4059_v9, -inf  ;;  %v2758_v19 = vadd.f32 %v2246_v4, %v1462_v18  ;;  %v1472_v57 = vmul.f32 %v17077_v22, %v12527_v29  ;;  %v2255_v23 = vmul.f32 %v17079_v27, %v12531_v6 }
 0x384   : > { %v4585_v17 = vsel %vm4235_vm1, %v4060_v13, -inf  ;;  %v4053_v50 = vadd.f32 %v3541_v44, %v2757_v59  ;;  %v2256_v9 = vmul.f32 %v17079_v27, %v12542_v7  ;;  %v3551_v4 = vmul.f32 %v17080_v48, %v12547_v60  ;;  %v17081_v59 = vld [vmem:[#allocation18_spill] sm:$0xff]  ;;  %v12832_v25 = vpop.xlane.xlu0 %5074 }
 0x385   : > { %v5268_v24 = vmax.f32 %v4584_v43, %v4585_v17  ;;  %v4054_v18 = vadd.f32 %v3542_v15, %v2758_v19  ;;  %v2767_v22 = vadd.f32 %v2255_v23, %v1471_v12  ;;  %v3552_v13 = vmul.f32 %v17080_v48, %v12550_v37  ;;  %v17082_v15 = vld [vmem:[#allocation175_spill] sm:$0xff]  ;;  %v12826_v23 = vpop.xlane.xlu1 %5083  ;;  %17085 = vst [vmem:[#allocation196_spill] sm:$0xff] %v12832_v25 }
 0x386   : > { %v4578_v28 = vsel %vm4234_vm0, %v4053_v50, -inf  ;;  %v2768_v47 = vadd.f32 %v2256_v9, %v1472_v57  ;;  %v1465_v27 = vmul.f32 %v17081_v59, %v12520_v36  ;;  %v1466_v17 = vmul.f32 %v17081_v59, %v12527_v29  ;;  %17083 = vst [vmem:[#allocation195_spill] sm:$0xff] %v12826_v23 }
 0x387   : > { %5269 = vmax.xlane.f32.xlu1 %v5268_v24  ;;  %v4579_v44 = vsel %vm4235_vm1, %v4054_v18, -inf  ;;  %v2249_v43 = vmul.f32 %v17082_v15, %v12531_v6  ;;  %v4063_v50 = vadd.f32 %v3551_v4, %v2767_v22  ;;  %v2250_v57 = vmul.f32 %v17082_v15, %v12542_v7  ;;  %v17084_v24 = vld [vmem:[#allocation53_spill] sm:$0xff] }
 0x388   : > { %v5259_v19 = vmax.f32 %v4578_v28, %v4579_v44  ;;  %v4064_v12 = vadd.f32 %v3552_v13, %v2768_v47  ;;  %v3545_v18 = vmul.f32 %v17084_v24, %v12547_v60  ;;  %v3546_v48 = vmul.f32 %v17084_v24, %v12550_v37  ;;  %v17087_v24 = vld [vmem:[#allocation82_spill] sm:$0xff]  ;;  %v12864_v15 = vpop.xlane.xlu0 %5080 }
 0x389   : > { %v2761_v9 = vadd.f32 %v2249_v43, %v1465_v27  ;;  %v4588_v28 = vsel %vm4234_vm0, %v4063_v50, -inf  ;;  %v2762_v22 = vadd.f32 %v2250_v57, %v1466_v17  ;;  %v17086_v27 = vld [vmem:[#allocation39_spill] sm:$0xff]  ;;  %v2259_v25 = vmul.f32 %v17087_v24, %v12531_v6  ;;  %v17088_v17 = vld [vmem:[#allocation162_spill] sm:$0xff]  ;;  %17092 = vst [vmem:[#allocation198_spill] sm:$0xff] %v12864_v15 }
 0x38a   : > { %5260 = vmax.xlane.f32.xlu0 %v5259_v19  ;;  %v4589_v47 = vsel %vm4235_vm1, %v4064_v12, -inf  ;;  %v1475_v44 = vmul.f32 %v17086_v27, %v12520_v36  ;;  %v1476_v23 = vmul.f32 %v17086_v27, %v12527_v29  ;;  %v2260_v19 = vmul.f32 %v17087_v24, %v12542_v7  ;;  %v17091_v24 = vld [vmem:[#allocation68_spill] sm:$0xff] }
 0x38b   : > { %v5274_v4 = vmax.f32 %v4588_v28, %v4589_v47  ;;  %v4057_v13 = vadd.f32 %v3545_v18, %v2761_v9  ;;  %v4058_v43 = vadd.f32 %v3546_v48, %v2762_v22  ;;  %v3555_v12 = vmul.f32 %v17088_v17, %v12547_v60  ;;  %v17089_v28 = vld [vmem:[#allocation23_spill] sm:$0xff]  ;;  %v12856_v22 = vpop.xlane.xlu1 %5089 }
 0x38c   : > { %v3556_v57 = vmul.f32 %v17088_v17, %v12550_v37  ;;  %v2771_v9 = vadd.f32 %v2259_v25, %v1475_v44  ;;  %v2772_v18 = vadd.f32 %v2260_v19, %v1476_v23  ;;  %v1469_v47 = vmul.f32 %v17089_v28, %v12520_v36  ;;  %17090 = vst [vmem:[#allocation197_spill] sm:$0xff] %v12856_v22  ;;  %v17093_v23 = vld [vmem:[#allocation59_spill] sm:$0xff] }
 0x38d   : > { %5275 = vmax.xlane.f32.xlu1 %v5274_v4  ;;  %v4582_v50 = vsel %vm4234_vm0, %v4057_v13, -inf  ;;  %v4583_v48 = vsel %vm4235_vm1, %v4058_v43, -inf  ;;  %v1470_v13 = vmul.f32 %v17089_v28, %v12527_v29  ;;  %v2253_v27 = vmul.f32 %v17091_v24, %v12531_v6 }
 0x38e   : > { %v5265_v4 = vmax.f32 %v4582_v50, %v4583_v48  ;;  %v2254_v17 = vmul.f32 %v17091_v24, %v12542_v7  ;;  %v4067_v43 = vadd.f32 %v3555_v12, %v2771_v9  ;;  %v4068_v25 = vadd.f32 %v3556_v57, %v2772_v18  ;;  %v17094_v12 = vld [vmem:[#allocation48_spill] sm:$0xff]  ;;  %v17095_v18 = vld [vmem:[#allocation181_spill] sm:$0xff] }
 0x38f   : > { %v3549_v44 = vmul.f32 %v17093_v23, %v12547_v60  ;;  %v3550_v19 = vmul.f32 %v17093_v23, %v12550_v37  ;;  %v2765_v50 = vadd.f32 %v2253_v27, %v1469_v47  ;;  %v1479_v57 = vmul.f32 %v17094_v12, %v12520_v36 }
 0x390   : > { %5266 = vmax.xlane.f32.xlu0 %v5265_v4  ;;  %v2766_v48 = vadd.f32 %v2254_v17, %v1470_v13  ;;  %v4592_v22 = vsel %vm4234_vm0, %v4067_v43, -inf  ;;  %v4593_v28 = vsel %vm4235_vm1, %v4068_v25, -inf  ;;  %v1480_v9 = vmul.f32 %v17094_v12, %v12527_v29  ;;  %v17096_v17 = vld [vmem:[#allocation164_spill] sm:$0xff]  ;;  %v12884_v13 = vpop.xlane.xlu1 %5095  ;;  %v17098_v25 = vld [vmem:[#allocation30_spill] sm:$0xff]  ;;  %v17101_v12 = vld [vmem:[#allocation163_spill] sm:$0xff] }
 0x391   : > { %v5280_v24 = vmax.f32 %v4592_v22, %v4593_v28  ;;  %v4061_v59 = vadd.f32 %v3549_v44, %v2765_v50  ;;  %v2263_v4 = vmul.f32 %v17095_v18, %v12531_v6  ;;  %v2264_v27 = vmul.f32 %v17095_v18, %v12542_v7  ;;  %17097 = vst [vmem:[#allocation199_spill] sm:$0xff] %v12884_v13  ;;  %v17100_v13 = vld [vmem:[#allocation178_spill] sm:$0xff] }
 0x392   : > { %v4062_v15 = vadd.f32 %v3550_v19, %v2766_v48  ;;  %v3559_v47 = vmul.f32 %v17096_v17, %v12547_v60  ;;  %v3560_v43 = vmul.f32 %v17096_v17, %v12550_v37  ;;  %v1473_v44 = vmul.f32 %v17098_v25, %v12520_v36  ;;  %v12894_v19 = vpop.xlane.xlu0 %5086 }
 0x393   : > { %5281 = vmax.xlane.f32.xlu1 %v5280_v24  ;;  %v4586_v28 = vsel %vm4234_vm0, %v4061_v59, -inf  ;;  %17099 = vst [vmem:[#allocation200_spill] sm:$0xff] %v12894_v19  ;;  %v2775_v48 = vadd.f32 %v2263_v4, %v1479_v57  ;;  %v2776_v18 = vadd.f32 %v2264_v27, %v1480_v9  ;;  %v1474_v24 = vmul.f32 %v17098_v25, %v12527_v29  ;;  %v17103_v25 = vld [vmem:[#allocation96_spill] sm:$0xff] }
 0x394   : > { %v4587_v22 = vsel %vm4235_vm1, %v4062_v15, -inf  ;;  %v2257_v59 = vmul.f32 %v17100_v13, %v12531_v6  ;;  %v2258_v15 = vmul.f32 %v17100_v13, %v12542_v7  ;;  %v3553_v17 = vmul.f32 %v17101_v12, %v12547_v60  ;;  %v12914_v33 = vpop.xlane.xlu1 %5101 }
 0x395   : > { %v5271_v50 = vmax.f32 %v4586_v28, %v4587_v22  ;;  %v3554_v23 = vmul.f32 %v17101_v12, %v12550_v37  ;;  %v4071_v19 = vadd.f32 %v3559_v47, %v2775_v48  ;;  %v4072_v28 = vadd.f32 %v3560_v43, %v2776_v18  ;;  %v17102_v22 = vld [vmem:[#allocation62_spill] sm:$0xff]  ;;  %17104 = vst [vmem:[#allocation201_spill] sm:$0xff] %v12914_v33 }
 0x396   : > { %v2769_v57 = vadd.f32 %v2257_v59, %v1473_v44  ;;  %v2770_v9 = vadd.f32 %v2258_v15, %v1474_v24  ;;  %v1483_v13 = vmul.f32 %v17102_v22, %v12520_v36  ;;  %v2267_v20 = vmul.f32 %v17103_v25, %v12531_v6  ;;  %v12918_v43 = vpop.xlane.xlu0 %5092  ;;  %v17106_v48 = vld [vmem:[#allocation166_spill] sm:$0xff] }
 0x397   : > { %5272 = vmax.xlane.f32.xlu0 %v5271_v50  ;;  %v4596_v4 = vsel %vm4234_vm0, %v4071_v19, -inf  ;;  %v4597_v27 = vsel %vm4235_vm1, %v4072_v28, -inf  ;;  %v1484_v18 = vmul.f32 %v17102_v22, %v12527_v29  ;;  %17105 = vst [vmem:[#allocation202_spill] sm:$0xff] %v12918_v43  ;;  %v2268_v44 = vmul.f32 %v17103_v25, %v12542_v7  ;;  %v17107_v15 = vld [vmem:[#allocation38_spill] sm:$0xff] }
 0x398   : > { %v5286_v12 = vmax.f32 %v4596_v4, %v4597_v27  ;;  %v4065_v50 = vadd.f32 %v3553_v17, %v2769_v57  ;;  %v4066_v47 = vadd.f32 %v3554_v23, %v2770_v9  ;;  %v2779_v19 = vadd.f32 %v2267_v20, %v1483_v13  ;;  %v17108_v20 = vld [vmem:[#allocation83_spill] sm:$0xff] }
 0x399   : > { %v3563_v24 = vmul.f32 %v17106_v48, %v12547_v60  ;;  %v3564_v59 = vmul.f32 %v17106_v48, %v12550_v37  ;;  %v1477_v28 = vmul.f32 %v17107_v15, %v12520_v36  ;;  %v2780_v9 = vadd.f32 %v2268_v44, %v1484_v18 }
 0x39a   : > { %5287 = vmax.xlane.f32.xlu1 %v5286_v12  ;;  %v4590_v17 = vsel %vm4234_vm0, %v4065_v50, -inf  ;;  %v4591_v23 = vsel %vm4235_vm1, %v4066_v47, -inf  ;;  %v2261_v13 = vmul.f32 %v17108_v20, %v12531_v6  ;;  %v1478_v27 = vmul.f32 %v17107_v15, %v12527_v29  ;;  %v17109_v50 = vld [vmem:[#allocation58_spill] sm:$0xff]  ;;  %v12950_v25 = vpop.xlane.xlu0 %5098 }
 0x39b   : > { %v5277_v57 = vmax.f32 %v4590_v17, %v4591_v23  ;;  %v4075_v4 = vadd.f32 %v3563_v24, %v2779_v19  ;;  %v2262_v12 = vmul.f32 %v17108_v20, %v12542_v7  ;;  %v3557_v33 = vmul.f32 %v17109_v50, %v12547_v60  ;;  %v12944_v19 = vpop.xlane.xlu1 %5107  ;;  %v17111_v17 = vld [vmem:[#allocation75_spill] sm:$0xff]  ;;  %17112 = vst [vmem:[#allocation204_spill] sm:$0xff] %v12950_v25 }
 0x39c   : > { %v3558_v47 = vmul.f32 %v17109_v50, %v12550_v37  ;;  %v4076_v43 = vadd.f32 %v3564_v59, %v2780_v9  ;;  %v2773_v44 = vadd.f32 %v2261_v13, %v1477_v28  ;;  %17110 = vst [vmem:[#allocation203_spill] sm:$0xff] %v12944_v19  ;;  %v1487_v23 = vmul.f32 %v17111_v17, %v12520_v36  ;;  %v17113_v59 = vld [vmem:[#allocation186_spill] sm:$0xff] }
 0x39d   : > { %5278 = vmax.xlane.f32.xlu0 %v5277_v57  ;;  %v4600_v18 = vsel %vm4234_vm0, %v4075_v4, -inf  ;;  %v2774_v24 = vadd.f32 %v2262_v12, %v1478_v27  ;;  %v1488_v48 = vmul.f32 %v17111_v17, %v12527_v29  ;;  %v2271_v9 = vmul.f32 %v17113_v59, %v12531_v6  ;;  %v17114_v27 = vld [vmem:[#allocation69_spill] sm:$0xff] }
 0x39e   : > { %v4601_v22 = vsel %vm4235_vm1, %v4076_v43, -inf  ;;  %v4069_v57 = vadd.f32 %v3557_v33, %v2773_v44  ;;  %v2272_v28 = vmul.f32 %v17113_v59, %v12542_v7  ;;  %v3567_v12 = vmul.f32 %v17114_v27, %v12547_v60  ;;  %v17115_v44 = vld [vmem:[#allocation47_spill] sm:$0xff]  ;;  %v12980_v50 = vpop.xlane.xlu0 %5104 }
 0x39f   : > { %v5292_v4 = vmax.f32 %v4600_v18, %v4601_v22  ;;  %v4070_v13 = vadd.f32 %v3558_v47, %v2774_v24  ;;  %v2783_v17 = vadd.f32 %v2271_v9, %v1487_v23  ;;  %v3568_v43 = vmul.f32 %v17114_v27, %v12550_v37  ;;  %v17116_v47 = vld [vmem:[#allocation182_spill] sm:$0xff]  ;;  %v12974_v9 = vpop.xlane.xlu1 %5113  ;;  %17119 = vst [vmem:[#allocation206_spill] sm:$0xff] %v12980_v50 }
 0x3a0   : > { %v4594_v19 = vsel %vm4234_vm0, %v4069_v57, -inf  ;;  %v2784_v25 = vadd.f32 %v2272_v28, %v1488_v48  ;;  %v1481_v59 = vmul.f32 %v17115_v44, %v12520_v36  ;;  %v1482_v22 = vmul.f32 %v17115_v44, %v12527_v29  ;;  %17117 = vst [vmem:[#allocation205_spill] sm:$0xff] %v12974_v9 }
 0x3a1   : > { %5293 = vmax.xlane.f32.xlu1 %v5292_v4  ;;  %v4595_v33 = vsel %vm4235_vm1, %v4070_v13, -inf  ;;  %v2265_v18 = vmul.f32 %v17116_v47, %v12531_v6  ;;  %v4079_v57 = vadd.f32 %v3567_v12, %v2783_v17  ;;  %v2266_v48 = vmul.f32 %v17116_v47, %v12542_v7  ;;  %v17118_v4 = vld [vmem:[#allocation66_spill] sm:$0xff] }
 0x3a2   : > { %v5283_v24 = vmax.f32 %v4594_v19, %v4595_v33  ;;  %v4080_v23 = vadd.f32 %v3568_v43, %v2784_v25  ;;  %v3561_v13 = vmul.f32 %v17118_v4, %v12547_v60  ;;  %v3562_v27 = vmul.f32 %v17118_v4, %v12550_v37  ;;  %v17121_v4 = vld [vmem:[#allocation109_spill] sm:$0xff]  ;;  %v13012_v47 = vpop.xlane.xlu0 %5110 }
 0x3a3   : > { %v2777_v28 = vadd.f32 %v2265_v18, %v1481_v59  ;;  %v4604_v19 = vsel %vm4234_vm0, %v4079_v57, -inf  ;;  %v2778_v17 = vadd.f32 %v2266_v48, %v1482_v22  ;;  %v17120_v59 = vld [vmem:[#allocation88_spill] sm:$0xff]  ;;  %v2275_v50 = vmul.f32 %v17121_v4, %v12531_v6  ;;  %v17122_v22 = vld [vmem:[#allocation77_spill] sm:$0xff]  ;;  %17126 = vst [vmem:[#allocation208_spill] sm:$0xff] %v13012_v47 }
 0x3a4   : > { %5284 = vmax.xlane.f32.xlu0 %v5283_v24  ;;  %v4605_v25 = vsel %vm4235_vm1, %v4080_v23, -inf  ;;  %v1491_v33 = vmul.f32 %v17120_v59, %v12520_v36  ;;  %v1492_v9 = vmul.f32 %v17120_v59, %v12527_v29  ;;  %v2276_v24 = vmul.f32 %v17121_v4, %v12542_v7  ;;  %v17125_v4 = vld [vmem:[#allocation97_spill] sm:$0xff] }
 0x3a5   : > { %v5298_v12 = vmax.f32 %v4604_v19, %v4605_v25  ;;  %v4073_v43 = vadd.f32 %v3561_v13, %v2777_v28  ;;  %v4074_v18 = vadd.f32 %v3562_v27, %v2778_v17  ;;  %v3571_v23 = vmul.f32 %v17122_v22, %v12547_v60  ;;  %v17123_v19 = vld [vmem:[#allocation61_spill] sm:$0xff]  ;;  %v13004_v17 = vpop.xlane.xlu1 %5119 }
 0x3a6   : > { %v3572_v48 = vmul.f32 %v17122_v22, %v12550_v37  ;;  %v2787_v28 = vadd.f32 %v2275_v50, %v1491_v33  ;;  %v2788_v13 = vadd.f32 %v2276_v24, %v1492_v9  ;;  %v1485_v25 = vmul.f32 %v17123_v19, %v12520_v36  ;;  %17124 = vst [vmem:[#allocation207_spill] sm:$0xff] %v13004_v17  ;;  %v17127_v9 = vld [vmem:[#allocation71_spill] sm:$0xff] }
 0x3a7   : > { %5299 = vmax.xlane.f32.xlu1 %v5298_v12  ;;  %v4598_v57 = vsel %vm4234_vm0, %v4073_v43, -inf  ;;  %v4599_v27 = vsel %vm4235_vm1, %v4074_v18, -inf  ;;  %v1486_v43 = vmul.f32 %v17123_v19, %v12527_v29  ;;  %v2269_v59 = vmul.f32 %v17125_v4, %v12531_v6 }
 0x3a8   : > { %v5289_v12 = vmax.f32 %v4598_v57, %v4599_v27  ;;  %v2270_v22 = vmul.f32 %v17125_v4, %v12542_v7  ;;  %v4083_v18 = vadd.f32 %v3571_v23, %v2787_v28  ;;  %v4084_v50 = vadd.f32 %v3572_v48, %v2788_v13  ;;  %v17128_v23 = vld [vmem:[#allocation102_spill] sm:$0xff]  ;;  %v17129_v13 = vld [vmem:[#allocation124_spill] sm:$0xff] }
 0x3a9   : > { %v3565_v33 = vmul.f32 %v17127_v9, %v12547_v60  ;;  %v3566_v24 = vmul.f32 %v17127_v9, %v12550_v37  ;;  %v2781_v57 = vadd.f32 %v2269_v59, %v1485_v25  ;;  %v1495_v48 = vmul.f32 %v17128_v23, %v12520_v36  ;;  %v17137_v9 = vld [vmem:[#allocation122_spill] sm:$0xff] }
 0x3aa   : > { %5290 = vmax.xlane.f32.xlu0 %v5289_v12  ;;  %v2782_v27 = vadd.f32 %v2270_v22, %v1486_v43  ;;  %v4608_v17 = vsel %vm4234_vm0, %v4083_v18, -inf  ;;  %v4609_v19 = vsel %vm4235_vm1, %v4084_v50, -inf  ;;  %v1496_v28 = vmul.f32 %v17128_v23, %v12527_v29  ;;  %v17130_v22 = vld [vmem:[#allocation84_spill] sm:$0xff]  ;;  %v13032_v43 = vpop.xlane.xlu1 %5125  ;;  %v13040_v50 = vpop.xlane.xlu0 %5116 }
 0x3ab   : > { %v5304_v4 = vmax.f32 %v4608_v17, %v4609_v19  ;;  %v4077_v44 = vadd.f32 %v3565_v33, %v2781_v57  ;;  %v2279_v12 = vmul.f32 %v17129_v13, %v12531_v6  ;;  %v2280_v59 = vmul.f32 %v17129_v13, %v12542_v7  ;;  %17131 = vst [vmem:[#allocation209_spill] sm:$0xff] %v13032_v43  ;;  %v17134_v43 = vld [vmem:[#allocation187_spill] sm:$0xff]  ;;  %v17135_v23 = vld [vmem:[#allocation80_spill] sm:$0xff] }
 0x3ac   : > { %v4078_v47 = vadd.f32 %v3566_v24, %v2782_v27  ;;  %v3575_v25 = vmul.f32 %v17130_v22, %v12547_v60  ;;  %v3576_v18 = vmul.f32 %v17130_v22, %v12550_v37  ;;  %17132 = vst [vmem:[#allocation210_spill] sm:$0xff] %v13040_v50  ;;  %v17133_v27 = vld [vmem:[#allocation74_spill] sm:$0xff]  ;;  %v3569_v22 = vmul.f32 %v17135_v23, %v12547_v60 }
 0x3ad   : > { %5305 = vmax.xlane.f32.xlu1 %v5304_v4  ;;  %v4602_v19 = vsel %vm4234_vm0, %v4077_v44, -inf  ;;  %v2791_v24 = vadd.f32 %v2279_v12, %v1495_v48  ;;  %v2792_v57 = vadd.f32 %v2280_v59, %v1496_v28  ;;  %v1489_v13 = vmul.f32 %v17133_v27, %v12520_v36 }
 0x3ae   : > { %v4603_v17 = vsel %vm4235_vm1, %v4078_v47, -inf  ;;  %v1490_v4 = vmul.f32 %v17133_v27, %v12527_v29  ;;  %v2273_v44 = vmul.f32 %v17134_v43, %v12531_v6  ;;  %v2274_v47 = vmul.f32 %v17134_v43, %v12542_v7  ;;  %v17136_v27 = vld [vmem:[#allocation115_spill] sm:$0xff] }
 0x3af   : > { %v5295_v33 = vmax.f32 %v4602_v19, %v4603_v17  ;;  %v4087_v50 = vadd.f32 %v3575_v25, %v2791_v24  ;;  %v4088_v19 = vadd.f32 %v3576_v18, %v2792_v57  ;;  %v3570_v48 = vmul.f32 %v17135_v23, %v12550_v37  ;;  %v13066_v57 = vpop.xlane.xlu0 %5122  ;;  %v17156_v23 = vld [vmem:[#allocation17_spill] sm:$0xff] }
 0x3b0   : > { %v2785_v28 = vadd.f32 %v2273_v44, %v1489_v13  ;;  %v2786_v12 = vadd.f32 %v2274_v47, %v1490_v4  ;;  %v1499_v43 = vmul.f32 %v17136_v27, %v12520_v36  ;;  %v2283_v20 = vmul.f32 %v17137_v9, %v12531_v6  ;;  %17139 = vst [vmem:[#allocation212_spill] sm:$0xff] %v13066_v57  ;;  %v17140_v44 = vld [vmem:[#allocation42_spill] sm:$0xff] }
 0x3b1   : > { %5296 = vmax.xlane.f32.xlu0 %v5295_v33  ;;  %v4612_v59 = vsel %vm4234_vm0, %v4087_v50, -inf  ;;  %v4613_v17 = vsel %vm4235_vm1, %v4088_v19, -inf  ;;  %v13062_v33 = vpop.xlane.xlu1 %5131  ;;  %v1500_v13 = vmul.f32 %v17136_v27, %v12527_v29  ;;  %v2284_v50 = vmul.f32 %v17137_v9, %v12542_v7 }
 0x3b2   : > { %17138 = vst [vmem:[#allocation211_spill] sm:$0xff] %v13062_v33  ;;  %v5310_v25 = vmax.f32 %v4612_v59, %v4613_v17  ;;  %v4081_v18 = vadd.f32 %v3569_v22, %v2785_v28  ;;  %v4082_v24 = vadd.f32 %v3570_v48, %v2786_v12  ;;  %v2795_v4 = vadd.f32 %v2283_v20, %v1499_v43  ;;  %v17141_v28 = vld [vmem:[#allocation87_spill] sm:$0xff]  ;;  %v17142_v20 = vld [vmem:[#allocation110_spill] sm:$0xff] }
 0x3b3   : > { %v3579_v47 = vmul.f32 %v17140_v44, %v12547_v60  ;;  %v3580_v19 = vmul.f32 %v17140_v44, %v12550_v37  ;;  %v1493_v12 = vmul.f32 %v17141_v28, %v12520_v36  ;;  %v2796_v17 = vadd.f32 %v2284_v50, %v1500_v13 }
 0x3b4   : > { %5311 = vmax.xlane.f32.xlu1 %v5310_v25  ;;  %v4606_v22 = vsel %vm4234_vm0, %v4081_v18, -inf  ;;  %v4607_v48 = vsel %vm4235_vm1, %v4082_v24, -inf  ;;  %v2277_v43 = vmul.f32 %v17142_v20, %v12531_v6  ;;  %v1494_v57 = vmul.f32 %v17141_v28, %v12527_v29  ;;  %v17143_v18 = vld [vmem:[#allocation89_spill] sm:$0xff] }
 0x3b5   : > { %v5301_v59 = vmax.f32 %v4606_v22, %v4607_v48  ;;  %v4091_v33 = vadd.f32 %v3579_v47, %v2795_v4  ;;  %v2278_v25 = vmul.f32 %v17142_v20, %v12542_v7  ;;  %v3573_v44 = vmul.f32 %v17143_v18, %v12547_v60  ;;  %v13092_v4 = vpop.xlane.xlu1 %5137  ;;  %v17145_v22 = vld [vmem:[#allocation129_spill] sm:$0xff]  ;;  %v13098_v20 = vpop.xlane.xlu0 %5128 }
 0x3b6   : > { %v3574_v24 = vmul.f32 %v17143_v18, %v12550_v37  ;;  %v4092_v9 = vadd.f32 %v3580_v19, %v2796_v17  ;;  %v2789_v50 = vadd.f32 %v2277_v43, %v1493_v12  ;;  %17144 = vst [vmem:[#allocation213_spill] sm:$0xff] %v13092_v4  ;;  %v1503_v48 = vmul.f32 %v17145_v22, %v12520_v36  ;;  %v17147_v19 = vld [vmem:[#allocation136_spill] sm:$0xff]  ;;  %v17148_v43 = vld [vmem:[#allocation95_spill] sm:$0xff] }
 0x3b7   : > { %5302 = vmax.xlane.f32.xlu0 %v5301_v59  ;;  %v4616_v13 = vsel %vm4234_vm0, %v4091_v33, -inf  ;;  %v2790_v47 = vadd.f32 %v2278_v25, %v1494_v57  ;;  %v1504_v27 = vmul.f32 %v17145_v22, %v12527_v29  ;;  %17146 = vst [vmem:[#allocation214_spill] sm:$0xff] %v13098_v20  ;;  %v2287_v17 = vmul.f32 %v17147_v19, %v12531_v6 }
 0x3b8   : > { %v4617_v18 = vsel %vm4235_vm1, %v4092_v9, -inf  ;;  %v4085_v59 = vadd.f32 %v3573_v44, %v2789_v50  ;;  %v2288_v33 = vmul.f32 %v17147_v19, %v12542_v7  ;;  %v3583_v25 = vmul.f32 %v17148_v43, %v12547_v60  ;;  %v17149_v50 = vld [vmem:[#allocation101_spill] sm:$0xff] }
 0x3b9   : > { %v5316_v12 = vmax.f32 %v4616_v13, %v4617_v18  ;;  %v4086_v57 = vadd.f32 %v3574_v24, %v2790_v47  ;;  %v2799_v20 = vadd.f32 %v2287_v17, %v1503_v48  ;;  %v3584_v9 = vmul.f32 %v17148_v43, %v12550_v37  ;;  %v17150_v13 = vld [vmem:[#allocation188_spill] sm:$0xff]  ;;  %v777_v17 = vld [vmem:[%s8251_s22 + $0x30] sm:$0x77] }
 0x3ba   : > { %v4610_v4 = vsel %vm4234_vm0, %v4085_v59, -inf  ;;  %v2800_v22 = vadd.f32 %v2288_v33, %v1504_v27  ;;  %v1497_v18 = vmul.f32 %v17149_v50, %v12520_v36  ;;  %v1498_v24 = vmul.f32 %v17149_v50, %v12527_v29  ;;  %v13123_v33 = vpop.xlane.xlu1 %5143  ;;  %v13129_v50 = vpop.xlane.xlu0 %5134 }
 0x3bb   : > { %5317 = vmax.xlane.f32.xlu1 %v5316_v12  ;;  %v4611_v44 = vsel %vm4235_vm1, %v4086_v57, -inf  ;;  %v2281_v47 = vmul.f32 %v17150_v13, %v12531_v6  ;;  %v4095_v59 = vadd.f32 %v3583_v25, %v2799_v20  ;;  %v2282_v27 = vmul.f32 %v17150_v13, %v12542_v7  ;;  %17151 = vst [vmem:[#allocation215_spill] sm:$0xff] %v13123_v33  ;;  %v17152_v57 = vld [vmem:[#allocation91_spill] sm:$0xff]  ;;  %v17155_v33 = vld [vmem:[#allocation16_spill] sm:$0xff] }
 0x3bc   : > { %v5307_v19 = vmax.f32 %v4610_v4, %v4611_v44  ;;  %v4096_v48 = vadd.f32 %v3584_v9, %v2800_v22  ;;  %v3577_v43 = vmul.f32 %v17152_v57, %v12547_v60  ;;  %v3578_v28 = vmul.f32 %v17152_v57, %v12550_v37  ;;  %17153 = vst [vmem:[#allocation216_spill] sm:$0xff] %v13129_v50  ;;  %v17154_v44 = vld [vmem:[#allocation15_spill] sm:$0xff]  ;;  %v17157_v57 = vld [vmem:[#allocation20_spill] sm:$0xff]  ;;  %v17163_v50 = vld [vmem:[#allocation142_spill] sm:$0xff] }
 0x3bd   : > { %v2793_v12 = vadd.f32 %v2281_v47, %v1497_v18  ;;  %v4620_v20 = vsel %vm4234_vm0, %v4095_v59, -inf  ;;  %v2794_v22 = vadd.f32 %v2282_v27, %v1498_v24  ;;  %v870_v18 = vrot.slane %v777_v17, %v17154_v44 }
 0x3be   : > { %5308 = vmax.xlane.f32.xlu0 %v5307_v19  ;;  %v4621_v4 = vsel %vm4235_vm1, %v4096_v48, -inf  ;;  %v874_v13 = vrot.slane %v777_v17, %v17155_v33  ;;  %v1686_v15 = vrot.slane %v777_v17, %v17156_v23  ;;  %v1690_v3 = vrot.slane %v777_v17, %v17157_v57  ;;  %v17158_v48 = vld [vmem:[#allocation21_spill] sm:$0xff] }
 0x3bf   : > { %v5322_v25 = vmax.f32 %v4620_v20, %v4621_v4  ;;  %v4089_v9 = vadd.f32 %v3577_v43, %v2793_v12  ;;  %v4090_v47 = vadd.f32 %v3578_v28, %v2794_v22  ;;  %v13142_v59 = vrot.slane %v870_v18, %v17154_v44  ;;  %v13156_v20 = vpop.xlane.xlu1 %5149  ;;  %v17160_v22 = vld [vmem:[#allocation22_spill] sm:$0xff]  ;;  %v13162_v18 = vpop.xlane.xlu0 %5140 }
 0x3c0   : > { %v2982_v24 = vrot.slane %v777_v17, %v17158_v48  ;;  %v13148_v28 = vrot.slane %v874_v13, %v17154_v44  ;;  %v13151_v27 = vrot.slane %v1686_v15, %v17156_v23  ;;  %v13154_v12 = vrot.slane %v1690_v3, %v17156_v23  ;;  %17159 = vst [vmem:[#allocation217_spill] sm:$0xff] %v13156_v20 }
 0x3c1   : > { %5323 = vmax.xlane.f32.xlu1 %v5322_v25  ;;  %v4614_v19 = vsel %vm4234_vm0, %v4089_v9, -inf  ;;  %v4615_v43 = vsel %vm4235_vm1, %v4090_v47, -inf  ;;  %v2986_v25 = vrot.slane %v777_v17, %v17160_v22  ;;  %17161 = vst [vmem:[#allocation218_spill] sm:$0xff] %v13162_v18  ;;  %v17162_v47 = vld [vmem:[#allocation5_spill] sm:$0xff] }
 0x3c2   : > { %v5313_v4 = vmax.f32 %v4614_v19, %v4615_v43  ;;  %v13160_v9 = vrot.slane %v2982_v24, %v17158_v48  ;;  %v1507_v13 = vmul.f32 %v17162_v47, %v13142_v59  ;;  %v1508_v15 = vmul.f32 %v17162_v47, %v13148_v28  ;;  %v17164_v19 = vld [vmem:[#allocation144_spill] sm:$0xff]  ;;  %v17165_v43 = vld [vmem:[#allocation114_spill] sm:$0xff]  ;;  %v17166_v22 = vld [vmem:[#allocation125_spill] sm:$0xff] }
 0x3c3   : > { %v2291_v3 = vmul.f32 %v17163_v50, %v13151_v27  ;;  %v2292_v20 = vmul.f32 %v17163_v50, %v13154_v12  ;;  %v13173_v17 = vrot.slane %v2986_v25, %v17158_v48  ;;  %v1501_v18 = vmul.f32 %v17165_v43, %v12520_v36  ;;  %v13195_v5 = vpop.xlane.xlu0 %5146 }
 0x3c4   : > { %5314 = vmax.xlane.f32.xlu0 %v5313_v4  ;;  %v3587_v24 = vmul.f32 %v17164_v19, %v13160_v9  ;;  %v2285_v57 = vmul.f32 %v17166_v22, %v12531_v6  ;;  %v1502_v23 = vmul.f32 %v17165_v43, %v12527_v29  ;;  %v2286_v50 = vmul.f32 %v17166_v22, %v12542_v7  ;;  %v17167_v4 = vld [vmem:[#allocation183_spill] sm:$0xff] }
 0x3c5   : > { %v2803_v47 = vadd.f32 %v2291_v3, %v1507_v13  ;;  %v3581_v25 = vmul.f32 %v17167_v4, %v12547_v60  ;;  %v2804_v48 = vadd.f32 %v2292_v20, %v1508_v15  ;;  %v3588_v33 = vmul.f32 %v17164_v19, %v13173_v17  ;;  %v13191_v13 = vpop.xlane.xlu1 %5155  ;;  %17169 = vst [vmem:[#allocation219_spill] sm:$0xff] %v13195_v5 }
 0x3c6   : > { %v2797_v44 = vadd.f32 %v2285_v57, %v1501_v18  ;;  %v3582_v41 = vmul.f32 %v17167_v4, %v12550_v37  ;;  %v2798_v42 = vadd.f32 %v2286_v50, %v1502_v23  ;;  %17168 = vst [vmem:[#allocation144_spill] sm:$0xff] %v13191_v13  ;;  %v1511_v22 = vmul.f32 %v16824_v51, %v13142_v59 }
 0x3c7   : > { %v4099_v40 = vadd.f32 %v3587_v24, %v2803_v47  ;;  %v4100_v3 = vadd.f32 %v3588_v33, %v2804_v48  ;;  %v1512_v57 = vmul.f32 %v16824_v51, %v13148_v28  ;;  %v2295_v18 = vmul.f32 %v16825_v11, %v13151_v27 }
 0x3c8   : > { %v4093_v43 = vadd.f32 %v3581_v25, %v2797_v44  ;;  %v4094_v15 = vadd.f32 %v3582_v41, %v2798_v42  ;;  %v2296_v33 = vmul.f32 %v16825_v11, %v13154_v12  ;;  %v3591_v44 = vmul.f32 %v16828_v2, %v13160_v9 }
 0x3c9   : > { %v4624_v20 = vsel %vm4234_vm0, %v4099_v40, -inf  ;;  %v4625_v23 = vsel %vm4235_vm1, %v4100_v3, -inf  ;;  %v2807_v41 = vadd.f32 %v2295_v18, %v1511_v22  ;;  %v3592_v48 = vmul.f32 %v16828_v2, %v13173_v17  ;;  %v13225_v18 = vpop.xlane.xlu1 %5161 }
 0x3ca   : > { %v4618_v50 = vsel %vm4234_vm0, %v4093_v43, -inf  ;;  %v5328_v40 = vmax.f32 %v4624_v20, %v4625_v23  ;;  %v4619_v42 = vsel %vm4235_vm1, %v4094_v15, -inf  ;;  %v2808_v24 = vadd.f32 %v2296_v33, %v1512_v57  ;;  %17170 = vst [vmem:[#allocation220_spill] sm:$0xff] %v13225_v18  ;;  %v13229_v23 = vpop.xlane.xlu0 %5152 }
 0x3cb   : > { %v5319_v47 = vmax.f32 %v4618_v50, %v4619_v42  ;;  %v1505_v25 = vmul.f32 %v16829_v52, %v12520_v36  ;;  %v1506_v43 = vmul.f32 %v16829_v52, %v12527_v29  ;;  %v4103_v3 = vadd.f32 %v3591_v44, %v2807_v41  ;;  %17171 = vst [vmem:[#allocation221_spill] sm:$0xff] %v13229_v23 }
 0x3cc   : > { %5329 = vmax.xlane.f32.xlu1 %v5328_v40  ;;  %v2289_v20 = vmul.f32 %v16830_v62, %v12531_v6  ;;  %v2290_v15 = vmul.f32 %v16830_v62, %v12542_v7  ;;  %v3585_v22 = vmul.f32 %v16831_v54, %v12547_v60  ;;  %v4104_v57 = vadd.f32 %v3592_v48, %v2808_v24  ;;  %v17193_v62 = vld [vmem:[#allocation177_spill] sm:$0xff] }
 0x3cd   : > { %5320 = vmax.xlane.f32.xlu0 %v5319_v47  ;;  %v3586_v36 = vmul.f32 %v16831_v54, %v12550_v37  ;;  %v4628_v29 = vsel %vm4234_vm0, %v4103_v3, -inf  ;;  %v1515_v60 = vmul.f32 %v16832_v31, %v13142_v59  ;;  %v2299_v33 = vmul.f32 %v16834_v26, %v13151_v27 }
 0x3ce   : > { %v2801_v50 = vadd.f32 %v2289_v20, %v1505_v25  ;;  %v2802_v6 = vadd.f32 %v2290_v15, %v1506_v43  ;;  %v4629_v7 = vsel %vm4235_vm1, %v4104_v57, -inf  ;;  %v1516_v37 = vmul.f32 %v16832_v31, %v13148_v28  ;;  %v13253_v20 = vpop.xlane.xlu1 %5167 }
 0x3cf   : > { %v5334_v44 = vmax.f32 %v4628_v29, %v4629_v7  ;;  %v2300_v41 = vmul.f32 %v16834_v26, %v13154_v12  ;;  %v2811_v48 = vadd.f32 %v2299_v33, %v1515_v60  ;;  %v3595_v47 = vmul.f32 %v16836_v45, %v13160_v9  ;;  %17172 = vst [vmem:[#allocation222_spill] sm:$0xff] %v13253_v20  ;;  %v13257_v29 = vpop.xlane.xlu0 %5158 }
 0x3d0   : > { %v4097_v40 = vadd.f32 %v3585_v22, %v2801_v50  ;;  %v4098_v42 = vadd.f32 %v3586_v36, %v2802_v6  ;;  %v3596_v24 = vmul.f32 %v16836_v45, %v13173_v17  ;;  %v1509_v3 = vmul.f32 %v16943_v39, %v13142_v59  ;;  %17173 = vst [vmem:[#allocation223_spill] sm:$0xff] %v13257_v29 }
 0x3d1   : > { %5335 = vmax.xlane.f32.xlu1 %v5334_v44  ;;  %v2812_v22 = vadd.f32 %v2300_v41, %v1516_v37  ;;  %v4107_v57 = vadd.f32 %v3595_v47, %v2811_v48  ;;  %v2293_v36 = vmul.f32 %v16945_v14, %v13151_v27  ;;  %v1510_v50 = vmul.f32 %v16943_v39, %v13148_v28 }
 0x3d2   : > { %v4622_v25 = vsel %vm4234_vm0, %v4097_v40, -inf  ;;  %v4623_v43 = vsel %vm4235_vm1, %v4098_v42, -inf  ;;  %v2294_v6 = vmul.f32 %v16945_v14, %v13154_v12  ;;  %v3589_v7 = vmul.f32 %v16946_v46, %v13160_v9 }
 0x3d3   : > { %v5325_v15 = vmax.f32 %v4622_v25, %v4623_v43  ;;  %v3590_v60 = vmul.f32 %v16946_v46, %v13173_v17  ;;  %v4108_v33 = vadd.f32 %v3596_v24, %v2812_v22  ;;  %v4632_v44 = vsel %vm4234_vm0, %v4107_v57, -inf  ;;  %v13281_v22 = vpop.xlane.xlu1 %5173 }
 0x3d4   : > { %v2805_v40 = vadd.f32 %v2293_v36, %v1509_v3  ;;  %v2806_v42 = vadd.f32 %v2294_v6, %v1510_v50  ;;  %v1519_v37 = vmul.f32 %v16840_v32, %v13142_v59  ;;  %v1520_v41 = vmul.f32 %v16840_v32, %v13148_v28  ;;  %17174 = vst [vmem:[#allocation224_spill] sm:$0xff] %v13281_v22 }
 0x3d5   : > { %5326 = vmax.xlane.f32.xlu0 %v5325_v15  ;;  %v4633_v48 = vsel %vm4235_vm1, %v4108_v33, -inf  ;;  %v2303_v25 = vmul.f32 %v16947_v16, %v13151_v27  ;;  %v2304_v24 = vmul.f32 %v16947_v16, %v13154_v12  ;;  %v3599_v3 = vmul.f32 %v16949_v55, %v13160_v9 }
 0x3d6   : > { %v4101_v47 = vadd.f32 %v3589_v7, %v2805_v40  ;;  %v5340_v43 = vmax.f32 %v4632_v44, %v4633_v48  ;;  %v4102_v15 = vadd.f32 %v3590_v60, %v2806_v42  ;;  %v3600_v6 = vmul.f32 %v16949_v55, %v13173_v17  ;;  %v13287_v7 = vpop.xlane.xlu0 %5164 }
 0x3d7   : > { %v2815_v36 = vadd.f32 %v2303_v25, %v1519_v37  ;;  %v2816_v50 = vadd.f32 %v2304_v24, %v1520_v41  ;;  %17175 = vst [vmem:[#allocation225_spill] sm:$0xff] %v13287_v7  ;;  %v1513_v60 = vmul.f32 %v16951_v61, %v13142_v59  ;;  %v1514_v44 = vmul.f32 %v16951_v61, %v13148_v28 }
 0x3d8   : > { %v4626_v57 = vsel %vm4234_vm0, %v4101_v47, -inf  ;;  %5341 = vmax.xlane.f32.xlu1 %v5340_v43  ;;  %v4627_v33 = vsel %vm4235_vm1, %v4102_v15, -inf  ;;  %v2297_v40 = vmul.f32 %v16952_v30, %v13151_v27  ;;  %v2298_v48 = vmul.f32 %v16952_v30, %v13154_v12 }
 0x3d9   : > { %v5331_v42 = vmax.f32 %v4626_v57, %v4627_v33  ;;  %v4111_v37 = vadd.f32 %v3599_v3, %v2815_v36  ;;  %v4112_v41 = vadd.f32 %v3600_v6, %v2816_v50  ;;  %v3593_v25 = vmul.f32 %v16846_v1, %v13160_v9  ;;  %v13309_v6 = vpop.xlane.xlu1 %5179 }
 0x3da   : > { %v2809_v47 = vadd.f32 %v2297_v40, %v1513_v60  ;;  %v3594_v24 = vmul.f32 %v16846_v1, %v13173_v17  ;;  %v2810_v57 = vadd.f32 %v2298_v48, %v1514_v44  ;;  %v1523_v50 = vmul.f32 %v16746_v49, %v13142_v59  ;;  %17176 = vst [vmem:[#allocation226_spill] sm:$0xff] %v13309_v6 }
 0x3db   : > { %5332 = vmax.xlane.f32.xlu0 %v5331_v42  ;;  %v4636_v43 = vsel %vm4234_vm0, %v4111_v37, -inf  ;;  %v4637_v15 = vsel %vm4235_vm1, %v4112_v41, -inf  ;;  %v1524_v60 = vmul.f32 %v16746_v49, %v13148_v28  ;;  %v2307_v40 = vmul.f32 %v16747_v35, %v13151_v27  ;;  %v13317_v37 = vpop.xlane.xlu0 %5170 }
 0x3dc   : > { %v5346_v3 = vmax.f32 %v4636_v43, %v4637_v15  ;;  %v4105_v36 = vadd.f32 %v3593_v25, %v2809_v47  ;;  %v4106_v33 = vadd.f32 %v3594_v24, %v2810_v57  ;;  %v2308_v42 = vmul.f32 %v16747_v35, %v13154_v12  ;;  %17177 = vst [vmem:[#allocation227_spill] sm:$0xff] %v13317_v37 }
 0x3dd   : > { %v3603_v41 = vmul.f32 %v10021_v56, %v13160_v9  ;;  %v3604_v48 = vmul.f32 %v10021_v56, %v13173_v17  ;;  %v2819_v25 = vadd.f32 %v2307_v40, %v1523_v50  ;;  %v1517_v43 = vmul.f32 %v16749_v21, %v13142_v59 }
 0x3de   : > { %5347 = vmax.xlane.f32.xlu1 %v5346_v3  ;;  %v4630_v44 = vsel %vm4234_vm0, %v4105_v36, -inf  ;;  %v4631_v47 = vsel %vm4235_vm1, %v4106_v33, -inf  ;;  %v2820_v24 = vadd.f32 %v2308_v42, %v1524_v60  ;;  %v1518_v57 = vmul.f32 %v16749_v21, %v13148_v28  ;;  %v13339_v42 = vpop.xlane.xlu1 %5185 }
 0x3df   : > { %v5337_v15 = vmax.f32 %v4630_v44, %v4631_v47  ;;  %v2301_v3 = vmul.f32 %v16748_v0, %v13151_v27  ;;  %v2302_v36 = vmul.f32 %v16748_v0, %v13154_v12  ;;  %v4115_v6 = vadd.f32 %v3603_v41, %v2819_v25  ;;  %17178 = vst [vmem:[#allocation228_spill] sm:$0xff] %v13339_v42  ;;  %v13345_v20 = vpop.xlane.xlu0 %5176  ;;  %v17184_v42 = vld [vmem:[#allocation24_spill] sm:$0xff] }
 0x3e0   : > { %v4116_v22 = vadd.f32 %v3604_v48, %v2820_v24  ;;  %v3597_v33 = vmul.f32 %v10019_v10, %v13160_v9  ;;  %v3598_v50 = vmul.f32 %v10019_v10, %v13173_v17  ;;  %17179 = vst [vmem:[#allocation229_spill] sm:$0xff] %v13345_v20  ;;  %v1527_v24 = vmul.f32 %v16750_v58, %v13142_v59 }
 0x3e1   : > { %5338 = vmax.xlane.f32.xlu0 %v5337_v15  ;;  %v2813_v60 = vadd.f32 %v2301_v3, %v1517_v43  ;;  %v2814_v40 = vadd.f32 %v2302_v36, %v1518_v57  ;;  %v4640_v44 = vsel %vm4234_vm0, %v4115_v6, -inf  ;;  %v1528_v43 = vmul.f32 %v16750_v58, %v13148_v28 }
 0x3e2   : > { %v4641_v47 = vsel %vm4235_vm1, %v4116_v22, -inf  ;;  %v2311_v15 = vmul.f32 %v16957_v34, %v13151_v27  ;;  %v2312_v6 = vmul.f32 %v16957_v34, %v13154_v12  ;;  %v3607_v22 = vmul.f32 %v17063_v38, %v13160_v9  ;;  %v13373_v37 = vpop.xlane.xlu1 %5191  ;;  %v17219_v34 = vld [vmem:[#allocation16_spill] sm:$0xff] }
 0x3e3   : > { %v5352_v41 = vmax.f32 %v4640_v44, %v4641_v47  ;;  %v4109_v48 = vadd.f32 %v3597_v33, %v2813_v60  ;;  %v4110_v25 = vadd.f32 %v3598_v50, %v2814_v40  ;;  %v3608_v36 = vmul.f32 %v17063_v38, %v13173_v17  ;;  %v17180_v47 = vld [vmem:[#allocation169_spill] sm:$0xff]  ;;  %17182 = vst [vmem:[#allocation230_spill] sm:$0xff] %v13373_v37 }
 0x3e4   : > { %v2823_v50 = vadd.f32 %v2311_v15, %v1527_v24  ;;  %v2824_v60 = vadd.f32 %v2312_v6, %v1528_v43  ;;  %v1521_v40 = vmul.f32 %v16852_v8, %v13142_v59  ;;  %v1522_v44 = vmul.f32 %v16852_v8, %v13148_v28  ;;  %v13377_v6 = vpop.xlane.xlu0 %5182 }
 0x3e5   : > { %5353 = vmax.xlane.f32.xlu1 %v5352_v41  ;;  %v4634_v57 = vsel %vm4234_vm0, %v4109_v48, -inf  ;;  %v4635_v3 = vsel %vm4235_vm1, %v4110_v25, -inf  ;;  %v2305_v41 = vmul.f32 %v17180_v47, %v13151_v27  ;;  %v2306_v48 = vmul.f32 %v17180_v47, %v13154_v12  ;;  %v17181_v25 = vld [vmem:[#allocation27_spill] sm:$0xff]  ;;  %17183 = vst [vmem:[#allocation231_spill] sm:$0xff] %v13377_v6 }
 0x3e6   : > { %v5343_v33 = vmax.f32 %v4634_v57, %v4635_v3  ;;  %v3601_v20 = vmul.f32 %v17181_v25, %v13160_v9  ;;  %v4119_v24 = vadd.f32 %v3607_v22, %v2823_v50  ;;  %v4120_v43 = vadd.f32 %v3608_v36, %v2824_v60 }
 0x3e7   : > { %v3602_v15 = vmul.f32 %v17181_v25, %v13173_v17  ;;  %v2817_v57 = vadd.f32 %v2305_v41, %v1521_v40  ;;  %v2818_v3 = vadd.f32 %v2306_v48, %v1522_v44  ;;  %v1531_v13 = vmul.f32 %v17184_v42, %v13142_v59  ;;  %v17186_v41 = vld [vmem:[#allocation167_spill] sm:$0xff] }
 0x3e8   : > { %5344 = vmax.xlane.f32.xlu0 %v5343_v33  ;;  %v4644_v18 = vsel %vm4234_vm0, %v4119_v24, -inf  ;;  %v4645_v7 = vsel %vm4235_vm1, %v4120_v43, -inf  ;;  %v17185_v33 = vld [vmem:[#allocation67_spill] sm:$0xff]  ;;  %v1532_v6 = vmul.f32 %v17184_v42, %v13148_v28  ;;  %v3611_v48 = vmul.f32 %v17186_v41, %v13160_v9  ;;  %v13405_v29 = vpop.xlane.xlu0 %5188 }
 0x3e9   : > { %v2315_v22 = vmul.f32 %v17185_v33, %v13151_v27  ;;  %v5358_v36 = vmax.f32 %v4644_v18, %v4645_v7  ;;  %v4113_v50 = vadd.f32 %v3601_v20, %v2817_v57  ;;  %v4114_v60 = vadd.f32 %v3602_v15, %v2818_v3  ;;  %v17187_v20 = vld [vmem:[#allocation13_spill] sm:$0xff]  ;;  %v13401_v15 = vpop.xlane.xlu1 %5197  ;;  %17190 = vst [vmem:[#allocation233_spill] sm:$0xff] %v13405_v29 }
 0x3ea   : > { %v2316_v40 = vmul.f32 %v17185_v33, %v13154_v12  ;;  %v3612_v24 = vmul.f32 %v17186_v41, %v13173_v17  ;;  %v1525_v7 = vmul.f32 %v17187_v20, %v13142_v59  ;;  %17188 = vst [vmem:[#allocation232_spill] sm:$0xff] %v13401_v15  ;;  %v2319_v52 = vmul.f32 %v17193_v62, %v13151_v27  ;;  %v17207_v33 = vld [vmem:[#allocation59_spill] sm:$0xff] }
 0x3eb   : > { %v2827_v44 = vadd.f32 %v2315_v22, %v1531_v13  ;;  %5359 = vmax.xlane.f32.xlu1 %v5358_v36  ;;  %v4638_v43 = vsel %vm4234_vm0, %v4113_v50, -inf  ;;  %v4639_v18 = vsel %vm4235_vm1, %v4114_v60, -inf  ;;  %v17189_v22 = vld [vmem:[#allocation171_spill] sm:$0xff]  ;;  %v1526_v36 = vmul.f32 %v17187_v20, %v13148_v28  ;;  %v17191_v60 = vld [vmem:[#allocation165_spill] sm:$0xff] }
 0x3ec   : > { %v5349_v57 = vmax.f32 %v4638_v43, %v4639_v18  ;;  %v2828_v13 = vadd.f32 %v2316_v40, %v1532_v6  ;;  %v2309_v37 = vmul.f32 %v17189_v22, %v13151_v27  ;;  %v2310_v50 = vmul.f32 %v17189_v22, %v13154_v12  ;;  %v17192_v43 = vld [vmem:[#allocation31_spill] sm:$0xff] }
 0x3ed   : > { %v4123_v3 = vadd.f32 %v3611_v48, %v2827_v44  ;;  %v3605_v23 = vmul.f32 %v17191_v60, %v13160_v9  ;;  %v3606_v15 = vmul.f32 %v17191_v60, %v13173_v17  ;;  %v1535_v18 = vmul.f32 %v17192_v43, %v13142_v59 }
 0x3ee   : > { %5350 = vmax.xlane.f32.xlu0 %v5349_v57  ;;  %v4124_v6 = vadd.f32 %v3612_v24, %v2828_v13  ;;  %v2821_v44 = vadd.f32 %v2309_v37, %v1525_v7  ;;  %v2822_v48 = vadd.f32 %v2310_v50, %v1526_v36  ;;  %v1536_v29 = vmul.f32 %v17192_v43, %v13148_v28  ;;  %v17194_v37 = vld [vmem:[#allocation54_spill] sm:$0xff] }
 0x3ef   : > { %v4648_v40 = vsel %vm4234_vm0, %v4123_v3, -inf  ;;  %v2320_v24 = vmul.f32 %v17193_v62, %v13154_v12  ;;  %v3615_v7 = vmul.f32 %v17194_v37, %v13160_v9  ;;  %v13429_v3 = vpop.xlane.xlu1 %5203  ;;  %v2831_v50 = vadd.f32 %v2319_v52, %v1535_v18 }
 0x3f0   : > { %v4649_v5 = vsel %vm4235_vm1, %v4124_v6, -inf  ;;  %v4117_v54 = vadd.f32 %v3605_v23, %v2821_v44  ;;  %v4118_v13 = vadd.f32 %v3606_v15, %v2822_v48  ;;  %17195 = vst [vmem:[#allocation234_spill] sm:$0xff] %v13429_v3  ;;  %v3616_v23 = vmul.f32 %v17194_v37, %v13173_v17  ;;  %v13435_v6 = vpop.xlane.xlu0 %5194  ;;  %v17197_v15 = vld [vmem:[#allocation18_spill] sm:$0xff]  ;;  %v17198_v48 = vld [vmem:[#allocation175_spill] sm:$0xff] }
 0x3f1   : > { %v5364_v57 = vmax.f32 %v4648_v40, %v4649_v5  ;;  %v2832_v43 = vadd.f32 %v2320_v24, %v1536_v29  ;;  %17196 = vst [vmem:[#allocation235_spill] sm:$0xff] %v13435_v6  ;;  %v1529_v40 = vmul.f32 %v17197_v15, %v13142_v59  ;;  %v1530_v44 = vmul.f32 %v17197_v15, %v13148_v28 }
 0x3f2   : > { %v4642_v36 = vsel %vm4234_vm0, %v4117_v54, -inf  ;;  %v4643_v5 = vsel %vm4235_vm1, %v4118_v13, -inf  ;;  %v2313_v54 = vmul.f32 %v17198_v48, %v13151_v27  ;;  %v4127_v29 = vadd.f32 %v3615_v7, %v2831_v50  ;;  %v17200_v50 = vld [vmem:[#allocation39_spill] sm:$0xff] }
 0x3f3   : > { %5365 = vmax.xlane.f32.xlu1 %v5364_v57  ;;  %v5355_v52 = vmax.f32 %v4642_v36, %v4643_v5  ;;  %v4128_v18 = vadd.f32 %v3616_v23, %v2832_v43  ;;  %v2314_v24 = vmul.f32 %v17198_v48, %v13154_v12  ;;  %v17199_v57 = vld [vmem:[#allocation53_spill] sm:$0xff]  ;;  %v1539_v23 = vmul.f32 %v17200_v50, %v13142_v59  ;;  %v13457_v5 = vpop.xlane.xlu1 %5209 }
 0x3f4   : > { %v2825_v3 = vadd.f32 %v2313_v54, %v1529_v40  ;;  %v3609_v6 = vmul.f32 %v17199_v57, %v13160_v9  ;;  %v3610_v13 = vmul.f32 %v17199_v57, %v13173_v17  ;;  %v4652_v37 = vsel %vm4234_vm0, %v4127_v29, -inf  ;;  %17201 = vst [vmem:[#allocation39_spill] sm:$0xff] %v13457_v5  ;;  %v13465_v57 = vpop.xlane.xlu0 %5200 }
 0x3f5   : > { %5356 = vmax.xlane.f32.xlu0 %v5355_v52  ;;  %v4653_v62 = vsel %vm4235_vm1, %v4128_v18, -inf  ;;  %v2826_v36 = vadd.f32 %v2314_v24, %v1530_v44  ;;  %v1540_v54 = vmul.f32 %v17200_v50, %v13148_v28  ;;  %v17202_v52 = vld [vmem:[#allocation82_spill] sm:$0xff] }
 0x3f6   : > { %v5370_v7 = vmax.f32 %v4652_v37, %v4653_v62  ;;  %v4121_v43 = vadd.f32 %v3609_v6, %v2825_v3  ;;  %v2323_v4 = vmul.f32 %v17202_v52, %v13151_v27  ;;  %v2324_v29 = vmul.f32 %v17202_v52, %v13154_v12  ;;  %17203 = vst [vmem:[#allocation82_spill] sm:$0xff] %v13465_v57  ;;  %v17204_v37 = vld [vmem:[#allocation162_spill] sm:$0xff] }
 0x3f7   : > { %v4122_v40 = vadd.f32 %v3610_v13, %v2826_v36  ;;  %v3619_v3 = vmul.f32 %v17204_v37, %v13160_v9  ;;  %v3620_v6 = vmul.f32 %v17204_v37, %v13173_v17  ;;  %v17205_v13 = vld [vmem:[#allocation23_spill] sm:$0xff] }
 0x3f8   : > { %5371 = vmax.xlane.f32.xlu1 %v5370_v7  ;;  %v4646_v62 = vsel %vm4234_vm0, %v4121_v43, -inf  ;;  %v2835_v18 = vadd.f32 %v2323_v4, %v1539_v23  ;;  %v2836_v24 = vadd.f32 %v2324_v29, %v1540_v54  ;;  %v1533_v36 = vmul.f32 %v17205_v13, %v13142_v59  ;;  %v17206_v43 = vld [vmem:[#allocation68_spill] sm:$0xff]  ;;  %v13487_v29 = vpop.xlane.xlu1 %5215 }
 0x3f9   : > { %v4647_v44 = vsel %vm4235_vm1, %v4122_v40, -inf  ;;  %v1534_v7 = vmul.f32 %v17205_v13, %v13148_v28  ;;  %v2317_v57 = vmul.f32 %v17206_v43, %v13151_v27  ;;  %v2318_v48 = vmul.f32 %v17206_v43, %v13154_v12  ;;  %17208 = vst [vmem:[#allocation162_spill] sm:$0xff] %v13487_v29  ;;  %v13493_v43 = vpop.xlane.xlu0 %5206  ;;  %v778_v13 = vld [vmem:[%s8251_s22 + $0x38] sm:$0x77] }
 0x3fa   : > { %v5361_v5 = vmax.f32 %v4646_v62, %v4647_v44  ;;  %v4131_v15 = vadd.f32 %v3619_v3, %v2835_v18  ;;  %v4132_v41 = vadd.f32 %v3620_v6, %v2836_v24  ;;  %v3613_v40 = vmul.f32 %v17207_v33, %v13160_v9  ;;  %17209 = vst [vmem:[#allocation236_spill] sm:$0xff] %v13493_v43  ;;  %v17210_v24 = vld [vmem:[#allocation48_spill] sm:$0xff] }
 0x3fb   : > { %v3614_v4 = vmul.f32 %v17207_v33, %v13173_v17  ;;  %v2829_v23 = vadd.f32 %v2317_v57, %v1533_v36  ;;  %v2830_v54 = vadd.f32 %v2318_v48, %v1534_v7  ;;  %v1543_v33 = vmul.f32 %v17210_v24, %v13142_v59  ;;  %v17211_v57 = vld [vmem:[#allocation181_spill] sm:$0xff] }
 0x3fc   : > { %5362 = vmax.xlane.f32.xlu0 %v5361_v5  ;;  %v4656_v62 = vsel %vm4234_vm0, %v4131_v15, -inf  ;;  %v4657_v44 = vsel %vm4235_vm1, %v4132_v41, -inf  ;;  %v1544_v48 = vmul.f32 %v17210_v24, %v13148_v28  ;;  %v2327_v5 = vmul.f32 %v17211_v57, %v13151_v27  ;;  %v17212_v41 = vld [vmem:[#allocation164_spill] sm:$0xff]  ;;  %v13524_v20 = vpop.xlane.xlu1 %5221 }
 0x3fd   : > { %v5376_v3 = vmax.f32 %v4656_v62, %v4657_v44  ;;  %v4125_v6 = vadd.f32 %v3613_v40, %v2829_v23  ;;  %v4126_v18 = vadd.f32 %v3614_v4, %v2830_v54  ;;  %v2328_v15 = vmul.f32 %v17211_v57, %v13154_v12  ;;  %v17213_v23 = vld [vmem:[#allocation30_spill] sm:$0xff]  ;;  %17216 = vst [vmem:[#allocation48_spill] sm:$0xff] %v13524_v20 }
 0x3fe   : > { %v3623_v36 = vmul.f32 %v17212_v41, %v13160_v9  ;;  %v3624_v4 = vmul.f32 %v17212_v41, %v13173_v17  ;;  %v1537_v54 = vmul.f32 %v17213_v23, %v13142_v59  ;;  %v2839_v44 = vadd.f32 %v2327_v5, %v1543_v33  ;;  %v13526_v5 = vpop.xlane.xlu0 %5212 }
 0x3ff   : > { %5377 = vmax.xlane.f32.xlu1 %v5376_v3  ;;  %v4650_v7 = vsel %vm4234_vm0, %v4125_v6, -inf  ;;  %v4651_v40 = vsel %vm4235_vm1, %v4126_v18, -inf  ;;  %v2840_v29 = vadd.f32 %v2328_v15, %v1544_v48  ;;  %v1538_v43 = vmul.f32 %v17213_v23, %v13148_v28  ;;  %v17214_v3 = vld [vmem:[#allocation178_spill] sm:$0xff]  ;;  %v17215_v18 = vld [vmem:[#allocation163_spill] sm:$0xff]  ;;  %17217 = vst [vmem:[#allocation181_spill] sm:$0xff] %v13526_v5 }
 0x400   : > { %v5367_v62 = vmax.f32 %v4650_v7, %v4651_v40  ;;  %v2321_v42 = vmul.f32 %v17214_v3, %v13151_v27  ;;  %v2322_v6 = vmul.f32 %v17214_v3, %v13154_v12  ;;  %v3617_v60 = vmul.f32 %v17215_v18, %v13160_v9  ;;  %v17218_v40 = vld [vmem:[#allocation15_spill] sm:$0xff] }
 0x401   : > { %v3618_v22 = vmul.f32 %v17215_v18, %v13173_v17  ;;  %v4135_v33 = vadd.f32 %v3623_v36, %v2839_v44  ;;  %v4136_v48 = vadd.f32 %v3624_v4, %v2840_v29  ;;  %v878_v23 = vrot.slane %v778_v13, %v17218_v40  ;;  %v17220_v18 = vld [vmem:[#allocation17_spill] sm:$0xff]  ;;  %v17223_v44 = vld [vmem:[#allocation22_spill] sm:$0xff] }
 0x402   : > { %5368 = vmax.xlane.f32.xlu0 %v5367_v62  ;;  %v2833_v15 = vadd.f32 %v2321_v42, %v1537_v54  ;;  %v2834_v7 = vadd.f32 %v2322_v6, %v1538_v43  ;;  %v882_v58 = vrot.slane %v778_v13, %v17219_v34  ;;  %v1694_v25 = vrot.slane %v778_v13, %v17220_v18  ;;  %v17221_v43 = vld [vmem:[#allocation20_spill] sm:$0xff] }
 0x403   : > { %v4660_v3 = vsel %vm4234_vm0, %v4135_v33, -inf  ;;  %v4661_v38 = vsel %vm4235_vm1, %v4136_v48, -inf  ;;  %v13536_v29 = vrot.slane %v878_v23, %v17218_v40  ;;  %v1698_v4 = vrot.slane %v778_v13, %v17221_v43  ;;  %v13560_v33 = vpop.xlane.xlu0 %5218 }
 0x404   : > { %v5382_v20 = vmax.f32 %v4660_v3, %v4661_v38  ;;  %v4129_v62 = vadd.f32 %v3617_v60, %v2833_v15  ;;  %v4130_v36 = vadd.f32 %v3618_v22, %v2834_v7  ;;  %v13539_v42 = vrot.slane %v882_v58, %v17218_v40  ;;  %v17222_v60 = vld [vmem:[#allocation21_spill] sm:$0xff]  ;;  %v13551_v3 = vpop.xlane.xlu1 %5227  ;;  %17225 = vst [vmem:[#allocation16_spill] sm:$0xff] %v13560_v33  ;;  %v17226_v7 = vld [vmem:[#allocation38_spill] sm:$0xff] }
 0x405   : > { %v13543_v54 = vrot.slane %v1694_v25, %v17220_v18  ;;  %v2990_v22 = vrot.slane %v778_v13, %v17222_v60  ;;  %v2994_v23 = vrot.slane %v778_v13, %v17223_v44  ;;  %17224 = vst [vmem:[#allocation164_spill] sm:$0xff] %v13551_v3  ;;  %v1573_v6 = vmul.f32 %v16943_v39, %v13536_v29 }
 0x406   : > { %5383 = vmax.xlane.f32.xlu1 %v5382_v20  ;;  %v4654_v34 = vsel %vm4234_vm0, %v4129_v62, -inf  ;;  %v4655_v38 = vsel %vm4235_vm1, %v4130_v36, -inf  ;;  %v1574_v25 = vmul.f32 %v16943_v39, %v13539_v42  ;;  %v13558_v20 = vrot.slane %v1698_v4, %v17220_v18  ;;  %v17227_v62 = vld [vmem:[#allocation83_spill] sm:$0xff] }
 0x407   : > { %v5373_v58 = vmax.f32 %v4654_v34, %v4655_v38  ;;  %v2357_v48 = vmul.f32 %v16945_v14, %v13543_v54  ;;  %v13565_v15 = vrot.slane %v2990_v22, %v17222_v60  ;;  %v13568_v13 = vrot.slane %v2994_v23, %v17222_v60  ;;  %v17228_v60 = vld [vmem:[#allocation58_spill] sm:$0xff]  ;;  %v13590_v47 = vpop.xlane.xlu0 %5224 }
 0x408   : > { %v1541_v40 = vmul.f32 %v17226_v7, %v13142_v59  ;;  %v2358_v39 = vmul.f32 %v16945_v14, %v13558_v20  ;;  %v1542_v18 = vmul.f32 %v17226_v7, %v13148_v28  ;;  %v2325_v36 = vmul.f32 %v17227_v62, %v13151_v27  ;;  %v13588_v33 = vpop.xlane.xlu1 %5233  ;;  %17230 = vst [vmem:[#allocation21_spill] sm:$0xff] %v13590_v47 }
 0x409   : > { %5374 = vmax.xlane.f32.xlu0 %v5373_v58  ;;  %v2326_v43 = vmul.f32 %v17227_v62, %v13154_v12  ;;  %v2869_v4 = vadd.f32 %v2357_v48, %v1573_v6  ;;  %v3653_v34 = vmul.f32 %v16946_v46, %v13565_v15  ;;  %v3654_v38 = vmul.f32 %v16946_v46, %v13568_v13 }
 0x40a   : > { %v3621_v22 = vmul.f32 %v17228_v60, %v13160_v9  ;;  %v2870_v14 = vadd.f32 %v2358_v39, %v1574_v25  ;;  %v2837_v44 = vadd.f32 %v2325_v36, %v1541_v40  ;;  %v3622_v58 = vmul.f32 %v17228_v60, %v13173_v17  ;;  %17229 = vst [vmem:[#allocation20_spill] sm:$0xff] %v13588_v33 }
 0x40b   : > { %v2838_v23 = vadd.f32 %v2326_v43, %v1542_v18  ;;  %v4165_v3 = vadd.f32 %v3653_v34, %v2869_v4  ;;  %v1605_v8 = vmul.f32 %v17226_v7, %v13536_v29  ;;  %v1606_v25 = vmul.f32 %v17226_v7, %v13539_v42 }
 0x40c   : > { %v4166_v5 = vadd.f32 %v3654_v38, %v2870_v14  ;;  %v4133_v6 = vadd.f32 %v3621_v22, %v2837_v44  ;;  %v2389_v40 = vmul.f32 %v17227_v62, %v13543_v54  ;;  %v3685_v7 = vmul.f32 %v17228_v60, %v13565_v15 }
 0x40d   : > { %v4134_v48 = vadd.f32 %v3622_v58, %v2838_v23  ;;  %v4690_v46 = vsel %vm4234_vm0, %v4165_v3, -inf  ;;  %v2390_v3 = vmul.f32 %v17227_v62, %v13558_v20  ;;  %v3686_v22 = vmul.f32 %v17228_v60, %v13568_v13  ;;  %v17232_v62 = vld [vmem:[#allocation142_spill] sm:$0xff] }
 0x40e   : > { %v4691_v39 = vsel %vm4235_vm1, %v4166_v5, -inf  ;;  %v4658_v18 = vsel %vm4234_vm0, %v4133_v6, -inf  ;;  %v2901_v34 = vadd.f32 %v2389_v40, %v1605_v8  ;;  %v17231_v5 = vld [vmem:[#allocation5_spill] sm:$0xff]  ;;  %v2355_v58 = vmul.f32 %v17232_v62, %v13543_v54  ;;  %v13620_v6 = vpop.xlane.xlu1 %5239 }
 0x40f   : > { %v4659_v36 = vsel %vm4235_vm1, %v4134_v48, -inf  ;;  %v5427_v43 = vmax.f32 %v4690_v46, %v4691_v39  ;;  %v2902_v38 = vadd.f32 %v2390_v3, %v1606_v25  ;;  %v1571_v14 = vmul.f32 %v17231_v5, %v13536_v29  ;;  %17233 = vst [vmem:[#allocation22_spill] sm:$0xff] %v13620_v6  ;;  %v13626_v25 = vpop.xlane.xlu0 %5230 }
 0x410   : > { %v5379_v4 = vmax.f32 %v4658_v18, %v4659_v36  ;;  %v1572_v44 = vmul.f32 %v17231_v5, %v13539_v42  ;;  %v4197_v23 = vadd.f32 %v3685_v7, %v2901_v34  ;;  %v2356_v8 = vmul.f32 %v17232_v62, %v13558_v20  ;;  %17234 = vst [vmem:[#allocation38_spill] sm:$0xff] %v13626_v25 }
 0x411   : > { %5428 = vmax.xlane.f32.xlu1 %v5427_v43  ;;  %v4198_v48 = vadd.f32 %v3686_v22, %v2902_v38  ;;  %v3651_v60 = vmul.f32 %v17164_v19, %v13565_v15  ;;  %v3652_v46 = vmul.f32 %v17164_v19, %v13568_v13  ;;  %v2867_v39 = vadd.f32 %v2355_v58, %v1571_v14 }
 0x412   : > { %5380 = vmax.xlane.f32.xlu0 %v5379_v4  ;;  %v4722_v40 = vsel %vm4234_vm0, %v4197_v23, -inf  ;;  %v2868_v18 = vadd.f32 %v2356_v8, %v1572_v44  ;;  %v1575_v3 = vmul.f32 %v16824_v51, %v13536_v29  ;;  %v2359_v7 = vmul.f32 %v16825_v11, %v13543_v54  ;;  %v13650_v62 = vpop.xlane.xlu1 %5245 }
 0x413   : > { %v4723_v36 = vsel %vm4235_vm1, %v4198_v48, -inf  ;;  %v4163_v4 = vadd.f32 %v3651_v60, %v2867_v39  ;;  %v1576_v19 = vmul.f32 %v16824_v51, %v13539_v42  ;;  %v2360_v38 = vmul.f32 %v16825_v11, %v13558_v20  ;;  %17235 = vst [vmem:[#allocation83_spill] sm:$0xff] %v13650_v62  ;;  %v13656_v48 = vpop.xlane.xlu0 %5236 }
 0x414   : > { %v5475_v43 = vmax.f32 %v4722_v40, %v4723_v36  ;;  %v4164_v34 = vadd.f32 %v3652_v46, %v2868_v18  ;;  %v3655_v22 = vmul.f32 %v16828_v2, %v13565_v15  ;;  %v3656_v5 = vmul.f32 %v16828_v2, %v13568_v13 }
 0x415   : > { %v4688_v14 = vsel %vm4234_vm0, %v4163_v4, -inf  ;;  %v2871_v23 = vadd.f32 %v2359_v7, %v1575_v3  ;;  %v1603_v51 = vmul.f32 %v17200_v50, %v13536_v29  ;;  %v2872_v58 = vadd.f32 %v2360_v38, %v1576_v19  ;;  %v17237_v7 = vld [vmem:[#allocation96_spill] sm:$0xff] }
 0x416   : > { %5476 = vmax.xlane.f32.xlu1 %v5475_v43  ;;  %v4689_v44 = vsel %vm4235_vm1, %v4164_v34, -inf  ;;  %v1604_v8 = vmul.f32 %v17200_v50, %v13539_v42  ;;  %v2387_v2 = vmul.f32 %v17202_v52, %v13543_v54  ;;  %v2388_v46 = vmul.f32 %v17202_v52, %v13558_v20  ;;  %v17236_v34 = vld [vmem:[#allocation62_spill] sm:$0xff] }
 0x417   : > { %v5424_v11 = vmax.f32 %v4688_v14, %v4689_v44  ;;  %v4167_v60 = vadd.f32 %v3655_v22, %v2871_v23  ;;  %v3683_v40 = vmul.f32 %v17204_v37, %v13565_v15  ;;  %v3684_v39 = vmul.f32 %v17204_v37, %v13568_v13  ;;  %v13676_v14 = vpop.xlane.xlu1 %5251 }
 0x418   : > { %v4168_v18 = vadd.f32 %v3656_v5, %v2872_v58  ;;  %v2899_v36 = vadd.f32 %v2387_v2, %v1603_v51  ;;  %v2900_v3 = vadd.f32 %v2388_v46, %v1604_v8  ;;  %v1547_v52 = vmul.f32 %v17236_v34, %v13142_v59  ;;  %17238 = vst [vmem:[#allocation58_spill] sm:$0xff] %v13676_v14  ;;  %v17239_v51 = vld [vmem:[#allocation166_spill] sm:$0xff]  ;;  %v13682_v58 = vpop.xlane.xlu0 %5242  ;;  %v17241_v46 = vld [vmem:[#allocation47_spill] sm:$0xff] }
 0x419   : > { %5425 = vmax.xlane.f32.xlu0 %v5424_v11  ;;  %v4692_v50 = vsel %vm4234_vm0, %v4167_v60, -inf  ;;  %v2331_v19 = vmul.f32 %v17237_v7, %v13151_v27  ;;  %v1548_v37 = vmul.f32 %v17236_v34, %v13148_v28  ;;  %v2332_v5 = vmul.f32 %v17237_v7, %v13154_v12  ;;  %17240 = vst [vmem:[#allocation5_spill] sm:$0xff] %v13682_v58 }
 0x41a   : > { %v4693_v43 = vsel %vm4235_vm1, %v4168_v18, -inf  ;;  %v4195_v4 = vadd.f32 %v3683_v40, %v2899_v36  ;;  %v4196_v22 = vadd.f32 %v3684_v39, %v2900_v3  ;;  %v3627_v11 = vmul.f32 %v17239_v51, %v13160_v9 }
 0x41b   : > { %v5430_v38 = vmax.f32 %v4692_v50, %v4693_v43  ;;  %v2843_v23 = vadd.f32 %v2331_v19, %v1547_v52  ;;  %v2844_v2 = vadd.f32 %v2332_v5, %v1548_v37  ;;  %v3628_v60 = vmul.f32 %v17239_v51, %v13173_v17  ;;  %v17242_v50 = vld [vmem:[#allocation182_spill] sm:$0xff] }
 0x41c   : > { %v4720_v44 = vsel %vm4234_vm0, %v4195_v4, -inf  ;;  %v4721_v8 = vsel %vm4235_vm1, %v4196_v22, -inf  ;;  %v1545_v40 = vmul.f32 %v17241_v46, %v13142_v59  ;;  %v1546_v36 = vmul.f32 %v17241_v46, %v13148_v28  ;;  %v17243_v52 = vld [vmem:[#allocation66_spill] sm:$0xff]  ;;  %v13712_v25 = vpop.xlane.xlu0 %5248 }
 0x41d   : > { %5431 = vmax.xlane.f32.xlu1 %v5430_v38  ;;  %v5472_v39 = vmax.f32 %v4720_v44, %v4721_v8  ;;  %v4139_v18 = vadd.f32 %v3627_v11, %v2843_v23  ;;  %v2329_v3 = vmul.f32 %v17242_v50, %v13151_v27  ;;  %v4140_v43 = vadd.f32 %v3628_v60, %v2844_v2  ;;  %v13706_v11 = vpop.xlane.xlu1 %5257 }
 0x41e   : > { %v2330_v4 = vmul.f32 %v17242_v50, %v13154_v12  ;;  %v3625_v19 = vmul.f32 %v17243_v52, %v13160_v9  ;;  %v3626_v38 = vmul.f32 %v17243_v52, %v13173_v17  ;;  %v1609_v23 = vmul.f32 %v17241_v46, %v13536_v29  ;;  %17244 = vst [vmem:[#allocation142_spill] sm:$0xff] %v13706_v11 }
 0x41f   : > { %5473 = vmax.xlane.f32.xlu0 %v5472_v39  ;;  %v4664_v22 = vsel %vm4234_vm0, %v4139_v18, -inf  ;;  %v2841_v37 = vadd.f32 %v2329_v3, %v1545_v40  ;;  %v4665_v5 = vsel %vm4235_vm1, %v4140_v43, -inf  ;;  %v1610_v60 = vmul.f32 %v17241_v46, %v13539_v42  ;;  %17245 = vst [vmem:[#allocation62_spill] sm:$0xff] %v13712_v25 }
 0x420   : > { %v2842_v44 = vadd.f32 %v2330_v4, %v1546_v36  ;;  %v5388_v8 = vmax.f32 %v4664_v22, %v4665_v5  ;;  %v2393_v39 = vmul.f32 %v17242_v50, %v13543_v54  ;;  %v2394_v18 = vmul.f32 %v17242_v50, %v13558_v20 }
 0x421   : > { %v4137_v2 = vadd.f32 %v3625_v19, %v2841_v37  ;;  %v3689_v36 = vmul.f32 %v17243_v52, %v13565_v15  ;;  %v3690_v3 = vmul.f32 %v17243_v52, %v13568_v13  ;;  %v1607_v4 = vmul.f32 %v17210_v24, %v13536_v29 }
 0x422   : > { %v4138_v40 = vadd.f32 %v3626_v38, %v2842_v44  ;;  %5389 = vmax.xlane.f32.xlu1 %v5388_v8  ;;  %v2905_v46 = vadd.f32 %v2393_v39, %v1609_v23  ;;  %v1608_v19 = vmul.f32 %v17210_v24, %v13539_v42  ;;  %v2906_v38 = vadd.f32 %v2394_v18, %v1610_v60  ;;  %v13736_v39 = vpop.xlane.xlu1 %5263 }
 0x423   : > { %v4662_v43 = vsel %vm4234_vm0, %v4137_v2, -inf  ;;  %v2391_v22 = vmul.f32 %v17211_v57, %v13543_v54  ;;  %v2392_v52 = vmul.f32 %v17211_v57, %v13558_v20  ;;  %v3687_v44 = vmul.f32 %v17212_v41, %v13565_v15  ;;  %17246 = vst [vmem:[#allocation96_spill] sm:$0xff] %v13736_v39 }
 0x424   : > { %v4663_v50 = vsel %vm4235_vm1, %v4138_v40, -inf  ;;  %v4201_v5 = vadd.f32 %v3689_v36, %v2905_v46  ;;  %v3688_v23 = vmul.f32 %v17212_v41, %v13568_v13  ;;  %v4202_v8 = vadd.f32 %v3690_v3, %v2906_v38  ;;  %v13740_v40 = vpop.xlane.xlu0 %5254 }
 0x425   : > { %v5385_v37 = vmax.f32 %v4662_v43, %v4663_v50  ;;  %v2903_v24 = vadd.f32 %v2391_v22, %v1607_v4  ;;  %v2904_v2 = vadd.f32 %v2392_v52, %v1608_v19  ;;  %17247 = vst [vmem:[#allocation166_spill] sm:$0xff] %v13740_v40  ;;  %v1579_v43 = vmul.f32 %v16832_v31, %v13536_v29 }
 0x426   : > { %v4726_v60 = vsel %vm4234_vm0, %v4201_v5, -inf  ;;  %v4727_v57 = vsel %vm4235_vm1, %v4202_v8, -inf  ;;  %v1580_v3 = vmul.f32 %v16832_v31, %v13539_v42  ;;  %v2363_v46 = vmul.f32 %v16834_v26, %v13543_v54 }
 0x427   : > { %5386 = vmax.xlane.f32.xlu0 %v5385_v37  ;;  %v4199_v18 = vadd.f32 %v3687_v44, %v2903_v24  ;;  %v4200_v36 = vadd.f32 %v3688_v23, %v2904_v2  ;;  %v5481_v41 = vmax.f32 %v4726_v60, %v4727_v57  ;;  %v2364_v4 = vmul.f32 %v16834_v26, %v13558_v20 }
 0x428   : > { %v3659_v38 = vmul.f32 %v16836_v45, %v13565_v15  ;;  %v3660_v22 = vmul.f32 %v16836_v45, %v13568_v13  ;;  %v2875_v52 = vadd.f32 %v2363_v46, %v1579_v43  ;;  %v1577_v5 = vmul.f32 %v16951_v61, %v13536_v29  ;;  %v13770_v45 = vpop.xlane.xlu1 %5269  ;;  %v13774_v57 = vpop.xlane.xlu0 %5260  ;;  %v17250_v43 = vld [vmem:[#allocation75_spill] sm:$0xff] }
 0x429   : > { %v4724_v19 = vsel %vm4234_vm0, %v4199_v18, -inf  ;;  %v4725_v50 = vsel %vm4235_vm1, %v4200_v36, -inf  ;;  %5482 = vmax.xlane.f32.xlu1 %v5481_v41  ;;  %v2876_v37 = vadd.f32 %v2364_v4, %v1580_v3  ;;  %v1578_v26 = vmul.f32 %v16951_v61, %v13539_v42  ;;  %17248 = vst [vmem:[#allocation47_spill] sm:$0xff] %v13770_v45  ;;  %17249 = vst [vmem:[#allocation182_spill] sm:$0xff] %v13774_v57 }
 0x42a   : > { %v5478_v31 = vmax.f32 %v4724_v19, %v4725_v50  ;;  %v2361_v44 = vmul.f32 %v16952_v30, %v13543_v54  ;;  %v2362_v23 = vmul.f32 %v16952_v30, %v13558_v20  ;;  %v3657_v8 = vmul.f32 %v16846_v1, %v13565_v15 }
 0x42b   : > { %v4171_v24 = vadd.f32 %v3659_v38, %v2875_v52  ;;  %v4172_v2 = vadd.f32 %v3660_v22, %v2876_v37  ;;  %v3658_v60 = vmul.f32 %v16846_v1, %v13568_v13  ;;  %v1551_v41 = vmul.f32 %v17250_v43, %v13142_v59  ;;  %v17251_v1 = vld [vmem:[#allocation186_spill] sm:$0xff]  ;;  %v17252_v22 = vld [vmem:[#allocation69_spill] sm:$0xff] }
 0x42c   : > { %5479 = vmax.xlane.f32.xlu0 %v5478_v31  ;;  %v2873_v61 = vadd.f32 %v2361_v44, %v1577_v5  ;;  %v2874_v18 = vadd.f32 %v2362_v23, %v1578_v26  ;;  %v1552_v19 = vmul.f32 %v17250_v43, %v13148_v28  ;;  %v2335_v50 = vmul.f32 %v17251_v1, %v13151_v27  ;;  %v17253_v26 = vld [vmem:[#allocation61_spill] sm:$0xff]  ;;  %v13798_v23 = vpop.xlane.xlu1 %5275 }
 0x42d   : > { %v4696_v36 = vsel %vm4234_vm0, %v4171_v24, -inf  ;;  %v4697_v30 = vsel %vm4235_vm1, %v4172_v2, -inf  ;;  %v2336_v38 = vmul.f32 %v17251_v1, %v13154_v12  ;;  %v3631_v31 = vmul.f32 %v17252_v22, %v13160_v9  ;;  %17254 = vst [vmem:[#allocation66_spill] sm:$0xff] %v13798_v23 }
 0x42e   : > { %v5436_v3 = vmax.f32 %v4696_v36, %v4697_v30  ;;  %v4169_v46 = vadd.f32 %v3657_v8, %v2873_v61  ;;  %v4170_v4 = vadd.f32 %v3658_v60, %v2874_v18  ;;  %v3632_v52 = vmul.f32 %v17252_v22, %v13173_v17  ;;  %v17255_v60 = vld [vmem:[#allocation97_spill] sm:$0xff]  ;;  %v13802_v18 = vpop.xlane.xlu0 %5266 }
 0x42f   : > { %v1549_v44 = vmul.f32 %v17253_v26, %v13142_v59  ;;  %v2847_v24 = vadd.f32 %v2335_v50, %v1551_v41  ;;  %v2848_v2 = vadd.f32 %v2336_v38, %v1552_v19  ;;  %v2333_v61 = vmul.f32 %v17255_v60, %v13151_v27  ;;  %17256 = vst [vmem:[#allocation75_spill] sm:$0xff] %v13802_v18 }
 0x430   : > { %5437 = vmax.xlane.f32.xlu1 %v5436_v3  ;;  %v4694_v37 = vsel %vm4234_vm0, %v4169_v46, -inf  ;;  %v4695_v5 = vsel %vm4235_vm1, %v4170_v4, -inf  ;;  %v1550_v36 = vmul.f32 %v17253_v26, %v13148_v28  ;;  %v2334_v30 = vmul.f32 %v17255_v60, %v13154_v12  ;;  %v17257_v3 = vld [vmem:[#allocation71_spill] sm:$0xff] }
 0x431   : > { %v5433_v8 = vmax.f32 %v4694_v37, %v4695_v5  ;;  %v3629_v46 = vmul.f32 %v17257_v3, %v13160_v9  ;;  %v3630_v4 = vmul.f32 %v17257_v3, %v13173_v17  ;;  %v4143_v41 = vadd.f32 %v3631_v31, %v2847_v24 }
 0x432   : > { %v4144_v19 = vadd.f32 %v3632_v52, %v2848_v2  ;;  %v2845_v50 = vadd.f32 %v2333_v61, %v1549_v44  ;;  %v2846_v38 = vadd.f32 %v2334_v30, %v1550_v36  ;;  %v1613_v37 = vmul.f32 %v17253_v26, %v13536_v29  ;;  %v13824_v44 = vpop.xlane.xlu1 %5281 }
 0x433   : > { %5434 = vmax.xlane.f32.xlu0 %v5433_v8  ;;  %v4668_v5 = vsel %vm4234_vm0, %v4143_v41, -inf  ;;  %v2397_v45 = vmul.f32 %v17255_v60, %v13543_v54  ;;  %v1614_v31 = vmul.f32 %v17253_v26, %v13539_v42  ;;  %v2398_v52 = vmul.f32 %v17255_v60, %v13558_v20  ;;  %17258 = vst [vmem:[#allocation186_spill] sm:$0xff] %v13824_v44  ;;  %v17315_v44 = vld [vmem:[#allocation25_spill] sm:$0xff] }
 0x434   : > { %v4669_v47 = vsel %vm4235_vm1, %v4144_v19, -inf  ;;  %v4141_v23 = vadd.f32 %v3629_v46, %v2845_v50  ;;  %v4142_v18 = vadd.f32 %v3630_v4, %v2846_v38  ;;  %v3693_v2 = vmul.f32 %v17257_v3, %v13565_v15 }
 0x435   : > { %v5394_v39 = vmax.f32 %v4668_v5, %v4669_v47  ;;  %v2909_v24 = vadd.f32 %v2397_v45, %v1613_v37  ;;  %v3694_v61 = vmul.f32 %v17257_v3, %v13568_v13  ;;  %v13832_v47 = vpop.xlane.xlu0 %5272  ;;  %v2910_v36 = vadd.f32 %v2398_v52, %v1614_v31 }
 0x436   : > { %v4666_v8 = vsel %vm4234_vm0, %v4141_v23, -inf  ;;  %17259 = vst [vmem:[#allocation69_spill] sm:$0xff] %v13832_v47  ;;  %v4667_v26 = vsel %vm4235_vm1, %v4142_v18, -inf  ;;  %v1611_v60 = vmul.f32 %v17236_v34, %v13536_v29  ;;  %v1612_v23 = vmul.f32 %v17236_v34, %v13539_v42 }
 0x437   : > { %5395 = vmax.xlane.f32.xlu1 %v5394_v39  ;;  %v5391_v45 = vmax.f32 %v4666_v8, %v4667_v26  ;;  %v4205_v30 = vadd.f32 %v3693_v2, %v2909_v24  ;;  %v2395_v46 = vmul.f32 %v17237_v7, %v13543_v54  ;;  %v2396_v3 = vmul.f32 %v17237_v7, %v13558_v20  ;;  %v13854_v7 = vpop.xlane.xlu1 %5287 }
 0x438   : > { %v4206_v4 = vadd.f32 %v3694_v61, %v2910_v36  ;;  %v3691_v39 = vmul.f32 %v17239_v51, %v13565_v15  ;;  %v3692_v18 = vmul.f32 %v17239_v51, %v13568_v13  ;;  %v1583_v38 = vmul.f32 %v16840_v32, %v13536_v29  ;;  %17260 = vst [vmem:[#allocation61_spill] sm:$0xff] %v13854_v7 }
 0x439   : > { %5392 = vmax.xlane.f32.xlu0 %v5391_v45  ;;  %v4730_v41 = vsel %vm4234_vm0, %v4205_v30, -inf  ;;  %v2907_v34 = vadd.f32 %v2395_v46, %v1611_v60  ;;  %v2908_v19 = vadd.f32 %v2396_v3, %v1612_v23  ;;  %v2367_v51 = vmul.f32 %v16947_v16, %v13543_v54  ;;  %v13858_v52 = vpop.xlane.xlu0 %5278 }
 0x43a   : > { %v4731_v50 = vsel %vm4235_vm1, %v4206_v4, -inf  ;;  %17261 = vst [vmem:[#allocation97_spill] sm:$0xff] %v13858_v52  ;;  %v1584_v8 = vmul.f32 %v16840_v32, %v13539_v42  ;;  %v2368_v24 = vmul.f32 %v16947_v16, %v13558_v20  ;;  %v3663_v2 = vmul.f32 %v16949_v55, %v13565_v15  ;;  %v17313_v52 = vld [vmem:[#allocation125_spill] sm:$0xff] }
 0x43b   : > { %v5487_v37 = vmax.f32 %v4730_v41, %v4731_v50  ;;  %v4203_v5 = vadd.f32 %v3691_v39, %v2907_v34  ;;  %v4204_v31 = vadd.f32 %v3692_v18, %v2908_v19  ;;  %v3664_v61 = vmul.f32 %v16949_v55, %v13568_v13  ;;  %v13884_v41 = vpop.xlane.xlu1 %5293 }
 0x43c   : > { %v2879_v60 = vadd.f32 %v2367_v51, %v1583_v38  ;;  %v1581_v32 = vmul.f32 %v16749_v21, %v13536_v29  ;;  %v2880_v45 = vadd.f32 %v2368_v24, %v1584_v8  ;;  %v1582_v16 = vmul.f32 %v16749_v21, %v13539_v42  ;;  %17262 = vst [vmem:[#allocation71_spill] sm:$0xff] %v13884_v41  ;;  %v17264_v38 = vld [vmem:[#allocation88_spill] sm:$0xff] }
 0x43d   : > { %5488 = vmax.xlane.f32.xlu1 %v5487_v37  ;;  %v4728_v26 = vsel %vm4234_vm0, %v4203_v5, -inf  ;;  %v4729_v36 = vsel %vm4235_vm1, %v4204_v31, -inf  ;;  %v2365_v30 = vmul.f32 %v16748_v0, %v13543_v54  ;;  %v2366_v46 = vmul.f32 %v16748_v0, %v13558_v20  ;;  %v13888_v19 = vpop.xlane.xlu0 %5284  ;;  %v17310_v41 = vld [vmem:[#allocation136_spill] sm:$0xff] }
 0x43e   : > { %v5484_v23 = vmax.f32 %v4728_v26, %v4729_v36  ;;  %v4175_v55 = vadd.f32 %v3663_v2, %v2879_v60  ;;  %v3661_v3 = vmul.f32 %v10019_v10, %v13565_v15  ;;  %v3662_v4 = vmul.f32 %v10019_v10, %v13568_v13  ;;  %17263 = vst [vmem:[#allocation237_spill] sm:$0xff] %v13888_v19  ;;  %v17265_v10 = vld [vmem:[#allocation109_spill] sm:$0xff] }
 0x43f   : > { %v4176_v39 = vadd.f32 %v3664_v61, %v2880_v45  ;;  %v2877_v18 = vadd.f32 %v2365_v30, %v1581_v32  ;;  %v2878_v34 = vadd.f32 %v2366_v46, %v1582_v16  ;;  %v1555_v37 = vmul.f32 %v17264_v38, %v13142_v59  ;;  %v17266_v26 = vld [vmem:[#allocation77_spill] sm:$0xff]  ;;  %v17267_v45 = vld [vmem:[#allocation74_spill] sm:$0xff] }
 0x440   : > { %5485 = vmax.xlane.f32.xlu0 %v5484_v23  ;;  %v4700_v21 = vsel %vm4234_vm0, %v4175_v55, -inf  ;;  %v2339_v5 = vmul.f32 %v17265_v10, %v13151_v27  ;;  %v1556_v8 = vmul.f32 %v17264_v38, %v13148_v28  ;;  %v2340_v24 = vmul.f32 %v17265_v10, %v13154_v12 }
 0x441   : > { %v4701_v0 = vsel %vm4235_vm1, %v4176_v39, -inf  ;;  %v4173_v50 = vadd.f32 %v3661_v3, %v2877_v18  ;;  %v4174_v51 = vadd.f32 %v3662_v4, %v2878_v34  ;;  %v3635_v36 = vmul.f32 %v17266_v26, %v13160_v9  ;;  %v17268_v3 = vld [vmem:[#allocation187_spill] sm:$0xff]  ;;  %v13916_v18 = vpop.xlane.xlu1 %5299  ;;  %v17270_v34 = vld [vmem:[#allocation80_spill] sm:$0xff] }
 0x442   : > { %v5442_v31 = vmax.f32 %v4700_v21, %v4701_v0  ;;  %v2851_v61 = vadd.f32 %v2339_v5, %v1555_v37  ;;  %v3636_v60 = vmul.f32 %v17266_v26, %v13173_v17  ;;  %v2852_v23 = vadd.f32 %v2340_v24, %v1556_v8  ;;  %17269 = vst [vmem:[#allocation88_spill] sm:$0xff] %v13916_v18  ;;  %v13922_v37 = vpop.xlane.xlu0 %5290 }
 0x443   : > { %v4698_v2 = vsel %vm4234_vm0, %v4173_v50, -inf  ;;  %v4699_v32 = vsel %vm4235_vm1, %v4174_v51, -inf  ;;  %v1553_v16 = vmul.f32 %v17267_v45, %v13142_v59  ;;  %v1554_v30 = vmul.f32 %v17267_v45, %v13148_v28  ;;  %17271 = vst [vmem:[#allocation109_spill] sm:$0xff] %v13922_v37 }
 0x444   : > { %5443 = vmax.xlane.f32.xlu1 %v5442_v31  ;;  %v5439_v55 = vmax.f32 %v4698_v2, %v4699_v32  ;;  %v4147_v46 = vadd.f32 %v3635_v36, %v2851_v61  ;;  %v2337_v4 = vmul.f32 %v17268_v3, %v13151_v27  ;;  %v2338_v39 = vmul.f32 %v17268_v3, %v13154_v12 }
 0x445   : > { %v4148_v21 = vadd.f32 %v3636_v60, %v2852_v23  ;;  %v3633_v0 = vmul.f32 %v17270_v34, %v13160_v9  ;;  %v3634_v50 = vmul.f32 %v17270_v34, %v13173_v17  ;;  %v1617_v24 = vmul.f32 %v17267_v45, %v13536_v29 }
 0x446   : > { %5440 = vmax.xlane.f32.xlu0 %v5439_v55  ;;  %v4672_v5 = vsel %vm4234_vm0, %v4147_v46, -inf  ;;  %v2849_v31 = vadd.f32 %v2337_v4, %v1553_v16  ;;  %v2850_v51 = vadd.f32 %v2338_v39, %v1554_v30  ;;  %v2401_v60 = vmul.f32 %v17268_v3, %v13543_v54  ;;  %v13946_v39 = vpop.xlane.xlu1 %5305 }
 0x447   : > { %v4673_v8 = vsel %vm4235_vm1, %v4148_v21, -inf  ;;  %v1618_v32 = vmul.f32 %v17267_v45, %v13539_v42  ;;  %v2402_v23 = vmul.f32 %v17268_v3, %v13558_v20  ;;  %v3697_v16 = vmul.f32 %v17270_v34, %v13565_v15  ;;  %17272 = vst [vmem:[#allocation77_spill] sm:$0xff] %v13946_v39 }
 0x448   : > { %v5400_v2 = vmax.f32 %v4672_v5, %v4673_v8  ;;  %v4145_v61 = vadd.f32 %v3633_v0, %v2849_v31  ;;  %v4146_v36 = vadd.f32 %v3634_v50, %v2850_v51  ;;  %v3698_v30 = vmul.f32 %v17270_v34, %v13568_v13  ;;  %v13952_v50 = vpop.xlane.xlu0 %5296 }
 0x449   : > { %v2913_v4 = vadd.f32 %v2401_v60, %v1617_v24  ;;  %v1615_v45 = vmul.f32 %v17250_v43, %v13536_v29  ;;  %v2914_v21 = vadd.f32 %v2402_v23, %v1618_v32  ;;  %v1616_v0 = vmul.f32 %v17250_v43, %v13539_v42  ;;  %17273 = vst [vmem:[#allocation74_spill] sm:$0xff] %v13952_v50 }
 0x44a   : > { %5401 = vmax.xlane.f32.xlu1 %v5400_v2  ;;  %v4670_v55 = vsel %vm4234_vm0, %v4145_v61, -inf  ;;  %v4671_v46 = vsel %vm4235_vm1, %v4146_v36, -inf  ;;  %v2399_v34 = vmul.f32 %v17251_v1, %v13543_v54  ;;  %v2400_v31 = vmul.f32 %v17251_v1, %v13558_v20 }
 0x44b   : > { %v5397_v3 = vmax.f32 %v4670_v55, %v4671_v46  ;;  %v4209_v5 = vadd.f32 %v3697_v16, %v2913_v4  ;;  %v3695_v51 = vmul.f32 %v17252_v22, %v13565_v15  ;;  %v3696_v8 = vmul.f32 %v17252_v22, %v13568_v13  ;;  %v13972_v55 = vpop.xlane.xlu1 %5311 }
 0x44c   : > { %v4210_v24 = vadd.f32 %v3698_v30, %v2914_v21  ;;  %v2911_v2 = vadd.f32 %v2399_v34, %v1615_v45  ;;  %v2912_v61 = vadd.f32 %v2400_v31, %v1616_v0  ;;  %v1587_v1 = vmul.f32 %v16746_v49, %v13536_v29  ;;  %17274 = vst [vmem:[#allocation187_spill] sm:$0xff] %v13972_v55 }
 0x44d   : > { %5398 = vmax.xlane.f32.xlu0 %v5397_v3  ;;  %v4734_v43 = vsel %vm4234_vm0, %v4209_v5, -inf  ;;  %v2371_v32 = vmul.f32 %v16747_v35, %v13543_v54  ;;  %v1588_v22 = vmul.f32 %v16746_v49, %v13539_v42  ;;  %v2372_v30 = vmul.f32 %v16747_v35, %v13558_v20  ;;  %v13978_v3 = vpop.xlane.xlu0 %5302  ;;  %v17276_v35 = vld [vmem:[#allocation10_spill] sm:$0xff] }
 0x44e   : > { %v4735_v36 = vsel %vm4235_vm1, %v4210_v24, -inf  ;;  %v4207_v60 = vadd.f32 %v3695_v51, %v2911_v2  ;;  %v4208_v16 = vadd.f32 %v3696_v8, %v2912_v61  ;;  %v3667_v45 = vmul.f32 %v10021_v56, %v13565_v15  ;;  %17275 = vst [vmem:[#allocation80_spill] sm:$0xff] %v13978_v3  ;;  %v17277_v8 = vld [vmem:[#allocation169_spill] sm:$0xff]  ;;  %v17278_v61 = vld [vmem:[#allocation27_spill] sm:$0xff] }
 0x44f   : > { %v5493_v23 = vmax.f32 %v4734_v43, %v4735_v36  ;;  %v2883_v4 = vadd.f32 %v2371_v32, %v1587_v1  ;;  %v2884_v0 = vadd.f32 %v2372_v30, %v1588_v22  ;;  %v3668_v49 = vmul.f32 %v10021_v56, %v13568_v13  ;;  %v14002_v30 = vpop.xlane.xlu1 %5317 }
 0x450   : > { %v4732_v46 = vsel %vm4234_vm0, %v4207_v60, -inf  ;;  %v4733_v21 = vsel %vm4235_vm1, %v4208_v16, -inf  ;;  %v1585_v34 = vmul.f32 %v17276_v35, %v13536_v29  ;;  %v1586_v51 = vmul.f32 %v17276_v35, %v13539_v42  ;;  %v17279_v16 = vld [vmem:[#allocation102_spill] sm:$0xff]  ;;  %17280 = vst [vmem:[#allocation10_spill] sm:$0xff] %v14002_v30 }
 0x451   : > { %5494 = vmax.xlane.f32.xlu1 %v5493_v23  ;;  %v5490_v5 = vmax.f32 %v4732_v46, %v4733_v21  ;;  %v4179_v31 = vadd.f32 %v3667_v45, %v2883_v4  ;;  %v2369_v24 = vmul.f32 %v17277_v8, %v13543_v54  ;;  %v4180_v2 = vadd.f32 %v3668_v49, %v2884_v0  ;;  %v17281_v21 = vld [vmem:[#allocation124_spill] sm:$0xff]  ;;  %v14008_v49 = vpop.xlane.xlu0 %5308 }
 0x452   : > { %v2370_v43 = vmul.f32 %v17277_v8, %v13558_v20  ;;  %v3665_v36 = vmul.f32 %v17278_v61, %v13565_v15  ;;  %v3666_v56 = vmul.f32 %v17278_v61, %v13568_v13  ;;  %v1559_v22 = vmul.f32 %v17279_v16, %v13142_v59  ;;  %17282 = vst [vmem:[#allocation169_spill] sm:$0xff] %v14008_v49 }
 0x453   : > { %5491 = vmax.xlane.f32.xlu0 %v5490_v5  ;;  %v4704_v60 = vsel %vm4234_vm0, %v4179_v31, -inf  ;;  %v2881_v1 = vadd.f32 %v2369_v24, %v1585_v34  ;;  %v4705_v32 = vsel %vm4235_vm1, %v4180_v2, -inf  ;;  %v1560_v45 = vmul.f32 %v17279_v16, %v13148_v28  ;;  %v17283_v5 = vld [vmem:[#allocation84_spill] sm:$0xff]  ;;  %v17284_v2 = vld [vmem:[#allocation87_spill] sm:$0xff]  ;;  %v14032_v39 = vpop.xlane.xlu1 %5323 }
 0x454   : > { %v2882_v23 = vadd.f32 %v2370_v43, %v1586_v51  ;;  %v5448_v46 = vmax.f32 %v4704_v60, %v4705_v32  ;;  %v2343_v0 = vmul.f32 %v17281_v21, %v13151_v27  ;;  %v2344_v34 = vmul.f32 %v17281_v21, %v13154_v12  ;;  %v17285_v60 = vld [vmem:[#allocation110_spill] sm:$0xff]  ;;  %17287 = vst [vmem:[#allocation27_spill] sm:$0xff] %v14032_v39 }
 0x455   : > { %v4177_v4 = vadd.f32 %v3665_v36, %v2881_v1  ;;  %v3639_v31 = vmul.f32 %v17283_v5, %v13160_v9  ;;  %v3640_v51 = vmul.f32 %v17283_v5, %v13173_v17  ;;  %v1557_v43 = vmul.f32 %v17284_v2, %v13142_v59  ;;  %v17298_v39 = vld [vmem:[#allocation122_spill] sm:$0xff] }
 0x456   : > { %v4178_v35 = vadd.f32 %v3666_v56, %v2882_v23  ;;  %5449 = vmax.xlane.f32.xlu1 %v5448_v46  ;;  %v2855_v24 = vadd.f32 %v2343_v0, %v1559_v22  ;;  %v1558_v61 = vmul.f32 %v17284_v2, %v13148_v28  ;;  %v2856_v56 = vadd.f32 %v2344_v34, %v1560_v45  ;;  %v17286_v22 = vld [vmem:[#allocation89_spill] sm:$0xff] }
 0x457   : > { %v4702_v8 = vsel %vm4234_vm0, %v4177_v4, -inf  ;;  %v2341_v1 = vmul.f32 %v17285_v60, %v13151_v27  ;;  %v2342_v32 = vmul.f32 %v17285_v60, %v13154_v12  ;;  %v3637_v4 = vmul.f32 %v17286_v22, %v13160_v9 }
 0x458   : > { %v4703_v36 = vsel %vm4235_vm1, %v4178_v35, -inf  ;;  %v4151_v46 = vadd.f32 %v3639_v31, %v2855_v24  ;;  %v3638_v0 = vmul.f32 %v17286_v22, %v13173_v17  ;;  %v4152_v30 = vadd.f32 %v3640_v51, %v2856_v56  ;;  %v14036_v35 = vpop.xlane.xlu0 %5314 }
 0x459   : > { %v5445_v23 = vmax.f32 %v4702_v8, %v4703_v36  ;;  %v2853_v49 = vadd.f32 %v2341_v1, %v1557_v43  ;;  %v2854_v55 = vadd.f32 %v2342_v32, %v1558_v61  ;;  %17288 = vst [vmem:[#allocation102_spill] sm:$0xff] %v14036_v35  ;;  %v1621_v24 = vmul.f32 %v17284_v2, %v13536_v29 }
 0x45a   : > { %v4676_v45 = vsel %vm4234_vm0, %v4151_v46, -inf  ;;  %v4677_v34 = vsel %vm4235_vm1, %v4152_v30, -inf  ;;  %v1622_v51 = vmul.f32 %v17284_v2, %v13539_v42  ;;  %v2405_v43 = vmul.f32 %v17285_v60, %v13543_v54 }
 0x45b   : > { %5446 = vmax.xlane.f32.xlu0 %v5445_v23  ;;  %v4149_v31 = vadd.f32 %v3637_v4, %v2853_v49  ;;  %v4150_v8 = vadd.f32 %v3638_v0, %v2854_v55  ;;  %v5406_v36 = vmax.f32 %v4676_v45, %v4677_v34  ;;  %v2406_v61 = vmul.f32 %v17285_v60, %v13558_v20 }
 0x45c   : > { %v3701_v55 = vmul.f32 %v17286_v22, %v13565_v15  ;;  %v3702_v49 = vmul.f32 %v17286_v22, %v13568_v13  ;;  %v2917_v1 = vadd.f32 %v2405_v43, %v1621_v24  ;;  %v1619_v23 = vmul.f32 %v17264_v38, %v13536_v29  ;;  %v14066_v22 = vpop.xlane.xlu1 %5329 }
 0x45d   : > { %v4674_v56 = vsel %vm4234_vm0, %v4149_v31, -inf  ;;  %v4675_v30 = vsel %vm4235_vm1, %v4150_v8, -inf  ;;  %5407 = vmax.xlane.f32.xlu1 %v5406_v36  ;;  %v2918_v32 = vadd.f32 %v2406_v61, %v1622_v51  ;;  %v1620_v60 = vmul.f32 %v17264_v38, %v13539_v42  ;;  %v14070_v8 = vpop.xlane.xlu0 %5320  ;;  %v17290_v51 = vld [vmem:[#allocation19_spill] sm:$0xff] }
 0x45e   : > { %v5403_v2 = vmax.f32 %v4674_v56, %v4675_v30  ;;  %v2403_v46 = vmul.f32 %v17265_v10, %v13543_v54  ;;  %v2404_v4 = vmul.f32 %v17265_v10, %v13558_v20  ;;  %v3699_v0 = vmul.f32 %v17266_v26, %v13565_v15  ;;  %17289 = vst [vmem:[#allocation124_spill] sm:$0xff] %v14070_v8 }
 0x45f   : > { %v4213_v45 = vadd.f32 %v3701_v55, %v2917_v1  ;;  %v4214_v34 = vadd.f32 %v3702_v49, %v2918_v32  ;;  %v3700_v31 = vmul.f32 %v17266_v26, %v13568_v13  ;;  %v1591_v43 = vmul.f32 %v17290_v51, %v13536_v29  ;;  %v17291_v26 = vld [vmem:[#allocation174_spill] sm:$0xff]  ;;  %v17292_v1 = vld [vmem:[#allocation45_spill] sm:$0xff] }
 0x460   : > { %5404 = vmax.xlane.f32.xlu0 %v5403_v2  ;;  %v2915_v38 = vadd.f32 %v2403_v46, %v1619_v23  ;;  %v2916_v24 = vadd.f32 %v2404_v4, %v1620_v60  ;;  %v1592_v55 = vmul.f32 %v17290_v51, %v13539_v42  ;;  %v2375_v49 = vmul.f32 %v17291_v26, %v13543_v54  ;;  %v17293_v4 = vld [vmem:[#allocation13_spill] sm:$0xff] }
 0x461   : > { %v4738_v36 = vsel %vm4234_vm0, %v4213_v45, -inf  ;;  %v4739_v10 = vsel %vm4235_vm1, %v4214_v34, -inf  ;;  %v2376_v2 = vmul.f32 %v17291_v26, %v13558_v20  ;;  %v3671_v32 = vmul.f32 %v17292_v1, %v13565_v15  ;;  %v14094_v45 = vpop.xlane.xlu1 %5335 }
 0x462   : > { %v5499_v61 = vmax.f32 %v4738_v36, %v4739_v10  ;;  %v4211_v56 = vadd.f32 %v3699_v0, %v2915_v38  ;;  %v4212_v30 = vadd.f32 %v3700_v31, %v2916_v24  ;;  %v3672_v23 = vmul.f32 %v17292_v1, %v13568_v13  ;;  %v17294_v24 = vld [vmem:[#allocation171_spill] sm:$0xff]  ;;  %v14098_v10 = vpop.xlane.xlu0 %5326 }
 0x463   : > { %v1589_v0 = vmul.f32 %v17293_v4, %v13536_v29  ;;  %v2887_v31 = vadd.f32 %v2375_v49, %v1591_v43  ;;  %v2888_v38 = vadd.f32 %v2376_v2, %v1592_v55  ;;  %v2373_v36 = vmul.f32 %v17294_v24, %v13543_v54  ;;  %17295 = vst [vmem:[#allocation84_spill] sm:$0xff] %v14098_v10  ;;  %v17297_v1 = vld [vmem:[#allocation115_spill] sm:$0xff] }
 0x464   : > { %5500 = vmax.xlane.f32.xlu1 %v5499_v61  ;;  %v4736_v60 = vsel %vm4234_vm0, %v4211_v56, -inf  ;;  %v4737_v46 = vsel %vm4235_vm1, %v4212_v30, -inf  ;;  %v1590_v51 = vmul.f32 %v17293_v4, %v13539_v42  ;;  %v2374_v61 = vmul.f32 %v17294_v24, %v13558_v20  ;;  %v17296_v56 = vld [vmem:[#allocation165_spill] sm:$0xff] }
 0x465   : > { %v5496_v34 = vmax.f32 %v4736_v60, %v4737_v46  ;;  %v3669_v30 = vmul.f32 %v17296_v56, %v13565_v15  ;;  %v3670_v26 = vmul.f32 %v17296_v56, %v13568_v13  ;;  %v4183_v43 = vadd.f32 %v3671_v32, %v2887_v31 }
 0x466   : > { %v4184_v55 = vadd.f32 %v3672_v23, %v2888_v38  ;;  %v2885_v49 = vadd.f32 %v2373_v36, %v1589_v0  ;;  %v2886_v2 = vadd.f32 %v2374_v61, %v1590_v51  ;;  %v1563_v60 = vmul.f32 %v17297_v1, %v13142_v59  ;;  %v14120_v0 = vpop.xlane.xlu1 %5341  ;;  %v17299_v38 = vld [vmem:[#allocation42_spill] sm:$0xff] }
 0x467   : > { %5497 = vmax.xlane.f32.xlu0 %v5496_v34  ;;  %v4708_v46 = vsel %vm4234_vm0, %v4183_v43, -inf  ;;  %v2347_v10 = vmul.f32 %v17298_v39, %v13151_v27  ;;  %v1564_v32 = vmul.f32 %v17297_v1, %v13148_v28  ;;  %v2348_v23 = vmul.f32 %v17298_v39, %v13154_v12  ;;  %v17300_v43 = vld [vmem:[#allocation101_spill] sm:$0xff] }
 0x468   : > { %v4709_v4 = vsel %vm4235_vm1, %v4184_v55, -inf  ;;  %v4181_v24 = vadd.f32 %v3669_v30, %v2885_v49  ;;  %v4182_v56 = vadd.f32 %v3670_v26, %v2886_v2  ;;  %v3643_v36 = vmul.f32 %v17299_v38, %v13160_v9  ;;  %v14128_v61 = vpop.xlane.xlu0 %5332 }
 0x469   : > { %v5454_v8 = vmax.f32 %v4708_v46, %v4709_v4  ;;  %v2859_v31 = vadd.f32 %v2347_v10, %v1563_v60  ;;  %v3644_v51 = vmul.f32 %v17299_v38, %v13173_v17  ;;  %v2860_v26 = vadd.f32 %v2348_v23, %v1564_v32  ;;  %v17301_v60 = vld [vmem:[#allocation188_spill] sm:$0xff] }
 0x46a   : > { %v4706_v34 = vsel %vm4234_vm0, %v4181_v24, -inf  ;;  %v4707_v30 = vsel %vm4235_vm1, %v4182_v56, -inf  ;;  %v1561_v55 = vmul.f32 %v17300_v43, %v13142_v59  ;;  %v1562_v49 = vmul.f32 %v17300_v43, %v13148_v28 }
 0x46b   : > { %5455 = vmax.xlane.f32.xlu1 %v5454_v8  ;;  %v5451_v10 = vmax.f32 %v4706_v34, %v4707_v30  ;;  %v4155_v2 = vadd.f32 %v3643_v36, %v2859_v31  ;;  %v2345_v46 = vmul.f32 %v17301_v60, %v13151_v27  ;;  %v2346_v4 = vmul.f32 %v17301_v60, %v13154_v12  ;;  %v17302_v8 = vld [vmem:[#allocation91_spill] sm:$0xff]  ;;  %v14150_v30 = vpop.xlane.xlu1 %5347 }
 0x46c   : > { %v4156_v24 = vadd.f32 %v3644_v51, %v2860_v26  ;;  %v3641_v35 = vmul.f32 %v17302_v8, %v13160_v9  ;;  %v3642_v56 = vmul.f32 %v17302_v8, %v13173_v17  ;;  %v1625_v36 = vmul.f32 %v17300_v43, %v13536_v29 }
 0x46d   : > { %5452 = vmax.xlane.f32.xlu0 %v5451_v10  ;;  %v4680_v32 = vsel %vm4234_vm0, %v4155_v2, -inf  ;;  %v2857_v23 = vadd.f32 %v2345_v46, %v1561_v55  ;;  %v2858_v34 = vadd.f32 %v2346_v4, %v1562_v49  ;;  %v2409_v3 = vmul.f32 %v17301_v60, %v13543_v54 }
 0x46e   : > { %v4681_v31 = vsel %vm4235_vm1, %v4156_v24, -inf  ;;  %v14154_v10 = vpop.xlane.xlu0 %5338  ;;  %v1626_v55 = vmul.f32 %v17300_v43, %v13539_v42  ;;  %v2410_v49 = vmul.f32 %v17301_v60, %v13558_v20  ;;  %v3705_v2 = vmul.f32 %v17302_v8, %v13565_v15 }
 0x46f   : > { %v5412_v51 = vmax.f32 %v4680_v32, %v4681_v31  ;;  %v4153_v26 = vadd.f32 %v3641_v35, %v2857_v23  ;;  %v4154_v18 = vadd.f32 %v3642_v56, %v2858_v34  ;;  %v3706_v46 = vmul.f32 %v17302_v8, %v13568_v13 }
 0x470   : > { %v2921_v24 = vadd.f32 %v2409_v3, %v1625_v36  ;;  %v1623_v43 = vmul.f32 %v17279_v16, %v13536_v29  ;;  %v2922_v32 = vadd.f32 %v2410_v49, %v1626_v55  ;;  %v1624_v60 = vmul.f32 %v17279_v16, %v13539_v42 }
 0x471   : > { %5413 = vmax.xlane.f32.xlu1 %v5412_v51  ;;  %v4678_v35 = vsel %vm4234_vm0, %v4153_v26, -inf  ;;  %v4679_v4 = vsel %vm4235_vm1, %v4154_v18, -inf  ;;  %v2407_v23 = vmul.f32 %v17281_v21, %v13543_v54  ;;  %v2408_v34 = vmul.f32 %v17281_v21, %v13558_v20 }
 0x472   : > { %v5409_v56 = vmax.f32 %v4678_v35, %v4679_v4  ;;  %v4217_v8 = vadd.f32 %v3705_v2, %v2921_v24  ;;  %v3703_v31 = vmul.f32 %v17283_v5, %v13565_v15  ;;  %v3704_v18 = vmul.f32 %v17283_v5, %v13568_v13  ;;  %v14180_v51 = vpop.xlane.xlu1 %5353  ;;  %v17303_v2 = vld [vmem:[#allocation24_spill] sm:$0xff]  ;;  %v17304_v5 = vld [vmem:[#allocation67_spill] sm:$0xff] }
 0x473   : > { %v4218_v3 = vadd.f32 %v3706_v46, %v2922_v32  ;;  %v2919_v36 = vadd.f32 %v2407_v23, %v1623_v43  ;;  %v2920_v26 = vadd.f32 %v2408_v34, %v1624_v60  ;;  %v1595_v35 = vmul.f32 %v17303_v2, %v13536_v29  ;;  %v17305_v23 = vld [vmem:[#allocation167_spill] sm:$0xff] }
 0x474   : > { %5410 = vmax.xlane.f32.xlu0 %v5409_v56  ;;  %v4742_v16 = vsel %vm4234_vm0, %v4217_v8, -inf  ;;  %v2379_v4 = vmul.f32 %v17304_v5, %v13543_v54  ;;  %v1596_v43 = vmul.f32 %v17303_v2, %v13539_v42  ;;  %v2380_v56 = vmul.f32 %v17304_v5, %v13558_v20 }
 0x475   : > { %v14184_v55 = vpop.xlane.xlu0 %5344  ;;  %v4743_v21 = vsel %vm4235_vm1, %v4218_v3, -inf  ;;  %v4215_v49 = vadd.f32 %v3703_v31, %v2919_v36  ;;  %v4216_v24 = vadd.f32 %v3704_v18, %v2920_v26  ;;  %v3675_v8 = vmul.f32 %v17305_v23, %v13565_v15  ;;  %v17306_v3 = vld [vmem:[#allocation18_spill] sm:$0xff] }
 0x476   : > { %v5505_v46 = vmax.f32 %v4742_v16, %v4743_v21  ;;  %v2891_v60 = vadd.f32 %v2379_v4, %v1595_v35  ;;  %v3676_v34 = vmul.f32 %v17305_v23, %v13568_v13  ;;  %v2892_v18 = vadd.f32 %v2380_v56, %v1596_v43 }
 0x477   : > { %v4740_v32 = vsel %vm4234_vm0, %v4215_v49, -inf  ;;  %v4741_v31 = vsel %vm4235_vm1, %v4216_v24, -inf  ;;  %v1593_v36 = vmul.f32 %v17306_v3, %v13536_v29  ;;  %v1594_v16 = vmul.f32 %v17306_v3, %v13539_v42  ;;  %v17307_v49 = vld [vmem:[#allocation175_spill] sm:$0xff] }
 0x478   : > { %5506 = vmax.xlane.f32.xlu1 %v5505_v46  ;;  %v5502_v26 = vmax.f32 %v4740_v32, %v4741_v31  ;;  %v4187_v21 = vadd.f32 %v3675_v8, %v2891_v60  ;;  %v2377_v2 = vmul.f32 %v17307_v49, %v13543_v54  ;;  %v2378_v35 = vmul.f32 %v17307_v49, %v13558_v20  ;;  %v14212_v5 = vpop.xlane.xlu1 %5359  ;;  %v17308_v46 = vld [vmem:[#allocation53_spill] sm:$0xff] }
 0x479   : > { %v4188_v4 = vadd.f32 %v3676_v34, %v2892_v18  ;;  %v3673_v24 = vmul.f32 %v17308_v46, %v13565_v15  ;;  %v3674_v43 = vmul.f32 %v17308_v46, %v13568_v13  ;;  %v17309_v31 = vld [vmem:[#allocation129_spill] sm:$0xff]  ;;  %v2351_v46 = vmul.f32 %v17310_v41, %v13151_v27 }
 0x47a   : > { %5503 = vmax.xlane.f32.xlu0 %v5502_v26  ;;  %v4712_v32 = vsel %vm4234_vm0, %v4187_v21, -inf  ;;  %v2889_v60 = vadd.f32 %v2377_v2, %v1593_v36  ;;  %v2890_v23 = vadd.f32 %v2378_v35, %v1594_v16  ;;  %v1567_v34 = vmul.f32 %v17309_v31, %v13142_v59  ;;  %v17311_v36 = vld [vmem:[#allocation95_spill] sm:$0xff] }
 0x47b   : > { %v14218_v56 = vpop.xlane.xlu0 %5350  ;;  %v4713_v8 = vsel %vm4235_vm1, %v4188_v4, -inf  ;;  %v1568_v26 = vmul.f32 %v17309_v31, %v13148_v28  ;;  %v2352_v21 = vmul.f32 %v17310_v41, %v13154_v12  ;;  %v3647_v16 = vmul.f32 %v17311_v36, %v13160_v9 }
 0x47c   : > { %v5460_v18 = vmax.f32 %v4712_v32, %v4713_v8  ;;  %v4185_v3 = vadd.f32 %v3673_v24, %v2889_v60  ;;  %v4186_v49 = vadd.f32 %v3674_v43, %v2890_v23  ;;  %v3648_v2 = vmul.f32 %v17311_v36, %v13173_v17  ;;  %v17312_v43 = vld [vmem:[#allocation114_spill] sm:$0xff] }
 0x47d   : > { %v2863_v24 = vadd.f32 %v2351_v46, %v1567_v34  ;;  %v1565_v32 = vmul.f32 %v17312_v43, %v13142_v59  ;;  %v2864_v8 = vadd.f32 %v2352_v21, %v1568_v26  ;;  %v1566_v50 = vmul.f32 %v17312_v43, %v13148_v28  ;;  %v17314_v34 = vld [vmem:[#allocation183_spill] sm:$0xff] }
 0x47e   : > { %5461 = vmax.xlane.f32.xlu1 %v5460_v18  ;;  %v4710_v35 = vsel %vm4234_vm0, %v4185_v3, -inf  ;;  %v4711_v4 = vsel %vm4235_vm1, %v4186_v49, -inf  ;;  %v2349_v18 = vmul.f32 %v17313_v52, %v13151_v27  ;;  %v2350_v49 = vmul.f32 %v17313_v52, %v13154_v12 }
 0x47f   : > { %v5457_v23 = vmax.f32 %v4710_v35, %v4711_v4  ;;  %v4159_v3 = vadd.f32 %v3647_v16, %v2863_v24  ;;  %v3645_v46 = vmul.f32 %v17314_v34, %v13160_v9  ;;  %v3646_v37 = vmul.f32 %v17314_v34, %v13173_v17 }
 0x480   : > { %v14242_v60 = vpop.xlane.xlu1 %5365  ;;  %v4160_v26 = vadd.f32 %v3648_v2, %v2864_v8  ;;  %v2861_v21 = vadd.f32 %v2349_v18, %v1565_v32  ;;  %v2862_v4 = vadd.f32 %v2350_v49, %v1566_v50  ;;  %v5782_v19 = vadd.s32 4294967288, %v17315_v44 }
 0x481   : > { %5458 = vmax.xlane.f32.xlu0 %v5457_v23  ;;  %v4684_v35 = vsel %vm4234_vm0, %v4159_v3, -inf  ;;  %v1629_v57 = vmul.f32 %v17312_v43, %v13536_v29  ;;  %v2413_v23 = vmul.f32 %v17313_v52, %v13543_v54  ;;  %v1630_v50 = vmul.f32 %v17312_v43, %v13539_v42 }
 0x482   : > { %v14248_v7 = vpop.xlane.xlu0 %5356  ;;  %v4685_v16 = vsel %vm4235_vm1, %v4160_v26, -inf  ;;  %v4157_v24 = vadd.f32 %v3645_v46, %v2861_v21  ;;  %v4158_v11 = vadd.f32 %v3646_v37, %v2862_v4  ;;  %v2414_v8 = vmul.f32 %v17313_v52, %v13558_v20 }
 0x483   : > { %v5418_v47 = vmax.f32 %v4684_v35, %v4685_v16  ;;  %v3709_v37 = vmul.f32 %v17314_v34, %v13565_v15  ;;  %v2925_v49 = vadd.f32 %v2413_v23, %v1629_v57  ;;  %v3710_v46 = vmul.f32 %v17314_v34, %v13568_v13  ;;  %v17316_v34 = vld [vmem:[#allocation12_spill] sm:$0xff] }
 0x484   : > { %v4682_v32 = vsel %vm4234_vm0, %v4157_v24, -inf  ;;  %v4683_v3 = vsel %vm4235_vm1, %v4158_v11, -inf  ;;  %v1627_v26 = vmul.f32 %v17297_v1, %v13536_v29  ;;  %v2926_v21 = vadd.f32 %v2414_v8, %v1630_v50  ;;  %v17317_v8 = vld [vmem:[#allocation31_spill] sm:$0xff] }
 0x485   : > { %v14265_v2 = vpop.xlane.xlu1 %5371  ;;  %5419 = vmax.xlane.f32.xlu1 %v5418_v47  ;;  %v5415_v43 = vmax.f32 %v4682_v32, %v4683_v3  ;;  %v1628_v52 = vmul.f32 %v17297_v1, %v13539_v42  ;;  %v2411_v35 = vmul.f32 %v17298_v39, %v13543_v54  ;;  %v4221_v4 = vadd.f32 %v3709_v37, %v2925_v49 }
 0x486   : > { %v2412_v47 = vmul.f32 %v17298_v39, %v13558_v20  ;;  %v3707_v11 = vmul.f32 %v17299_v38, %v13565_v15  ;;  %v3708_v57 = vmul.f32 %v17299_v38, %v13568_v13  ;;  %v14294_v16 = vsub.s32 %v5782_v19, %v17316_v34 }
 0x487   : > { %v14298_v24 = vsub.s32 %v17315_v44, %v17316_v34  ;;  %5416 = vmax.xlane.f32.xlu0 %v5415_v43  ;;  %v4222_v1 = vadd.f32 %v3710_v46, %v2926_v21  ;;  %v2923_v23 = vadd.f32 %v2411_v35, %v1627_v26  ;;  %v5803_v32 = vadd.s32 4294967264, %v17315_v44  ;;  %v17318_v46 = vld [vmem:[#allocation177_spill] sm:$0xff] }
 0x488   : > { %v4746_v39 = vsel %vm4234_vm0, %v4221_v4, -inf  ;;  %v2924_v50 = vadd.f32 %v2412_v47, %v1628_v52  ;;  %v1599_v37 = vmul.f32 %v17317_v8, %v13536_v29  ;;  %v1600_v49 = vmul.f32 %v17317_v8, %v13539_v42  ;;  %v17319_v4 = vld [vmem:[#allocation54_spill] sm:$0xff]  ;;  %v17320_v8 = vld [vmem:[#allocation23_spill] sm:$0xff] }
 0x489   : > { %v14275_v18 = vpop.xlane.xlu0 %5362  ;;  %v4747_v19 = vsel %vm4235_vm1, %v4222_v1, -inf  ;;  %v4219_v3 = vadd.f32 %v3707_v11, %v2923_v23  ;;  %v2383_v26 = vmul.f32 %v17318_v46, %v13543_v54  ;;  %v2384_v52 = vmul.f32 %v17318_v46, %v13558_v20 }
 0x48a   : > { %v5511_v21 = vmax.f32 %v4746_v39, %v4747_v19  ;;  %v4220_v35 = vadd.f32 %v3708_v57, %v2924_v50  ;;  %v3679_v47 = vmul.f32 %v17319_v4, %v13565_v15  ;;  %v3680_v23 = vmul.f32 %v17319_v4, %v13568_v13  ;;  %v17321_v19 = vld [vmem:[#allocation68_spill] sm:$0xff] }
 0x48b   : > { %v4744_v1 = vsel %vm4234_vm0, %v4219_v3, -inf  ;;  %v2895_v11 = vadd.f32 %v2383_v26, %v1599_v37  ;;  %v1597_v14 = vmul.f32 %v17320_v8, %v13536_v29  ;;  %v2896_v39 = vadd.f32 %v2384_v52, %v1600_v49  ;;  %v17322_v26 = vld [vmem:[#allocation59_spill] sm:$0xff] }
 0x48c   : > { %v14305_v38 = vpop.xlane.xlu1 %5377  ;;  %5512 = vmax.xlane.f32.xlu1 %v5511_v21  ;;  %v4745_v57 = vsel %vm4235_vm1, %v4220_v35, -inf  ;;  %v1598_v50 = vmul.f32 %v17320_v8, %v13539_v42  ;;  %v2381_v46 = vmul.f32 %v17321_v19, %v13543_v54  ;;  %v2382_v37 = vmul.f32 %v17321_v19, %v13558_v20 }
 0x48d   : > { %v5508_v40 = vmax.f32 %v4744_v1, %v4745_v57  ;;  %v4191_v3 = vadd.f32 %v3679_v47, %v2895_v11  ;;  %v3677_v4 = vmul.f32 %v17322_v26, %v13565_v15  ;;  %v5789_v21 = vadd.s32 4294967280, %v17315_v44 }
 0x48e   : > { %v4192_v62 = vadd.f32 %v3680_v23, %v2896_v39  ;;  %v2893_v25 = vadd.f32 %v2381_v46, %v1597_v14  ;;  %v3678_v49 = vmul.f32 %v17322_v26, %v13568_v13  ;;  %v14341_v52 = vsub.s32 %v5803_v32, %v17316_v34  ;;  %v17323_v39 = vld [vmem:[#allocation30_spill] sm:$0xff] }
 0x48f   : > { %v14313_v43 = vpop.xlane.xlu0 %5368  ;;  %v5817_v47 = vadd.s32 4294967248, %v17315_v44  ;;  %5509 = vmax.xlane.f32.xlu0 %v5508_v40  ;;  %v4716_v1 = vsel %vm4234_vm0, %v4191_v3, -inf  ;;  %v2894_v11 = vadd.f32 %v2382_v37, %v1598_v50  ;;  %v5796_v23 = vadd.s32 4294967272, %v17315_v44  ;;  %v17324_v26 = vld [vmem:[#allocation178_spill] sm:$0xff] }
 0x490   : > { %v4717_v14 = vsel %vm4235_vm1, %v4192_v62, -inf  ;;  %v4189_v57 = vadd.f32 %v3677_v4, %v2893_v25  ;;  %v1601_v19 = vmul.f32 %v17323_v39, %v13536_v29  ;;  %v1602_v40 = vmul.f32 %v17323_v39, %v13539_v42  ;;  %v17325_v62 = vld [vmem:[#allocation163_spill] sm:$0xff] }
 0x491   : > { %v5466_v32 = vmax.f32 %v4716_v1, %v4717_v14  ;;  %v4190_v46 = vadd.f32 %v3678_v49, %v2894_v11  ;;  %v2385_v3 = vmul.f32 %v17324_v26, %v13543_v54  ;;  %v2386_v37 = vmul.f32 %v17324_v26, %v13558_v20  ;;  %v17326_v11 = vld [vmem:[#allocation128_spill] sm:$0xff] }
 0x492   : > { %v4714_v50 = vsel %vm4234_vm0, %v4189_v57, -inf  ;;  %v3681_v25 = vmul.f32 %v17325_v62, %v13565_v15  ;;  %v3682_v4 = vmul.f32 %v17325_v62, %v13568_v13  ;;  %v1569_v14 = vmul.f32 %v17326_v11, %v13142_v59  ;;  %v17327_v26 = vld [vmem:[#allocation140_spill] sm:$0xff] }
 0x493   : > { %v14338_v35 = vpop.xlane.xlu1 %5383  ;;  %5467 = vmax.xlane.f32.xlu1 %v5466_v32  ;;  %v4715_v49 = vsel %vm4235_vm1, %v4190_v46, -inf  ;;  %v2897_v1 = vadd.f32 %v2385_v3, %v1601_v19  ;;  %v1570_v57 = vmul.f32 %v17326_v11, %v13148_v28  ;;  %v2898_v6 = vadd.f32 %v2386_v37, %v1602_v40  ;;  %v17328_v46 = vld [vmem:[#allocation43_spill] sm:$0xff] }
 0x494   : > { %v5463_v39 = vmax.f32 %v4714_v50, %v4715_v49  ;;  %v2353_v58 = vmul.f32 %v17327_v26, %v13151_v27  ;;  %v2354_v33 = vmul.f32 %v17327_v26, %v13154_v12  ;;  %v14378_v32 = vsub.s32 %v5789_v21, %v17316_v34 }
 0x495   : > { %v4193_v19 = vadd.f32 %v3681_v25, %v2897_v1  ;;  %v3649_v59 = vmul.f32 %v17328_v46, %v13160_v9  ;;  %v3650_v28 = vmul.f32 %v17328_v46, %v13173_v17  ;;  %v14387_v40 = vsub.s32 %v5817_v47, %v17316_v34 }
 0x496   : > { %v14346_v8 = vpop.xlane.xlu0 %5374  ;;  %5464 = vmax.xlane.f32.xlu0 %v5463_v39  ;;  %v4194_v27 = vadd.f32 %v3682_v4, %v2898_v6  ;;  %v2865_v12 = vadd.f32 %v2353_v58, %v1569_v14  ;;  %v2866_v50 = vadd.f32 %v2354_v33, %v1570_v57  ;;  %v14390_v37 = vsub.s32 %v5796_v23, %v17316_v34 }
 0x497   : > { %v5831_v21 = vadd.s32 4294967232, %v17315_v44  ;;  %v4718_v9 = vsel %vm4234_vm0, %v4193_v19, -inf  ;;  %v1631_v17 = vmul.f32 %v17309_v31, %v13536_v29  ;;  %v2415_v6 = vmul.f32 %v17310_v41, %v13543_v54 }
 0x498   : > { %v4719_v25 = vsel %vm4235_vm1, %v4194_v27, -inf  ;;  %v4161_v47 = vadd.f32 %v3649_v59, %v2865_v12  ;;  %v4162_v49 = vadd.f32 %v3650_v28, %v2866_v50  ;;  %v1632_v58 = vmul.f32 %v17309_v31, %v13539_v42 }
 0x499   : > { %v5469_v33 = vmax.f32 %v4718_v9, %v4719_v25  ;;  %v2416_v23 = vmul.f32 %v17310_v41, %v13558_v20  ;;  %v3711_v4 = vmul.f32 %v17311_v36, %v13565_v15  ;;  %v2927_v57 = vadd.f32 %v2415_v6, %v1631_v17 }
 0x49a   : > { %v4686_v1 = vsel %vm4234_vm0, %v4161_v47, -inf  ;;  %v4687_v14 = vsel %vm4235_vm1, %v4162_v49, -inf  ;;  %v3712_v39 = vmul.f32 %v17311_v36, %v13568_v13  ;;  %v5810_v31 = vadd.s32 4294967256, %v17315_v44 }
 0x49b   : > { %v5845_v59 = vadd.s32 4294967216, %v17315_v44  ;;  %5470 = vmax.xlane.f32.xlu1 %v5469_v33  ;;  %v5421_v41 = vmax.f32 %v4686_v1, %v4687_v14  ;;  %v2928_v28 = vadd.f32 %v2416_v23, %v1632_v58  ;;  %v5824_v12 = vadd.s32 4294967240, %v17315_v44 }
 0x49c   : > { %v4223_v50 = vadd.f32 %v3711_v4, %v2927_v57  ;;  %v1633_v9 = vmul.f32 %v17326_v11, %v13536_v29  ;;  %v1634_v36 = vmul.f32 %v17326_v11, %v13539_v42  ;;  %v2417_v25 = vmul.f32 %v17327_v26, %v13543_v54 }
 0x49d   : > { %5422 = vmax.xlane.f32.xlu0 %v5421_v41  ;;  %v4224_v17 = vadd.f32 %v3712_v39, %v2928_v28  ;;  %v2418_v47 = vmul.f32 %v17327_v26, %v13558_v20  ;;  %v3713_v49 = vmul.f32 %v17328_v46, %v13565_v15  ;;  %v5859_v6 = vadd.s32 4294967200, %v17315_v44 }
 0x49e   : > { %v14375_v62 = vpop.xlane.xlu1 %5428  ;;  %v5838_v29 = vadd.s32 4294967224, %v17315_v44  ;;  %v4748_v42 = vsel %vm4234_vm0, %v4223_v50, -inf  ;;  %v3714_v11 = vmul.f32 %v17328_v46, %v13568_v13  ;;  %v14437_v33 = vsub.s32 %v5831_v21, %v17316_v34 }
 0x49f   : > { %v14384_v3 = vpop.xlane.xlu0 %5380  ;;  %v4749_v54 = vsel %vm4235_vm1, %v4224_v17, -inf  ;;  %v2929_v20 = vadd.f32 %v2417_v25, %v1633_v9  ;;  %v2930_v15 = vadd.f32 %v2418_v47, %v1634_v36  ;;  %v14442_v26 = vsub.s32 %v5810_v31, %v17316_v34 }
 0x4a0   : > { %v14445_v58 = vsub.s32 %v5845_v59, %v17316_v34  ;;  %v5514_v23 = vmax.f32 %v4748_v42, %v4749_v54  ;;  %v14450_v13 = vsub.s32 %v5824_v12, %v17316_v34  ;;  %v5873_v46 = vadd.s32 4294967184, %v17315_v44 }
 0x4a1   : > { %v4225_v21 = vadd.f32 %v3713_v49, %v2929_v20  ;;  %v4226_v1 = vadd.f32 %v3714_v11, %v2930_v15  ;;  %v14456_v57 = vsub.s32 %v5859_v6, %v17316_v34  ;;  %v14459_v39 = vsub.s32 %v5838_v29, %v17316_v34 }
 0x4a2   : > { %v5852_v31 = vadd.s32 4294967208, %v17315_v44  ;;  %v5866_v59 = vadd.s32 4294967192, %v17315_v44  ;;  %5515 = vmax.xlane.f32.xlu0 %v5514_v23  ;;  %v6759_v12 = vrot.slane %v14066_v22, %v14298_v24  ;;  %v6763_v50 = vrot.slane %v14128_v61, %v14294_v16 }
 0x4a3   : > { %v14413_v19 = vpop.xlane.xlu1 %5476  ;;  %v4750_v41 = vsel %vm4234_vm0, %v4225_v21, -inf  ;;  %v4751_v28 = vsel %vm4235_vm1, %v4226_v1, -inf  ;;  %v5880_v9 = vadd.s32 4294967176, %v17315_v44  ;;  %v6768_v17 = vrot.slane %v14094_v45, %v14378_v32 }
 0x4a4   : > { %v5517_v36 = vmax.f32 %v4750_v41, %v4751_v28  ;;  %v6773_v53 = vrot.slane %v14154_v10, %v14390_v37  ;;  %v14477_v25 = vsub.s32 %v5873_v46, %v17316_v34  ;;  %v6764_v63 = vsel %vm5787_vm2, %v6763_v50, %v6759_v12 }
 0x4a5   : > { %v6783_v22 = vrot.slane %v14184_v55, %v14442_v26  ;;  %v14483_v61 = vsub.s32 %v5852_v31, %v17316_v34  ;;  %v6778_v44 = vrot.slane %v14120_v0, %v14341_v52  ;;  %v6769_v45 = vsel %vm5794_vm3, %v6768_v17, %v6764_v63 }
 0x4a6   : > { %v14417_v27 = vpop.xlane.xlu0 %5425  ;;  %5518 = vmax.xlane.f32.xlu0 %v5517_v36  ;;  %v14489_v47 = vsub.s32 %v5866_v59, %v17316_v34  ;;  %v6774_v49 = vsel %vm5801_vm4, %v6773_v53, %v6769_v45  ;;  %v6793_v55 = vrot.slane %v14218_v56, %v14450_v13  ;;  %v14495_v29 = vsub.s32 %v5880_v9, %v17316_v34 }
 0x4a7   : > { %v6788_v0 = vrot.slane %v14150_v30, %v14387_v40  ;;  %v6798_v42 = vrot.slane %v14180_v51, %v14437_v33  ;;  %v6779_v11 = vsel %vm5808_vm5, %v6778_v44, %v6774_v49  ;;  %v6808_v20 = vrot.slane %v14212_v5, %v14445_v58 }
 0x4a8   : > { %v6784_v54 = vsel %vm5815_vm6, %v6783_v22, %v6779_v11  ;;  %v6818_v56 = vrot.slane %v14242_v60, %v14456_v57  ;;  %v6803_v34 = vrot.slane %v14248_v7, %v14459_v39  ;;  %v6813_v30 = vrot.slane %v14275_v18, %v14483_v61  ;;  %v17333_v11 = vld [vmem:[#allocation121_spill] sm:$0xff] }
 0x4a9   : > { %v6789_v15 = vsel %vm5822_vm7, %v6788_v0, %v6784_v54  ;;  %v6838_v51 = vrot.slane %v14305_v38, %v14298_v24  ;;  %v6823_v23 = vrot.slane %v14313_v43, %v14489_v47  ;;  %v6847_v5 = vrot.slane %v14338_v35, %v14378_v32  ;;  %v17332_v0 = vld [vmem:[#allocation55_spill] sm:$0xff] }
 0x4aa   : > { %v14447_v4 = vpop.xlane.xlu1 %5431  ;;  %v6794_v46 = vsel %vm5829_vm8, %v6793_v55, %v6789_v15  ;;  %v6921_v60 = vrot.slane %v14375_v62, %v14294_v16  ;;  %v6842_v7 = vrot.slane %v14384_v3, %v14294_v16  ;;  %v7000_v18 = vrot.slane %v14413_v19, %v14294_v16  ;;  %v17331_v55 = vld [vmem:[#allocation105_spill] sm:$0xff] }
 0x4ab   : > { %v6799_v21 = vsel %vm5836_vm9, %v6798_v42, %v6794_v46  ;;  %v6917_v38 = vrot.slane %v14417_v27, %v14298_v24  ;;  %v6833_v12 = vrot.slane %v14346_v8, %v14495_v29  ;;  %v6828_v36 = vrot.slane %v14265_v2, %v14477_v25  ;;  %v17336_v46 = vld [vmem:[#allocation126_spill] sm:$0xff] }
 0x4ac   : > { %v14453_v14 = vpop.xlane.xlu0 %5473  ;;  %v6804_v35 = vsel %vm5843_vm10, %v6803_v34, %v6799_v21  ;;  %v6843_v31 = vsel %vm5787_vm2, %v6842_v7, %v6838_v51  ;;  %vm5885_vm0 = vcmask 1048512   ;;  %v5793_v42 = vrot.slane %v17332_v0, %v14378_v32 }
 0x4ad   : > { %v6996_v43 = vrot.slane %v14453_v14, %v14298_v24  ;;  %v6809_v41 = vsel %vm5850_vm11, %v6808_v20, %v6804_v35  ;;  %v14536_v19 = vsel %vm5787_vm2, %v6921_v60, %v6917_v38  ;;  %v6848_v28 = vsel %vm5794_vm3, %v6847_v5, %v6843_v31  ;;  %v17334_v20 = vld [vmem:[#allocation70_spill] sm:$0xff]  ;;  %v17337_v60 = vld [vmem:[#allocation108_spill] sm:$0xff]  ;;  %v17340_v35 = vld [vmem:[#allocation49_spill] sm:$0xff] }
 0x4ae   : > { %v6814_v14 = vsel %vm5857_vm12, %v6813_v30, %v6809_v41  ;;  %v5800_v54 = vrot.slane %v17333_v11, %v14390_v37  ;;  %v17335_v30 = vld [vmem:[#allocation153_spill] sm:$0xff]  ;;  %v5814_v5 = vrot.slane %v17336_v46, %v14442_v26  ;;  %v5807_v7 = vrot.slane %v17337_v60, %v14341_v52  ;;  %v17351_v46 = vld [vmem:[#allocation106_spill] sm:$0xff]  ;;  %v17352_v60 = vld [vmem:[#allocation176_spill] sm:$0xff] }
 0x4af   : > { %v5390_v10 = vpop.xlane.xlu1 %5389  ;;  %v7001_v27 = vsel %vm5787_vm2, %v7000_v18, %v6996_v43  ;;  %v6819_v17 = vsel %vm5864_vm13, %v6818_v56, %v6814_v14  ;;  %v5894_v56 = vrot.slane %v17334_v20, %v14294_v16  ;;  %v5890_v51 = vrot.slane %v17335_v30, %v14298_v24  ;;  %v17338_v18 = vld [vmem:[#allocation57_spill] sm:$0xff]  ;;  %v17339_v43 = vld [vmem:[#allocation98_spill] sm:$0xff]  ;;  %v17343_v14 = vld [vmem:[#allocation64_spill] sm:$0xff] }
 0x4b0   : > { %v6857_v62 = vrot.slane %v5390_v10, %v14341_v52  ;;  %v6824_v22 = vsel %vm5871_vm14, %v6823_v23, %v6819_v17  ;;  %v17330_v10 = vld [vmem:[#allocation103_spill] sm:$0xff]  ;;  %v5904_v38 = vrot.slane %v17338_v18, %v14390_v37  ;;  %v5899_v31 = vrot.slane %v17340_v35, %v14378_v32  ;;  %v17342_v41 = vld [vmem:[#allocation117_spill] sm:$0xff]  ;;  %v17350_v30 = vld [vmem:[#allocation172_spill] sm:$0xff] }
 0x4b1   : > { %v6829_v8 = vsel %vm5878_vm15, %v6828_v36, %v6824_v22  ;;  %v5786_v49 = vrot.slane %v17330_v10, %v14294_v16  ;;  %v5895_v21 = vsel %vm5787_vm2, %v5894_v56, %v5890_v51  ;;  %v17344_v36 = vld [vmem:[#allocation73_spill] sm:$0xff]  ;;  %v5924_v51 = vrot.slane %v17350_v30, %v14450_v13 }
 0x4b2   : > { %v14556_v45 = vsel %vm5885_vm0, %v6833_v12, %v6829_v8  ;;  %v5828_v12 = vrot.slane %v17343_v14, %v14450_v13  ;;  %v5914_v17 = vrot.slane %v17344_v36, %v14442_v26  ;;  %v17345_v22 = vld [vmem:[#allocation85_spill] sm:$0xff]  ;;  %v17356_v14 = vld [vmem:[#allocation179_spill] sm:$0xff]  ;;  %vm7072_vm1 = vcmask 1041409  }
 0x4b3   : > { %17329 = vst [vmem:[#allocation87_spill] sm:$0xff] %v14556_v45  ;;  %v5983_v8 = vrot.slane %v17345_v22, %v14390_v37  ;;  %v17359_v22 = vld [vmem:[#allocation99_spill] sm:$0xff]  ;;  %v17470_v45 = vld [vmem:[#allocation228_spill] sm:$0xff] }
 0x4b4   : > { %v5387_v6 = vpop.xlane.xlu0 %5386 }
 0x4b5   : > { %v6852_v3 = vrot.slane %v5387_v6, %v14390_v37  ;;  %v5781_v6 = vrot.slane %v17331_v55, %v14298_v24 }
 0x4b6   : > { %v5483_v1 = vpop.xlane.xlu1 %5482 }
 0x4b7   : > { %v6853_v50 = vsel %vm5801_vm4, %v6852_v3, %v6848_v28  ;;  %v7010_v9 = vrot.slane %v5483_v1, %v14390_v37  ;;  %v5788_v34 = vsel %vm5787_vm2, %v5786_v49, %v5781_v6  ;;  %v5973_v1 = vrot.slane %v17339_v43, %v14294_v16  ;;  %v17341_v3 = vld [vmem:[#allocation76_spill] sm:$0xff] }
 0x4b8   : > { %v14550_v63 = vsel %vm5808_vm5, %v6857_v62, %v6853_v50  ;;  %v5795_v15 = vsel %vm5794_vm3, %v5793_v42, %v5788_v34  ;;  %v5900_v50 = vsel %vm5794_vm3, %v5899_v31, %v5895_v21  ;;  %v17347_v49 = vld [vmem:[#allocation92_spill] sm:$0xff]  ;;  %v17353_v21 = vld [vmem:[#allocation81_spill] sm:$0xff] }
 0x4b9   : > { %v5480_v59 = vpop.xlane.xlu0 %5479  ;;  %v5802_v23 = vsel %vm5801_vm4, %v5800_v54, %v5795_v15  ;;  %v5978_v55 = vrot.slane %v17347_v49, %v14378_v32  ;;  %v17348_v6 = vld [vmem:[#allocation56_spill] sm:$0xff]  ;;  %v17349_v54 = vld [vmem:[#allocation65_spill] sm:$0xff]  ;;  %v5988_v18 = vrot.slane %v17353_v21, %v14341_v52 }
 0x4ba   : > { %v7005_v53 = vrot.slane %v5480_v59, %v14378_v32  ;;  %v5809_v62 = vsel %vm5808_vm5, %v5807_v7, %v5802_v23  ;;  %v5969_v59 = vrot.slane %v17341_v3, %v14298_v24  ;;  %v5835_v0 = vrot.slane %v17348_v6, %v14437_v33  ;;  %v17361_v6 = vld [vmem:[#allocation46_spill] sm:$0xff] }
 0x4bb   : > { %v5816_v28 = vsel %vm5815_vm6, %v5814_v5, %v5809_v62  ;;  %v5842_v20 = vrot.slane %v17349_v54, %v14459_v39  ;;  %v5993_v5 = vrot.slane %v17351_v46, %v14442_v26  ;;  %v5919_v7 = vrot.slane %v17352_v60, %v14387_v40  ;;  %v17355_v62 = vld [vmem:[#allocation152_spill] sm:$0xff] }
 0x4bc   : > { %v7006_v44 = vsel %vm5794_vm3, %v7005_v53, %v7001_v27  ;;  %v5821_v27 = vrot.slane %v17342_v41, %v14387_v40  ;;  %v5974_v53 = vsel %vm5787_vm2, %v5973_v1, %v5969_v59  ;;  %v5856_v3 = vrot.slane %v17355_v62, %v14483_v61 }
 0x4bd   : > { %v14559_v2 = vsel %vm5801_vm4, %v7010_v9, %v7006_v44  ;;  %v5905_v9 = vsel %vm5801_vm4, %v5904_v38, %v5900_v50  ;;  %v17346_v44 = vld [vmem:[#allocation138_spill] sm:$0xff]  ;;  %v5979_v34 = vsel %vm5794_vm3, %v5978_v55, %v5974_v53  ;;  %v17354_v38 = vld [vmem:[#allocation147_spill] sm:$0xff]  ;;  %v14627_v35 = vpop.xlane.xlu1 %5437 }
 0x4be   : > { %v5909_v10 = vrot.slane %v17346_v44, %v14341_v52  ;;  %v5823_v42 = vsel %vm5822_vm7, %v5821_v27, %v5816_v28  ;;  %v5984_v23 = vsel %vm5801_vm4, %v5983_v8, %v5979_v34  ;;  %v5849_v43 = vrot.slane %v17354_v38, %v14445_v58  ;;  %v17360_v44 = vld [vmem:[#allocation190_spill] sm:$0xff]  ;;  %v17367_v38 = vld [vmem:[#allocation192_spill] sm:$0xff] }
 0x4bf   : > { %v5830_v11 = vsel %vm5829_vm8, %v5828_v12, %v5823_v42  ;;  %v5989_v41 = vsel %vm5808_vm5, %v5988_v18, %v5984_v23  ;;  %v5934_v12 = vrot.slane %v17356_v14, %v14459_v39  ;;  %v5998_v8 = vrot.slane %v17359_v22, %v14387_v40  ;;  %v17364_v23 = vld [vmem:[#allocation78_spill] sm:$0xff]  ;;  %v17372_v22 = vld [vmem:[#allocation184_spill] sm:$0xff] }
 0x4c0   : > { %v5910_v56 = vsel %vm5808_vm5, %v5909_v10, %v5905_v9  ;;  %v5837_v1 = vsel %vm5836_vm9, %v5835_v0, %v5830_v11  ;;  %v14634_v27 = vpop.xlane.xlu0 %5434  ;;  %v5994_v50 = vsel %vm5815_vm6, %v5993_v5, %v5989_v41  ;;  %v17357_v9 = vld [vmem:[#allocation93_spill] sm:$0xff]  ;;  %v5863_v10 = vrot.slane %v17360_v44, %v14456_v57  ;;  %v17365_v5 = vld [vmem:[#allocation90_spill] sm:$0xff] }
 0x4c1   : > { %v5915_v15 = vsel %vm5815_vm6, %v5914_v17, %v5910_v56  ;;  %v5844_v31 = vsel %vm5843_vm10, %v5842_v20, %v5837_v1  ;;  %v6003_v36 = vrot.slane %v17357_v9, %v14450_v13  ;;  %v17358_v17 = vld [vmem:[#allocation63_spill] sm:$0xff]  ;;  %v5870_v0 = vrot.slane %v17361_v6, %v14489_v47  ;;  %v17362_v20 = vld [vmem:[#allocation72_spill] sm:$0xff] }
 0x4c2   : > { %v5920_v59 = vsel %vm5822_vm7, %v5919_v7, %v5915_v15  ;;  %v5929_v53 = vrot.slane %v17358_v17, %v14437_v33  ;;  %v5851_v49 = vsel %vm5850_vm11, %v5849_v43, %v5844_v31  ;;  %v5999_v11 = vsel %vm5822_vm7, %v5998_v8, %v5994_v50  ;;  %v17363_v15 = vld [vmem:[#allocation111_spill] sm:$0xff]  ;;  %v17370_v9 = vld [vmem:[#allocation100_spill] sm:$0xff]  ;;  %v17371_v17 = vld [vmem:[#allocation86_spill] sm:$0xff] }
 0x4c3   : > { %v5925_v28 = vsel %vm5829_vm8, %v5924_v51, %v5920_v59  ;;  %v5858_v55 = vsel %vm5857_vm12, %v5856_v3, %v5851_v49  ;;  %v5944_v56 = vrot.slane %v17362_v20, %v14483_v61  ;;  %v6004_v34 = vsel %vm5829_vm8, %v6003_v36, %v5999_v11  ;;  %v17366_v7 = vld [vmem:[#allocation127_spill] sm:$0xff]  ;;  %v17368_v59 = vld [vmem:[#allocation104_spill] sm:$0xff]  ;;  %v17376_v20 = vld [vmem:[#allocation137_spill] sm:$0xff] }
 0x4c4   : > { %v5930_v42 = vsel %vm5836_vm9, %v5929_v53, %v5925_v28  ;;  %v6013_v30 = vrot.slane %v17363_v15, %v14459_v39  ;;  %v14660_v51 = vpop.xlane.xlu1 %5395  ;;  %v5939_v46 = vrot.slane %v17364_v23, %v14445_v58  ;;  %v6008_v60 = vrot.slane %v17365_v5, %v14437_v33  ;;  %v17369_v28 = vld [vmem:[#allocation173_spill] sm:$0xff] }
 0x4c5   : > { %v5935_v54 = vsel %vm5843_vm10, %v5934_v12, %v5930_v42  ;;  %v6052_v21 = vrot.slane %v17366_v7, %v14294_v16  ;;  %v5877_v43 = vrot.slane %v17367_v38, %v14477_v25  ;;  %v5865_v1 = vsel %vm5864_vm13, %v5863_v10, %v5858_v55  ;;  %v17373_v10 = vld [vmem:[#allocation113_spill] sm:$0xff]  ;;  %v17374_v55 = vld [vmem:[#allocation118_spill] sm:$0xff]  ;;  %v17378_v7 = vld [vmem:[#allocation191_spill] sm:$0xff] }
 0x4c6   : > { %v14668_v18 = vpop.xlane.xlu0 %5392  ;;  %v5872_v31 = vsel %vm5871_vm14, %v5870_v0, %v5865_v1  ;;  %v5940_v62 = vsel %vm5850_vm11, %v5939_v46, %v5935_v54  ;;  %v6009_v3 = vsel %vm5836_vm9, %v6008_v60, %v6004_v34  ;;  %v6048_v41 = vrot.slane %v17368_v59, %v14298_v24  ;;  %v17375_v0 = vld [vmem:[#allocation135_spill] sm:$0xff]  ;;  %v17381_v59 = vld [vmem:[#allocation180_spill] sm:$0xff] }
 0x4c7   : > { %v5949_v14 = vrot.slane %v17369_v28, %v14456_v57  ;;  %v5945_v12 = vsel %vm5857_vm12, %v5944_v56, %v5940_v62  ;;  %v6014_v50 = vsel %vm5843_vm10, %v6013_v30, %v6009_v3  ;;  %v6023_v36 = vrot.slane %v17370_v9, %v14483_v61  ;;  %v17377_v46 = vld [vmem:[#allocation119_spill] sm:$0xff]  ;;  %v17380_v62 = vld [vmem:[#allocation193_spill] sm:$0xff] }
 0x4c8   : > { %v5954_v53 = vrot.slane %v17371_v17, %v14489_v47  ;;  %v6018_v8 = vrot.slane %v17372_v22, %v14445_v58  ;;  %v6053_v44 = vsel %vm5787_vm2, %v6052_v21, %v6048_v41  ;;  %v6062_v49 = vrot.slane %v17373_v10, %v14390_v37  ;;  %v17382_v28 = vld [vmem:[#allocation185_spill] sm:$0xff] }
 0x4c9   : > { %v6057_v6 = vrot.slane %v17374_v55, %v14378_v32  ;;  %v6131_v42 = vrot.slane %v17375_v0, %v14294_v16  ;;  %v5879_v54 = vsel %vm5878_vm15, %v5877_v43, %v5872_v31  ;;  %v5884_v56 = vrot.slane %v17376_v20, %v14495_v29  ;;  %v17379_v43 = vld [vmem:[#allocation94_spill] sm:$0xff]  ;;  %v17387_v20 = vld [vmem:[#allocation120_spill] sm:$0xff] }
 0x4ca   : > { %v14695_v11 = vpop.xlane.xlu1 %5488  ;;  %v5950_v34 = vsel %vm5864_vm13, %v5949_v14, %v5945_v12  ;;  %v6019_v15 = vsel %vm5850_vm11, %v6018_v8, %v6014_v50  ;;  %v6033_v5 = vrot.slane %v17377_v46, %v14489_v47  ;;  %v6127_v21 = vrot.slane %v17378_v7, %v14298_v24  ;;  %v17383_v50 = vld [vmem:[#allocation51_spill] sm:$0xff]  ;;  %v17385_v8 = vld [vmem:[#allocation132_spill] sm:$0xff] }
 0x4cb   : > { %v6024_v23 = vsel %vm5857_vm12, %v6023_v36, %v6019_v15  ;;  %v6058_v60 = vsel %vm5794_vm3, %v6057_v6, %v6053_v44  ;;  %v5955_v38 = vsel %vm5871_vm14, %v5954_v53, %v5950_v34  ;;  %v6028_v1 = vrot.slane %v17379_v43, %v14456_v57  ;;  %v17384_v53 = vld [vmem:[#allocation146_spill] sm:$0xff]  ;;  %v17388_v15 = vld [vmem:[#allocation35_spill] sm:$0xff] }
 0x4cc   : > { %v6063_v31 = vsel %vm5801_vm4, %v6062_v49, %v6058_v60  ;;  %v6072_v3 = vrot.slane %v17380_v62, %v14442_v26  ;;  %v5959_v41 = vrot.slane %v17381_v59, %v14477_v25  ;;  %v6067_v14 = vrot.slane %v17382_v28, %v14341_v52  ;;  %v17386_v49 = vld [vmem:[#allocation79_spill] sm:$0xff]  ;;  %v17389_v60 = vld [vmem:[#allocation112_spill] sm:$0xff]  ;;  %v17394_v28 = vld [vmem:[#allocation134_spill] sm:$0xff] }
 0x4cd   : > { %v14702_v30 = vpop.xlane.xlu0 %5485  ;;  %v6132_v12 = vsel %vm5787_vm2, %v6131_v42, %v6127_v21  ;;  %v6141_v9 = vrot.slane %v17383_v50, %v14390_v37  ;;  %v14724_v36 = vsel %vm5885_vm0, %v5884_v56, %v5879_v54  ;;  %v6029_v17 = vsel %vm5864_vm13, %v6028_v1, %v6024_v23  ;;  %v17391_v43 = vld [vmem:[#allocation155_spill] sm:$0xff] }
 0x4ce   : > { %v6136_v22 = vrot.slane %v17384_v53, %v14378_v32  ;;  %v6210_v44 = vrot.slane %v17385_v8, %v14294_v16  ;;  %v14732_v10 = vsel %vm5878_vm15, %v5959_v41, %v5955_v38  ;;  %v5964_v55 = vrot.slane %v17386_v49, %v14495_v29  ;;  %v17396_v53 = vld [vmem:[#allocation26_spill] sm:$0xff]  ;;  %v17397_v8 = vld [vmem:[#allocation116_spill] sm:$0xff] }
 0x4cf   : > { %v6034_v6 = vsel %vm5871_vm14, %v6033_v5, %v6029_v17  ;;  %v6068_v0 = vsel %vm5808_vm5, %v6067_v14, %v6063_v31  ;;  %v6082_v56 = vrot.slane %v17387_v20, %v14450_v13  ;;  %v6206_v23 = vrot.slane %v17388_v15, %v14298_v24  ;;  %v17390_v5 = vld [vmem:[#allocation189_spill] sm:$0xff]  ;;  %v17392_v31 = vld [vmem:[#allocation107_spill] sm:$0xff] }
 0x4d0   : > { %v6073_v54 = vsel %vm5815_vm6, %v6072_v3, %v6068_v0  ;;  %v6137_v34 = vsel %vm5794_vm3, %v6136_v22, %v6132_v12  ;;  %v6038_v7 = vrot.slane %v17389_v60, %v14477_v25  ;;  %v6077_v21 = vrot.slane %v17390_v5, %v14387_v40  ;;  %v17393_v3 = vld [vmem:[#allocation41_spill] sm:$0xff] }
 0x4d1   : > { %v14738_v42 = vpop.xlane.xlu1 %5443  ;;  %v6142_v38 = vsel %vm5801_vm4, %v6141_v9, %v6137_v34  ;;  %v6151_v1 = vrot.slane %v17391_v43, %v14442_v26  ;;  %v6043_v62 = vrot.slane %v17392_v31, %v14495_v29  ;;  %v6146_v59 = vrot.slane %v17393_v3, %v14341_v52  ;;  %v17395_v9 = vld [vmem:[#allocation159_spill] sm:$0xff] }
 0x4d2   : > { %v6211_v41 = vsel %vm5787_vm2, %v6210_v44, %v6206_v23  ;;  %v6220_v14 = vrot.slane %v17394_v28, %v14390_v37  ;;  %v6039_v12 = vsel %vm5878_vm15, %v6038_v7, %v6034_v6  ;;  %v6078_v50 = vsel %vm5822_vm7, %v6077_v21, %v6073_v54  ;;  %v17398_v44 = vld [vmem:[#allocation139_spill] sm:$0xff]  ;;  %v17399_v54 = vld [vmem:[#allocation149_spill] sm:$0xff] }
 0x4d3   : > { %v14746_v46 = vpop.xlane.xlu0 %5440  ;;  %v6215_v17 = vrot.slane %v17395_v9, %v14378_v32  ;;  %v6289_v22 = vrot.slane %v17396_v53, %v14294_v16  ;;  %v6087_v0 = vrot.slane %v17397_v8, %v14437_v33  ;;  %v6083_v20 = vsel %vm5829_vm8, %v6082_v56, %v6078_v50  ;;  %v17400_v7 = vld [vmem:[#allocation151_spill] sm:$0xff]  ;;  %v17401_v56 = vld [vmem:[#allocation50_spill] sm:$0xff] }
 0x4d4   : > { %v6092_v34 = vrot.slane %v17398_v44, %v14459_v39  ;;  %v6147_v15 = vsel %vm5808_vm5, %v6146_v59, %v6142_v38  ;;  %v6161_v23 = vrot.slane %v17399_v54, %v14450_v13  ;;  %v6285_v5 = vrot.slane %v17400_v7, %v14298_v24  ;;  %v17403_v28 = vld [vmem:[#allocation131_spill] sm:$0xff]  ;;  %v17405_v53 = vld [vmem:[#allocation130_spill] sm:$0xff]  ;;  %v17406_v44 = vld [vmem:[#allocation160_spill] sm:$0xff] }
 0x4d5   : > { %v6152_v6 = vsel %vm5815_vm6, %v6151_v1, %v6147_v15  ;;  %v6216_v60 = vsel %vm5794_vm3, %v6215_v17, %v6211_v41  ;;  %v14783_v43 = vsel %vm5885_vm0, %v6043_v62, %v6039_v12  ;;  %v6156_v31 = vrot.slane %v17401_v56, %v14387_v40  ;;  %v17402_v1 = vld [vmem:[#allocation29_spill] sm:$0xff] }
 0x4d6   : > { %v6221_v38 = vsel %vm5801_vm4, %v6220_v14, %v6216_v60  ;;  %v6230_v3 = vrot.slane %v17402_v1, %v14442_v26  ;;  %v6088_v41 = vsel %vm5836_vm9, %v6087_v0, %v6083_v20  ;;  %v6225_v50 = vrot.slane %v17403_v28, %v14341_v52  ;;  %v17404_v62 = vld [vmem:[#allocation141_spill] sm:$0xff]  ;;  %v17407_v0 = vld [vmem:[#allocation40_spill] sm:$0xff] }
 0x4d7   : > { %v14780_v21 = vpop.xlane.xlu1 %5401  ;;  %v6290_v9 = vsel %vm5787_vm2, %v6289_v22, %v6285_v5  ;;  %v6299_v12 = vrot.slane %v17404_v62, %v14390_v37  ;;  %v6093_v17 = vsel %vm5843_vm10, %v6092_v34, %v6088_v41  ;;  %v6102_v14 = vrot.slane %v17405_v53, %v14483_v61  ;;  %v17408_v22 = vld [vmem:[#allocation158_spill] sm:$0xff]  ;;  %v17409_v34 = vld [vmem:[#allocation37_spill] sm:$0xff]  ;;  %v17412_v53 = vld [vmem:[#allocation168_spill] sm:$0xff] }
 0x4d8   : > { %v6157_v8 = vsel %vm5822_vm7, %v6156_v31, %v6152_v6  ;;  %v6294_v15 = vrot.slane %v17406_v44, %v14378_v32  ;;  %v6097_v20 = vrot.slane %v17407_v0, %v14445_v58  ;;  %v6171_v60 = vrot.slane %v17408_v22, %v14459_v39  ;;  %v17410_v6 = vld [vmem:[#allocation170_spill] sm:$0xff]  ;;  %v17411_v28 = vld [vmem:[#allocation133_spill] sm:$0xff] }
 0x4d9   : > { %v6162_v54 = vsel %vm5829_vm8, %v6161_v23, %v6157_v8  ;;  %v6226_v7 = vsel %vm5808_vm5, %v6225_v50, %v6221_v38  ;;  %v6166_v5 = vrot.slane %v17409_v34, %v14437_v33  ;;  %v6240_v31 = vrot.slane %v17410_v6, %v14450_v13  ;;  %v17417_v6 = vld [vmem:[#allocation52_spill] sm:$0xff] }
 0x4da   : > { %v14790_v59 = vpop.xlane.xlu0 %5398  ;;  %v6231_v56 = vsel %vm5815_vm6, %v6230_v3, %v6226_v7  ;;  %v6295_v1 = vsel %vm5794_vm3, %v6294_v15, %v6290_v9  ;;  %v6098_v41 = vsel %vm5850_vm11, %v6097_v20, %v6093_v17  ;;  %v6235_v23 = vrot.slane %v17411_v28, %v14387_v40  ;;  %v17413_v3 = vld [vmem:[#allocation34_spill] sm:$0xff]  ;;  %v17414_v9 = vld [vmem:[#allocation11_spill] sm:$0xff]  ;;  %v17416_v7 = vld [vmem:[#allocation33_spill] sm:$0xff] }
 0x4db   : > { %v6300_v62 = vsel %vm5801_vm4, %v6299_v12, %v6295_v1  ;;  %v6309_v38 = vrot.slane %v17412_v53, %v14442_v26  ;;  %v6103_v8 = vsel %vm5857_vm12, %v6102_v14, %v6098_v41  ;;  %v6112_v44 = vrot.slane %v17413_v3, %v14489_v47  ;;  %v17415_v20 = vld [vmem:[#allocation123_spill] sm:$0xff]  ;;  %v17419_v3 = vld [vmem:[#allocation28_spill] sm:$0xff] }
 0x4dc   : > { %v6167_v0 = vsel %vm5836_vm9, %v6166_v5, %v6162_v54  ;;  %v6304_v17 = vrot.slane %v17414_v9, %v14341_v52  ;;  %v6107_v12 = vrot.slane %v17415_v20, %v14456_v57  ;;  %v6181_v34 = vrot.slane %v17416_v7, %v14483_v61  ;;  %v17418_v5 = vld [vmem:[#allocation8_spill] sm:$0xff]  ;;  %v17420_v9 = vld [vmem:[#allocation6_spill] sm:$0xff] }
 0x4dd   : > { %v6172_v22 = vsel %vm5843_vm10, %v6171_v60, %v6167_v0  ;;  %v6236_v14 = vsel %vm5822_vm7, %v6235_v23, %v6231_v56  ;;  %v6176_v1 = vrot.slane %v17417_v6, %v14445_v58  ;;  %v6250_v41 = vrot.slane %v17418_v5, %v14459_v39  ;;  %v17421_v23 = vld [vmem:[#allocation143_spill] sm:$0xff] }
 0x4de   : > { %v14822_v50 = vpop.xlane.xlu1 %5494  ;;  %v6241_v54 = vsel %vm5829_vm8, %v6240_v31, %v6236_v14  ;;  %v6305_v28 = vsel %vm5808_vm5, %v6304_v17, %v6300_v62  ;;  %v6108_v53 = vsel %vm5864_vm13, %v6107_v12, %v6103_v8  ;;  %v6245_v60 = vrot.slane %v17419_v3, %v14437_v33  ;;  %v17422_v14 = vld [vmem:[#allocation7_spill] sm:$0xff]  ;;  %v17423_v8 = vld [vmem:[#allocation148_spill] sm:$0xff] }
 0x4df   : > { %v6310_v0 = vsel %vm5815_vm6, %v6309_v38, %v6305_v28  ;;  %v6319_v56 = vrot.slane %v17420_v9, %v14450_v13  ;;  %v6117_v20 = vrot.slane %v17421_v23, %v14477_v25  ;;  %v6113_v31 = vsel %vm5871_vm14, %v6112_v44, %v6108_v53  ;;  %v17424_v12 = vld [vmem:[#allocation60_spill] sm:$0xff] }
 0x4e0   : > { %v14830_v15 = vpop.xlane.xlu0 %5491  ;;  %v6177_v7 = vsel %vm5850_vm11, %v6176_v1, %v6172_v22  ;;  %v6314_v62 = vrot.slane %v17422_v14, %v14387_v40  ;;  %v6122_v17 = vrot.slane %v17423_v8, %v14495_v29  ;;  %v6186_v6 = vrot.slane %v17424_v12, %v14456_v57  ;;  %v17425_v3 = vld [vmem:[#allocation36_spill] sm:$0xff]  ;;  %v17427_v14 = vld [vmem:[#allocation14_spill] sm:$0xff] }
 0x4e1   : > { %v6182_v38 = vsel %vm5857_vm12, %v6181_v34, %v6177_v7  ;;  %v6246_v5 = vsel %vm5836_vm9, %v6245_v60, %v6241_v54  ;;  %v6191_v44 = vrot.slane %v17425_v3, %v14489_v47  ;;  %v17426_v1 = vld [vmem:[#allocation156_spill] sm:$0xff]  ;;  %v6255_v8 = vrot.slane %v17427_v14, %v14445_v58  ;;  %v17428_v54 = vld [vmem:[#allocation194_spill] sm:$0xff]  ;;  %v17431_v14 = vld [vmem:[#allocation197_spill] sm:$0xff] }
 0x4e2   : > { %v6251_v22 = vsel %vm5843_vm10, %v6250_v41, %v6246_v5  ;;  %v6260_v53 = vrot.slane %v17426_v1, %v14483_v61  ;;  %v6315_v9 = vsel %vm5822_vm7, %v6314_v62, %v6310_v0  ;;  %v6329_v60 = vrot.slane %v17428_v54, %v14459_v39  ;;  %v17429_v7 = vld [vmem:[#allocation202_spill] sm:$0xff] }
 0x4e3   : > { %v14862_v28 = vpop.xlane.xlu1 %5449  ;;  %v6320_v34 = vsel %vm5829_vm8, %v6319_v56, %v6315_v9  ;;  %v6368_v12 = vrot.slane %v17429_v7, %v14294_v16  ;;  %v5965_v41 = vsel %vm5885_vm0, %v5964_v55, %v14732_v10  ;;  %v7073_v0 = vsel %vm7072_vm1, %v14783_v43, %v14724_v36  ;;  %v17430_v56 = vld [vmem:[#allocation145_spill] sm:$0xff]  ;;  %v17432_v10 = vld [vmem:[#allocation32_spill] sm:$0xff] }
 0x4e4   : > { %v6118_v62 = vsel %vm5878_vm15, %v6117_v20, %v6113_v31  ;;  %v6324_v5 = vrot.slane %v17430_v56, %v14437_v33  ;;  %v6187_v1 = vsel %vm5864_vm13, %v6186_v6, %v6182_v38  ;;  %v6256_v9 = vsel %vm5850_vm11, %v6255_v8, %v6251_v22  ;;  %v17433_v31 = vld [vmem:[#allocation196_spill] sm:$0xff]  ;;  %v17436_v7 = vld [vmem:[#allocation161_spill] sm:$0xff] }
 0x4e5   : > { %v6123_v3 = vsel %vm5885_vm0, %v6122_v17, %v6118_v62  ;;  %v6364_v49 = vrot.slane %v17431_v14, %v14298_v24  ;;  %v6196_v55 = vrot.slane %v17432_v10, %v14477_v25  ;;  %v6192_v54 = vsel %vm5871_vm14, %v6191_v44, %v6187_v1  ;;  %v17434_v38 = vld [vmem:[#allocation204_spill] sm:$0xff]  ;;  %v17441_v14 = vld [vmem:[#allocation150_spill] sm:$0xff]  ;;  %v17442_v10 = vld [vmem:[#allocation9_spill] sm:$0xff] }
 0x4e6   : > { %v6261_v36 = vsel %vm5857_vm12, %v6260_v53, %v6256_v9  ;;  %v6325_v43 = vsel %vm5836_vm9, %v6324_v5, %v6320_v34  ;;  %v6339_v17 = vrot.slane %v17433_v31, %v14483_v61  ;;  %v6378_v22 = vrot.slane %v17434_v38, %v14390_v37  ;;  %v17437_v44 = vld [vmem:[#allocation44_spill] sm:$0xff]  ;;  %v17438_v34 = vld [vmem:[#allocation199_spill] sm:$0xff] }
 0x4e7   : > { %v6330_v20 = vsel %vm5843_vm10, %v6329_v60, %v6325_v43  ;;  %v6369_v6 = vsel %vm5787_vm2, %v6368_v12, %v6364_v49  ;;  %v6265_v62 = vrot.slane %v17436_v7, %v14456_v57  ;;  %v6334_v53 = vrot.slane %v17437_v44, %v14445_v58  ;;  %v17439_v60 = vld [vmem:[#allocation218_spill] sm:$0xff]  ;;  %v17443_v44 = vld [vmem:[#allocation213_spill] sm:$0xff] }
 0x4e8   : > { %v14870_v23 = vpop.xlane.xlu0 %5446  ;;  %v6373_v56 = vrot.slane %v17438_v34, %v14378_v32  ;;  %v6447_v5 = vrot.slane %v17439_v60, %v14294_v16  ;;  %v14919_v12 = vsel %vm7072_vm1, %v6123_v3, %v5965_v41  ;;  %v6197_v9 = vsel %vm5878_vm15, %v6196_v55, %v6192_v54  ;;  %v17444_v3 = vld [vmem:[#allocation198_spill] sm:$0xff] }
 0x4e9   : > { %17440 = vst [vmem:[#allocation89_spill] sm:$0xff] %v14919_v12  ;;  %v6201_v49 = vrot.slane %v17441_v14, %v14495_v29  ;;  %v6270_v43 = vrot.slane %v17442_v10, %v14489_v47  ;;  %v6266_v31 = vsel %vm5864_vm13, %v6265_v62, %v6261_v36  ;;  %v6335_v38 = vsel %vm5850_vm11, %v6334_v53, %v6330_v20  ;;  %v17445_v60 = vld [vmem:[#allocation206_spill] sm:$0xff]  ;;  %v17446_v10 = vld [vmem:[#allocation157_spill] sm:$0xff]  ;;  %v17448_v53 = vld [vmem:[#allocation219_spill] sm:$0xff] }
 0x4ea   : > { %v14906_v8 = vpop.xlane.xlu1 %5407  ;;  %v6374_v7 = vsel %vm5794_vm3, %v6373_v56, %v6369_v6  ;;  %v6443_v34 = vrot.slane %v17443_v44, %v14298_v24  ;;  %v6340_v41 = vsel %vm5857_vm12, %v6339_v17, %v6335_v38  ;;  %v6349_v55 = vrot.slane %v17444_v3, %v14489_v47  ;;  %v17447_v20 = vld [vmem:[#allocation201_spill] sm:$0xff]  ;;  %v17451_v3 = vld [vmem:[#allocation154_spill] sm:$0xff] }
 0x4eb   : > { %17435 = vst [vmem:[#allocation110_spill] sm:$0xff] %v14906_v8  ;;  %v6379_v54 = vsel %vm5801_vm4, %v6378_v22, %v6374_v7  ;;  %v6388_v14 = vrot.slane %v17445_v60, %v14442_v26  ;;  %v6344_v36 = vrot.slane %v17446_v10, %v14456_v57  ;;  %v6383_v62 = vrot.slane %v17447_v20, %v14341_v52  ;;  %v17449_v22 = vld [vmem:[#allocation215_spill] sm:$0xff] }
 0x4ec   : > { %v6448_v6 = vsel %vm5787_vm2, %v6447_v5, %v6443_v34  ;;  %v6457_v56 = vrot.slane %v17448_v53, %v14390_v37  ;;  %vm16201_vm1 = vcmask 1042434   ;;  %v6202_v17 = vsel %vm5885_vm0, %v6201_v49, %v6197_v9  ;;  %v17452_v9 = vld [vmem:[#allocation4_spill] sm:$0xff] }
 0x4ed   : > { %v14916_v1 = vpop.xlane.xlu0 %5404  ;;  %v6271_v38 = vsel %vm5871_vm14, %v6270_v43, %v6266_v31  ;;  %v6452_v7 = vrot.slane %v17449_v22, %v14378_v32  ;;  %v6280_v60 = vrot.slane %v17451_v3, %v14495_v29  ;;  %v6345_v10 = vsel %vm5864_vm13, %v6344_v36, %v6340_v41  ;;  %v17453_v22 = vld [vmem:[#allocation208_spill] sm:$0xff] }
 0x4ee   : > { %v6384_v5 = vsel %vm5808_vm5, %v6383_v62, %v6379_v54  ;;  %v6605_v34 = vrot.slane %v13656_v48, %v14294_v16  ;;  %v6275_v49 = vrot.slane %v17452_v9, %v14477_v25  ;;  %v6350_v43 = vsel %vm5871_vm14, %v6349_v55, %v6345_v10  ;;  %v17454_v54 = vld [vmem:[#allocation221_spill] sm:$0xff]  ;;  %v17455_v48 = vld [vmem:[#allocation20_spill] sm:$0xff]  ;;  %v17456_v9 = vld [vmem:[#allocation195_spill] sm:$0xff] }
 0x4ef   : > { %v6389_v31 = vsel %vm5815_vm6, %v6388_v14, %v6384_v5  ;;  %v6453_v53 = vsel %vm5794_vm3, %v6452_v7, %v6448_v6  ;;  %v6398_v3 = vrot.slane %v17453_v22, %v14450_v13  ;;  %v6467_v36 = vrot.slane %v17454_v54, %v14442_v26  ;;  %v17457_v14 = vld [vmem:[#allocation203_spill] sm:$0xff]  ;;  %v17458_v6 = vld [vmem:[#allocation217_spill] sm:$0xff] }
 0x4f0   : > { %v6458_v41 = vsel %vm5801_vm4, %v6457_v56, %v6453_v53  ;;  %v6601_v62 = vrot.slane %v17455_v48, %v14298_v24  ;;  %v6276_v12 = vsel %vm5878_vm15, %v6275_v49, %v6271_v38  ;;  %v6354_v55 = vrot.slane %v17456_v9, %v14477_v25  ;;  %v17460_v22 = vld [vmem:[#allocation5_spill] sm:$0xff]  ;;  %v17461_v9 = vld [vmem:[#allocation22_spill] sm:$0xff] }
 0x4f1   : > { %v14948_v44 = vpop.xlane.xlu1 %5500  ;;  %v6393_v10 = vrot.slane %v17457_v14, %v14387_v40  ;;  %v6462_v7 = vrot.slane %v17458_v6, %v14341_v52  ;;  %v7075_v5 = vsel %vm16201_vm1, %v6202_v17, %v7073_v0  ;;  %v14979_v56 = vsel %vm5885_vm0, %v6280_v60, %v6276_v12  ;;  %v17462_v12 = vld [vmem:[#allocation210_spill] sm:$0xff] }
 0x4f2   : > { %17450 = vst [vmem:[#allocation19_spill] sm:$0xff] %v14948_v44  ;;  %17459 = vst [vmem:[#allocation174_spill] sm:$0xff] %v14979_v56  ;;  %v6606_v53 = vsel %vm5787_vm2, %v6605_v34, %v6601_v62  ;;  %v6615_v54 = vrot.slane %v17460_v22, %v14390_v37  ;;  %v6355_v38 = vsel %vm5878_vm15, %v6354_v55, %v6350_v43  ;;  %vm16202_vm1 = vcmask 1043459   ;;  %v17463_v34 = vld [vmem:[#allocation223_spill] sm:$0xff]  ;;  %v17465_v55 = vld [vmem:[#allocation144_spill] sm:$0xff] }
 0x4f3   : > { %v6394_v49 = vsel %vm5822_vm7, %v6393_v10, %v6389_v31  ;;  %v6463_v48 = vsel %vm5808_vm5, %v6462_v7, %v6458_v41  ;;  %v6610_v14 = vrot.slane %v17461_v9, %v14378_v32  ;;  %v6408_v17 = vrot.slane %v17462_v12, %v14459_v39  ;;  %v17464_v31 = vld [vmem:[#allocation205_spill] sm:$0xff]  ;;  %v17472_v44 = vld [vmem:[#allocation212_spill] sm:$0xff] }
 0x4f4   : > { %v14956_v20 = vpop.xlane.xlu0 %5497  ;;  %v6399_v0 = vsel %vm5829_vm8, %v6398_v3, %v6394_v49  ;;  %v6468_v60 = vsel %vm5815_vm6, %v6467_v36, %v6463_v48  ;;  %v6477_v43 = vrot.slane %v17463_v34, %v14450_v13  ;;  %v6403_v41 = vrot.slane %v17464_v31, %v14437_v33  ;;  %v17466_v7 = vld [vmem:[#allocation233_spill] sm:$0xff]  ;;  %v17467_v49 = vld [vmem:[#allocation200_spill] sm:$0xff]  ;;  %v17468_v36 = vld [vmem:[#allocation207_spill] sm:$0xff] }
 0x4f5   : > { %v6472_v10 = vrot.slane %v17465_v55, %v14387_v40  ;;  %v6526_v22 = vrot.slane %v17466_v7, %v14294_v16  ;;  %v6611_v3 = vsel %vm5794_vm3, %v6610_v14, %v6606_v53  ;;  %v6359_v9 = vrot.slane %v17467_v49, %v14495_v29  ;;  %v17469_v34 = vld [vmem:[#allocation62_spill] sm:$0xff]  ;;  %v17471_v53 = vld [vmem:[#allocation83_spill] sm:$0xff] }
 0x4f6   : > { %v6413_v48 = vrot.slane %v17468_v36, %v14445_v58  ;;  %v6616_v12 = vsel %vm5801_vm4, %v6615_v54, %v6611_v3  ;;  %v6625_v56 = vrot.slane %v17469_v34, %v14442_v26  ;;  %v6404_v31 = vsel %vm5836_vm9, %v6403_v41, %v6399_v0  ;;  %v17473_v3 = vld [vmem:[#allocation225_spill] sm:$0xff]  ;;  %v17474_v0 = vld [vmem:[#allocation220_spill] sm:$0xff] }
 0x4f7   : > { %v6473_v55 = vsel %vm5822_vm7, %v6472_v10, %v6468_v60  ;;  %v6522_v7 = vrot.slane %v17470_v45, %v14298_v24  ;;  %v6620_v14 = vrot.slane %v17471_v53, %v14341_v52  ;;  %v6409_v49 = vsel %vm5843_vm10, %v6408_v17, %v6404_v31  ;;  %v17475_v45 = vld [vmem:[#allocation235_spill] sm:$0xff] }
 0x4f8   : > { %v14989_v6 = vpop.xlane.xlu1 %5455  ;;  %v6418_v36 = vrot.slane %v17472_v44, %v14483_v61  ;;  %v6478_v54 = vsel %vm5829_vm8, %v6477_v43, %v6473_v55  ;;  %v6487_v34 = vrot.slane %v17473_v3, %v14459_v39  ;;  %v6482_v41 = vrot.slane %v17474_v0, %v14437_v33  ;;  %v17477_v44 = vld [vmem:[#allocation230_spill] sm:$0xff] }
 0x4f9   : > { %v6527_v60 = vsel %vm5787_vm2, %v6526_v22, %v6522_v7  ;;  %v6536_v10 = vrot.slane %v17475_v45, %v14390_v37  ;;  %v6621_v53 = vsel %vm5808_vm5, %v6620_v14, %v6616_v12  ;;  %v6360_v17 = vsel %vm5885_vm0, %v6359_v9, %v6355_v38  ;;  %v17478_v55 = vld [vmem:[#allocation166_spill] sm:$0xff]  ;;  %v17480_v22 = vld [vmem:[#allocation209_spill] sm:$0xff] }
 0x4fa   : > { %v14997_v62 = vpop.xlane.xlu0 %5452  ;;  %v6531_v43 = vrot.slane %v17477_v44, %v14378_v32  ;;  %v6626_v31 = vsel %vm5815_vm6, %v6625_v56, %v6621_v53  ;;  %v6635_v3 = vrot.slane %v17478_v55, %v14450_v13  ;;  %v6423_v7 = vrot.slane %v17480_v22, %v14456_v57  ;;  %v17481_v14 = vld [vmem:[#allocation58_spill] sm:$0xff]  ;;  %v17482_v56 = vld [vmem:[#allocation227_spill] sm:$0xff] }
 0x4fb   : > { %v6414_v45 = vsel %vm5850_vm11, %v6413_v48, %v6409_v49  ;;  %v6483_v12 = vsel %vm5836_vm9, %v6482_v41, %v6478_v54  ;;  %v6630_v38 = vrot.slane %v17481_v14, %v14387_v40  ;;  %v6497_v53 = vrot.slane %v17482_v56, %v14483_v61  ;;  %v17484_v48 = vld [vmem:[#allocation82_spill] sm:$0xff] }
 0x4fc   : > { %v6419_v9 = vsel %vm5857_vm12, %v6418_v36, %v6414_v45  ;;  %v6488_v44 = vsel %vm5843_vm10, %v6487_v34, %v6483_v12  ;;  %v6532_v55 = vsel %vm5794_vm3, %v6531_v43, %v6527_v60  ;;  %v6546_v49 = vrot.slane %v17484_v48, %v14442_v26  ;;  %v17485_v41 = vld [vmem:[#allocation214_spill] sm:$0xff]  ;;  %v17486_v34 = vld [vmem:[#allocation232_spill] sm:$0xff] }
 0x4fd   : > { %v6537_v22 = vsel %vm5801_vm4, %v6536_v10, %v6532_v55  ;;  %v6631_v54 = vsel %vm5822_vm7, %v6630_v38, %v6626_v31  ;;  %v6428_v36 = vrot.slane %v17485_v41, %v14489_v47  ;;  %v6541_v45 = vrot.slane %v17486_v34, %v14341_v52  ;;  %v17487_v60 = vld [vmem:[#allocation182_spill] sm:$0xff]  ;;  %v17488_v10 = vld [vmem:[#allocation211_spill] sm:$0xff]  ;;  %v17491_v34 = vld [vmem:[#allocation224_spill] sm:$0xff] }
 0x4fe   : > { %v15031_v8 = vpop.xlane.xlu1 %5413  ;;  %v6636_v12 = vsel %vm5829_vm8, %v6635_v3, %v6631_v54  ;;  %v6645_v43 = vrot.slane %v17487_v60, %v14459_v39  ;;  %v17489_v31 = vld [vmem:[#allocation142_spill] sm:$0xff]  ;;  %v6424_v48 = vsel %vm5864_vm13, %v6423_v7, %v6419_v9  ;;  %v17490_v54 = vld [vmem:[#allocation229_spill] sm:$0xff]  ;;  %v6502_v60 = vrot.slane %v17491_v34, %v14456_v57 }
 0x4ff   : > { %17476 = vst [vmem:[#allocation45_spill] sm:$0xff] %v15031_v8  ;;  %v17483_v8 = vld [vmem:[#allocation222_spill] sm:$0xff]  ;;  %v6640_v38 = vrot.slane %v17489_v31, %v14437_v33  ;;  %v6507_v41 = vrot.slane %v17490_v54, %v14489_v47  ;;  %v15089_v7 = vsel %vm5871_vm14, %v6428_v36, %v6424_v48  ;;  %v17495_v54 = vld [vmem:[#allocation216_spill] sm:$0xff]  ;;  %v6926_v36 = vrot.slane %v14447_v4, %v14378_v32 }
 0x500   : > { %v17493_v9 = vld [vmem:[#allocation234_spill] sm:$0xff] }
 0x501   : > { %v15039_v0 = vpop.xlane.xlu0 %5410  ;;  %v6641_v14 = vsel %vm5836_vm9, %v6640_v38, %v6636_v12  ;;  %v17497_v12 = vld [vmem:[#allocation226_spill] sm:$0xff] }
 0x502   : > { %17479 = vst [vmem:[#allocation13_spill] sm:$0xff] %v15039_v0  ;;  %v6492_v0 = vrot.slane %v17483_v8, %v14445_v58  ;;  %v15066_v8 = vsel %vm16202_vm1, %v6360_v17, %v7075_v5  ;;  %v6542_v5 = vsel %vm5808_vm5, %v6541_v45, %v6537_v22  ;;  %v6646_v22 = vsel %vm5843_vm10, %v6645_v43, %v6641_v14  ;;  %v17494_v45 = vld [vmem:[#allocation75_spill] sm:$0xff] }
 0x503   : > { %v6512_v38 = vrot.slane %v17497_v12, %v14477_v25  ;;  %v6931_v14 = vrot.slane %v14634_v27, %v14390_v37  ;;  %vm7078_vm1 = vcmask 1044484   ;;  %v17501_v27 = vld [vmem:[#allocation69_spill] sm:$0xff] }
 0x504   : > { %v6493_v56 = vsel %vm5850_vm11, %v6492_v0, %v6488_v44  ;;  %v6547_v0 = vsel %vm5815_vm6, %v6546_v49, %v6542_v5  ;;  %v17492_v44 = vld [vmem:[#allocation236_spill] sm:$0xff]  ;;  %v17502_v12 = vld [vmem:[#allocation237_spill] sm:$0xff] }
 0x505   : > { %v15073_v55 = vpop.xlane.xlu1 %5506  ;;  %v6498_v3 = vsel %vm5857_vm12, %v6497_v53, %v6493_v56  ;;  %v6556_v31 = vrot.slane %v17492_v44, %v14450_v13  ;;  %v6551_v53 = vrot.slane %v17493_v9, %v14387_v40  ;;  %v6655_v56 = vrot.slane %v17494_v45, %v14483_v61  ;;  %v17496_v5 = vld [vmem:[#allocation96_spill] sm:$0xff]  ;;  %v17498_v9 = vld [vmem:[#allocation231_spill] sm:$0xff] }
 0x506   : > { %v6503_v49 = vsel %vm5864_vm13, %v6502_v60, %v6498_v3  ;;  %v6650_v44 = vrot.slane %v17496_v5, %v14445_v58  ;;  %v6517_v45 = vrot.slane %v17498_v9, %v14495_v29  ;;  %v17499_v60 = vld [vmem:[#allocation181_spill] sm:$0xff]  ;;  %v6684_v9 = vrot.slane %v17502_v12, %v14294_v16 }
 0x507   : > { %v15080_v17 = vpop.xlane.xlu0 %5503  ;;  %v6508_v48 = vsel %vm5871_vm14, %v6507_v41, %v6503_v49  ;;  %v6552_v43 = vsel %vm5822_vm7, %v6551_v53, %v6547_v0  ;;  %v6566_v5 = vrot.slane %v17499_v60, %v14459_v39  ;;  %v17500_v41 = vld [vmem:[#allocation39_spill] sm:$0xff]  ;;  %v6665_v53 = vrot.slane %v17501_v27, %v14489_v47 }
 0x508   : > { %v6557_v3 = vsel %vm5829_vm8, %v6556_v31, %v6552_v43  ;;  %v6651_v4 = vsel %vm5850_vm11, %v6650_v44, %v6646_v22  ;;  %v6561_v49 = vrot.slane %v17500_v41, %v14437_v33  ;;  %v6513_v43 = vsel %vm5878_vm15, %v6512_v38, %v6508_v48  ;;  %v17503_v22 = vld [vmem:[#allocation47_spill] sm:$0xff] }
 0x509   : > { %v6656_v0 = vsel %vm5857_vm12, %v6655_v56, %v6651_v4  ;;  %v6660_v44 = vrot.slane %v17503_v22, %v14456_v57  ;;  %v6927_v60 = vsel %vm5794_vm3, %v6926_v36, %v14536_v19  ;;  %v6936_v41 = vrot.slane %v14627_v35, %v14341_v52  ;;  %v17504_v4 = vld [vmem:[#allocation186_spill] sm:$0xff]  ;;  %v17505_v22 = vld [vmem:[#allocation16_spill] sm:$0xff] }
 0x50a   : > { %v6562_v56 = vsel %vm5836_vm9, %v6561_v49, %v6557_v3  ;;  %v6680_v27 = vrot.slane %v17504_v4, %v14298_v24  ;;  %v6932_v16 = vsel %vm5801_vm4, %v6931_v14, %v6927_v60  ;;  %v6941_v12 = vrot.slane %v14746_v46, %v14442_v26  ;;  %v17506_v35 = vld [vmem:[#allocation162_spill] sm:$0xff]  ;;  %v17507_v14 = vld [vmem:[#allocation109_spill] sm:$0xff] }
 0x50b   : > { %v15115_v34 = vpop.xlane.xlu1 %5461  ;;  %v6518_v38 = vsel %vm5885_vm0, %v6517_v45, %v6513_v43  ;;  %v6567_v48 = vsel %vm5843_vm10, %v6566_v5, %v6562_v56  ;;  %v6576_v19 = vrot.slane %v17505_v22, %v14483_v61  ;;  %v6661_v36 = vsel %vm5864_vm13, %v6660_v44, %v6656_v0  ;;  %v17508_v46 = vld [vmem:[#allocation61_spill] sm:$0xff]  ;;  %v17511_v22 = vld [vmem:[#allocation48_spill] sm:$0xff] }
 0x50c   : > { %v6571_v3 = vrot.slane %v17506_v35, %v14445_v58  ;;  %v6666_v49 = vsel %vm5871_vm14, %v6665_v53, %v6661_v36  ;;  %v6685_v24 = vsel %vm5787_vm2, %v6684_v9, %v6680_v27  ;;  %v6694_v60 = vrot.slane %v17507_v14, %v14390_v37  ;;  %v17509_v5 = vld [vmem:[#allocation97_spill] sm:$0xff]  ;;  %v17510_v9 = vld [vmem:[#allocation66_spill] sm:$0xff] }
 0x50d   : > { %v6689_v45 = vrot.slane %v17508_v46, %v14378_v32  ;;  %v6675_v43 = vrot.slane %v17509_v5, %v14495_v29  ;;  %v6946_v56 = vrot.slane %v14738_v42, %v14387_v40  ;;  %v6937_v0 = vsel %vm5808_vm5, %v6936_v41, %v6932_v16  ;;  %v17512_v41 = vld [vmem:[#allocation21_spill] sm:$0xff]  ;;  %v17514_v46 = vld [vmem:[#allocation71_spill] sm:$0xff] }
 0x50e   : > { %v15124_v31 = vpop.xlane.xlu0 %5458  ;;  %v6572_v53 = vsel %vm5850_vm11, %v6571_v3, %v6567_v48  ;;  %v6670_v4 = vrot.slane %v17510_v9, %v14477_v25  ;;  %v6942_v37 = vsel %vm5815_vm6, %v6941_v12, %v6937_v0  ;;  %v6951_v32 = vrot.slane %v14870_v23, %v14450_v13  ;;  %v17513_v3 = vld [vmem:[#allocation74_spill] sm:$0xff] }
 0x50f   : > { %v6581_v36 = vrot.slane %v17511_v22, %v14456_v57  ;;  %v6577_v42 = vsel %vm5857_vm12, %v6576_v19, %v6572_v53  ;;  %v6586_v16 = vrot.slane %v17512_v41, %v14489_v47  ;;  %v6690_v48 = vsel %vm5794_vm3, %v6689_v45, %v6685_v24  ;;  %v17515_v53 = vld [vmem:[#allocation164_spill] sm:$0xff] }
 0x510   : > { %v6671_v35 = vsel %vm5878_vm15, %v6670_v4, %v6666_v49  ;;  %vm7080_vm2 = vcmask 1045509   ;;  %v6695_v12 = vsel %vm5801_vm4, %v6694_v60, %v6690_v48  ;;  %v6704_v23 = vrot.slane %v17513_v3, %v14442_v26  ;;  %v17517_v22 = vld [vmem:[#allocation88_spill] sm:$0xff] }
 0x511   : > { %v6676_v14 = vsel %vm5885_vm0, %v6675_v43, %v6671_v35  ;;  %v6699_v5 = vrot.slane %v17514_v46, %v14341_v52  ;;  %v6956_v19 = vrot.slane %v14862_v28, %v14437_v33  ;;  %v6947_v0 = vsel %vm5822_vm7, %v6946_v56, %v6942_v37 }
 0x512   : > { %v15157_v44 = vpop.xlane.xlu1 %5419  ;;  %v6582_v24 = vsel %vm5864_vm13, %v6581_v36, %v6577_v42  ;;  %v6862_v49 = vrot.slane %v14668_v18, %v14442_v26  ;;  %v6952_v60 = vsel %vm5829_vm8, %v6951_v32, %v6947_v0  ;;  %v6961_v45 = vrot.slane %v14997_v62, %v14459_v39  ;;  %v17516_v62 = vld [vmem:[#allocation80_spill] sm:$0xff] }
 0x513   : > { %v7079_v43 = vsel %vm7078_vm1, %v6518_v38, %v15066_v8  ;;  %v6591_v9 = vrot.slane %v17515_v53, %v14477_v25  ;;  %v15194_v28 = vsel %vm5871_vm14, %v6586_v16, %v6582_v24  ;;  %v6700_v56 = vsel %vm5808_vm5, %v6699_v5, %v6695_v12  ;;  %v17518_v12 = vld [vmem:[#allocation77_spill] sm:$0xff] }
 0x514   : > { %v15165_v27 = vpop.xlane.xlu0 %5416  ;;  %v15200_v18 = vsel %vm7080_vm2, %v6676_v14, %v7079_v43  ;;  %v6705_v37 = vsel %vm5815_vm6, %v6704_v23, %v6700_v56  ;;  %v6714_v32 = vrot.slane %v17516_v62, %v14450_v13  ;;  %v7015_v8 = vrot.slane %v14702_v30, %v14341_v52  ;;  %v17522_v62 = vld [vmem:[#allocation102_spill] sm:$0xff] }
 0x515   : > { %v6709_v36 = vrot.slane %v17517_v22, %v14387_v40  ;;  %v6867_v42 = vrot.slane %v14660_v51, %v14387_v40  ;;  %v6966_v41 = vrot.slane %v14989_v6, %v14445_v58  ;;  %v6957_v16 = vsel %vm5836_vm9, %v6956_v19, %v6952_v60  ;;  %v17519_v51 = vld [vmem:[#allocation187_spill] sm:$0xff]  ;;  %v17523_v22 = vld [vmem:[#allocation110_spill] sm:$0xff] }
 0x516   : > { %v6863_v48 = vsel %vm5815_vm6, %v6862_v49, %v14550_v63  ;;  %v6872_v35 = vrot.slane %v14790_v59, %v14450_v13  ;;  %v6962_v52 = vsel %vm5843_vm10, %v6961_v45, %v6957_v16  ;;  %v6971_v30 = vrot.slane %v15124_v31, %v14483_v61  ;;  %v17520_v59 = vld [vmem:[#allocation169_spill] sm:$0xff]  ;;  %v17521_v49 = vld [vmem:[#allocation10_spill] sm:$0xff] }
 0x517   : > { %v6719_v3 = vrot.slane %v17518_v12, %v14437_v33  ;;  %v6729_v23 = vrot.slane %v17519_v51, %v14445_v58  ;;  %v6710_v6 = vsel %vm5822_vm7, %v6709_v36, %v6705_v37  ;;  %v7020_v14 = vrot.slane %v14695_v11, %v14442_v26 }
 0x518   : > { %v6715_v63 = vsel %vm5829_vm8, %v6714_v32, %v6710_v6  ;;  %v6724_v46 = vrot.slane %v17520_v59, %v14459_v39  ;;  %v7016_v5 = vsel %vm5808_vm5, %v7015_v8, %v14559_v2  ;;  %v7025_v31 = vrot.slane %v14830_v15, %v14387_v40 }
 0x519   : > { %v15197_v4 = vpop.xlane.xlu1 %5512  ;;  %v6877_v19 = vrot.slane %v14780_v21, %v14437_v33  ;;  %v6868_v0 = vsel %vm5822_vm7, %v6867_v42, %v6863_v48  ;;  %v6976_v24 = vrot.slane %v15115_v34, %v14456_v57  ;;  %v6967_v26 = vsel %vm5850_vm11, %v6966_v41, %v6962_v52  ;;  %v17524_v41 = vld [vmem:[#allocation124_spill] sm:$0xff] }
 0x51a   : > { %v6739_v60 = vrot.slane %v17521_v49, %v14456_v57  ;;  %v6873_v45 = vsel %vm5829_vm8, %v6872_v35, %v6868_v0  ;;  %v6882_v2 = vrot.slane %v14916_v1, %v14459_v39  ;;  %v6972_v40 = vsel %vm5857_vm12, %v6971_v30, %v6967_v26  ;;  %v17525_v35 = vld [vmem:[#allocation13_spill] sm:$0xff]  ;;  %v17528_v0 = vld [vmem:[#allocation87_spill] sm:$0xff] }
 0x51b   : > { %v6720_v21 = vsel %vm5836_vm9, %v6719_v3, %v6715_v63  ;;  %v7030_v43 = vrot.slane %v14822_v50, %v14450_v13  ;;  %v7021_v34 = vsel %vm5815_vm6, %v7020_v14, %v7016_v5  ;;  %v6734_v32 = vrot.slane %v17522_v62, %v14483_v61  ;;  %v17532_v62 = vld [vmem:[#allocation27_spill] sm:$0xff] }
 0x51c   : > { %v15207_v38 = vpop.xlane.xlu0 %5509  ;;  %v6725_v37 = vsel %vm5843_vm10, %v6724_v46, %v6720_v21  ;;  %v7026_v8 = vsel %vm5822_vm7, %v7025_v31, %v7021_v34  ;;  %v7035_v1 = vrot.slane %v14956_v20, %v14437_v33  ;;  %v6887_v36 = vrot.slane %v17523_v22, %v14445_v58  ;;  %v17526_v20 = vld [vmem:[#allocation19_spill] sm:$0xff]  ;;  %v17527_v46 = vld [vmem:[#allocation45_spill] sm:$0xff]  ;;  %v5520_v31 = vld [vmem:[#allocation2] sm:$0xff] }
 0x51d   : > { %v6878_v42 = vsel %vm5836_vm9, %v6877_v19, %v6873_v45  ;;  %v6977_v50 = vsel %vm5864_vm13, %v6976_v24, %v6972_v40  ;;  %v6744_v16 = vrot.slane %v17524_v41, %v14489_v47  ;;  %v6892_v52 = vrot.slane %v17525_v35, %v14483_v61  ;;  %v17530_v34 = vld [vmem:[#allocation84_spill] sm:$0xff]  ;;  %v17535_v41 = vld [vmem:[#allocation174_spill] sm:$0xff] }
 0x51e   : > { %v6883_v48 = vsel %vm5843_vm10, %v6882_v2, %v6878_v42  ;;  %v6730_v33 = vsel %vm5850_vm11, %v6729_v23, %v6725_v37  ;;  %vm7082_vm3 = vcmask 1046534   ;;  %v7040_v12 = vrot.slane %v17526_v20, %v14459_v39 }
 0x51f   : > { %v7031_v3 = vsel %vm5829_vm8, %v7030_v43, %v7026_v8  ;;  %v7045_v14 = vrot.slane %v15080_v17, %v14445_v58  ;;  %vm7084_vm4 = vcmask 1047559   ;;  %v6735_v59 = vsel %vm5857_vm12, %v6734_v32, %v6730_v33  ;;  %v5521_v33 = vld [vmem:[#allocation2 + $0x8] sm:$0xff] }
 0x520   : > { %v5468_v11 = vpop.xlane.xlu1 %5467  ;;  %v7036_v6 = vsel %vm5836_vm9, %v7035_v1, %v7031_v3  ;;  %v6897_v23 = vrot.slane %v17527_v46, %v14456_v57  ;;  %v6888_v5 = vsel %vm5850_vm11, %v6887_v36, %v6883_v48  ;;  %v7083_v24 = vsel %vm7082_vm3, %v17528_v0, %v15200_v18  ;;  %v7130_v46 = vld [vmem:[%s15674_s3 + $0x28] sm:$0xff] (!%p7572_p8) }
 0x521   : > { %v6986_v13 = vrot.slane %v5468_v11, %v14477_v25  ;;  %v6893_v58 = vsel %vm5857_vm12, %v6892_v52, %v6888_v5  ;;  %v6902_v17 = vrot.slane %v15165_v27, %v14489_v47  ;;  %v17529_v11 = vld [vmem:[#allocation38_spill] sm:$0xff]  ;;  %v7050_v45 = vrot.slane %v15073_v55, %v14483_v61  ;;  %v7134_v0 = vld [vmem:[%s15674_s3 + $0x48] sm:$0xff] (!%p7572_p8) }
 0x522   : > { %v6596_v49 = vrot.slane %v17529_v11, %v14495_v29  ;;  %v7041_v2 = vsel %vm5843_vm10, %v7040_v12, %v7036_v6  ;;  %v7055_v21 = vrot.slane %v15207_v38, %v14456_v57  ;;  %v6907_v61 = vrot.slane %v15157_v44, %v14477_v25  ;;  %v7128_v6 = vld [vmem:[%s15674_s3 + $0x18] sm:$0xff] (!%p7572_p8)  ;;  %v7135_v11 = vld [vmem:[%s15674_s3 + $0x50] sm:$0xff] (!%p7572_p8) }
 0x523   : > { %v5465_v15 = vpop.xlane.xlu0 %5464  ;;  %v7046_v18 = vsel %vm5850_vm11, %v7045_v14, %v7041_v2  ;;  %v6898_v55 = vsel %vm5864_vm13, %v6897_v23, %v6893_v58  ;;  %v6749_v57 = vrot.slane %v17532_v62, %v14477_v25  ;;  %v17533_v44 = vrot.slane %v17495_v54, %v14495_v29  ;;  %v7125_v14 = vld [vmem:[%s15674_s3] sm:$0xff] (!%p7572_p8)  ;;  %v7132_v23 = vld [vmem:[%s15674_s3 + $0x38] sm:$0xff] (!%p7572_p8) }
 0x524   : > { %v6981_v56 = vrot.slane %v5465_v15, %v14489_v47  ;;  %v6740_v15 = vsel %vm5864_vm13, %v6739_v60, %v6735_v59  ;;  %v17531_v60 = vrot.slane %v17488_v10, %v14477_v25  ;;  %v6903_v38 = vsel %vm5871_vm14, %v6902_v17, %v6898_v55  ;;  %v7127_v59 = vld [vmem:[%s15674_s3 + $0x10] sm:$0xff] (!%p7572_p8)  ;;  %v7146_v55 = vld [vmem:[%s15674_s3 + $0xa8] sm:$0xff] (!%p7572_p8) }
 0x525   : > { %v6745_v43 = vsel %vm5871_vm14, %v6744_v16, %v6740_v15  ;;  %v6592_v10 = vsel %vm5878_vm15, %v6591_v9, %v15194_v28  ;;  %v7051_v22 = vsel %vm5857_vm12, %v7050_v45, %v7046_v18  ;;  %vm17536_vm5 = vcmask 1042434   ;;  %v7140_v45 = vld [vmem:[%s15674_s3 + $0x78] sm:$0xff] (!%p7572_p8)  ;;  %v7137_v15 = vld [vmem:[%s15674_s3 + $0x60] sm:$0xff] (!%p7572_p8)  ;;  %v7139_v18 = vld [vmem:[%s15674_s3 + $0x70] sm:$0xff] (!%p7572_p8) }
 0x526   : > { %v6982_v30 = vsel %vm5871_vm14, %v6981_v56, %v6977_v50  ;;  %v6754_v56 = vrot.slane %v17530_v34, %v14495_v29  ;;  %v6434_v37 = vsel %vm5878_vm15, %v17531_v60, %v15089_v7  ;;  %v7060_v7 = vrot.slane %v15197_v4, %v14489_v47  ;;  %v17534_v50 = vld [vmem:[#allocation89_spill] sm:$0xff] }
 0x527   : > { %v6987_v39 = vsel %vm5878_vm15, %v6986_v13, %v6982_v30  ;;  %v6439_v1 = vsel %vm5885_vm0, %v17533_v44, %v6434_v37  ;;  %v6597_v36 = vsel %vm5885_vm0, %v6596_v49, %v6592_v10  ;;  %v6750_v42 = vsel %vm5878_vm15, %v6749_v57, %v6745_v43  ;;  %v7138_v49 = vld [vmem:[%s15674_s3 + $0x68] sm:$0xff] (!%p7572_p8)  ;;  %v7148_v60 = vld [vmem:[%s15674_s3 + $0xb8] sm:$0xff] (!%p7572_p8)  ;;  %v7145_v57 = vld [vmem:[%s15674_s3 + $0xa0] sm:$0xff] (!%p7572_p8) }
 0x528   : > { %v5471_v51 = vpop.xlane.xlu1 %5470  ;;  %v7056_v13 = vsel %vm5864_vm13, %v7055_v21, %v7051_v22  ;;  %v7087_v16 = vsel %vm17536_vm5, %v17535_v41, %v17534_v50  ;;  %v6755_v53 = vsel %vm5885_vm0, %v6754_v56, %v6750_v42  ;;  %v6908_v9 = vsel %vm5878_vm15, %v6907_v61, %v6903_v38  ;;  %v7142_v21 = vld [vmem:[%s15674_s3 + $0x88] sm:$0xff] (!%p7572_p8)  ;;  %v7141_v56 = vld [vmem:[%s15674_s3 + $0x80] sm:$0xff] (!%p7572_p8)  ;;  %v7143_v61 = vld [vmem:[%s15674_s3 + $0x90] sm:$0xff] (!%p7572_p8) }
 0x529   : > { %v6991_v63 = vrot.slane %v5471_v51, %v14495_v29  ;;  %vm17537_vm6 = vcmask 1043459   ;;  %v7061_v35 = vsel %vm5871_vm14, %v7060_v7, %v7056_v13  ;;  %v7619_v5 = vpack.c.bf16 (!%p7572_p8), %v7127_v59, %v7125_v14  ;;  %v7147_v38 = vld [vmem:[%s15674_s3 + $0xb0] sm:$0xff] (!%p7572_p8)  ;;  %v7154_v22 = vld [vmem:[%s15674_s3 + $0xe8] sm:$0xff] (!%p7572_p8)  ;;  %v15438_v42 = vld [vmem:[%s15673_s2] sm:$0x3] (!%p7572_p8) }
 0x52a   : > { %v5423_v19 = vpop.xlane.xlu0 %5422  ;;  %v7088_v47 = vsel %vm17537_vm6, %v6439_v1, %v7087_v16  ;;  %v7631_v43 = vpack.c.bf16 (!%p7572_p8), %v7139_v18, %v7137_v15  ;;  %v7635_v37 = vpack.c.bf16 (!%p7572_p8), %v7143_v61, %v7141_v56  ;;  %v7637_v62 = vpack.c.bf16 (!%p7572_p8), %v7148_v60, %v7146_v55  ;;  %v7149_v1 = vld [vmem:[%s15674_s3 + $0xc0] sm:$0xff] (!%p7572_p8)  ;;  %v7151_v10 = vld [vmem:[%s15674_s3 + $0xd0] sm:$0xff] (!%p7572_p8)  ;;  %v7156_v13 = vld [vmem:[%s15674_s3 + $0xf8] sm:$0xff] (!%p7572_p8) }
 0x52b   : > { %v6992_v26 = vsel %vm5885_vm0, %v6991_v63, %v6987_v39  ;;  %v6912_v32 = vrot.slane %v5423_v19, %v14495_v29  ;;  %v7089_v48 = vsel %vm7078_vm1, %v6597_v36, %v7088_v47  ;;  %v7129_v39 = vld [vmem:[%s15674_s3 + $0x20] sm:$0xff] (!%p7572_p8)  ;;  %v7131_v19 = vld [vmem:[%s15674_s3 + $0x30] sm:$0xff] (!%p7572_p8)  ;;  %v7639_v44 = vpack.c.bf16 (!%p7572_p8), %v7147_v38, %v7145_v57  ;;  %v7295_v16 = vld [vmem:[%s15676_s5 + $0x88] sm:$0xff] (!%p7572_p8) }
 0x52c   : > { %v7085_v40 = vsel %vm7084_vm4, %v6992_v26, %v7083_v24  ;;  %v7136_v24 = vld [vmem:[%s15674_s3 + $0x58] sm:$0xff] (!%p7572_p8)  ;;  %v7623_v58 = vpack.c.bf16 (!%p7572_p8), %v7131_v19, %v7129_v39  ;;  %v7133_v26 = vld [vmem:[%s15674_s3 + $0x40] sm:$0xff] (!%p7572_p8)  ;;  %v7300_v19 = vld [vmem:[%s15676_s5 + $0xb0] sm:$0xff] (!%p7572_p8) }
 0x52d   : > { %v7095_v27 = vmax.f32 %v5520_v31, %v7085_v40  ;;  %v6913_v28 = vsel %vm5885_vm0, %v6912_v32, %v6908_v9  ;;  %v7621_v31 = vpack.c.bf16 (!%p7572_p8), %v7132_v23, %v7130_v46  ;;  %v7625_v17 = vpack.c.bf16 (!%p7572_p8), %v7136_v24, %v7134_v0  ;;  %v7150_v32 = vld [vmem:[%s15674_s3 + $0xc8] sm:$0xff] (!%p7572_p8)  ;;  %v7294_v41 = vld [vmem:[%s15676_s5 + $0x80] sm:$0xff] (!%p7572_p8)  ;;  %v7160_v14 = vld [vmem:[%s15674_s3 + $0x118] sm:$0xff] (!%p7572_p8) }
 0x52e   : > { %v7627_v2 = vpack.c.bf16 (!%p7572_p8), %v7135_v11, %v7133_v26  ;;  %v7629_v40 = vpack.c.bf16 (!%p7572_p8), %v7140_v45, %v7138_v49  ;;  %v7681_v9 = vpack.c.bf16 (!%p7572_p8), %v7295_v16, %v7294_v41  ;;  %v7278_v47 = vld [vmem:[%s15676_s5] sm:$0xff] (!%p7572_p8)  ;;  %v7301_v0 = vld [vmem:[%s15676_s5 + $0xb8] sm:$0xff] (!%p7572_p8)  ;;  %v7162_v26 = vld [vmem:[%s15674_s3 + $0x128] sm:$0xff] (!%p7572_p8) }
 0x52f   : > { %7097 = vst [vmem:[#allocation2] sm:$0xff] %v7095_v27  ;;  %v5516_v8 = vpop.xlane.xlu0 %5515  ;;  %v7144_v27 = vld [vmem:[%s15674_s3 + $0x98] sm:$0xff] (!%p7572_p8)  ;;  %v7282_v23 = vld [vmem:[%s15676_s5 + $0x20] sm:$0xff] (!%p7572_p8)  ;;  %v7693_v45 = vpack.c.bf16 (!%p7572_p8), %v7301_v0, %v7300_v19  ;;  %v7166_v56 = vld [vmem:[%s15674_s3 + $0x148] sm:$0xff] (!%p7572_p8) }
 0x530   : > { %v7065_v54 = vrot.slane %v5516_v8, %v14477_v25  ;;  %v7090_v25 = vsel %vm7080_vm2, %v6755_v53, %v7089_v48  ;;  %v7633_v34 = vpack.c.bf16 (!%p7572_p8), %v7144_v27, %v7142_v21  ;;  %v7152_v8 = vld [vmem:[%s15674_s3 + $0xd8] sm:$0xff] (!%p7572_p8)  ;;  %v7153_v53 = vld [vmem:[%s15674_s3 + $0xe0] sm:$0xff] (!%p7572_p8)  ;;  %v7643_v48 = vpack.c.bf16 (!%p7572_p8), %v7151_v10, %v7149_v1  ;;  %7682 = vmatprep.subr.bf16.mxu1 (!%p7572_p8), %v7681_v9  ;;  %v7303_v21 = vld [vmem:[%s15676_s5 + $0xc8] sm:$0xff] (!%p7572_p8) }
 0x531   : > { %v7091_v20 = vsel %vm7082_vm3, %v6913_v28, %v7090_v25  ;;  %v7641_v7 = vpack.c.bf16 (!%p7572_p8), %v7152_v8, %v7150_v32  ;;  %v7279_v28 = vld [vmem:[%s15676_s5 + $0x8] sm:$0xff] (!%p7572_p8)  ;;  %v7297_v25 = vld [vmem:[%s15676_s5 + $0x98] sm:$0xff] (!%p7572_p8)  ;;  %v7302_v18 = vld [vmem:[%s15676_s5 + $0xc0] sm:$0xff] (!%p7572_p8) }
 0x532   : > { %v7066_v30 = vsel %vm5878_vm15, %v7065_v54, %v7061_v35  ;;  %v17538_v54 = vld [vmem:[#allocation17_spill] sm:$0xff] (!%p7572_p8)  ;;  %v7697_v60 = vpack.c.bf16 (!%p7572_p8), %v7303_v21, %v7302_v18  ;;  %v7304_v38 = vld [vmem:[%s15676_s5 + $0xd0] sm:$0xff] (!%p7572_p8)  ;;  %v7170_v10 = vld [vmem:[%s15674_s3 + $0x168] sm:$0xff] (!%p7572_p8) }
 0x533   : > { %v5519_v4 = vpop.xlane.xlu0 %5518  ;;  %v7114_v50 = vrot.slane (!%p7572_p8), %v15438_v42, %v17538_v54  ;;  %v7164_v11 = vld [vmem:[%s15674_s3 + $0x138] sm:$0xff] (!%p7572_p8)  ;;  %v7167_v1 = vld [vmem:[%s15674_s3 + $0x150] sm:$0xff] (!%p7572_p8)  ;;  %v7291_v18 = vld [vmem:[%s15676_s5 + $0x68] sm:$0xff] (!%p7572_p8) }
 0x534   : > { %v7070_v52 = vrot.slane %v5519_v4, %v14495_v29  ;;  %7102 = sbr.rel (%p7572_p8) target bundleno = 1836 (0x72c), region = 122  ;;  %v7126_v29 = vld [vmem:[%s15674_s3 + $0x8] sm:$0xff] (!%p7572_p8)  ;;  %v7296_v4 = vld [vmem:[%s15676_s5 + $0x90] sm:$0xff] (!%p7572_p8)  ;;  %v7653_v27 = vpack.c.bf16 (!%p7572_p8), %v7164_v11, %v7162_v26  ;;  %v7168_v61 = vld [vmem:[%s15674_s3 + $0x158] sm:$0xff] (!%p7572_p8) }
 0x535   : > { %v7617_v63 = vpack.c.bf16 (!%p7572_p8), %v7128_v6, %v7126_v29  ;;  %v7299_v29 = vld [vmem:[%s15676_s5 + $0xa8] sm:$0xff] (!%p7572_p8)  ;;  %v7305_v32 = vld [vmem:[%s15676_s5 + $0xd8] sm:$0xff] (!%p7572_p8)  ;;  %v7657_v8 = vpack.c.bf16 (!%p7572_p8), %v7168_v61, %v7166_v56  ;;  %v7171_v9 = vld [vmem:[%s15674_s3 + $0x170] sm:$0xff] (!%p7572_p8) }
 0x536   : > { %v7071_v12 = vsel %vm5885_vm0, %v7070_v52, %v7066_v30  ;;  %v7683_v52 = vpack.c.bf16 (!%p7572_p8), %v7279_v28, %v7278_v47  ;;  %v7280_v30 = vld [vmem:[%s15676_s5 + $0x10] sm:$0xff] (!%p7572_p8)  ;;  %v7158_v6 = vld [vmem:[%s15674_s3 + $0x108] sm:$0xff] (!%p7572_p8)  ;;  %v7176_v28 = vld [vmem:[%s15674_s3 + $0x198] sm:$0xff] (!%p7572_p8) }
 0x537   : > { %v7092_v3 = vsel %vm7084_vm4, %v7071_v12, %v7091_v20  ;;  %7618 = vmatprep.subr.bf16.mxu0 (!%p7572_p8), %v7617_v63  ;;  %v7645_v20 = vpack.c.bf16 (!%p7572_p8), %v7156_v13, %v7154_v22  ;;  %v7155_v12 = vld [vmem:[%s15674_s3 + $0xf0] sm:$0xff] (!%p7572_p8)  ;;  %v7649_v24 = vpack.c.bf16 (!%p7572_p8), %v7160_v14, %v7158_v6  ;;  %v7174_v47 = vld [vmem:[%s15674_s3 + $0x188] sm:$0xff] (!%p7572_p8)  ;;  %v7184_v6 = vld [vmem:[%s15674_s3 + $0x1d8] sm:$0xff] (!%p7572_p8) }
 0x538   : > { %v7096_v51 = vmax.f32 %v5521_v33, %v7092_v3  ;;  %7620 = vmatpush1.bf16.msra.mxu0 (!%p7572_p8), %v7619_v5  ;;  %v7281_v33 = vld [vmem:[%s15676_s5 + $0x18] sm:$0xff] (!%p7572_p8)  ;;  %v7685_v3 = vpack.c.bf16 (!%p7572_p8), %v7297_v25, %v7296_v4  ;;  %7684 = vmatpush3.bf16.msra.mxu1 (!%p7572_p8), %v7683_v52  ;;  %v7283_v5 = vld [vmem:[%s15676_s5 + $0x28] sm:$0xff] (!%p7572_p8)  ;;  %v7288_v13 = vld [vmem:[%s15676_s5 + $0x50] sm:$0xff] (!%p7572_p8) }
 0x539   : > { %7622 = vmatprep.subr.bf16.mxu0 (!%p7572_p8), %v7621_v31  ;;  %v7687_v59 = vpack.c.bf16 (!%p7572_p8), %v7281_v33, %v7280_v30  ;;  %v7647_v31 = vpack.c.bf16 (!%p7572_p8), %v7155_v12, %v7153_v53  ;;  %v7691_v49 = vpack.c.bf16 (!%p7572_p8), %v7283_v5, %v7282_v23  ;;  %v7169_v53 = vld [vmem:[%s15674_s3 + $0x160] sm:$0xff] (!%p7572_p8)  ;;  %v7175_v25 = vld [vmem:[%s15674_s3 + $0x190] sm:$0xff] (!%p7572_p8)  ;;  %v7178_v30 = vld [vmem:[%s15674_s3 + $0x1a8] sm:$0xff] (!%p7572_p8) }
 0x53a   : > { %7098 = vst [vmem:[#allocation2 + $0x8] sm:$0xff] %v7096_v51  ;;  %v7298_v51 = vld [vmem:[%s15676_s5 + $0xa0] sm:$0xff] (!%p7572_p8)  ;;  %7686 = vmatprep.subr.bf16.mxu1 (!%p7572_p8), %v7685_v3  ;;  %v7180_v33 = vld [vmem:[%s15674_s3 + $0x1b8] sm:$0xff] (!%p7572_p8)  ;;  %v7183_v5 = vld [vmem:[%s15674_s3 + $0x1d0] sm:$0xff] (!%p7572_p8) }
 0x53b   : > { %v7689_v46 = vpack.c.bf16 %v7299_v29, %v7298_v51  ;;  %v7173_v52 = vld [vmem:[%s15674_s3 + $0x180] sm:$0xff]  ;;  %v7669_v12 = vpack.c.bf16 %v7180_v33, %v7178_v30  ;;  %v7179_v51 = vld [vmem:[%s15674_s3 + $0x1b0] sm:$0xff]  ;;  %v7182_v29 = vld [vmem:[%s15674_s3 + $0x1c8] sm:$0xff] }
 0x53c   : > { %7624 = vmatpush1.bf16.msra.mxu0 %v7623_v58  ;;  %v7157_v58 = vld [vmem:[%s15674_s3 + $0x100] sm:$0xff]  ;;  %7688 = vmatpush3.bf16.msra.mxu1 %v7687_v59  ;;  %v7188_v19 = vld [vmem:[%s15674_s3 + $0x1f8] sm:$0xff]  ;;  %v7292_v56 = vld [vmem:[%s15676_s5 + $0x70] sm:$0xff] }
 0x53d   : > { %7626 = vmatprep.subr.bf16.mxu0 %v7625_v17  ;;  %v7159_v17 = vld [vmem:[%s15674_s3 + $0x110] sm:$0xff]  ;;  %7690 = vmatprep.subr.bf16.mxu1 %v7689_v46  ;;  %v7177_v3 = vld [vmem:[%s15674_s3 + $0x1a0] sm:$0xff]  ;;  %v7673_v46 = vpack.c.bf16 %v7184_v6, %v7182_v29  ;;  %v7293_v61 = vld [vmem:[%s15676_s5 + $0x78] sm:$0xff] }
 0x53e   : > { %v7651_v15 = vpack.c.bf16 %v7159_v17, %v7157_v58  ;;  %v7671_v14 = vpack.c.bf16 %v7179_v51, %v7177_v3  ;;  %v7181_v23 = vld [vmem:[%s15674_s3 + $0x1c0] sm:$0xff]  ;;  %v7187_v17 = vld [vmem:[%s15674_s3 + $0x1f0] sm:$0xff] }
 0x53f   : > { %v7185_v58 = vld [vmem:[%s15674_s3 + $0x1e0] sm:$0xff] }
 0x540   : > { %7628 = vmatpush1.bf16.msra.mxu0 %v7627_v2  ;;  %v7284_v2 = vld [vmem:[%s15676_s5 + $0x30] sm:$0xff]  ;;  %7692 = vmatpush3.bf16.msra.mxu1 %v7691_v49  ;;  %v7679_v26 = vpack.c.bf16 %v7187_v17, %v7185_v58 }
 0x541   : > { %7630 = vmatprep.subr.bf16.mxu0 %v7629_v40  ;;  %v7104_v36 = vld [vmem:[#allocation2 + $0x8] sm:$0xff]  ;;  %v7285_v40 = vld [vmem:[%s15676_s5 + $0x38] sm:$0xff]  ;;  %7694 = vmatprep.subr.bf16.mxu1 %v7693_v45  ;;  %v7306_v45 = vld [vmem:[%s15676_s5 + $0xe0] sm:$0xff] }
 0x542   : > { %v7118_v35 = vadd.f32 %v7114_v50, %v7104_v36  ;;  %v7695_v55 = vpack.c.bf16 %v7285_v40, %v7284_v2  ;;  %v7701_v36 = vpack.c.bf16 %v7305_v32, %v7304_v38  ;;  %v7289_v50 = vld [vmem:[%s15676_s5 + $0x58] sm:$0xff]  ;;  %v7307_v2 = vld [vmem:[%s15676_s5 + $0xe8] sm:$0xff] }
 0x543   : > { %v7703_v4 = vpack.c.bf16 %v7289_v50, %v7288_v13  ;;  %v7705_v40 = vpack.c.bf16 %v7307_v2, %v7306_v45 }
 0x544   : > { %7632 = vmatpush1.bf16.msra.mxu0 %v7631_v43  ;;  %vm7120_vm7 = vcmp.ge.f32.partialorder %v7118_v35, 0.0  ;;  %v7122_v63 = vmul.f32 0.2, %v7118_v35  ;;  %v7161_v43 = vld [vmem:[%s15674_s3 + $0x120] sm:$0xff]  ;;  %7696 = vmatpush3.bf16.msra.mxu1 %v7695_v55  ;;  %v7711_v55 = vpack.c.bf16 %v7293_v61, %v7292_v56 }
 0x545   : > { %7634 = vmatprep.subr.bf16.mxu0 %v7633_v34  ;;  %v7163_v34 = vld [vmem:[%s15674_s3 + $0x130] sm:$0xff]  ;;  %7698 = vmatprep.subr.bf16.mxu1 %v7697_v60  ;;  %v7189_v60 = vld [vmem:[%s15675_s4] sm:$0x3] }
 0x546   : > { %v7124_v39 = vsel %vm7120_vm7, %v7118_v35, %v7122_v63  ;;  %v7655_v57 = vpack.c.bf16 %v7163_v34, %v7161_v43  ;;  %v7665_v35 = vpack.c.bf16 %v7176_v28, %v7174_v47  ;;  %v17539_v63 = vld [vmem:[#allocation15_spill] sm:$0xff]  ;;  %v7309_v43 = vld [vmem:[%s15676_s5 + $0xf8] sm:$0xff] }
 0x547   : > { %7265 = vmatprep.mubr.f32.mxu0 %v7124_v39  ;;  %v7110_v59 = vrot.slane %v15438_v42, %v17539_v63  ;;  %v7186_v39 = vld [vmem:[%s15674_s3 + $0x1e8] sm:$0xff]  ;;  %v7675_v42 = vpack.c.bf16 %v7183_v5, %v7181_v23 }
 0x548   : > { %7636 = vmatpush1.bf16.msra.mxu0 %v7635_v37  ;;  %v7286_v37 = vld [vmem:[%s15676_s5 + $0x40] sm:$0xff] }
 0x549   : > { %7638 = vmatprep.subr.bf16.mxu0 %v7637_v62  ;;  %v7287_v62 = vld [vmem:[%s15676_s5 + $0x48] sm:$0xff] }
 0x54a   : > { %v7699_v22 = vpack.c.bf16 %v7287_v62, %v7286_v37  ;;  %v7194_v37 = vrot.slane %v7189_v60, %v17539_v63  ;;  %v7198_v62 = vrot.slane %v7189_v60, %v17538_v54 }
 0x54c   : > { %7640 = vmatpush1.bf16.msra.mxu0 %v7639_v44  ;;  %v7165_v44 = vld [vmem:[%s15674_s3 + $0x140] sm:$0xff]  ;;  %7700 = vmatpush3.bf16.msra.mxu1 %v7699_v22 }
 0x54d   : > { %7642 = vmatprep.subr.bf16.mxu0 %v7641_v7  ;;  %v7172_v7 = vld [vmem:[%s15674_s3 + $0x178] sm:$0xff]  ;;  %v7659_v41 = vpack.c.bf16 %v7167_v1, %v7165_v44  ;;  %7702 = vmatprep.subr.bf16.mxu1 %v7701_v36  ;;  %v7573_v36 = vld [vmem:[%s15677_s6] ss:$0 sm:$0xff] }
 0x54e   : > { %v7661_v16 = vpack.c.bf16 %v7172_v7, %v7170_v10 }
 0x550   : > { %7644 = vmatpush1.bf16.msra.mxu0 %v7643_v48  ;;  %v7663_v48 = vpack.c.bf16 %v7171_v9, %v7169_v53  ;;  %7704 = vmatpush3.bf16.msra.mxu1 %v7703_v4 }
 0x551   : > { %7646 = vmatprep.subr.bf16.mxu0 %v7645_v20  ;;  %v7667_v20 = vpack.c.bf16 %v7175_v25, %v7173_v52  ;;  %7706 = vmatprep.subr.bf16.mxu1 %v7705_v40 }
 0x554   : > { %7648 = vmatpush1.bf16.msra.mxu0 %v7647_v31  ;;  %v7103_v31 = vld [vmem:[#allocation2] sm:$0xff] }
 0x555   : > { %7650 = vmatprep.subr.bf16.mxu0 %v7649_v24  ;;  %v7117_v0 = vadd.f32 %v7110_v59, %v7103_v31  ;;  %v7677_v24 = vpack.c.bf16 %v7188_v19, %v7186_v39 }
 0x557   : > { %v7121_v11 = vmul.f32 0.2, %v7117_v0  ;;  %vm7119_vm8 = vcmp.ge.f32.partialorder %v7117_v0, 0.0 }
 0x558   : > { %7652 = vmatpush1.bf16.msra.mxu0 %v7651_v15  ;;  %v7290_v15 = vld [vmem:[%s15676_s5 + $0x60] sm:$0xff] }
 0x559   : > { %7654 = vmatprep.subr.bf16.mxu0 %v7653_v27  ;;  %v7123_v49 = vsel %vm7119_vm8, %v7117_v0, %v7121_v11  ;;  %v7707_v21 = vpack.c.bf16 %v7291_v18, %v7290_v15  ;;  %v7308_v27 = vld [vmem:[%s15676_s5 + $0xf0] sm:$0xff] }
 0x55a   : > { %v7709_v34 = vpack.c.bf16 %v7309_v43, %v7308_v27 }
 0x55b   : > { %7708 = vmatpush3.bf16.msra.mxu1 %v7707_v21 }
 0x55c   : > { %7656 = vmatpush1.bf16.msra.mxu0 %v7655_v57  ;;  %7710 = vmatprep.subr.bf16.mxu1 %v7709_v34 }
 0x55d   : > { %7658 = vmatprep.subr.bf16.mxu0 %v7657_v8 }
 0x55f   : > { %7712 = vmatpush3.bf16.msra.mxu1 %v7711_v55 }
 0x560   : > { %7660 = vmatpush1.bf16.msra.mxu0 %v7659_v41 }
 0x561   : > { %7662 = vmatprep.subr.bf16.mxu0 %v7661_v16 }
 0x564   : > { %7664 = vmatpush1.bf16.msra.mxu0 %v7663_v48 }
 0x565   : > { %7666 = vmatprep.subr.bf16.mxu0 %v7665_v35 }
 0x568   : > { %7668 = vmatpush1.bf16.msra.mxu0 %v7667_v20 }
 0x569   : > { %7670 = vmatprep.subr.bf16.mxu0 %v7669_v12 }
 0x56c   : > { %7672 = vmatpush1.bf16.msra.mxu0 %v7671_v14 }
 0x56d   : > { %7674 = vmatprep.subr.bf16.mxu0 %v7673_v46 }
 0x570   : > { %7676 = vmatpush1.bf16.msra.mxu0 %v7675_v42 }
 0x571   : > { %7678 = vmatprep.subr.bf16.mxu0 %v7677_v24 }
 0x574   : > { %7680 = vmatpush1.bf16.msra.mxu0 %v7679_v26 }
 0x577   : > { %7266 = vmatmul.mubr.f32.vlgmr.msra.gmra.mrb[0].mxu0 %v7123_v49 }
 0x64a   : > { %v7267_v57 = vpop.f32.mrb[0].mxu0 }
 0x64b   : > { %v7268_v38 = vadd.f32 %v7267_v57, %v7194_v37  ;;  %v7269_v32 = vpop.f32.mrb[1].mxu0 }
 0x64c   : > { %v7270_v8 = vadd.f32 %v7269_v32, %v7198_v62 }
 0x64d   : > { %v7274_v44 = vmul.f32 0.2, %v7268_v38  ;;  %vm7272_vm10 = vcmp.ge.f32.partialorder %v7268_v38, 0.0 }
 0x64e   : > { %vm7273_vm9 = vcmp.ge.f32.partialorder %v7270_v8, 0.0  ;;  %v7275_v1 = vmul.f32 0.2, %v7270_v8 }
 0x64f   : > { %v7276_v7 = vsel %vm7272_vm10, %v7268_v38, %v7274_v44 }
 0x650   : > { %v7277_v10 = vsel %vm7273_vm9, %v7270_v8, %v7275_v1 }
 0x651   : > { %7381 = vmatprep.mubr.f32.mxu1 %v7277_v10 }
 0x652   : > { %7382 = vmatmul.mubr.f32.vlgmr.msra.gmra.mrb[0].mxu1 %v7276_v7 }
 0x725   : > { %v7614_v22 = vpop.f32.mrb[0].mxu1 }
 0x726   : > { %v7615_v13 = vpop.f32.mrb[1].mxu1 }
 0x727   : > { %v7616_v50 = vadd.f32 %v7615_v13, %v7614_v22 }
 0x729   : > { %v7384_v54 = vadd.f32 %v7616_v50, %v7573_v36 }
 0x72b   : > { %7387 = vst [vmem:[%s15678_s7] sm:$0xff] %v7384_v54 }
 0x72c PF: > { %s17_s28 = sadd.s32 1, %s7995_s28   ;;  %s17540_s24 = smov %s7983_s25 }
 0x72d   : > { %p14_p9 = scmp.ge.s32.totalorder %s17_s28, 4   ;;  %s17541_s25 = smov %s8110_s9 }
 0x72e   : > { %s17542_s26 = smov %s7991_s27  ;;  %s17543_s27 = smov %s17545_s29 }
 0x72f   :  { %16 = sbr.rel (!%p14_p9) target bundleno = 5 (0x5), region = 219 }

</bundles_post_ra>
